<compile_context>
chip_gen: v6e
topology: v6e:2x2x1
jax: 0.10.0
libtpu: 0.0.40
codegen_flags: <defaults>
</compile_context>

<pallas_src>
import jax
import jax.numpy as jnp
from jax.experimental import pallas as pl
from jax.experimental.pallas import tpu as pltpu

C = 64                                    # hidden channels (fc_in out / TCN channels)
K = 5                                     # conv kernel size
NUM_LEVELS = 7                            # TCN levels, dilation = 2**l
NUM_CONVS = 2 * NUM_LEVELS                # two convs per TemporalBlock
MAX_SHIFT = (K - 1) * 2 ** (NUM_LEVELS - 1)   # 256 (multiple of 8 -> aligned stage store)


def _discriminator_kernel(x_ref, w_in_ref, b_in_ref, w_tap_ref, b_conv_ref,
                          w_pre_ref, b_pre_ref, out_ref, pad_ref):
    T = x_ref.shape[1]

    # Causal zero-padding region (rows [0, MAX_SHIFT)); never overwritten afterwards.
    pad_ref[0:MAX_SHIFT, :] = jnp.zeros((MAX_SHIFT, C), jnp.float32)

    # fc_in: Linear(1, 64) per time step.  x_ref[0]: (T, 1) broadcast over lanes.
    h = x_ref[0] * w_in_ref[...] + b_in_ref[...]                       # (T, C) f32

    def causal_conv_relu(h_in, conv_idx, dilation):
        # Stage the current activation behind MAX_SHIFT rows of zeros (aligned store).
        pad_ref[MAX_SHIFT:MAX_SHIFT + T, :] = h_in
        acc = None
        for k in range(K):
            shift = (K - 1 - k) * dilation
            start = MAX_SHIFT - shift
            tap = pad_ref[start:start + T, :].astype(jnp.bfloat16)     # (T, C) bf16
            w_k = w_tap_ref[conv_idx * K + k]                          # (C, C) bf16
            y = jnp.dot(tap, w_k, preferred_element_type=jnp.float32)  # MXU, f32 acc
            acc = y if acc is None else acc + y
        acc = acc + b_conv_ref[conv_idx:conv_idx + 1, :]               # conv bias (1, C)
        return jnp.maximum(acc, 0.0)                                   # ReLU (dropout=id)

    for level in range(NUM_LEVELS):
        d = 2 ** level
        res = h
        h1 = causal_conv_relu(h, 2 * level, d)
        h2 = causal_conv_relu(h1, 2 * level + 1, d)
        h = jnp.maximum(h2 + res, 0.0)                                 # residual + ReLU

    # fc_pre on the last time step.
    h_last = h[T - 1:T, :]                                             # (1, C)
    pre = jnp.sum(h_last * w_pre_ref[...], axis=1, keepdims=True) + b_pre_ref[...]
    out_ref[0] = pre                                                   # (1, 1)


def discriminator_forward(x, params):
    B, T, _ = x.shape
    out = pl.pallas_call(
        _discriminator_kernel,
        out_shape=jax.ShapeDtypeStruct((B, 1, 1), jnp.float32),
        grid=(B,),
        in_specs=[
            pl.BlockSpec((1, T, 1), lambda b: (b, 0, 0)),                   # x
            pl.BlockSpec((1, C), lambda b: (0, 0)),                         # fc_in weight^T
            pl.BlockSpec((1, C), lambda b: (0, 0)),                         # fc_in bias
            pl.BlockSpec((NUM_CONVS * K, C, C), lambda b: (0, 0, 0)),       # conv taps (bf16)
            pl.BlockSpec((NUM_CONVS, C), lambda b: (0, 0)),                 # conv biases
            pl.BlockSpec((1, C), lambda b: (0, 0)),                         # fc_pre weight
            pl.BlockSpec((1, 1), lambda b: (0, 0)),                         # fc_pre bias
        ],
        out_specs=pl.BlockSpec((1, 1, 1), lambda b: (b, 0, 0)),
        scratch_shapes=[pltpu.VMEM((MAX_SHIFT + T, C), jnp.float32)],
        compiler_params=pltpu.CompilerParams(dimension_semantics=("parallel",)),
    )(x, params["w_in"], params["b_in"], params["w_tap"], params["b_conv"],
      params["w_pre"], params["b_pre"])
    return out.reshape(B)


def init_params(key):
    ks = jax.random.split(key, 6)
    # fc_in: Linear(1, 64) -> weight stored transposed as (1, C).
    w_in = jax.random.uniform(ks[0], (1, C), jnp.float32, -1.0, 1.0)
    b_in = jax.random.uniform(ks[1], (1, C), jnp.float32, -1.0, 1.0)
    # Effective (weight-normed) conv weights, layout (conv_idx*K + k, C_in, C_out),
    # init N(0, 0.01) as in TemporalBlock.init_weights().
    w_tap = 0.01 * jax.random.normal(ks[2], (NUM_CONVS * K, C, C), jnp.float32)
    bound = 1.0 / (C * K) ** 0.5
    b_conv = jax.random.uniform(ks[3], (NUM_CONVS, C), jnp.float32, -bound, bound)
    bp = 1.0 / C ** 0.5
    w_pre = jax.random.uniform(ks[4], (1, C), jnp.float32, -bp, bp)
    b_pre = jax.random.uniform(ks[5], (1, 1), jnp.float32, -bp, bp)
    return dict(w_in=w_in, b_in=b_in,
                w_tap=w_tap.astype(jnp.bfloat16),   # MXU operands in bf16
                b_conv=b_conv, w_pre=w_pre, b_pre=b_pre)


def reference_forward(x, params):
    """Pure-JAX f32 reference (same bf16-rounded weights as the kernel)."""
    B, T, _ = x.shape
    w_tap = params["w_tap"].astype(jnp.float32)
    b_conv = params["b_conv"]
    h = x * params["w_in"][None] + params["b_in"][None]                # (B, T, C)
    for level in range(NUM_LEVELS):
        d = 2 ** level
        res = h
        cur = h
        for j in range(2):
            idx = 2 * level + j
            out = jnp.zeros((B, T, C), jnp.float32)
            for k in range(K):
                s = (K - 1 - k) * d
                shifted = jnp.pad(cur, ((0, 0), (s, 0), (0, 0)))[:, :T, :]
                out = out + jnp.einsum("btc,cd->btd", shifted, w_tap[idx * K + k])
            cur = jnp.maximum(out + b_conv[idx][None, None, :], 0.0)
        h = jnp.maximum(cur + res, 0.0)
    return jnp.sum(h[:, -1, :] * params["w_pre"], axis=-1) + params["b_pre"][0, 0]


if __name__ == "__main__":
    B, T = 4, 64
    key = jax.random.PRNGKey(0)
    key, kx = jax.random.split(key)
    x = jax.random.normal(kx, (B, T, 1), jnp.float32)
    params = init_params(key)

    out = jax.block_until_ready(discriminator_forward(x, params))
    assert out.shape == (B,)
    assert bool(jnp.all(jnp.isfinite(out)))

    ref = reference_forward(x, params)
    err = float(jnp.max(jnp.abs(out - ref)))
    assert err < 5e-2, f"mismatch vs reference: max abs err = {err}"
    print("KERNEL_OK")
</pallas_src>

<mosaic_0001>
module attributes {stable_mosaic.version = 11 : i64} {
  func.func @_discriminator_kernel(%arg0: i32, %arg1: memref<1x64x1xf32, #tpu.memory_space<vmem>>, %arg2: memref<1x64xf32, #tpu.memory_space<vmem>>, %arg3: memref<1x64xf32, #tpu.memory_space<vmem>>, %arg4: memref<70x64x64xbf16, #tpu.memory_space<vmem>>, %arg5: memref<14x64xf32, #tpu.memory_space<vmem>>, %arg6: memref<1x64xf32, #tpu.memory_space<vmem>>, %arg7: memref<1x1xf32, #tpu.memory_space<vmem>>, %arg8: memref<1x1x1xf32, #tpu.memory_space<vmem>>, %arg9: memref<320x64xf32, #tpu.memory_space<vmem>>) attributes {dimension_semantics = [#tpu.dimension_semantics<parallel>], iteration_bounds = array<i64: 4>, scalar_prefetch = 0 : i64, scratch_operands = 1 : i64, tpu.core_type = #tpu.core_type<tc>, window_params = [{transform_indices = @transform_0, window_bounds = array<i64: 1, 64, 1>}, {pipeline_mode = #tpu.pipeline_mode<synchronous>, transform_indices = @transform_1, window_bounds = array<i64: 1, 64>}, {pipeline_mode = #tpu.pipeline_mode<synchronous>, transform_indices = @transform_2, window_bounds = array<i64: 1, 64>}, {pipeline_mode = #tpu.pipeline_mode<synchronous>, transform_indices = @transform_3, window_bounds = array<i64: 70, 64, 64>}, {pipeline_mode = #tpu.pipeline_mode<synchronous>, transform_indices = @transform_4, window_bounds = array<i64: 14, 64>}, {pipeline_mode = #tpu.pipeline_mode<synchronous>, transform_indices = @transform_5, window_bounds = array<i64: 1, 64>}, {pipeline_mode = #tpu.pipeline_mode<synchronous>, transform_indices = @transform_6, window_bounds = array<i64: 1, 1>}, {transform_indices = @transform_7, window_bounds = array<i64: 1, 1, 1>}]} {
    %cst = arith.constant 0.000000e+00 : f32
    %0 = vector.broadcast %cst : f32 to vector<256x64xf32>
    %c0 = arith.constant 0 : index
    %c0_0 = arith.constant 0 : index
    %1 = vector.load %arg9[%c0, %c0_0] : memref<320x64xf32, #tpu.memory_space<vmem>>, vector<256x64xf32>
    tpu.vector_store %arg9[%c0, %c0_0], %0 {strides = array<i32>} : memref<320x64xf32, #tpu.memory_space<vmem>>, vector<256x64xf32>,
    %c0_1 = arith.constant 0 : index
    %c0_2 = arith.constant 0 : index
    %c0_3 = arith.constant 0 : index
    %2 = vector.load %arg1[%c0_1, %c0_2, %c0_3] : memref<1x64x1xf32, #tpu.memory_space<vmem>>, vector<1x64x1xf32>
    %3 = vector.shape_cast %2 : vector<1x64x1xf32> to vector<64x1xf32>
    %c0_4 = arith.constant 0 : index
    %c0_5 = arith.constant 0 : index
    %4 = vector.load %arg2[%c0_4, %c0_5] : memref<1x64xf32, #tpu.memory_space<vmem>>, vector<1x64xf32>
    %5 = vector.broadcast %3 : vector<64x1xf32> to vector<64x64xf32>
    %6 = vector.broadcast %4 : vector<1x64xf32> to vector<64x64xf32>
    %7 = arith.mulf %5, %6 : vector<64x64xf32>
    %c0_6 = arith.constant 0 : index
    %c0_7 = arith.constant 0 : index
    %8 = vector.load %arg3[%c0_6, %c0_7] : memref<1x64xf32, #tpu.memory_space<vmem>>, vector<1x64xf32>
    %9 = vector.broadcast %8 : vector<1x64xf32> to vector<64x64xf32>
    %10 = arith.addf %7, %9 : vector<64x64xf32>
    %c256 = arith.constant 256 : index
    %c0_8 = arith.constant 0 : index
    %11 = vector.load %arg9[%c256, %c0_8] : memref<320x64xf32, #tpu.memory_space<vmem>>, vector<64x64xf32>
    tpu.vector_store %arg9[%c256, %c0_8], %10 {strides = array<i32>} : memref<320x64xf32, #tpu.memory_space<vmem>>, vector<64x64xf32>,
    %c252 = arith.constant 252 : index
    %c0_9 = arith.constant 0 : index
    %12 = vector.load %arg9[%c252, %c0_9] : memref<320x64xf32, #tpu.memory_space<vmem>>, vector<64x64xf32>
    %13 = arith.truncf %12 : vector<64x64xf32> to vector<64x64xbf16>
    %c0_10 = arith.constant 0 : index
    %c0_11 = arith.constant 0 : index
    %c0_12 = arith.constant 0 : index
    %14 = vector.load %arg4[%c0_10, %c0_11, %c0_12] : memref<70x64x64xbf16, #tpu.memory_space<vmem>>, vector<1x64x64xbf16>
    %15 = vector.shape_cast %14 : vector<1x64x64xbf16> to vector<64x64xbf16>
    %cst_13 = arith.constant dense<0.000000e+00> : vector<64x64xf32>
    %16 = tpu.matmul %13, %15, %cst_13 {dimension_numbers = #tpu.dot_dimension_numbers<[1], [0], [0], [1], [0, 0, 1, 1], [], []>} : vector<64x64xbf16>, vector<64x64xbf16>, vector<64x64xf32> -> vector<64x64xf32>
    %c253 = arith.constant 253 : index
    %c0_14 = arith.constant 0 : index
    %17 = vector.load %arg9[%c253, %c0_14] : memref<320x64xf32, #tpu.memory_space<vmem>>, vector<64x64xf32>
    %18 = arith.truncf %17 : vector<64x64xf32> to vector<64x64xbf16>
    %c1 = arith.constant 1 : index
    %c0_15 = arith.constant 0 : index
    %c0_16 = arith.constant 0 : index
    %19 = vector.load %arg4[%c1, %c0_15, %c0_16] : memref<70x64x64xbf16, #tpu.memory_space<vmem>>, vector<1x64x64xbf16>
    %20 = vector.shape_cast %19 : vector<1x64x64xbf16> to vector<64x64xbf16>
    %cst_17 = arith.constant dense<0.000000e+00> : vector<64x64xf32>
    %21 = tpu.matmul %18, %20, %cst_17 {dimension_numbers = #tpu.dot_dimension_numbers<[1], [0], [0], [1], [0, 0, 1, 1], [], []>} : vector<64x64xbf16>, vector<64x64xbf16>, vector<64x64xf32> -> vector<64x64xf32>
    %22 = arith.addf %16, %21 : vector<64x64xf32>
    %c254 = arith.constant 254 : index
    %c0_18 = arith.constant 0 : index
    %23 = vector.load %arg9[%c254, %c0_18] : memref<320x64xf32, #tpu.memory_space<vmem>>, vector<64x64xf32>
    %24 = arith.truncf %23 : vector<64x64xf32> to vector<64x64xbf16>
    %c2 = arith.constant 2 : index
    %c0_19 = arith.constant 0 : index
    %c0_20 = arith.constant 0 : index
    %25 = vector.load %arg4[%c2, %c0_19, %c0_20] : memref<70x64x64xbf16, #tpu.memory_space<vmem>>, vector<1x64x64xbf16>
    %26 = vector.shape_cast %25 : vector<1x64x64xbf16> to vector<64x64xbf16>
    %cst_21 = arith.constant dense<0.000000e+00> : vector<64x64xf32>
    %27 = tpu.matmul %24, %26, %cst_21 {dimension_numbers = #tpu.dot_dimension_numbers<[1], [0], [0], [1], [0, 0, 1, 1], [], []>} : vector<64x64xbf16>, vector<64x64xbf16>, vector<64x64xf32> -> vector<64x64xf32>
    %28 = arith.addf %22, %27 : vector<64x64xf32>
    %c255 = arith.constant 255 : index
    %c0_22 = arith.constant 0 : index
    %29 = vector.load %arg9[%c255, %c0_22] : memref<320x64xf32, #tpu.memory_space<vmem>>, vector<64x64xf32>
    %30 = arith.truncf %29 : vector<64x64xf32> to vector<64x64xbf16>
    %c3 = arith.constant 3 : index
    %c0_23 = arith.constant 0 : index
    %c0_24 = arith.constant 0 : index
    %31 = vector.load %arg4[%c3, %c0_23, %c0_24] : memref<70x64x64xbf16, #tpu.memory_space<vmem>>, vector<1x64x64xbf16>
    %32 = vector.shape_cast %31 : vector<1x64x64xbf16> to vector<64x64xbf16>
    %cst_25 = arith.constant dense<0.000000e+00> : vector<64x64xf32>
    %33 = tpu.matmul %30, %32, %cst_25 {dimension_numbers = #tpu.dot_dimension_numbers<[1], [0], [0], [1], [0, 0, 1, 1], [], []>} : vector<64x64xbf16>, vector<64x64xbf16>, vector<64x64xf32> -> vector<64x64xf32>
    %34 = arith.addf %28, %33 : vector<64x64xf32>
    %c256_26 = arith.constant 256 : index
    %c0_27 = arith.constant 0 : index
    %35 = vector.load %arg9[%c256_26, %c0_27] : memref<320x64xf32, #tpu.memory_space<vmem>>, vector<64x64xf32>
    %36 = arith.truncf %35 : vector<64x64xf32> to vector<64x64xbf16>
    %c4 = arith.constant 4 : index
    %c0_28 = arith.constant 0 : index
    %c0_29 = arith.constant 0 : index
    %37 = vector.load %arg4[%c4, %c0_28, %c0_29] : memref<70x64x64xbf16, #tpu.memory_space<vmem>>, vector<1x64x64xbf16>
    %38 = vector.shape_cast %37 : vector<1x64x64xbf16> to vector<64x64xbf16>
    %cst_30 = arith.constant dense<0.000000e+00> : vector<64x64xf32>
    %39 = tpu.matmul %36, %38, %cst_30 {dimension_numbers = #tpu.dot_dimension_numbers<[1], [0], [0], [1], [0, 0, 1, 1], [], []>} : vector<64x64xbf16>, vector<64x64xbf16>, vector<64x64xf32> -> vector<64x64xf32>
    %40 = arith.addf %34, %39 : vector<64x64xf32>
    %c0_31 = arith.constant 0 : index
    %c0_32 = arith.constant 0 : index
    %41 = vector.load %arg5[%c0_31, %c0_32] : memref<14x64xf32, #tpu.memory_space<vmem>>, vector<1x64xf32>
    %42 = vector.broadcast %41 : vector<1x64xf32> to vector<64x64xf32>
    %43 = arith.addf %40, %42 : vector<64x64xf32>
    %cst_33 = arith.constant 0.000000e+00 : f32
    %44 = vector.broadcast %cst_33 : f32 to vector<64x64xf32>
    %45 = arith.maximumf %43, %44 : vector<64x64xf32>
    %c256_34 = arith.constant 256 : index
    %c0_35 = arith.constant 0 : index
    %46 = vector.load %arg9[%c256_34, %c0_35] : memref<320x64xf32, #tpu.memory_space<vmem>>, vector<64x64xf32>
    tpu.vector_store %arg9[%c256_34, %c0_35], %45 {strides = array<i32>} : memref<320x64xf32, #tpu.memory_space<vmem>>, vector<64x64xf32>,
    %c252_36 = arith.constant 252 : index
    %c0_37 = arith.constant 0 : index
    %47 = vector.load %arg9[%c252_36, %c0_37] : memref<320x64xf32, #tpu.memory_space<vmem>>, vector<64x64xf32>
    %48 = arith.truncf %47 : vector<64x64xf32> to vector<64x64xbf16>
    %c5 = arith.constant 5 : index
    %c0_38 = arith.constant 0 : index
    %c0_39 = arith.constant 0 : index
    %49 = vector.load %arg4[%c5, %c0_38, %c0_39] : memref<70x64x64xbf16, #tpu.memory_space<vmem>>, vector<1x64x64xbf16>
    %50 = vector.shape_cast %49 : vector<1x64x64xbf16> to vector<64x64xbf16>
    %cst_40 = arith.constant dense<0.000000e+00> : vector<64x64xf32>
    %51 = tpu.matmul %48, %50, %cst_40 {dimension_numbers = #tpu.dot_dimension_numbers<[1], [0], [0], [1], [0, 0, 1, 1], [], []>} : vector<64x64xbf16>, vector<64x64xbf16>, vector<64x64xf32> -> vector<64x64xf32>
    %c253_41 = arith.constant 253 : index
    %c0_42 = arith.constant 0 : index
    %52 = vector.load %arg9[%c253_41, %c0_42] : memref<320x64xf32, #tpu.memory_space<vmem>>, vector<64x64xf32>
    %53 = arith.truncf %52 : vector<64x64xf32> to vector<64x64xbf16>
    %c6 = arith.constant 6 : index
    %c0_43 = arith.constant 0 : index
    %c0_44 = arith.constant 0 : index
    %54 = vector.load %arg4[%c6, %c0_43, %c0_44] : memref<70x64x64xbf16, #tpu.memory_space<vmem>>, vector<1x64x64xbf16>
    %55 = vector.shape_cast %54 : vector<1x64x64xbf16> to vector<64x64xbf16>
    %cst_45 = arith.constant dense<0.000000e+00> : vector<64x64xf32>
    %56 = tpu.matmul %53, %55, %cst_45 {dimension_numbers = #tpu.dot_dimension_numbers<[1], [0], [0], [1], [0, 0, 1, 1], [], []>} : vector<64x64xbf16>, vector<64x64xbf16>, vector<64x64xf32> -> vector<64x64xf32>
    %57 = arith.addf %51, %56 : vector<64x64xf32>
    %c254_46 = arith.constant 254 : index
    %c0_47 = arith.constant 0 : index
    %58 = vector.load %arg9[%c254_46, %c0_47] : memref<320x64xf32, #tpu.memory_space<vmem>>, vector<64x64xf32>
    %59 = arith.truncf %58 : vector<64x64xf32> to vector<64x64xbf16>
    %c7 = arith.constant 7 : index
    %c0_48 = arith.constant 0 : index
    %c0_49 = arith.constant 0 : index
    %60 = vector.load %arg4[%c7, %c0_48, %c0_49] : memref<70x64x64xbf16, #tpu.memory_space<vmem>>, vector<1x64x64xbf16>
    %61 = vector.shape_cast %60 : vector<1x64x64xbf16> to vector<64x64xbf16>
    %cst_50 = arith.constant dense<0.000000e+00> : vector<64x64xf32>
    %62 = tpu.matmul %59, %61, %cst_50 {dimension_numbers = #tpu.dot_dimension_numbers<[1], [0], [0], [1], [0, 0, 1, 1], [], []>} : vector<64x64xbf16>, vector<64x64xbf16>, vector<64x64xf32> -> vector<64x64xf32>
    %63 = arith.addf %57, %62 : vector<64x64xf32>
    %c255_51 = arith.constant 255 : index
    %c0_52 = arith.constant 0 : index
    %64 = vector.load %arg9[%c255_51, %c0_52] : memref<320x64xf32, #tpu.memory_space<vmem>>, vector<64x64xf32>
    %65 = arith.truncf %64 : vector<64x64xf32> to vector<64x64xbf16>
    %c8 = arith.constant 8 : index
    %c0_53 = arith.constant 0 : index
    %c0_54 = arith.constant 0 : index
    %66 = vector.load %arg4[%c8, %c0_53, %c0_54] : memref<70x64x64xbf16, #tpu.memory_space<vmem>>, vector<1x64x64xbf16>
    %67 = vector.shape_cast %66 : vector<1x64x64xbf16> to vector<64x64xbf16>
    %cst_55 = arith.constant dense<0.000000e+00> : vector<64x64xf32>
    %68 = tpu.matmul %65, %67, %cst_55 {dimension_numbers = #tpu.dot_dimension_numbers<[1], [0], [0], [1], [0, 0, 1, 1], [], []>} : vector<64x64xbf16>, vector<64x64xbf16>, vector<64x64xf32> -> vector<64x64xf32>
    %69 = arith.addf %63, %68 : vector<64x64xf32>
    %c256_56 = arith.constant 256 : index
    %c0_57 = arith.constant 0 : index
    %70 = vector.load %arg9[%c256_56, %c0_57] : memref<320x64xf32, #tpu.memory_space<vmem>>, vector<64x64xf32>
    %71 = arith.truncf %70 : vector<64x64xf32> to vector<64x64xbf16>
    %c9 = arith.constant 9 : index
    %c0_58 = arith.constant 0 : index
    %c0_59 = arith.constant 0 : index
    %72 = vector.load %arg4[%c9, %c0_58, %c0_59] : memref<70x64x64xbf16, #tpu.memory_space<vmem>>, vector<1x64x64xbf16>
    %73 = vector.shape_cast %72 : vector<1x64x64xbf16> to vector<64x64xbf16>
    %cst_60 = arith.constant dense<0.000000e+00> : vector<64x64xf32>
    %74 = tpu.matmul %71, %73, %cst_60 {dimension_numbers = #tpu.dot_dimension_numbers<[1], [0], [0], [1], [0, 0, 1, 1], [], []>} : vector<64x64xbf16>, vector<64x64xbf16>, vector<64x64xf32> -> vector<64x64xf32>
    %75 = arith.addf %69, %74 : vector<64x64xf32>
    %c1_61 = arith.constant 1 : index
    %c0_62 = arith.constant 0 : index
    %76 = vector.load %arg5[%c1_61, %c0_62] : memref<14x64xf32, #tpu.memory_space<vmem>>, vector<1x64xf32>
    %77 = vector.broadcast %76 : vector<1x64xf32> to vector<64x64xf32>
    %78 = arith.addf %75, %77 : vector<64x64xf32>
    %cst_63 = arith.constant 0.000000e+00 : f32
    %79 = vector.broadcast %cst_63 : f32 to vector<64x64xf32>
    %80 = arith.maximumf %78, %79 : vector<64x64xf32>
    %81 = arith.addf %80, %10 : vector<64x64xf32>
    %cst_64 = arith.constant 0.000000e+00 : f32
    %82 = vector.broadcast %cst_64 : f32 to vector<64x64xf32>
    %83 = arith.maximumf %81, %82 : vector<64x64xf32>
    %c256_65 = arith.constant 256 : index
    %c0_66 = arith.constant 0 : index
    %84 = vector.load %arg9[%c256_65, %c0_66] : memref<320x64xf32, #tpu.memory_space<vmem>>, vector<64x64xf32>
    tpu.vector_store %arg9[%c256_65, %c0_66], %83 {strides = array<i32>} : memref<320x64xf32, #tpu.memory_space<vmem>>, vector<64x64xf32>,
    %c248 = arith.constant 248 : index
    %c0_67 = arith.constant 0 : index
    %85 = vector.load %arg9[%c248, %c0_67] : memref<320x64xf32, #tpu.memory_space<vmem>>, vector<64x64xf32>
    %86 = arith.truncf %85 : vector<64x64xf32> to vector<64x64xbf16>
    %c10 = arith.constant 10 : index
    %c0_68 = arith.constant 0 : index
    %c0_69 = arith.constant 0 : index
    %87 = vector.load %arg4[%c10, %c0_68, %c0_69] : memref<70x64x64xbf16, #tpu.memory_space<vmem>>, vector<1x64x64xbf16>
    %88 = vector.shape_cast %87 : vector<1x64x64xbf16> to vector<64x64xbf16>
    %cst_70 = arith.constant dense<0.000000e+00> : vector<64x64xf32>
    %89 = tpu.matmul %86, %88, %cst_70 {dimension_numbers = #tpu.dot_dimension_numbers<[1], [0], [0], [1], [0, 0, 1, 1], [], []>} : vector<64x64xbf16>, vector<64x64xbf16>, vector<64x64xf32> -> vector<64x64xf32>
    %c250 = arith.constant 250 : index
    %c0_71 = arith.constant 0 : index
    %90 = vector.load %arg9[%c250, %c0_71] : memref<320x64xf32, #tpu.memory_space<vmem>>, vector<64x64xf32>
    %91 = arith.truncf %90 : vector<64x64xf32> to vector<64x64xbf16>
    %c11 = arith.constant 11 : index
    %c0_72 = arith.constant 0 : index
    %c0_73 = arith.constant 0 : index
    %92 = vector.load %arg4[%c11, %c0_72, %c0_73] : memref<70x64x64xbf16, #tpu.memory_space<vmem>>, vector<1x64x64xbf16>
    %93 = vector.shape_cast %92 : vector<1x64x64xbf16> to vector<64x64xbf16>
    %cst_74 = arith.constant dense<0.000000e+00> : vector<64x64xf32>
    %94 = tpu.matmul %91, %93, %cst_74 {dimension_numbers = #tpu.dot_dimension_numbers<[1], [0], [0], [1], [0, 0, 1, 1], [], []>} : vector<64x64xbf16>, vector<64x64xbf16>, vector<64x64xf32> -> vector<64x64xf32>
    %95 = arith.addf %89, %94 : vector<64x64xf32>
    %c252_75 = arith.constant 252 : index
    %c0_76 = arith.constant 0 : index
    %96 = vector.load %arg9[%c252_75, %c0_76] : memref<320x64xf32, #tpu.memory_space<vmem>>, vector<64x64xf32>
    %97 = arith.truncf %96 : vector<64x64xf32> to vector<64x64xbf16>
    %c12 = arith.constant 12 : index
    %c0_77 = arith.constant 0 : index
    %c0_78 = arith.constant 0 : index
    %98 = vector.load %arg4[%c12, %c0_77, %c0_78] : memref<70x64x64xbf16, #tpu.memory_space<vmem>>, vector<1x64x64xbf16>
    %99 = vector.shape_cast %98 : vector<1x64x64xbf16> to vector<64x64xbf16>
    %cst_79 = arith.constant dense<0.000000e+00> : vector<64x64xf32>
    %100 = tpu.matmul %97, %99, %cst_79 {dimension_numbers = #tpu.dot_dimension_numbers<[1], [0], [0], [1], [0, 0, 1, 1], [], []>} : vector<64x64xbf16>, vector<64x64xbf16>, vector<64x64xf32> -> vector<64x64xf32>
    %101 = arith.addf %95, %100 : vector<64x64xf32>
    %c254_80 = arith.constant 254 : index
    %c0_81 = arith.constant 0 : index
    %102 = vector.load %arg9[%c254_80, %c0_81] : memref<320x64xf32, #tpu.memory_space<vmem>>, vector<64x64xf32>
    %103 = arith.truncf %102 : vector<64x64xf32> to vector<64x64xbf16>
    %c13 = arith.constant 13 : index
    %c0_82 = arith.constant 0 : index
    %c0_83 = arith.constant 0 : index
    %104 = vector.load %arg4[%c13, %c0_82, %c0_83] : memref<70x64x64xbf16, #tpu.memory_space<vmem>>, vector<1x64x64xbf16>
    %105 = vector.shape_cast %104 : vector<1x64x64xbf16> to vector<64x64xbf16>
    %cst_84 = arith.constant dense<0.000000e+00> : vector<64x64xf32>
    %106 = tpu.matmul %103, %105, %cst_84 {dimension_numbers = #tpu.dot_dimension_numbers<[1], [0], [0], [1], [0, 0, 1, 1], [], []>} : vector<64x64xbf16>, vector<64x64xbf16>, vector<64x64xf32> -> vector<64x64xf32>
    %107 = arith.addf %101, %106 : vector<64x64xf32>
    %c256_85 = arith.constant 256 : index
    %c0_86 = arith.constant 0 : index
    %108 = vector.load %arg9[%c256_85, %c0_86] : memref<320x64xf32, #tpu.memory_space<vmem>>, vector<64x64xf32>
    %109 = arith.truncf %108 : vector<64x64xf32> to vector<64x64xbf16>
    %c14 = arith.constant 14 : index
    %c0_87 = arith.constant 0 : index
    %c0_88 = arith.constant 0 : index
    %110 = vector.load %arg4[%c14, %c0_87, %c0_88] : memref<70x64x64xbf16, #tpu.memory_space<vmem>>, vector<1x64x64xbf16>
    %111 = vector.shape_cast %110 : vector<1x64x64xbf16> to vector<64x64xbf16>
    %cst_89 = arith.constant dense<0.000000e+00> : vector<64x64xf32>
    %112 = tpu.matmul %109, %111, %cst_89 {dimension_numbers = #tpu.dot_dimension_numbers<[1], [0], [0], [1], [0, 0, 1, 1], [], []>} : vector<64x64xbf16>, vector<64x64xbf16>, vector<64x64xf32> -> vector<64x64xf32>
    %113 = arith.addf %107, %112 : vector<64x64xf32>
    %c2_90 = arith.constant 2 : index
    %c0_91 = arith.constant 0 : index
    %114 = vector.load %arg5[%c2_90, %c0_91] : memref<14x64xf32, #tpu.memory_space<vmem>>, vector<1x64xf32>
    %115 = vector.broadcast %114 : vector<1x64xf32> to vector<64x64xf32>
    %116 = arith.addf %113, %115 : vector<64x64xf32>
    %cst_92 = arith.constant 0.000000e+00 : f32
    %117 = vector.broadcast %cst_92 : f32 to vector<64x64xf32>
    %118 = arith.maximumf %116, %117 : vector<64x64xf32>
    %c256_93 = arith.constant 256 : index
    %c0_94 = arith.constant 0 : index
    %119 = vector.load %arg9[%c256_93, %c0_94] : memref<320x64xf32, #tpu.memory_space<vmem>>, vector<64x64xf32>
    tpu.vector_store %arg9[%c256_93, %c0_94], %118 {strides = array<i32>} : memref<320x64xf32, #tpu.memory_space<vmem>>, vector<64x64xf32>,
    %c248_95 = arith.constant 248 : index
    %c0_96 = arith.constant 0 : index
    %120 = vector.load %arg9[%c248_95, %c0_96] : memref<320x64xf32, #tpu.memory_space<vmem>>, vector<64x64xf32>
    %121 = arith.truncf %120 : vector<64x64xf32> to vector<64x64xbf16>
    %c15 = arith.constant 15 : index
    %c0_97 = arith.constant 0 : index
    %c0_98 = arith.constant 0 : index
    %122 = vector.load %arg4[%c15, %c0_97, %c0_98] : memref<70x64x64xbf16, #tpu.memory_space<vmem>>, vector<1x64x64xbf16>
    %123 = vector.shape_cast %122 : vector<1x64x64xbf16> to vector<64x64xbf16>
    %cst_99 = arith.constant dense<0.000000e+00> : vector<64x64xf32>
    %124 = tpu.matmul %121, %123, %cst_99 {dimension_numbers = #tpu.dot_dimension_numbers<[1], [0], [0], [1], [0, 0, 1, 1], [], []>} : vector<64x64xbf16>, vector<64x64xbf16>, vector<64x64xf32> -> vector<64x64xf32>
    %c250_100 = arith.constant 250 : index
    %c0_101 = arith.constant 0 : index
    %125 = vector.load %arg9[%c250_100, %c0_101] : memref<320x64xf32, #tpu.memory_space<vmem>>, vector<64x64xf32>
    %126 = arith.truncf %125 : vector<64x64xf32> to vector<64x64xbf16>
    %c16 = arith.constant 16 : index
    %c0_102 = arith.constant 0 : index
    %c0_103 = arith.constant 0 : index
    %127 = vector.load %arg4[%c16, %c0_102, %c0_103] : memref<70x64x64xbf16, #tpu.memory_space<vmem>>, vector<1x64x64xbf16>
    %128 = vector.shape_cast %127 : vector<1x64x64xbf16> to vector<64x64xbf16>
    %cst_104 = arith.constant dense<0.000000e+00> : vector<64x64xf32>
    %129 = tpu.matmul %126, %128, %cst_104 {dimension_numbers = #tpu.dot_dimension_numbers<[1], [0], [0], [1], [0, 0, 1, 1], [], []>} : vector<64x64xbf16>, vector<64x64xbf16>, vector<64x64xf32> -> vector<64x64xf32>
    %130 = arith.addf %124, %129 : vector<64x64xf32>
    %c252_105 = arith.constant 252 : index
    %c0_106 = arith.constant 0 : index
    %131 = vector.load %arg9[%c252_105, %c0_106] : memref<320x64xf32, #tpu.memory_space<vmem>>, vector<64x64xf32>
    %132 = arith.truncf %131 : vector<64x64xf32> to vector<64x64xbf16>
    %c17 = arith.constant 17 : index
    %c0_107 = arith.constant 0 : index
    %c0_108 = arith.constant 0 : index
    %133 = vector.load %arg4[%c17, %c0_107, %c0_108] : memref<70x64x64xbf16, #tpu.memory_space<vmem>>, vector<1x64x64xbf16>
    %134 = vector.shape_cast %133 : vector<1x64x64xbf16> to vector<64x64xbf16>
    %cst_109 = arith.constant dense<0.000000e+00> : vector<64x64xf32>
    %135 = tpu.matmul %132, %134, %cst_109 {dimension_numbers = #tpu.dot_dimension_numbers<[1], [0], [0], [1], [0, 0, 1, 1], [], []>} : vector<64x64xbf16>, vector<64x64xbf16>, vector<64x64xf32> -> vector<64x64xf32>
    %136 = arith.addf %130, %135 : vector<64x64xf32>
    %c254_110 = arith.constant 254 : index
    %c0_111 = arith.constant 0 : index
    %137 = vector.load %arg9[%c254_110, %c0_111] : memref<320x64xf32, #tpu.memory_space<vmem>>, vector<64x64xf32>
    %138 = arith.truncf %137 : vector<64x64xf32> to vector<64x64xbf16>
    %c18 = arith.constant 18 : index
    %c0_112 = arith.constant 0 : index
    %c0_113 = arith.constant 0 : index
    %139 = vector.load %arg4[%c18, %c0_112, %c0_113] : memref<70x64x64xbf16, #tpu.memory_space<vmem>>, vector<1x64x64xbf16>
    %140 = vector.shape_cast %139 : vector<1x64x64xbf16> to vector<64x64xbf16>
    %cst_114 = arith.constant dense<0.000000e+00> : vector<64x64xf32>
    %141 = tpu.matmul %138, %140, %cst_114 {dimension_numbers = #tpu.dot_dimension_numbers<[1], [0], [0], [1], [0, 0, 1, 1], [], []>} : vector<64x64xbf16>, vector<64x64xbf16>, vector<64x64xf32> -> vector<64x64xf32>
    %142 = arith.addf %136, %141 : vector<64x64xf32>
    %c256_115 = arith.constant 256 : index
    %c0_116 = arith.constant 0 : index
    %143 = vector.load %arg9[%c256_115, %c0_116] : memref<320x64xf32, #tpu.memory_space<vmem>>, vector<64x64xf32>
    %144 = arith.truncf %143 : vector<64x64xf32> to vector<64x64xbf16>
    %c19 = arith.constant 19 : index
    %c0_117 = arith.constant 0 : index
    %c0_118 = arith.constant 0 : index
    %145 = vector.load %arg4[%c19, %c0_117, %c0_118] : memref<70x64x64xbf16, #tpu.memory_space<vmem>>, vector<1x64x64xbf16>
    %146 = vector.shape_cast %145 : vector<1x64x64xbf16> to vector<64x64xbf16>
    %cst_119 = arith.constant dense<0.000000e+00> : vector<64x64xf32>
    %147 = tpu.matmul %144, %146, %cst_119 {dimension_numbers = #tpu.dot_dimension_numbers<[1], [0], [0], [1], [0, 0, 1, 1], [], []>} : vector<64x64xbf16>, vector<64x64xbf16>, vector<64x64xf32> -> vector<64x64xf32>
    %148 = arith.addf %142, %147 : vector<64x64xf32>
    %c3_120 = arith.constant 3 : index
    %c0_121 = arith.constant 0 : index
    %149 = vector.load %arg5[%c3_120, %c0_121] : memref<14x64xf32, #tpu.memory_space<vmem>>, vector<1x64xf32>
    %150 = vector.broadcast %149 : vector<1x64xf32> to vector<64x64xf32>
    %151 = arith.addf %148, %150 : vector<64x64xf32>
    %cst_122 = arith.constant 0.000000e+00 : f32
    %152 = vector.broadcast %cst_122 : f32 to vector<64x64xf32>
    %153 = arith.maximumf %151, %152 : vector<64x64xf32>
    %154 = arith.addf %153, %83 : vector<64x64xf32>
    %cst_123 = arith.constant 0.000000e+00 : f32
    %155 = vector.broadcast %cst_123 : f32 to vector<64x64xf32>
    %156 = arith.maximumf %154, %155 : vector<64x64xf32>
    %c256_124 = arith.constant 256 : index
    %c0_125 = arith.constant 0 : index
    %157 = vector.load %arg9[%c256_124, %c0_125] : memref<320x64xf32, #tpu.memory_space<vmem>>, vector<64x64xf32>
    tpu.vector_store %arg9[%c256_124, %c0_125], %156 {strides = array<i32>} : memref<320x64xf32, #tpu.memory_space<vmem>>, vector<64x64xf32>,
    %c240 = arith.constant 240 : index
    %c0_126 = arith.constant 0 : index
    %158 = vector.load %arg9[%c240, %c0_126] : memref<320x64xf32, #tpu.memory_space<vmem>>, vector<64x64xf32>
    %159 = arith.truncf %158 : vector<64x64xf32> to vector<64x64xbf16>
    %c20 = arith.constant 20 : index
    %c0_127 = arith.constant 0 : index
    %c0_128 = arith.constant 0 : index
    %160 = vector.load %arg4[%c20, %c0_127, %c0_128] : memref<70x64x64xbf16, #tpu.memory_space<vmem>>, vector<1x64x64xbf16>
    %161 = vector.shape_cast %160 : vector<1x64x64xbf16> to vector<64x64xbf16>
    %cst_129 = arith.constant dense<0.000000e+00> : vector<64x64xf32>
    %162 = tpu.matmul %159, %161, %cst_129 {dimension_numbers = #tpu.dot_dimension_numbers<[1], [0], [0], [1], [0, 0, 1, 1], [], []>} : vector<64x64xbf16>, vector<64x64xbf16>, vector<64x64xf32> -> vector<64x64xf32>
    %c244 = arith.constant 244 : index
    %c0_130 = arith.constant 0 : index
    %163 = vector.load %arg9[%c244, %c0_130] : memref<320x64xf32, #tpu.memory_space<vmem>>, vector<64x64xf32>
    %164 = arith.truncf %163 : vector<64x64xf32> to vector<64x64xbf16>
    %c21 = arith.constant 21 : index
    %c0_131 = arith.constant 0 : index
    %c0_132 = arith.constant 0 : index
    %165 = vector.load %arg4[%c21, %c0_131, %c0_132] : memref<70x64x64xbf16, #tpu.memory_space<vmem>>, vector<1x64x64xbf16>
    %166 = vector.shape_cast %165 : vector<1x64x64xbf16> to vector<64x64xbf16>
    %cst_133 = arith.constant dense<0.000000e+00> : vector<64x64xf32>
    %167 = tpu.matmul %164, %166, %cst_133 {dimension_numbers = #tpu.dot_dimension_numbers<[1], [0], [0], [1], [0, 0, 1, 1], [], []>} : vector<64x64xbf16>, vector<64x64xbf16>, vector<64x64xf32> -> vector<64x64xf32>
    %168 = arith.addf %162, %167 : vector<64x64xf32>
    %c248_134 = arith.constant 248 : index
    %c0_135 = arith.constant 0 : index
    %169 = vector.load %arg9[%c248_134, %c0_135] : memref<320x64xf32, #tpu.memory_space<vmem>>, vector<64x64xf32>
    %170 = arith.truncf %169 : vector<64x64xf32> to vector<64x64xbf16>
    %c22 = arith.constant 22 : index
    %c0_136 = arith.constant 0 : index
    %c0_137 = arith.constant 0 : index
    %171 = vector.load %arg4[%c22, %c0_136, %c0_137] : memref<70x64x64xbf16, #tpu.memory_space<vmem>>, vector<1x64x64xbf16>
    %172 = vector.shape_cast %171 : vector<1x64x64xbf16> to vector<64x64xbf16>
    %cst_138 = arith.constant dense<0.000000e+00> : vector<64x64xf32>
    %173 = tpu.matmul %170, %172, %cst_138 {dimension_numbers = #tpu.dot_dimension_numbers<[1], [0], [0], [1], [0, 0, 1, 1], [], []>} : vector<64x64xbf16>, vector<64x64xbf16>, vector<64x64xf32> -> vector<64x64xf32>
    %174 = arith.addf %168, %173 : vector<64x64xf32>
    %c252_139 = arith.constant 252 : index
    %c0_140 = arith.constant 0 : index
    %175 = vector.load %arg9[%c252_139, %c0_140] : memref<320x64xf32, #tpu.memory_space<vmem>>, vector<64x64xf32>
    %176 = arith.truncf %175 : vector<64x64xf32> to vector<64x64xbf16>
    %c23 = arith.constant 23 : index
    %c0_141 = arith.constant 0 : index
    %c0_142 = arith.constant 0 : index
    %177 = vector.load %arg4[%c23, %c0_141, %c0_142] : memref<70x64x64xbf16, #tpu.memory_space<vmem>>, vector<1x64x64xbf16>
    %178 = vector.shape_cast %177 : vector<1x64x64xbf16> to vector<64x64xbf16>
    %cst_143 = arith.constant dense<0.000000e+00> : vector<64x64xf32>
    %179 = tpu.matmul %176, %178, %cst_143 {dimension_numbers = #tpu.dot_dimension_numbers<[1], [0], [0], [1], [0, 0, 1, 1], [], []>} : vector<64x64xbf16>, vector<64x64xbf16>, vector<64x64xf32> -> vector<64x64xf32>
    %180 = arith.addf %174, %179 : vector<64x64xf32>
    %c256_144 = arith.constant 256 : index
    %c0_145 = arith.constant 0 : index
    %181 = vector.load %arg9[%c256_144, %c0_145] : memref<320x64xf32, #tpu.memory_space<vmem>>, vector<64x64xf32>
    %182 = arith.truncf %181 : vector<64x64xf32> to vector<64x64xbf16>
    %c24 = arith.constant 24 : index
    %c0_146 = arith.constant 0 : index
    %c0_147 = arith.constant 0 : index
    %183 = vector.load %arg4[%c24, %c0_146, %c0_147] : memref<70x64x64xbf16, #tpu.memory_space<vmem>>, vector<1x64x64xbf16>
    %184 = vector.shape_cast %183 : vector<1x64x64xbf16> to vector<64x64xbf16>
    %cst_148 = arith.constant dense<0.000000e+00> : vector<64x64xf32>
    %185 = tpu.matmul %182, %184, %cst_148 {dimension_numbers = #tpu.dot_dimension_numbers<[1], [0], [0], [1], [0, 0, 1, 1], [], []>} : vector<64x64xbf16>, vector<64x64xbf16>, vector<64x64xf32> -> vector<64x64xf32>
    %186 = arith.addf %180, %185 : vector<64x64xf32>
    %c4_149 = arith.constant 4 : index
    %c0_150 = arith.constant 0 : index
    %187 = vector.load %arg5[%c4_149, %c0_150] : memref<14x64xf32, #tpu.memory_space<vmem>>, vector<1x64xf32>
    %188 = vector.broadcast %187 : vector<1x64xf32> to vector<64x64xf32>
    %189 = arith.addf %186, %188 : vector<64x64xf32>
    %cst_151 = arith.constant 0.000000e+00 : f32
    %190 = vector.broadcast %cst_151 : f32 to vector<64x64xf32>
    %191 = arith.maximumf %189, %190 : vector<64x64xf32>
    %c256_152 = arith.constant 256 : index
    %c0_153 = arith.constant 0 : index
    %192 = vector.load %arg9[%c256_152, %c0_153] : memref<320x64xf32, #tpu.memory_space<vmem>>, vector<64x64xf32>
    tpu.vector_store %arg9[%c256_152, %c0_153], %191 {strides = array<i32>} : memref<320x64xf32, #tpu.memory_space<vmem>>, vector<64x64xf32>,
    %c240_154 = arith.constant 240 : index
    %c0_155 = arith.constant 0 : index
    %193 = vector.load %arg9[%c240_154, %c0_155] : memref<320x64xf32, #tpu.memory_space<vmem>>, vector<64x64xf32>
    %194 = arith.truncf %193 : vector<64x64xf32> to vector<64x64xbf16>
    %c25 = arith.constant 25 : index
    %c0_156 = arith.constant 0 : index
    %c0_157 = arith.constant 0 : index
    %195 = vector.load %arg4[%c25, %c0_156, %c0_157] : memref<70x64x64xbf16, #tpu.memory_space<vmem>>, vector<1x64x64xbf16>
    %196 = vector.shape_cast %195 : vector<1x64x64xbf16> to vector<64x64xbf16>
    %cst_158 = arith.constant dense<0.000000e+00> : vector<64x64xf32>
    %197 = tpu.matmul %194, %196, %cst_158 {dimension_numbers = #tpu.dot_dimension_numbers<[1], [0], [0], [1], [0, 0, 1, 1], [], []>} : vector<64x64xbf16>, vector<64x64xbf16>, vector<64x64xf32> -> vector<64x64xf32>
    %c244_159 = arith.constant 244 : index
    %c0_160 = arith.constant 0 : index
    %198 = vector.load %arg9[%c244_159, %c0_160] : memref<320x64xf32, #tpu.memory_space<vmem>>, vector<64x64xf32>
    %199 = arith.truncf %198 : vector<64x64xf32> to vector<64x64xbf16>
    %c26 = arith.constant 26 : index
    %c0_161 = arith.constant 0 : index
    %c0_162 = arith.constant 0 : index
    %200 = vector.load %arg4[%c26, %c0_161, %c0_162] : memref<70x64x64xbf16, #tpu.memory_space<vmem>>, vector<1x64x64xbf16>
    %201 = vector.shape_cast %200 : vector<1x64x64xbf16> to vector<64x64xbf16>
    %cst_163 = arith.constant dense<0.000000e+00> : vector<64x64xf32>
    %202 = tpu.matmul %199, %201, %cst_163 {dimension_numbers = #tpu.dot_dimension_numbers<[1], [0], [0], [1], [0, 0, 1, 1], [], []>} : vector<64x64xbf16>, vector<64x64xbf16>, vector<64x64xf32> -> vector<64x64xf32>
    %203 = arith.addf %197, %202 : vector<64x64xf32>
    %c248_164 = arith.constant 248 : index
    %c0_165 = arith.constant 0 : index
    %204 = vector.load %arg9[%c248_164, %c0_165] : memref<320x64xf32, #tpu.memory_space<vmem>>, vector<64x64xf32>
    %205 = arith.truncf %204 : vector<64x64xf32> to vector<64x64xbf16>
    %c27 = arith.constant 27 : index
    %c0_166 = arith.constant 0 : index
    %c0_167 = arith.constant 0 : index
    %206 = vector.load %arg4[%c27, %c0_166, %c0_167] : memref<70x64x64xbf16, #tpu.memory_space<vmem>>, vector<1x64x64xbf16>
    %207 = vector.shape_cast %206 : vector<1x64x64xbf16> to vector<64x64xbf16>
    %cst_168 = arith.constant dense<0.000000e+00> : vector<64x64xf32>
    %208 = tpu.matmul %205, %207, %cst_168 {dimension_numbers = #tpu.dot_dimension_numbers<[1], [0], [0], [1], [0, 0, 1, 1], [], []>} : vector<64x64xbf16>, vector<64x64xbf16>, vector<64x64xf32> -> vector<64x64xf32>
    %209 = arith.addf %203, %208 : vector<64x64xf32>
    %c252_169 = arith.constant 252 : index
    %c0_170 = arith.constant 0 : index
    %210 = vector.load %arg9[%c252_169, %c0_170] : memref<320x64xf32, #tpu.memory_space<vmem>>, vector<64x64xf32>
    %211 = arith.truncf %210 : vector<64x64xf32> to vector<64x64xbf16>
    %c28 = arith.constant 28 : index
    %c0_171 = arith.constant 0 : index
    %c0_172 = arith.constant 0 : index
    %212 = vector.load %arg4[%c28, %c0_171, %c0_172] : memref<70x64x64xbf16, #tpu.memory_space<vmem>>, vector<1x64x64xbf16>
    %213 = vector.shape_cast %212 : vector<1x64x64xbf16> to vector<64x64xbf16>
    %cst_173 = arith.constant dense<0.000000e+00> : vector<64x64xf32>
    %214 = tpu.matmul %211, %213, %cst_173 {dimension_numbers = #tpu.dot_dimension_numbers<[1], [0], [0], [1], [0, 0, 1, 1], [], []>} : vector<64x64xbf16>, vector<64x64xbf16>, vector<64x64xf32> -> vector<64x64xf32>
    %215 = arith.addf %209, %214 : vector<64x64xf32>
    %c256_174 = arith.constant 256 : index
    %c0_175 = arith.constant 0 : index
    %216 = vector.load %arg9[%c256_174, %c0_175] : memref<320x64xf32, #tpu.memory_space<vmem>>, vector<64x64xf32>
    %217 = arith.truncf %216 : vector<64x64xf32> to vector<64x64xbf16>
    %c29 = arith.constant 29 : index
    %c0_176 = arith.constant 0 : index
    %c0_177 = arith.constant 0 : index
    %218 = vector.load %arg4[%c29, %c0_176, %c0_177] : memref<70x64x64xbf16, #tpu.memory_space<vmem>>, vector<1x64x64xbf16>
    %219 = vector.shape_cast %218 : vector<1x64x64xbf16> to vector<64x64xbf16>
    %cst_178 = arith.constant dense<0.000000e+00> : vector<64x64xf32>
    %220 = tpu.matmul %217, %219, %cst_178 {dimension_numbers = #tpu.dot_dimension_numbers<[1], [0], [0], [1], [0, 0, 1, 1], [], []>} : vector<64x64xbf16>, vector<64x64xbf16>, vector<64x64xf32> -> vector<64x64xf32>
    %221 = arith.addf %215, %220 : vector<64x64xf32>
    %c5_179 = arith.constant 5 : index
    %c0_180 = arith.constant 0 : index
    %222 = vector.load %arg5[%c5_179, %c0_180] : memref<14x64xf32, #tpu.memory_space<vmem>>, vector<1x64xf32>
    %223 = vector.broadcast %222 : vector<1x64xf32> to vector<64x64xf32>
    %224 = arith.addf %221, %223 : vector<64x64xf32>
    %cst_181 = arith.constant 0.000000e+00 : f32
    %225 = vector.broadcast %cst_181 : f32 to vector<64x64xf32>
    %226 = arith.maximumf %224, %225 : vector<64x64xf32>
    %227 = arith.addf %226, %156 : vector<64x64xf32>
    %cst_182 = arith.constant 0.000000e+00 : f32
    %228 = vector.broadcast %cst_182 : f32 to vector<64x64xf32>
    %229 = arith.maximumf %227, %228 : vector<64x64xf32>
    %c256_183 = arith.constant 256 : index
    %c0_184 = arith.constant 0 : index
    %230 = vector.load %arg9[%c256_183, %c0_184] : memref<320x64xf32, #tpu.memory_space<vmem>>, vector<64x64xf32>
    tpu.vector_store %arg9[%c256_183, %c0_184], %229 {strides = array<i32>} : memref<320x64xf32, #tpu.memory_space<vmem>>, vector<64x64xf32>,
    %c224 = arith.constant 224 : index
    %c0_185 = arith.constant 0 : index
    %231 = vector.load %arg9[%c224, %c0_185] : memref<320x64xf32, #tpu.memory_space<vmem>>, vector<64x64xf32>
    %232 = arith.truncf %231 : vector<64x64xf32> to vector<64x64xbf16>
    %c30 = arith.constant 30 : index
    %c0_186 = arith.constant 0 : index
    %c0_187 = arith.constant 0 : index
    %233 = vector.load %arg4[%c30, %c0_186, %c0_187] : memref<70x64x64xbf16, #tpu.memory_space<vmem>>, vector<1x64x64xbf16>
    %234 = vector.shape_cast %233 : vector<1x64x64xbf16> to vector<64x64xbf16>
    %cst_188 = arith.constant dense<0.000000e+00> : vector<64x64xf32>
    %235 = tpu.matmul %232, %234, %cst_188 {dimension_numbers = #tpu.dot_dimension_numbers<[1], [0], [0], [1], [0, 0, 1, 1], [], []>} : vector<64x64xbf16>, vector<64x64xbf16>, vector<64x64xf32> -> vector<64x64xf32>
    %c232 = arith.constant 232 : index
    %c0_189 = arith.constant 0 : index
    %236 = vector.load %arg9[%c232, %c0_189] : memref<320x64xf32, #tpu.memory_space<vmem>>, vector<64x64xf32>
    %237 = arith.truncf %236 : vector<64x64xf32> to vector<64x64xbf16>
    %c31 = arith.constant 31 : index
    %c0_190 = arith.constant 0 : index
    %c0_191 = arith.constant 0 : index
    %238 = vector.load %arg4[%c31, %c0_190, %c0_191] : memref<70x64x64xbf16, #tpu.memory_space<vmem>>, vector<1x64x64xbf16>
    %239 = vector.shape_cast %238 : vector<1x64x64xbf16> to vector<64x64xbf16>
    %cst_192 = arith.constant dense<0.000000e+00> : vector<64x64xf32>
    %240 = tpu.matmul %237, %239, %cst_192 {dimension_numbers = #tpu.dot_dimension_numbers<[1], [0], [0], [1], [0, 0, 1, 1], [], []>} : vector<64x64xbf16>, vector<64x64xbf16>, vector<64x64xf32> -> vector<64x64xf32>
    %241 = arith.addf %235, %240 : vector<64x64xf32>
    %c240_193 = arith.constant 240 : index
    %c0_194 = arith.constant 0 : index
    %242 = vector.load %arg9[%c240_193, %c0_194] : memref<320x64xf32, #tpu.memory_space<vmem>>, vector<64x64xf32>
    %243 = arith.truncf %242 : vector<64x64xf32> to vector<64x64xbf16>
    %c32 = arith.constant 32 : index
    %c0_195 = arith.constant 0 : index
    %c0_196 = arith.constant 0 : index
    %244 = vector.load %arg4[%c32, %c0_195, %c0_196] : memref<70x64x64xbf16, #tpu.memory_space<vmem>>, vector<1x64x64xbf16>
    %245 = vector.shape_cast %244 : vector<1x64x64xbf16> to vector<64x64xbf16>
    %cst_197 = arith.constant dense<0.000000e+00> : vector<64x64xf32>
    %246 = tpu.matmul %243, %245, %cst_197 {dimension_numbers = #tpu.dot_dimension_numbers<[1], [0], [0], [1], [0, 0, 1, 1], [], []>} : vector<64x64xbf16>, vector<64x64xbf16>, vector<64x64xf32> -> vector<64x64xf32>
    %247 = arith.addf %241, %246 : vector<64x64xf32>
    %c248_198 = arith.constant 248 : index
    %c0_199 = arith.constant 0 : index
    %248 = vector.load %arg9[%c248_198, %c0_199] : memref<320x64xf32, #tpu.memory_space<vmem>>, vector<64x64xf32>
    %249 = arith.truncf %248 : vector<64x64xf32> to vector<64x64xbf16>
    %c33 = arith.constant 33 : index
    %c0_200 = arith.constant 0 : index
    %c0_201 = arith.constant 0 : index
    %250 = vector.load %arg4[%c33, %c0_200, %c0_201] : memref<70x64x64xbf16, #tpu.memory_space<vmem>>, vector<1x64x64xbf16>
    %251 = vector.shape_cast %250 : vector<1x64x64xbf16> to vector<64x64xbf16>
    %cst_202 = arith.constant dense<0.000000e+00> : vector<64x64xf32>
    %252 = tpu.matmul %249, %251, %cst_202 {dimension_numbers = #tpu.dot_dimension_numbers<[1], [0], [0], [1], [0, 0, 1, 1], [], []>} : vector<64x64xbf16>, vector<64x64xbf16>, vector<64x64xf32> -> vector<64x64xf32>
    %253 = arith.addf %247, %252 : vector<64x64xf32>
    %c256_203 = arith.constant 256 : index
    %c0_204 = arith.constant 0 : index
    %254 = vector.load %arg9[%c256_203, %c0_204] : memref<320x64xf32, #tpu.memory_space<vmem>>, vector<64x64xf32>
    %255 = arith.truncf %254 : vector<64x64xf32> to vector<64x64xbf16>
    %c34 = arith.constant 34 : index
    %c0_205 = arith.constant 0 : index
    %c0_206 = arith.constant 0 : index
    %256 = vector.load %arg4[%c34, %c0_205, %c0_206] : memref<70x64x64xbf16, #tpu.memory_space<vmem>>, vector<1x64x64xbf16>
    %257 = vector.shape_cast %256 : vector<1x64x64xbf16> to vector<64x64xbf16>
    %cst_207 = arith.constant dense<0.000000e+00> : vector<64x64xf32>
    %258 = tpu.matmul %255, %257, %cst_207 {dimension_numbers = #tpu.dot_dimension_numbers<[1], [0], [0], [1], [0, 0, 1, 1], [], []>} : vector<64x64xbf16>, vector<64x64xbf16>, vector<64x64xf32> -> vector<64x64xf32>
    %259 = arith.addf %253, %258 : vector<64x64xf32>
    %c6_208 = arith.constant 6 : index
    %c0_209 = arith.constant 0 : index
    %260 = vector.load %arg5[%c6_208, %c0_209] : memref<14x64xf32, #tpu.memory_space<vmem>>, vector<1x64xf32>
    %261 = vector.broadcast %260 : vector<1x64xf32> to vector<64x64xf32>
    %262 = arith.addf %259, %261 : vector<64x64xf32>
    %cst_210 = arith.constant 0.000000e+00 : f32
    %263 = vector.broadcast %cst_210 : f32 to vector<64x64xf32>
    %264 = arith.maximumf %262, %263 : vector<64x64xf32>
    %c256_211 = arith.constant 256 : index
    %c0_212 = arith.constant 0 : index
    %265 = vector.load %arg9[%c256_211, %c0_212] : memref<320x64xf32, #tpu.memory_space<vmem>>, vector<64x64xf32>
    tpu.vector_store %arg9[%c256_211, %c0_212], %264 {strides = array<i32>} : memref<320x64xf32, #tpu.memory_space<vmem>>, vector<64x64xf32>,
    %c224_213 = arith.constant 224 : index
    %c0_214 = arith.constant 0 : index
    %266 = vector.load %arg9[%c224_213, %c0_214] : memref<320x64xf32, #tpu.memory_space<vmem>>, vector<64x64xf32>
    %267 = arith.truncf %266 : vector<64x64xf32> to vector<64x64xbf16>
    %c35 = arith.constant 35 : index
    %c0_215 = arith.constant 0 : index
    %c0_216 = arith.constant 0 : index
    %268 = vector.load %arg4[%c35, %c0_215, %c0_216] : memref<70x64x64xbf16, #tpu.memory_space<vmem>>, vector<1x64x64xbf16>
    %269 = vector.shape_cast %268 : vector<1x64x64xbf16> to vector<64x64xbf16>
    %cst_217 = arith.constant dense<0.000000e+00> : vector<64x64xf32>
    %270 = tpu.matmul %267, %269, %cst_217 {dimension_numbers = #tpu.dot_dimension_numbers<[1], [0], [0], [1], [0, 0, 1, 1], [], []>} : vector<64x64xbf16>, vector<64x64xbf16>, vector<64x64xf32> -> vector<64x64xf32>
    %c232_218 = arith.constant 232 : index
    %c0_219 = arith.constant 0 : index
    %271 = vector.load %arg9[%c232_218, %c0_219] : memref<320x64xf32, #tpu.memory_space<vmem>>, vector<64x64xf32>
    %272 = arith.truncf %271 : vector<64x64xf32> to vector<64x64xbf16>
    %c36 = arith.constant 36 : index
    %c0_220 = arith.constant 0 : index
    %c0_221 = arith.constant 0 : index
    %273 = vector.load %arg4[%c36, %c0_220, %c0_221] : memref<70x64x64xbf16, #tpu.memory_space<vmem>>, vector<1x64x64xbf16>
    %274 = vector.shape_cast %273 : vector<1x64x64xbf16> to vector<64x64xbf16>
    %cst_222 = arith.constant dense<0.000000e+00> : vector<64x64xf32>
    %275 = tpu.matmul %272, %274, %cst_222 {dimension_numbers = #tpu.dot_dimension_numbers<[1], [0], [0], [1], [0, 0, 1, 1], [], []>} : vector<64x64xbf16>, vector<64x64xbf16>, vector<64x64xf32> -> vector<64x64xf32>
    %276 = arith.addf %270, %275 : vector<64x64xf32>
    %c240_223 = arith.constant 240 : index
    %c0_224 = arith.constant 0 : index
    %277 = vector.load %arg9[%c240_223, %c0_224] : memref<320x64xf32, #tpu.memory_space<vmem>>, vector<64x64xf32>
    %278 = arith.truncf %277 : vector<64x64xf32> to vector<64x64xbf16>
    %c37 = arith.constant 37 : index
    %c0_225 = arith.constant 0 : index
    %c0_226 = arith.constant 0 : index
    %279 = vector.load %arg4[%c37, %c0_225, %c0_226] : memref<70x64x64xbf16, #tpu.memory_space<vmem>>, vector<1x64x64xbf16>
    %280 = vector.shape_cast %279 : vector<1x64x64xbf16> to vector<64x64xbf16>
    %cst_227 = arith.constant dense<0.000000e+00> : vector<64x64xf32>
    %281 = tpu.matmul %278, %280, %cst_227 {dimension_numbers = #tpu.dot_dimension_numbers<[1], [0], [0], [1], [0, 0, 1, 1], [], []>} : vector<64x64xbf16>, vector<64x64xbf16>, vector<64x64xf32> -> vector<64x64xf32>
    %282 = arith.addf %276, %281 : vector<64x64xf32>
    %c248_228 = arith.constant 248 : index
    %c0_229 = arith.constant 0 : index
    %283 = vector.load %arg9[%c248_228, %c0_229] : memref<320x64xf32, #tpu.memory_space<vmem>>, vector<64x64xf32>
    %284 = arith.truncf %283 : vector<64x64xf32> to vector<64x64xbf16>
    %c38 = arith.constant 38 : index
    %c0_230 = arith.constant 0 : index
    %c0_231 = arith.constant 0 : index
    %285 = vector.load %arg4[%c38, %c0_230, %c0_231] : memref<70x64x64xbf16, #tpu.memory_space<vmem>>, vector<1x64x64xbf16>
    %286 = vector.shape_cast %285 : vector<1x64x64xbf16> to vector<64x64xbf16>
    %cst_232 = arith.constant dense<0.000000e+00> : vector<64x64xf32>
    %287 = tpu.matmul %284, %286, %cst_232 {dimension_numbers = #tpu.dot_dimension_numbers<[1], [0], [0], [1], [0, 0, 1, 1], [], []>} : vector<64x64xbf16>, vector<64x64xbf16>, vector<64x64xf32> -> vector<64x64xf32>
    %288 = arith.addf %282, %287 : vector<64x64xf32>
    %c256_233 = arith.constant 256 : index
    %c0_234 = arith.constant 0 : index
    %289 = vector.load %arg9[%c256_233, %c0_234] : memref<320x64xf32, #tpu.memory_space<vmem>>, vector<64x64xf32>
    %290 = arith.truncf %289 : vector<64x64xf32> to vector<64x64xbf16>
    %c39 = arith.constant 39 : index
    %c0_235 = arith.constant 0 : index
    %c0_236 = arith.constant 0 : index
    %291 = vector.load %arg4[%c39, %c0_235, %c0_236] : memref<70x64x64xbf16, #tpu.memory_space<vmem>>, vector<1x64x64xbf16>
    %292 = vector.shape_cast %291 : vector<1x64x64xbf16> to vector<64x64xbf16>
    %cst_237 = arith.constant dense<0.000000e+00> : vector<64x64xf32>
    %293 = tpu.matmul %290, %292, %cst_237 {dimension_numbers = #tpu.dot_dimension_numbers<[1], [0], [0], [1], [0, 0, 1, 1], [], []>} : vector<64x64xbf16>, vector<64x64xbf16>, vector<64x64xf32> -> vector<64x64xf32>
    %294 = arith.addf %288, %293 : vector<64x64xf32>
    %c7_238 = arith.constant 7 : index
    %c0_239 = arith.constant 0 : index
    %295 = vector.load %arg5[%c7_238, %c0_239] : memref<14x64xf32, #tpu.memory_space<vmem>>, vector<1x64xf32>
    %296 = vector.broadcast %295 : vector<1x64xf32> to vector<64x64xf32>
    %297 = arith.addf %294, %296 : vector<64x64xf32>
    %cst_240 = arith.constant 0.000000e+00 : f32
    %298 = vector.broadcast %cst_240 : f32 to vector<64x64xf32>
    %299 = arith.maximumf %297, %298 : vector<64x64xf32>
    %300 = arith.addf %299, %229 : vector<64x64xf32>
    %cst_241 = arith.constant 0.000000e+00 : f32
    %301 = vector.broadcast %cst_241 : f32 to vector<64x64xf32>
    %302 = arith.maximumf %300, %301 : vector<64x64xf32>
    %c256_242 = arith.constant 256 : index
    %c0_243 = arith.constant 0 : index
    %303 = vector.load %arg9[%c256_242, %c0_243] : memref<320x64xf32, #tpu.memory_space<vmem>>, vector<64x64xf32>
    tpu.vector_store %arg9[%c256_242, %c0_243], %302 {strides = array<i32>} : memref<320x64xf32, #tpu.memory_space<vmem>>, vector<64x64xf32>,
    %c192 = arith.constant 192 : index
    %c0_244 = arith.constant 0 : index
    %304 = vector.load %arg9[%c192, %c0_244] : memref<320x64xf32, #tpu.memory_space<vmem>>, vector<64x64xf32>
    %305 = arith.truncf %304 : vector<64x64xf32> to vector<64x64xbf16>
    %c40 = arith.constant 40 : index
    %c0_245 = arith.constant 0 : index
    %c0_246 = arith.constant 0 : index
    %306 = vector.load %arg4[%c40, %c0_245, %c0_246] : memref<70x64x64xbf16, #tpu.memory_space<vmem>>, vector<1x64x64xbf16>
    %307 = vector.shape_cast %306 : vector<1x64x64xbf16> to vector<64x64xbf16>
    %cst_247 = arith.constant dense<0.000000e+00> : vector<64x64xf32>
    %308 = tpu.matmul %305, %307, %cst_247 {dimension_numbers = #tpu.dot_dimension_numbers<[1], [0], [0], [1], [0, 0, 1, 1], [], []>} : vector<64x64xbf16>, vector<64x64xbf16>, vector<64x64xf32> -> vector<64x64xf32>
    %c208 = arith.constant 208 : index
    %c0_248 = arith.constant 0 : index
    %309 = vector.load %arg9[%c208, %c0_248] : memref<320x64xf32, #tpu.memory_space<vmem>>, vector<64x64xf32>
    %310 = arith.truncf %309 : vector<64x64xf32> to vector<64x64xbf16>
    %c41 = arith.constant 41 : index
    %c0_249 = arith.constant 0 : index
    %c0_250 = arith.constant 0 : index
    %311 = vector.load %arg4[%c41, %c0_249, %c0_250] : memref<70x64x64xbf16, #tpu.memory_space<vmem>>, vector<1x64x64xbf16>
    %312 = vector.shape_cast %311 : vector<1x64x64xbf16> to vector<64x64xbf16>
    %cst_251 = arith.constant dense<0.000000e+00> : vector<64x64xf32>
    %313 = tpu.matmul %310, %312, %cst_251 {dimension_numbers = #tpu.dot_dimension_numbers<[1], [0], [0], [1], [0, 0, 1, 1], [], []>} : vector<64x64xbf16>, vector<64x64xbf16>, vector<64x64xf32> -> vector<64x64xf32>
    %314 = arith.addf %308, %313 : vector<64x64xf32>
    %c224_252 = arith.constant 224 : index
    %c0_253 = arith.constant 0 : index
    %315 = vector.load %arg9[%c224_252, %c0_253] : memref<320x64xf32, #tpu.memory_space<vmem>>, vector<64x64xf32>
    %316 = arith.truncf %315 : vector<64x64xf32> to vector<64x64xbf16>
    %c42 = arith.constant 42 : index
    %c0_254 = arith.constant 0 : index
    %c0_255 = arith.constant 0 : index
    %317 = vector.load %arg4[%c42, %c0_254, %c0_255] : memref<70x64x64xbf16, #tpu.memory_space<vmem>>, vector<1x64x64xbf16>
    %318 = vector.shape_cast %317 : vector<1x64x64xbf16> to vector<64x64xbf16>
    %cst_256 = arith.constant dense<0.000000e+00> : vector<64x64xf32>
    %319 = tpu.matmul %316, %318, %cst_256 {dimension_numbers = #tpu.dot_dimension_numbers<[1], [0], [0], [1], [0, 0, 1, 1], [], []>} : vector<64x64xbf16>, vector<64x64xbf16>, vector<64x64xf32> -> vector<64x64xf32>
    %320 = arith.addf %314, %319 : vector<64x64xf32>
    %c240_257 = arith.constant 240 : index
    %c0_258 = arith.constant 0 : index
    %321 = vector.load %arg9[%c240_257, %c0_258] : memref<320x64xf32, #tpu.memory_space<vmem>>, vector<64x64xf32>
    %322 = arith.truncf %321 : vector<64x64xf32> to vector<64x64xbf16>
    %c43 = arith.constant 43 : index
    %c0_259 = arith.constant 0 : index
    %c0_260 = arith.constant 0 : index
    %323 = vector.load %arg4[%c43, %c0_259, %c0_260] : memref<70x64x64xbf16, #tpu.memory_space<vmem>>, vector<1x64x64xbf16>
    %324 = vector.shape_cast %323 : vector<1x64x64xbf16> to vector<64x64xbf16>
    %cst_261 = arith.constant dense<0.000000e+00> : vector<64x64xf32>
    %325 = tpu.matmul %322, %324, %cst_261 {dimension_numbers = #tpu.dot_dimension_numbers<[1], [0], [0], [1], [0, 0, 1, 1], [], []>} : vector<64x64xbf16>, vector<64x64xbf16>, vector<64x64xf32> -> vector<64x64xf32>
    %326 = arith.addf %320, %325 : vector<64x64xf32>
    %c256_262 = arith.constant 256 : index
    %c0_263 = arith.constant 0 : index
    %327 = vector.load %arg9[%c256_262, %c0_263] : memref<320x64xf32, #tpu.memory_space<vmem>>, vector<64x64xf32>
    %328 = arith.truncf %327 : vector<64x64xf32> to vector<64x64xbf16>
    %c44 = arith.constant 44 : index
    %c0_264 = arith.constant 0 : index
    %c0_265 = arith.constant 0 : index
    %329 = vector.load %arg4[%c44, %c0_264, %c0_265] : memref<70x64x64xbf16, #tpu.memory_space<vmem>>, vector<1x64x64xbf16>
    %330 = vector.shape_cast %329 : vector<1x64x64xbf16> to vector<64x64xbf16>
    %cst_266 = arith.constant dense<0.000000e+00> : vector<64x64xf32>
    %331 = tpu.matmul %328, %330, %cst_266 {dimension_numbers = #tpu.dot_dimension_numbers<[1], [0], [0], [1], [0, 0, 1, 1], [], []>} : vector<64x64xbf16>, vector<64x64xbf16>, vector<64x64xf32> -> vector<64x64xf32>
    %332 = arith.addf %326, %331 : vector<64x64xf32>
    %c8_267 = arith.constant 8 : index
    %c0_268 = arith.constant 0 : index
    %333 = vector.load %arg5[%c8_267, %c0_268] : memref<14x64xf32, #tpu.memory_space<vmem>>, vector<1x64xf32>
    %334 = vector.broadcast %333 : vector<1x64xf32> to vector<64x64xf32>
    %335 = arith.addf %332, %334 : vector<64x64xf32>
    %cst_269 = arith.constant 0.000000e+00 : f32
    %336 = vector.broadcast %cst_269 : f32 to vector<64x64xf32>
    %337 = arith.maximumf %335, %336 : vector<64x64xf32>
    %c256_270 = arith.constant 256 : index
    %c0_271 = arith.constant 0 : index
    %338 = vector.load %arg9[%c256_270, %c0_271] : memref<320x64xf32, #tpu.memory_space<vmem>>, vector<64x64xf32>
    tpu.vector_store %arg9[%c256_270, %c0_271], %337 {strides = array<i32>} : memref<320x64xf32, #tpu.memory_space<vmem>>, vector<64x64xf32>,
    %c192_272 = arith.constant 192 : index
    %c0_273 = arith.constant 0 : index
    %339 = vector.load %arg9[%c192_272, %c0_273] : memref<320x64xf32, #tpu.memory_space<vmem>>, vector<64x64xf32>
    %340 = arith.truncf %339 : vector<64x64xf32> to vector<64x64xbf16>
    %c45 = arith.constant 45 : index
    %c0_274 = arith.constant 0 : index
    %c0_275 = arith.constant 0 : index
    %341 = vector.load %arg4[%c45, %c0_274, %c0_275] : memref<70x64x64xbf16, #tpu.memory_space<vmem>>, vector<1x64x64xbf16>
    %342 = vector.shape_cast %341 : vector<1x64x64xbf16> to vector<64x64xbf16>
    %cst_276 = arith.constant dense<0.000000e+00> : vector<64x64xf32>
    %343 = tpu.matmul %340, %342, %cst_276 {dimension_numbers = #tpu.dot_dimension_numbers<[1], [0], [0], [1], [0, 0, 1, 1], [], []>} : vector<64x64xbf16>, vector<64x64xbf16>, vector<64x64xf32> -> vector<64x64xf32>
    %c208_277 = arith.constant 208 : index
    %c0_278 = arith.constant 0 : index
    %344 = vector.load %arg9[%c208_277, %c0_278] : memref<320x64xf32, #tpu.memory_space<vmem>>, vector<64x64xf32>
    %345 = arith.truncf %344 : vector<64x64xf32> to vector<64x64xbf16>
    %c46 = arith.constant 46 : index
    %c0_279 = arith.constant 0 : index
    %c0_280 = arith.constant 0 : index
    %346 = vector.load %arg4[%c46, %c0_279, %c0_280] : memref<70x64x64xbf16, #tpu.memory_space<vmem>>, vector<1x64x64xbf16>
    %347 = vector.shape_cast %346 : vector<1x64x64xbf16> to vector<64x64xbf16>
    %cst_281 = arith.constant dense<0.000000e+00> : vector<64x64xf32>
    %348 = tpu.matmul %345, %347, %cst_281 {dimension_numbers = #tpu.dot_dimension_numbers<[1], [0], [0], [1], [0, 0, 1, 1], [], []>} : vector<64x64xbf16>, vector<64x64xbf16>, vector<64x64xf32> -> vector<64x64xf32>
    %349 = arith.addf %343, %348 : vector<64x64xf32>
    %c224_282 = arith.constant 224 : index
    %c0_283 = arith.constant 0 : index
    %350 = vector.load %arg9[%c224_282, %c0_283] : memref<320x64xf32, #tpu.memory_space<vmem>>, vector<64x64xf32>
    %351 = arith.truncf %350 : vector<64x64xf32> to vector<64x64xbf16>
    %c47 = arith.constant 47 : index
    %c0_284 = arith.constant 0 : index
    %c0_285 = arith.constant 0 : index
    %352 = vector.load %arg4[%c47, %c0_284, %c0_285] : memref<70x64x64xbf16, #tpu.memory_space<vmem>>, vector<1x64x64xbf16>
    %353 = vector.shape_cast %352 : vector<1x64x64xbf16> to vector<64x64xbf16>
    %cst_286 = arith.constant dense<0.000000e+00> : vector<64x64xf32>
    %354 = tpu.matmul %351, %353, %cst_286 {dimension_numbers = #tpu.dot_dimension_numbers<[1], [0], [0], [1], [0, 0, 1, 1], [], []>} : vector<64x64xbf16>, vector<64x64xbf16>, vector<64x64xf32> -> vector<64x64xf32>
    %355 = arith.addf %349, %354 : vector<64x64xf32>
    %c240_287 = arith.constant 240 : index
    %c0_288 = arith.constant 0 : index
    %356 = vector.load %arg9[%c240_287, %c0_288] : memref<320x64xf32, #tpu.memory_space<vmem>>, vector<64x64xf32>
    %357 = arith.truncf %356 : vector<64x64xf32> to vector<64x64xbf16>
    %c48 = arith.constant 48 : index
    %c0_289 = arith.constant 0 : index
    %c0_290 = arith.constant 0 : index
    %358 = vector.load %arg4[%c48, %c0_289, %c0_290] : memref<70x64x64xbf16, #tpu.memory_space<vmem>>, vector<1x64x64xbf16>
    %359 = vector.shape_cast %358 : vector<1x64x64xbf16> to vector<64x64xbf16>
    %cst_291 = arith.constant dense<0.000000e+00> : vector<64x64xf32>
    %360 = tpu.matmul %357, %359, %cst_291 {dimension_numbers = #tpu.dot_dimension_numbers<[1], [0], [0], [1], [0, 0, 1, 1], [], []>} : vector<64x64xbf16>, vector<64x64xbf16>, vector<64x64xf32> -> vector<64x64xf32>
    %361 = arith.addf %355, %360 : vector<64x64xf32>
    %c256_292 = arith.constant 256 : index
    %c0_293 = arith.constant 0 : index
    %362 = vector.load %arg9[%c256_292, %c0_293] : memref<320x64xf32, #tpu.memory_space<vmem>>, vector<64x64xf32>
    %363 = arith.truncf %362 : vector<64x64xf32> to vector<64x64xbf16>
    %c49 = arith.constant 49 : index
    %c0_294 = arith.constant 0 : index
    %c0_295 = arith.constant 0 : index
    %364 = vector.load %arg4[%c49, %c0_294, %c0_295] : memref<70x64x64xbf16, #tpu.memory_space<vmem>>, vector<1x64x64xbf16>
    %365 = vector.shape_cast %364 : vector<1x64x64xbf16> to vector<64x64xbf16>
    %cst_296 = arith.constant dense<0.000000e+00> : vector<64x64xf32>
    %366 = tpu.matmul %363, %365, %cst_296 {dimension_numbers = #tpu.dot_dimension_numbers<[1], [0], [0], [1], [0, 0, 1, 1], [], []>} : vector<64x64xbf16>, vector<64x64xbf16>, vector<64x64xf32> -> vector<64x64xf32>
    %367 = arith.addf %361, %366 : vector<64x64xf32>
    %c9_297 = arith.constant 9 : index
    %c0_298 = arith.constant 0 : index
    %368 = vector.load %arg5[%c9_297, %c0_298] : memref<14x64xf32, #tpu.memory_space<vmem>>, vector<1x64xf32>
    %369 = vector.broadcast %368 : vector<1x64xf32> to vector<64x64xf32>
    %370 = arith.addf %367, %369 : vector<64x64xf32>
    %cst_299 = arith.constant 0.000000e+00 : f32
    %371 = vector.broadcast %cst_299 : f32 to vector<64x64xf32>
    %372 = arith.maximumf %370, %371 : vector<64x64xf32>
    %373 = arith.addf %372, %302 : vector<64x64xf32>
    %cst_300 = arith.constant 0.000000e+00 : f32
    %374 = vector.broadcast %cst_300 : f32 to vector<64x64xf32>
    %375 = arith.maximumf %373, %374 : vector<64x64xf32>
    %c256_301 = arith.constant 256 : index
    %c0_302 = arith.constant 0 : index
    %376 = vector.load %arg9[%c256_301, %c0_302] : memref<320x64xf32, #tpu.memory_space<vmem>>, vector<64x64xf32>
    tpu.vector_store %arg9[%c256_301, %c0_302], %375 {strides = array<i32>} : memref<320x64xf32, #tpu.memory_space<vmem>>, vector<64x64xf32>,
    %c128 = arith.constant 128 : index
    %c0_303 = arith.constant 0 : index
    %377 = vector.load %arg9[%c128, %c0_303] : memref<320x64xf32, #tpu.memory_space<vmem>>, vector<64x64xf32>
    %378 = arith.truncf %377 : vector<64x64xf32> to vector<64x64xbf16>
    %c50 = arith.constant 50 : index
    %c0_304 = arith.constant 0 : index
    %c0_305 = arith.constant 0 : index
    %379 = vector.load %arg4[%c50, %c0_304, %c0_305] : memref<70x64x64xbf16, #tpu.memory_space<vmem>>, vector<1x64x64xbf16>
    %380 = vector.shape_cast %379 : vector<1x64x64xbf16> to vector<64x64xbf16>
    %cst_306 = arith.constant dense<0.000000e+00> : vector<64x64xf32>
    %381 = tpu.matmul %378, %380, %cst_306 {dimension_numbers = #tpu.dot_dimension_numbers<[1], [0], [0], [1], [0, 0, 1, 1], [], []>} : vector<64x64xbf16>, vector<64x64xbf16>, vector<64x64xf32> -> vector<64x64xf32>
    %c160 = arith.constant 160 : index
    %c0_307 = arith.constant 0 : index
    %382 = vector.load %arg9[%c160, %c0_307] : memref<320x64xf32, #tpu.memory_space<vmem>>, vector<64x64xf32>
    %383 = arith.truncf %382 : vector<64x64xf32> to vector<64x64xbf16>
    %c51 = arith.constant 51 : index
    %c0_308 = arith.constant 0 : index
    %c0_309 = arith.constant 0 : index
    %384 = vector.load %arg4[%c51, %c0_308, %c0_309] : memref<70x64x64xbf16, #tpu.memory_space<vmem>>, vector<1x64x64xbf16>
    %385 = vector.shape_cast %384 : vector<1x64x64xbf16> to vector<64x64xbf16>
    %cst_310 = arith.constant dense<0.000000e+00> : vector<64x64xf32>
    %386 = tpu.matmul %383, %385, %cst_310 {dimension_numbers = #tpu.dot_dimension_numbers<[1], [0], [0], [1], [0, 0, 1, 1], [], []>} : vector<64x64xbf16>, vector<64x64xbf16>, vector<64x64xf32> -> vector<64x64xf32>
    %387 = arith.addf %381, %386 : vector<64x64xf32>
    %c192_311 = arith.constant 192 : index
    %c0_312 = arith.constant 0 : index
    %388 = vector.load %arg9[%c192_311, %c0_312] : memref<320x64xf32, #tpu.memory_space<vmem>>, vector<64x64xf32>
    %389 = arith.truncf %388 : vector<64x64xf32> to vector<64x64xbf16>
    %c52 = arith.constant 52 : index
    %c0_313 = arith.constant 0 : index
    %c0_314 = arith.constant 0 : index
    %390 = vector.load %arg4[%c52, %c0_313, %c0_314] : memref<70x64x64xbf16, #tpu.memory_space<vmem>>, vector<1x64x64xbf16>
    %391 = vector.shape_cast %390 : vector<1x64x64xbf16> to vector<64x64xbf16>
    %cst_315 = arith.constant dense<0.000000e+00> : vector<64x64xf32>
    %392 = tpu.matmul %389, %391, %cst_315 {dimension_numbers = #tpu.dot_dimension_numbers<[1], [0], [0], [1], [0, 0, 1, 1], [], []>} : vector<64x64xbf16>, vector<64x64xbf16>, vector<64x64xf32> -> vector<64x64xf32>
    %393 = arith.addf %387, %392 : vector<64x64xf32>
    %c224_316 = arith.constant 224 : index
    %c0_317 = arith.constant 0 : index
    %394 = vector.load %arg9[%c224_316, %c0_317] : memref<320x64xf32, #tpu.memory_space<vmem>>, vector<64x64xf32>
    %395 = arith.truncf %394 : vector<64x64xf32> to vector<64x64xbf16>
    %c53 = arith.constant 53 : index
    %c0_318 = arith.constant 0 : index
    %c0_319 = arith.constant 0 : index
    %396 = vector.load %arg4[%c53, %c0_318, %c0_319] : memref<70x64x64xbf16, #tpu.memory_space<vmem>>, vector<1x64x64xbf16>
    %397 = vector.shape_cast %396 : vector<1x64x64xbf16> to vector<64x64xbf16>
    %cst_320 = arith.constant dense<0.000000e+00> : vector<64x64xf32>
    %398 = tpu.matmul %395, %397, %cst_320 {dimension_numbers = #tpu.dot_dimension_numbers<[1], [0], [0], [1], [0, 0, 1, 1], [], []>} : vector<64x64xbf16>, vector<64x64xbf16>, vector<64x64xf32> -> vector<64x64xf32>
    %399 = arith.addf %393, %398 : vector<64x64xf32>
    %c256_321 = arith.constant 256 : index
    %c0_322 = arith.constant 0 : index
    %400 = vector.load %arg9[%c256_321, %c0_322] : memref<320x64xf32, #tpu.memory_space<vmem>>, vector<64x64xf32>
    %401 = arith.truncf %400 : vector<64x64xf32> to vector<64x64xbf16>
    %c54 = arith.constant 54 : index
    %c0_323 = arith.constant 0 : index
    %c0_324 = arith.constant 0 : index
    %402 = vector.load %arg4[%c54, %c0_323, %c0_324] : memref<70x64x64xbf16, #tpu.memory_space<vmem>>, vector<1x64x64xbf16>
    %403 = vector.shape_cast %402 : vector<1x64x64xbf16> to vector<64x64xbf16>
    %cst_325 = arith.constant dense<0.000000e+00> : vector<64x64xf32>
    %404 = tpu.matmul %401, %403, %cst_325 {dimension_numbers = #tpu.dot_dimension_numbers<[1], [0], [0], [1], [0, 0, 1, 1], [], []>} : vector<64x64xbf16>, vector<64x64xbf16>, vector<64x64xf32> -> vector<64x64xf32>
    %405 = arith.addf %399, %404 : vector<64x64xf32>
    %c10_326 = arith.constant 10 : index
    %c0_327 = arith.constant 0 : index
    %406 = vector.load %arg5[%c10_326, %c0_327] : memref<14x64xf32, #tpu.memory_space<vmem>>, vector<1x64xf32>
    %407 = vector.broadcast %406 : vector<1x64xf32> to vector<64x64xf32>
    %408 = arith.addf %405, %407 : vector<64x64xf32>
    %cst_328 = arith.constant 0.000000e+00 : f32
    %409 = vector.broadcast %cst_328 : f32 to vector<64x64xf32>
    %410 = arith.maximumf %408, %409 : vector<64x64xf32>
    %c256_329 = arith.constant 256 : index
    %c0_330 = arith.constant 0 : index
    %411 = vector.load %arg9[%c256_329, %c0_330] : memref<320x64xf32, #tpu.memory_space<vmem>>, vector<64x64xf32>
    tpu.vector_store %arg9[%c256_329, %c0_330], %410 {strides = array<i32>} : memref<320x64xf32, #tpu.memory_space<vmem>>, vector<64x64xf32>,
    %c128_331 = arith.constant 128 : index
    %c0_332 = arith.constant 0 : index
    %412 = vector.load %arg9[%c128_331, %c0_332] : memref<320x64xf32, #tpu.memory_space<vmem>>, vector<64x64xf32>
    %413 = arith.truncf %412 : vector<64x64xf32> to vector<64x64xbf16>
    %c55 = arith.constant 55 : index
    %c0_333 = arith.constant 0 : index
    %c0_334 = arith.constant 0 : index
    %414 = vector.load %arg4[%c55, %c0_333, %c0_334] : memref<70x64x64xbf16, #tpu.memory_space<vmem>>, vector<1x64x64xbf16>
    %415 = vector.shape_cast %414 : vector<1x64x64xbf16> to vector<64x64xbf16>
    %cst_335 = arith.constant dense<0.000000e+00> : vector<64x64xf32>
    %416 = tpu.matmul %413, %415, %cst_335 {dimension_numbers = #tpu.dot_dimension_numbers<[1], [0], [0], [1], [0, 0, 1, 1], [], []>} : vector<64x64xbf16>, vector<64x64xbf16>, vector<64x64xf32> -> vector<64x64xf32>
    %c160_336 = arith.constant 160 : index
    %c0_337 = arith.constant 0 : index
    %417 = vector.load %arg9[%c160_336, %c0_337] : memref<320x64xf32, #tpu.memory_space<vmem>>, vector<64x64xf32>
    %418 = arith.truncf %417 : vector<64x64xf32> to vector<64x64xbf16>
    %c56 = arith.constant 56 : index
    %c0_338 = arith.constant 0 : index
    %c0_339 = arith.constant 0 : index
    %419 = vector.load %arg4[%c56, %c0_338, %c0_339] : memref<70x64x64xbf16, #tpu.memory_space<vmem>>, vector<1x64x64xbf16>
    %420 = vector.shape_cast %419 : vector<1x64x64xbf16> to vector<64x64xbf16>
    %cst_340 = arith.constant dense<0.000000e+00> : vector<64x64xf32>
    %421 = tpu.matmul %418, %420, %cst_340 {dimension_numbers = #tpu.dot_dimension_numbers<[1], [0], [0], [1], [0, 0, 1, 1], [], []>} : vector<64x64xbf16>, vector<64x64xbf16>, vector<64x64xf32> -> vector<64x64xf32>
    %422 = arith.addf %416, %421 : vector<64x64xf32>
    %c192_341 = arith.constant 192 : index
    %c0_342 = arith.constant 0 : index
    %423 = vector.load %arg9[%c192_341, %c0_342] : memref<320x64xf32, #tpu.memory_space<vmem>>, vector<64x64xf32>
    %424 = arith.truncf %423 : vector<64x64xf32> to vector<64x64xbf16>
    %c57 = arith.constant 57 : index
    %c0_343 = arith.constant 0 : index
    %c0_344 = arith.constant 0 : index
    %425 = vector.load %arg4[%c57, %c0_343, %c0_344] : memref<70x64x64xbf16, #tpu.memory_space<vmem>>, vector<1x64x64xbf16>
    %426 = vector.shape_cast %425 : vector<1x64x64xbf16> to vector<64x64xbf16>
    %cst_345 = arith.constant dense<0.000000e+00> : vector<64x64xf32>
    %427 = tpu.matmul %424, %426, %cst_345 {dimension_numbers = #tpu.dot_dimension_numbers<[1], [0], [0], [1], [0, 0, 1, 1], [], []>} : vector<64x64xbf16>, vector<64x64xbf16>, vector<64x64xf32> -> vector<64x64xf32>
    %428 = arith.addf %422, %427 : vector<64x64xf32>
    %c224_346 = arith.constant 224 : index
    %c0_347 = arith.constant 0 : index
    %429 = vector.load %arg9[%c224_346, %c0_347] : memref<320x64xf32, #tpu.memory_space<vmem>>, vector<64x64xf32>
    %430 = arith.truncf %429 : vector<64x64xf32> to vector<64x64xbf16>
    %c58 = arith.constant 58 : index
    %c0_348 = arith.constant 0 : index
    %c0_349 = arith.constant 0 : index
    %431 = vector.load %arg4[%c58, %c0_348, %c0_349] : memref<70x64x64xbf16, #tpu.memory_space<vmem>>, vector<1x64x64xbf16>
    %432 = vector.shape_cast %431 : vector<1x64x64xbf16> to vector<64x64xbf16>
    %cst_350 = arith.constant dense<0.000000e+00> : vector<64x64xf32>
    %433 = tpu.matmul %430, %432, %cst_350 {dimension_numbers = #tpu.dot_dimension_numbers<[1], [0], [0], [1], [0, 0, 1, 1], [], []>} : vector<64x64xbf16>, vector<64x64xbf16>, vector<64x64xf32> -> vector<64x64xf32>
    %434 = arith.addf %428, %433 : vector<64x64xf32>
    %c256_351 = arith.constant 256 : index
    %c0_352 = arith.constant 0 : index
    %435 = vector.load %arg9[%c256_351, %c0_352] : memref<320x64xf32, #tpu.memory_space<vmem>>, vector<64x64xf32>
    %436 = arith.truncf %435 : vector<64x64xf32> to vector<64x64xbf16>
    %c59 = arith.constant 59 : index
    %c0_353 = arith.constant 0 : index
    %c0_354 = arith.constant 0 : index
    %437 = vector.load %arg4[%c59, %c0_353, %c0_354] : memref<70x64x64xbf16, #tpu.memory_space<vmem>>, vector<1x64x64xbf16>
    %438 = vector.shape_cast %437 : vector<1x64x64xbf16> to vector<64x64xbf16>
    %cst_355 = arith.constant dense<0.000000e+00> : vector<64x64xf32>
    %439 = tpu.matmul %436, %438, %cst_355 {dimension_numbers = #tpu.dot_dimension_numbers<[1], [0], [0], [1], [0, 0, 1, 1], [], []>} : vector<64x64xbf16>, vector<64x64xbf16>, vector<64x64xf32> -> vector<64x64xf32>
    %440 = arith.addf %434, %439 : vector<64x64xf32>
    %c11_356 = arith.constant 11 : index
    %c0_357 = arith.constant 0 : index
    %441 = vector.load %arg5[%c11_356, %c0_357] : memref<14x64xf32, #tpu.memory_space<vmem>>, vector<1x64xf32>
    %442 = vector.broadcast %441 : vector<1x64xf32> to vector<64x64xf32>
    %443 = arith.addf %440, %442 : vector<64x64xf32>
    %cst_358 = arith.constant 0.000000e+00 : f32
    %444 = vector.broadcast %cst_358 : f32 to vector<64x64xf32>
    %445 = arith.maximumf %443, %444 : vector<64x64xf32>
    %446 = arith.addf %445, %375 : vector<64x64xf32>
    %cst_359 = arith.constant 0.000000e+00 : f32
    %447 = vector.broadcast %cst_359 : f32 to vector<64x64xf32>
    %448 = arith.maximumf %446, %447 : vector<64x64xf32>
    %c256_360 = arith.constant 256 : index
    %c0_361 = arith.constant 0 : index
    %449 = vector.load %arg9[%c256_360, %c0_361] : memref<320x64xf32, #tpu.memory_space<vmem>>, vector<64x64xf32>
    tpu.vector_store %arg9[%c256_360, %c0_361], %448 {strides = array<i32>} : memref<320x64xf32, #tpu.memory_space<vmem>>, vector<64x64xf32>,
    %c0_362 = arith.constant 0 : index
    %c0_363 = arith.constant 0 : index
    %450 = vector.load %arg9[%c0_362, %c0_363] : memref<320x64xf32, #tpu.memory_space<vmem>>, vector<64x64xf32>
    %451 = arith.truncf %450 : vector<64x64xf32> to vector<64x64xbf16>
    %c60 = arith.constant 60 : index
    %c0_364 = arith.constant 0 : index
    %c0_365 = arith.constant 0 : index
    %452 = vector.load %arg4[%c60, %c0_364, %c0_365] : memref<70x64x64xbf16, #tpu.memory_space<vmem>>, vector<1x64x64xbf16>
    %453 = vector.shape_cast %452 : vector<1x64x64xbf16> to vector<64x64xbf16>
    %cst_366 = arith.constant dense<0.000000e+00> : vector<64x64xf32>
    %454 = tpu.matmul %451, %453, %cst_366 {dimension_numbers = #tpu.dot_dimension_numbers<[1], [0], [0], [1], [0, 0, 1, 1], [], []>} : vector<64x64xbf16>, vector<64x64xbf16>, vector<64x64xf32> -> vector<64x64xf32>
    %c64 = arith.constant 64 : index
    %c0_367 = arith.constant 0 : index
    %455 = vector.load %arg9[%c64, %c0_367] : memref<320x64xf32, #tpu.memory_space<vmem>>, vector<64x64xf32>
    %456 = arith.truncf %455 : vector<64x64xf32> to vector<64x64xbf16>
    %c61 = arith.constant 61 : index
    %c0_368 = arith.constant 0 : index
    %c0_369 = arith.constant 0 : index
    %457 = vector.load %arg4[%c61, %c0_368, %c0_369] : memref<70x64x64xbf16, #tpu.memory_space<vmem>>, vector<1x64x64xbf16>
    %458 = vector.shape_cast %457 : vector<1x64x64xbf16> to vector<64x64xbf16>
    %cst_370 = arith.constant dense<0.000000e+00> : vector<64x64xf32>
    %459 = tpu.matmul %456, %458, %cst_370 {dimension_numbers = #tpu.dot_dimension_numbers<[1], [0], [0], [1], [0, 0, 1, 1], [], []>} : vector<64x64xbf16>, vector<64x64xbf16>, vector<64x64xf32> -> vector<64x64xf32>
    %460 = arith.addf %454, %459 : vector<64x64xf32>
    %c128_371 = arith.constant 128 : index
    %c0_372 = arith.constant 0 : index
    %461 = vector.load %arg9[%c128_371, %c0_372] : memref<320x64xf32, #tpu.memory_space<vmem>>, vector<64x64xf32>
    %462 = arith.truncf %461 : vector<64x64xf32> to vector<64x64xbf16>
    %c62 = arith.constant 62 : index
    %c0_373 = arith.constant 0 : index
    %c0_374 = arith.constant 0 : index
    %463 = vector.load %arg4[%c62, %c0_373, %c0_374] : memref<70x64x64xbf16, #tpu.memory_space<vmem>>, vector<1x64x64xbf16>
    %464 = vector.shape_cast %463 : vector<1x64x64xbf16> to vector<64x64xbf16>
    %cst_375 = arith.constant dense<0.000000e+00> : vector<64x64xf32>
    %465 = tpu.matmul %462, %464, %cst_375 {dimension_numbers = #tpu.dot_dimension_numbers<[1], [0], [0], [1], [0, 0, 1, 1], [], []>} : vector<64x64xbf16>, vector<64x64xbf16>, vector<64x64xf32> -> vector<64x64xf32>
    %466 = arith.addf %460, %465 : vector<64x64xf32>
    %c192_376 = arith.constant 192 : index
    %c0_377 = arith.constant 0 : index
    %467 = vector.load %arg9[%c192_376, %c0_377] : memref<320x64xf32, #tpu.memory_space<vmem>>, vector<64x64xf32>
    %468 = arith.truncf %467 : vector<64x64xf32> to vector<64x64xbf16>
    %c63 = arith.constant 63 : index
    %c0_378 = arith.constant 0 : index
    %c0_379 = arith.constant 0 : index
    %469 = vector.load %arg4[%c63, %c0_378, %c0_379] : memref<70x64x64xbf16, #tpu.memory_space<vmem>>, vector<1x64x64xbf16>
    %470 = vector.shape_cast %469 : vector<1x64x64xbf16> to vector<64x64xbf16>
    %cst_380 = arith.constant dense<0.000000e+00> : vector<64x64xf32>
    %471 = tpu.matmul %468, %470, %cst_380 {dimension_numbers = #tpu.dot_dimension_numbers<[1], [0], [0], [1], [0, 0, 1, 1], [], []>} : vector<64x64xbf16>, vector<64x64xbf16>, vector<64x64xf32> -> vector<64x64xf32>
    %472 = arith.addf %466, %471 : vector<64x64xf32>
    %c256_381 = arith.constant 256 : index
    %c0_382 = arith.constant 0 : index
    %473 = vector.load %arg9[%c256_381, %c0_382] : memref<320x64xf32, #tpu.memory_space<vmem>>, vector<64x64xf32>
    %474 = arith.truncf %473 : vector<64x64xf32> to vector<64x64xbf16>
    %c64_383 = arith.constant 64 : index
    %c0_384 = arith.constant 0 : index
    %c0_385 = arith.constant 0 : index
    %475 = vector.load %arg4[%c64_383, %c0_384, %c0_385] : memref<70x64x64xbf16, #tpu.memory_space<vmem>>, vector<1x64x64xbf16>
    %476 = vector.shape_cast %475 : vector<1x64x64xbf16> to vector<64x64xbf16>
    %cst_386 = arith.constant dense<0.000000e+00> : vector<64x64xf32>
    %477 = tpu.matmul %474, %476, %cst_386 {dimension_numbers = #tpu.dot_dimension_numbers<[1], [0], [0], [1], [0, 0, 1, 1], [], []>} : vector<64x64xbf16>, vector<64x64xbf16>, vector<64x64xf32> -> vector<64x64xf32>
    %478 = arith.addf %472, %477 : vector<64x64xf32>
    %c12_387 = arith.constant 12 : index
    %c0_388 = arith.constant 0 : index
    %479 = vector.load %arg5[%c12_387, %c0_388] : memref<14x64xf32, #tpu.memory_space<vmem>>, vector<1x64xf32>
    %480 = vector.broadcast %479 : vector<1x64xf32> to vector<64x64xf32>
    %481 = arith.addf %478, %480 : vector<64x64xf32>
    %cst_389 = arith.constant 0.000000e+00 : f32
    %482 = vector.broadcast %cst_389 : f32 to vector<64x64xf32>
    %483 = arith.maximumf %481, %482 : vector<64x64xf32>
    %c256_390 = arith.constant 256 : index
    %c0_391 = arith.constant 0 : index
    %484 = vector.load %arg9[%c256_390, %c0_391] : memref<320x64xf32, #tpu.memory_space<vmem>>, vector<64x64xf32>
    tpu.vector_store %arg9[%c256_390, %c0_391], %483 {strides = array<i32>} : memref<320x64xf32, #tpu.memory_space<vmem>>, vector<64x64xf32>,
    %c0_392 = arith.constant 0 : index
    %c0_393 = arith.constant 0 : index
    %485 = vector.load %arg9[%c0_392, %c0_393] : memref<320x64xf32, #tpu.memory_space<vmem>>, vector<64x64xf32>
    %486 = arith.truncf %485 : vector<64x64xf32> to vector<64x64xbf16>
    %c65 = arith.constant 65 : index
    %c0_394 = arith.constant 0 : index
    %c0_395 = arith.constant 0 : index
    %487 = vector.load %arg4[%c65, %c0_394, %c0_395] : memref<70x64x64xbf16, #tpu.memory_space<vmem>>, vector<1x64x64xbf16>
    %488 = vector.shape_cast %487 : vector<1x64x64xbf16> to vector<64x64xbf16>
    %cst_396 = arith.constant dense<0.000000e+00> : vector<64x64xf32>
    %489 = tpu.matmul %486, %488, %cst_396 {dimension_numbers = #tpu.dot_dimension_numbers<[1], [0], [0], [1], [0, 0, 1, 1], [], []>} : vector<64x64xbf16>, vector<64x64xbf16>, vector<64x64xf32> -> vector<64x64xf32>
    %c64_397 = arith.constant 64 : index
    %c0_398 = arith.constant 0 : index
    %490 = vector.load %arg9[%c64_397, %c0_398] : memref<320x64xf32, #tpu.memory_space<vmem>>, vector<64x64xf32>
    %491 = arith.truncf %490 : vector<64x64xf32> to vector<64x64xbf16>
    %c66 = arith.constant 66 : index
    %c0_399 = arith.constant 0 : index
    %c0_400 = arith.constant 0 : index
    %492 = vector.load %arg4[%c66, %c0_399, %c0_400] : memref<70x64x64xbf16, #tpu.memory_space<vmem>>, vector<1x64x64xbf16>
    %493 = vector.shape_cast %492 : vector<1x64x64xbf16> to vector<64x64xbf16>
    %cst_401 = arith.constant dense<0.000000e+00> : vector<64x64xf32>
    %494 = tpu.matmul %491, %493, %cst_401 {dimension_numbers = #tpu.dot_dimension_numbers<[1], [0], [0], [1], [0, 0, 1, 1], [], []>} : vector<64x64xbf16>, vector<64x64xbf16>, vector<64x64xf32> -> vector<64x64xf32>
    %495 = arith.addf %489, %494 : vector<64x64xf32>
    %c128_402 = arith.constant 128 : index
    %c0_403 = arith.constant 0 : index
    %496 = vector.load %arg9[%c128_402, %c0_403] : memref<320x64xf32, #tpu.memory_space<vmem>>, vector<64x64xf32>
    %497 = arith.truncf %496 : vector<64x64xf32> to vector<64x64xbf16>
    %c67 = arith.constant 67 : index
    %c0_404 = arith.constant 0 : index
    %c0_405 = arith.constant 0 : index
    %498 = vector.load %arg4[%c67, %c0_404, %c0_405] : memref<70x64x64xbf16, #tpu.memory_space<vmem>>, vector<1x64x64xbf16>
    %499 = vector.shape_cast %498 : vector<1x64x64xbf16> to vector<64x64xbf16>
    %cst_406 = arith.constant dense<0.000000e+00> : vector<64x64xf32>
    %500 = tpu.matmul %497, %499, %cst_406 {dimension_numbers = #tpu.dot_dimension_numbers<[1], [0], [0], [1], [0, 0, 1, 1], [], []>} : vector<64x64xbf16>, vector<64x64xbf16>, vector<64x64xf32> -> vector<64x64xf32>
    %501 = arith.addf %495, %500 : vector<64x64xf32>
    %c192_407 = arith.constant 192 : index
    %c0_408 = arith.constant 0 : index
    %502 = vector.load %arg9[%c192_407, %c0_408] : memref<320x64xf32, #tpu.memory_space<vmem>>, vector<64x64xf32>
    %503 = arith.truncf %502 : vector<64x64xf32> to vector<64x64xbf16>
    %c68 = arith.constant 68 : index
    %c0_409 = arith.constant 0 : index
    %c0_410 = arith.constant 0 : index
    %504 = vector.load %arg4[%c68, %c0_409, %c0_410] : memref<70x64x64xbf16, #tpu.memory_space<vmem>>, vector<1x64x64xbf16>
    %505 = vector.shape_cast %504 : vector<1x64x64xbf16> to vector<64x64xbf16>
    %cst_411 = arith.constant dense<0.000000e+00> : vector<64x64xf32>
    %506 = tpu.matmul %503, %505, %cst_411 {dimension_numbers = #tpu.dot_dimension_numbers<[1], [0], [0], [1], [0, 0, 1, 1], [], []>} : vector<64x64xbf16>, vector<64x64xbf16>, vector<64x64xf32> -> vector<64x64xf32>
    %507 = arith.addf %501, %506 : vector<64x64xf32>
    %c256_412 = arith.constant 256 : index
    %c0_413 = arith.constant 0 : index
    %508 = vector.load %arg9[%c256_412, %c0_413] : memref<320x64xf32, #tpu.memory_space<vmem>>, vector<64x64xf32>
    %509 = arith.truncf %508 : vector<64x64xf32> to vector<64x64xbf16>
    %c69 = arith.constant 69 : index
    %c0_414 = arith.constant 0 : index
    %c0_415 = arith.constant 0 : index
    %510 = vector.load %arg4[%c69, %c0_414, %c0_415] : memref<70x64x64xbf16, #tpu.memory_space<vmem>>, vector<1x64x64xbf16>
    %511 = vector.shape_cast %510 : vector<1x64x64xbf16> to vector<64x64xbf16>
    %cst_416 = arith.constant dense<0.000000e+00> : vector<64x64xf32>
    %512 = tpu.matmul %509, %511, %cst_416 {dimension_numbers = #tpu.dot_dimension_numbers<[1], [0], [0], [1], [0, 0, 1, 1], [], []>} : vector<64x64xbf16>, vector<64x64xbf16>, vector<64x64xf32> -> vector<64x64xf32>
    %513 = arith.addf %507, %512 : vector<64x64xf32>
    %c13_417 = arith.constant 13 : index
    %c0_418 = arith.constant 0 : index
    %514 = vector.load %arg5[%c13_417, %c0_418] : memref<14x64xf32, #tpu.memory_space<vmem>>, vector<1x64xf32>
    %515 = vector.broadcast %514 : vector<1x64xf32> to vector<64x64xf32>
    %516 = arith.addf %513, %515 : vector<64x64xf32>
    %cst_419 = arith.constant 0.000000e+00 : f32
    %517 = vector.broadcast %cst_419 : f32 to vector<64x64xf32>
    %518 = arith.maximumf %516, %517 : vector<64x64xf32>
    %519 = arith.addf %518, %448 : vector<64x64xf32>
    %cst_420 = arith.constant 0.000000e+00 : f32
    %520 = vector.broadcast %cst_420 : f32 to vector<64x64xf32>
    %521 = arith.maximumf %519, %520 : vector<64x64xf32>
    %522 = vector.extract_strided_slice %521 {offsets = [63, 0], sizes = [1, 64], strides = [1, 1]} : vector<64x64xf32> to vector<1x64xf32>
    %c0_421 = arith.constant 0 : index
    %c0_422 = arith.constant 0 : index
    %523 = vector.load %arg6[%c0_421, %c0_422] : memref<1x64xf32, #tpu.memory_space<vmem>>, vector<1x64xf32>
    %524 = arith.mulf %522, %523 : vector<1x64xf32>
    %cst_423 = arith.constant dense<0.000000e+00> : vector<1xf32>
    %525 = vector.multi_reduction <add>, %524, %cst_423 [1] : vector<1x64xf32> to vector<1xf32>
    %526 = vector.shape_cast %525 : vector<1xf32> to vector<1x1xf32>
    %c0_424 = arith.constant 0 : index
    %c0_425 = arith.constant 0 : index
    %527 = vector.load %arg7[%c0_424, %c0_425] : memref<1x1xf32, #tpu.memory_space<vmem>>, vector<1x1xf32>
    %528 = arith.addf %526, %527 : vector<1x1xf32>
    %c0_426 = arith.constant 0 : index
    %c0_427 = arith.constant 0 : index
    %c0_428 = arith.constant 0 : index
    %529 = vector.load %arg8[%c0_426, %c0_427, %c0_428] : memref<1x1x1xf32, #tpu.memory_space<vmem>>, vector<1x1x1xf32>
    %530 = vector.shape_cast %529 : vector<1x1x1xf32> to vector<1x1xf32>
    %531 = vector.shape_cast %528 : vector<1x1xf32> to vector<1x1x1xf32>
    tpu.vector_store %arg8[%c0_426, %c0_427, %c0_428], %531 {strides = array<i32>} : memref<1x1x1xf32, #tpu.memory_space<vmem>>, vector<1x1x1xf32>,
    return
  }
  func.func @transform_0(%arg0: i32) -> (i32, i32, i32) {
    %c0_i32 = arith.constant 0 : i32
    %c0_i32_0 = arith.constant 0 : i32
    %c0_i32_1 = arith.constant 0 : i32
    return %arg0, %c0_i32, %c0_i32_0 : i32, i32, i32
  }
  func.func @transform_1(%arg0: i32) -> (i32, i32) {
    %c0_i32 = arith.constant 0 : i32
    %c0_i32_0 = arith.constant 0 : i32
    %c0_i32_1 = arith.constant 0 : i32
    return %c0_i32, %c0_i32_0 : i32, i32
  }
  func.func @transform_2(%arg0: i32) -> (i32, i32) {
    %c0_i32 = arith.constant 0 : i32
    %c0_i32_0 = arith.constant 0 : i32
    %c0_i32_1 = arith.constant 0 : i32
    return %c0_i32, %c0_i32_0 : i32, i32
  }
  func.func @transform_3(%arg0: i32) -> (i32, i32, i32) {
    %c0_i32 = arith.constant 0 : i32
    %c0_i32_0 = arith.constant 0 : i32
    %c0_i32_1 = arith.constant 0 : i32
    %c0_i32_2 = arith.constant 0 : i32
    return %c0_i32, %c0_i32_0, %c0_i32_1 : i32, i32, i32
  }
  func.func @transform_4(%arg0: i32) -> (i32, i32) {
    %c0_i32 = arith.constant 0 : i32
    %c0_i32_0 = arith.constant 0 : i32
    %c0_i32_1 = arith.constant 0 : i32
    return %c0_i32, %c0_i32_0 : i32, i32
  }
  func.func @transform_5(%arg0: i32) -> (i32, i32) {
    %c0_i32 = arith.constant 0 : i32
    %c0_i32_0 = arith.constant 0 : i32
    %c0_i32_1 = arith.constant 0 : i32
    return %c0_i32, %c0_i32_0 : i32, i32
  }
  func.func @transform_6(%arg0: i32) -> (i32, i32) {
    %c0_i32 = arith.constant 0 : i32
    %c0_i32_0 = arith.constant 0 : i32
    %c0_i32_1 = arith.constant 0 : i32
    return %c0_i32, %c0_i32_0 : i32, i32
  }
  func.func @transform_7(%arg0: i32) -> (i32, i32, i32) {
    %c0_i32 = arith.constant 0 : i32
    %c0_i32_0 = arith.constant 0 : i32
    %c0_i32_1 = arith.constant 0 : i32
    return %arg0, %c0_i32, %c0_i32_0 : i32, i32, i32
  }
}

</mosaic_0001>

<bundles_post_ra>
// kernel: tpu_custom_call.1
= control target key start
LH: loop header
LB: loop body
LE: loop exit
PB: predicated region body
PF: predicated region fallthrough
CT: control target
= control target key end

     0   :  { %s12858_s26 = smov 0   ;;  %s14947_s0 = inlined_call_operand.vmem [shape: f32[4,64,1], index: 0, kind: input, shape index: {}]   ;;  %s14948_s1 = inlined_call_operand.vmem [shape: f32[1,64], index: 1, kind: input, shape index: {}]   ;;  %s14949_s2 = inlined_call_operand.vmem [shape: f32[1,64], index: 2, kind: input, shape index: {}]   ;;  %s14950_s3 = inlined_call_operand.vmem [shape: bf16[70,64,64], index: 3, kind: input, shape index: {}]   ;;  %s14951_s4 = inlined_call_operand.vmem [shape: f32[14,64], index: 4, kind: input, shape index: {}]   ;;  %s14952_s5 = inlined_call_operand.vmem [shape: f32[1,64], index: 5, kind: input, shape index: {}]   ;;  %s14953_s6 = inlined_call_operand.<no memory space> [shape: f32[1,1], index: 6, kind: input, shape index: {}]   ;;  %s14954_s7 = inlined_call_operand.vmem [shape: f32[4,1,1], index: 7, kind: output, shape index: {}]  }
   0x1   :  { %v12_v0 = vstv %s14953_s6 }
   0x2   :  { %13 = vst [vmem:[#allocation3] sm:$0x1] %v12_v0 }
   0x3 LB: > { %s9693_s27 = sadd.s32 4294967295, %s12811_s26   ;;  %p9697_p0 = scmp.ge.s32.totalorder %s12811_s26, 1  ;;  %s12811_s26 = sphi %s12858_s26, %s19_s26  }
   0x4   : > { %p239_p1 = scmp.lt.s32.totalorder %s12811_s26, 5 }
   0x6   : > { %p240_p2 = pnand %p9697_p0, %p239_p1 }
   0x7   : > { %p269_p3 = scmp.lt.s32.totalorder (!%p240_p2), %s9693_s27, 3 }
   0x8   : > { %243 = sbr.rel (%p240_p2) target bundleno = 3644 (0xe3c), region = 48 }
   0xd   : > { %v12813_v1 = vmov 0   ;;  %s14966_s27 = smov (!%p269_p3, %s9693_s27), 3  ;;  %vm278_vm0 = vcmask 523264   ;;  %v12525_v2 = vld [vmem:[%s14950_s3 + $0x38] sm:$0xff]   ;;  %v12814_v6 = vmov 0.0   ;;  %v12527_v11 = vld [vmem:[%s14950_s3 + $0x30] sm:$0xff]  }
   0xe   : > { %12524 = vset.pattern.permute.xlu1 %v12813_v1  ;;  %12523 = vset.pattern.permute.xlu0 %v12813_v1  ;;  %s10832_s6 = sshll.u32 %s14966_s27, 6  ;;  %v12526_v3 = vld [vmem:[%s14950_s3 + $0x18] sm:$0xff]   ;;  %310 = vst.msk [vmem:[#allocation2 + $0xf8] sm:$0xff] %vm278_vm0, %v12814_v6  ;;  %279 = vst.msk [vmem:[#allocation2] sm:$0xff] %vm278_vm0, %v12814_v6  ;;  %v12528_v12 = vld [vmem:[%s14950_s3 + $0x10] sm:$0xff]   ;;  %vm9632_vm1 = vcmask 523271   ;;  %s276_s10 = scalar_lea.vmem %s14954_s7, %s14966_s27 }
   0xf   : > { %s12872_s30 = scalar_lea.vmem %s14947_s0, %s10832_s6  ;;  %280 = vst.msk [vmem:[#allocation2 + $0x8] sm:$0xff] %vm278_vm0, %v12814_v6  ;;  %281 = vst.msk [vmem:[#allocation2 + $0x10] sm:$0xff] %vm278_vm0, %v12814_v6  ;;  %11393 = vmatprep.subr.bf16.mxu0 %v12525_v2  ;;  %11409 = vmatprep.subr.bf16.mxu1 %v12526_v3  ;;  %v12529_v15 = vld [vmem:[%s14950_s3 + $0x28] sm:$0xff]   ;;  %v12531_v17 = vld [vmem:[%s14950_s3 + $0x20] sm:$0xff]   ;;  %vm9644_vm2 = vcmask 7175  }
  0x10   : > { %v313_v4 = vld [vmem:[%s12872_s30 + $0x10] sm:$0xff]  ;;  %v311_v5 = vld [vmem:[%s12872_s30] sm:$0xff]  ;;  %282 = vst.msk [vmem:[#allocation2 + $0x18] sm:$0xff] %vm278_vm0, %v12814_v6  ;;  %283 = vst.msk [vmem:[#allocation2 + $0x20] sm:$0xff] %vm278_vm0, %v12814_v6  ;;  %11394 = vmatpush3.bf16.msra.mxu0 %v12525_v2  ;;  %11410 = vmatpush3.bf16.msra.mxu1 %v12526_v3 }
  0x11   : > { %332 = vperm.xlu1 %12524, %v313_v4   ;;  %322 = vperm.xlu0 %12523, %v311_v5   ;;  %284 = vst.msk [vmem:[#allocation2 + $0x28] sm:$0xff] %vm278_vm0, %v12814_v6  ;;  %285 = vst.msk [vmem:[#allocation2 + $0x30] sm:$0xff] %vm278_vm0, %v12814_v6  ;;  %v314_v7 = vld [vmem:[%s12872_s30 + $0x18] sm:$0xff]  ;;  %v312_v8 = vld [vmem:[%s12872_s30 + $0x8] sm:$0xff] }
  0x12   : > { %286 = vst.msk [vmem:[#allocation2 + $0x38] sm:$0xff] %vm278_vm0, %v12814_v6  ;;  %287 = vst.msk [vmem:[#allocation2 + $0x40] sm:$0xff] %vm278_vm0, %v12814_v6  ;;  %v316_v9 = vld [vmem:[%s12872_s30 + $0x28] sm:$0xff]  ;;  %v315_v10 = vld [vmem:[%s12872_s30 + $0x20] sm:$0xff]  ;;  %11395 = vmatprep.subr.bf16.mxu0 %v12527_v11  ;;  %11411 = vmatprep.subr.bf16.mxu1 %v12528_v12 }
  0x13   : > { %288 = vst.msk [vmem:[#allocation2 + $0x48] sm:$0xff] %vm278_vm0, %v12814_v6  ;;  %289 = vst.msk [vmem:[#allocation2 + $0x50] sm:$0xff] %vm278_vm0, %v12814_v6  ;;  %v318_v13 = vld [vmem:[%s12872_s30 + $0x38] sm:$0xff]  ;;  %v317_v14 = vld [vmem:[%s12872_s30 + $0x30] sm:$0xff] }
  0x14   : > { %290 = vst.msk [vmem:[#allocation2 + $0x58] sm:$0xff] %vm278_vm0, %v12814_v6  ;;  %291 = vst.msk [vmem:[#allocation2 + $0x60] sm:$0xff] %vm278_vm0, %v12814_v6  ;;  %11396 = vmatpush3.bf16.msra.mxu0 %v12527_v11  ;;  %11412 = vmatpush3.bf16.msra.mxu1 %v12528_v12  ;;  %v12530_v16 = vld [vmem:[%s14950_s3 + $0x8] sm:$0xff]   ;;  %v12532_v18 = vld [vmem:[%s14950_s3] sm:$0xff]  }
  0x15   : > { %292 = vst.msk [vmem:[#allocation2 + $0x68] sm:$0xff] %vm278_vm0, %v12814_v6  ;;  %293 = vst.msk [vmem:[#allocation2 + $0x70] sm:$0xff] %vm278_vm0, %v12814_v6  ;;  %337 = vperm.xlu1 %12524, %v314_v7   ;;  %327 = vperm.xlu0 %12523, %v312_v8   ;;  %v12941_v19 = vld [vmem:[%s14950_s3 + $0x58] sm:$0xff]   ;;  %v9700_v21 = vld [vmem:[%s14948_s1] ss:$0 sm:$0xff] }
  0x16   : > { %294 = vst.msk [vmem:[#allocation2 + $0x78] sm:$0xff] %vm278_vm0, %v12814_v6  ;;  %295 = vst.msk [vmem:[#allocation2 + $0x80] sm:$0xff] %vm278_vm0, %v12814_v6  ;;  %11397 = vmatprep.subr.bf16.mxu0 %v12529_v15  ;;  %11413 = vmatprep.subr.bf16.mxu1 %v12530_v16  ;;  %v12534_v20 = vld [vmem:[%s14950_s3 + $0x78] sm:$0xff]   ;;  %v9701_v22 = vld [vmem:[%s14949_s2] ss:$0 sm:$0xff] }
  0x17   : > { %296 = vst.msk [vmem:[#allocation2 + $0x88] sm:$0xff] %vm278_vm0, %v12814_v6  ;;  %297 = vst.msk [vmem:[#allocation2 + $0x90] sm:$0xff] %vm278_vm0, %v12814_v6  ;;  %v12535_v59 = vld [vmem:[%s14950_s3 + $0x50] sm:$0xff]   ;;  %v12537_v3 = vld [vmem:[%s14950_s3 + $0x48] sm:$0xff]  }
  0x18   : > { %298 = vst.msk [vmem:[#allocation2 + $0x98] sm:$0xff] %vm278_vm0, %v12814_v6  ;;  %299 = vst.msk [vmem:[#allocation2 + $0xa0] sm:$0xff] %vm278_vm0, %v12814_v6  ;;  %11398 = vmatpush3.bf16.msra.mxu0 %v12529_v15  ;;  %11414 = vmatpush3.bf16.msra.mxu1 %v12530_v16  ;;  %v12536_v1 = vld [vmem:[%s14950_s3 + $0x70] sm:$0xff]   ;;  %v12538_v4 = vld [vmem:[%s14950_s3 + $0x68] sm:$0xff]  }
  0x19   : > { %300 = vst.msk [vmem:[#allocation2 + $0xa8] sm:$0xff] %vm278_vm0, %v12814_v6  ;;  %301 = vst.msk [vmem:[#allocation2 + $0xb0] sm:$0xff] %vm278_vm0, %v12814_v6  ;;  %347 = vperm.xlu1 %12524, %v316_v9   ;;  %342 = vperm.xlu0 %12523, %v315_v10   ;;  %v12540_v16 = vld [vmem:[%s14950_s3 + $0x60] sm:$0xff]  }
  0x1a   : > { %302 = vst.msk [vmem:[#allocation2 + $0xb8] sm:$0xff] %vm278_vm0, %v12814_v6  ;;  %303 = vst.msk [vmem:[#allocation2 + $0xc0] sm:$0xff] %vm278_vm0, %v12814_v6  ;;  %11399 = vmatprep.subr.bf16.mxu0 %v12531_v17  ;;  %11415 = vmatprep.subr.bf16.mxu1 %v12532_v18 }
  0x1b   : > { %304 = vst.msk [vmem:[#allocation2 + $0xc8] sm:$0xff] %vm278_vm0, %v12814_v6  ;;  %305 = vst.msk [vmem:[#allocation2 + $0xd0] sm:$0xff] %vm278_vm0, %v12814_v6 }
  0x1c   : > { %306 = vst.msk [vmem:[#allocation2 + $0xd8] sm:$0xff] %vm278_vm0, %v12814_v6  ;;  %307 = vst.msk [vmem:[#allocation2 + $0xe0] sm:$0xff] %vm278_vm0, %v12814_v6  ;;  %11400 = vmatpush3.bf16.msra.mxu0 %v12531_v17  ;;  %11416 = vmatpush3.bf16.msra.mxu1 %v12532_v18 }
  0x1d   : > { %308 = vst.msk [vmem:[#allocation2 + $0xe8] sm:$0xff] %vm278_vm0, %v12814_v6  ;;  %309 = vst.msk [vmem:[#allocation2 + $0xf0] sm:$0xff] %vm278_vm0, %v12814_v6  ;;  %357 = vperm.xlu1 %12524, %v318_v13   ;;  %352 = vperm.xlu0 %12523, %v317_v14   ;;  %v12539_v13 = vld [vmem:[%s14950_s3 + $0x40] sm:$0xff]  }
  0x1e   : > { %11425 = vmatprep.subr.bf16.mxu0 %v12941_v19  ;;  %11441 = vmatprep.subr.bf16.mxu1 %v12534_v20 }
  0x8c   : > { %v333_v23 = vpop.permute.xlu1 %332  ;;  %v323_v24 = vpop.permute.xlu0 %322 }
  0x8d   : > { %v368_v25 = vmul.f32 %v9700_v21, %v333_v23  ;;  %v366_v26 = vmul.f32 %v9700_v21, %v323_v24 }
  0x8f   : > { %v12953_v27 = vadd.f32 %v9701_v22, %v368_v25  ;;  %v12955_v28 = vadd.f32 %v9701_v22, %v366_v26 }
  0x90   : > { %v338_v29 = vpop.permute.xlu1 %337  ;;  %v328_v30 = vpop.permute.xlu0 %327 }
  0x91   : > { %391 = vst.msk [vmem:[#allocation2 + $0x110] sm:$0xff] %vm278_vm0, %v12953_v27  ;;  %389 = vst.msk [vmem:[#allocation2 + $0x100] sm:$0xff] %vm278_vm0, %v12955_v28  ;;  %v369_v31 = vmul.f32 %v9700_v21, %v338_v29  ;;  %v367_v32 = vmul.f32 %v9700_v21, %v328_v30  ;;  %v12542_v30 = vld [vmem:[%s14950_s3 + $0x90] sm:$0xff]  }
  0x93   : > { %v12961_v33 = vadd.f32 %v9701_v22, %v369_v31  ;;  %v12963_v34 = vadd.f32 %v9701_v22, %v367_v32 }
  0x94   : > { %v348_v35 = vpop.permute.xlu1 %347  ;;  %v343_v36 = vpop.permute.xlu0 %342 }
  0x95   : > { %392 = vst.msk [vmem:[#allocation2 + $0x118] sm:$0xff] %vm278_vm0, %v12961_v33  ;;  %390 = vst.msk [vmem:[#allocation2 + $0x108] sm:$0xff] %vm278_vm0, %v12963_v34  ;;  %v371_v37 = vmul.f32 %v9700_v21, %v348_v35  ;;  %v370_v38 = vmul.f32 %v9700_v21, %v343_v36 }
  0x97   : > { %v12969_v39 = vadd.f32 %v9701_v22, %v371_v37  ;;  %v12971_v40 = vadd.f32 %v9701_v22, %v370_v38 }
  0x98   : > { %v358_v41 = vpop.permute.xlu1 %357  ;;  %v353_v42 = vpop.permute.xlu0 %352  ;;  %v397_v49 = vld [vmem:[#allocation2 + $0xfc] sm:$0xff] }
  0x99   : > { %394 = vst.msk [vmem:[#allocation2 + $0x128] sm:$0xff] %vm278_vm0, %v12969_v39  ;;  %393 = vst.msk [vmem:[#allocation2 + $0x120] sm:$0xff] %vm278_vm0, %v12971_v40  ;;  %v373_v43 = vmul.f32 %v9700_v21, %v358_v41  ;;  %v372_v44 = vmul.f32 %v9700_v21, %v353_v42  ;;  %v417_v52 = vld [vmem:[#allocation2 + $0xfd] sm:$0xff]  ;;  %v12543_v41 = vld [vmem:[%s14950_s3 + $0x88] sm:$0xff]  }
  0x9a   : > { %v640_v10 = vld [vmem:[#allocation2 + $0xfe] sm:$0xff] }
  0x9b   : > { %v12977_v45 = vadd.f32 %v9701_v22, %v373_v43  ;;  %v12979_v46 = vadd.f32 %v9701_v22, %v372_v44  ;;  %v770_v14 = vld [vmem:[#allocation2 + $0xff] sm:$0xff] }
  0x9c   : > { %v400_v47 = vld [vmem:[#allocation2 + $0x114] sm:$0xff]  ;;  %v398_v50 = vld [vmem:[#allocation2 + $0x104] sm:$0xff]  ;;  %v399_v51 = vld [vmem:[#allocation2 + $0x10c] sm:$0xff] }
  0x9d   : > { %v420_v48 = vld [vmem:[#allocation2 + $0x115] sm:$0xff]  ;;  %396 = vst.msk [vmem:[#allocation2 + $0x138] sm:$0xff] %vm278_vm0, %v12977_v45  ;;  %395 = vst.msk [vmem:[#allocation2 + $0x130] sm:$0xff] %vm278_vm0, %v12979_v46  ;;  %v418_v53 = vld [vmem:[#allocation2 + $0x105] sm:$0xff]  ;;  %v405_v55 = vpack.c.bf16 %v398_v50, %v397_v49  ;;  %v406_v56 = vpack.c.bf16 %v400_v47, %v399_v51 }
  0x9e   : > { %v419_v54 = vld [vmem:[#allocation2 + $0x10d] sm:$0xff]  ;;  %v425_v57 = vpack.c.bf16 %v418_v53, %v417_v52  ;;  %v773_v18 = vld [vmem:[#allocation2 + $0x117] sm:$0xff]  ;;  %v900_v47 = vld [vmem:[#allocation2 + $0x100] sm:$0xff] }
  0x9f   : > { %v426_v58 = vpack.c.bf16 %v420_v48, %v419_v54  ;;  %11417 = vmatprep.mubr.msk.bf16.mxu1 %vm278_vm0, %v405_v55  ;;  %v641_v11 = vld [vmem:[#allocation2 + $0x106] sm:$0xff]  ;;  %v12541_v21 = vld [vmem:[%s14950_s3 + $0x98] sm:$0xff]   ;;  %v642_v23 = vld [vmem:[#allocation2 + $0x10e] sm:$0xff] }
  0xa0   : > { %v401_v60 = vld [vmem:[#allocation2 + $0x11c] sm:$0xff]  ;;  %v402_v61 = vld [vmem:[#allocation2 + $0x124] sm:$0xff]  ;;  %11401 = vmatprep.mubr.msk.bf16.mxu0 %vm278_vm0, %v425_v57  ;;  %11418 = vmatmul.mubr.msk.bf16.vlgmr.msra.gmra.mxu1 %vm278_vm0, %v406_v56  ;;  %v648_v17 = vpack.c.bf16 %v641_v11, %v640_v10  ;;  %v902_v55 = vld [vmem:[#allocation2 + $0x110] sm:$0xff] }
  0xa1   : > { %v421_v62 = vld [vmem:[#allocation2 + $0x11d] sm:$0xff]  ;;  %v422_v63 = vld [vmem:[#allocation2 + $0x125] sm:$0xff]  ;;  %v407_v0 = vpack.c.bf16 %v402_v61, %v401_v60  ;;  %11402 = vmatmul.mubr.msk.bf16.vlgmr.msra.gmra.mxu0 %vm278_vm0, %v426_v58  ;;  %11442 = vmatpush3.bf16.msra.mxu1 %v12534_v20 }
  0xa2   : > { %v427_v2 = vpack.c.bf16 %v422_v63, %v421_v62  ;;  %11426 = vmatpush3.bf16.msra.mxu0 %v12941_v19  ;;  %11443 = vmatprep.subr.bf16.mxu1 %v12536_v1  ;;  %v771_v15 = vld [vmem:[#allocation2 + $0x107] sm:$0xff]  ;;  %v772_v19 = vld [vmem:[#allocation2 + $0x10f] sm:$0xff]  ;;  %v774_v24 = vld [vmem:[#allocation2 + $0x11f] sm:$0xff] }
  0xa3   : > { %11421 = vmatprep.mubr.msk.bf16.mxu1 %vm278_vm0, %v407_v0  ;;  %11427 = vmatprep.subr.bf16.mxu0 %v12535_v59  ;;  %v778_v20 = vpack.c.bf16 %v771_v15, %v770_v14  ;;  %v643_v22 = vld [vmem:[#allocation2 + $0x116] sm:$0xff]  ;;  %v775_v25 = vld [vmem:[#allocation2 + $0x127] sm:$0xff]  ;;  %v644_v26 = vld [vmem:[#allocation2 + $0x11e] sm:$0xff]  ;;  %v779_v31 = vpack.c.bf16 %v773_v18, %v772_v19 }
  0xa4   : > { %v403_v5 = vld [vmem:[#allocation2 + $0x12c] sm:$0xff]  ;;  %v404_v6 = vld [vmem:[#allocation2 + $0x134] sm:$0xff]  ;;  %11405 = vmatprep.mubr.msk.bf16.mxu0 %vm278_vm0, %v427_v2  ;;  %v649_v32 = vpack.c.bf16 %v643_v22, %v642_v23  ;;  %v780_v35 = vpack.c.bf16 %v775_v25, %v774_v24  ;;  %v12544_v48 = vld [vmem:[%s14950_s3 + $0x80] sm:$0xff]  }
  0xa5   : > { %v423_v7 = vld [vmem:[#allocation2 + $0x12d] sm:$0xff]  ;;  %v424_v8 = vld [vmem:[#allocation2 + $0x135] sm:$0xff]  ;;  %v408_v9 = vpack.c.bf16 %v404_v6, %v403_v5  ;;  %11444 = vmatpush3.bf16.msra.mxu1 %v12536_v1  ;;  %v904_v53 = vld [vmem:[#allocation2 + $0x120] sm:$0xff] }
  0xa6   : > { %v428_v12 = vpack.c.bf16 %v424_v8, %v423_v7  ;;  %11428 = vmatpush3.bf16.msra.mxu0 %v12535_v59  ;;  %11445 = vmatprep.subr.bf16.mxu1 %v12538_v4  ;;  %v645_v29 = vld [vmem:[#allocation2 + $0x126] sm:$0xff]  ;;  %v776_v37 = vld [vmem:[#allocation2 + $0x12f] sm:$0xff]  ;;  %v777_v38 = vld [vmem:[#allocation2 + $0x137] sm:$0xff] }
  0xa7   : > { %11429 = vmatprep.subr.bf16.mxu0 %v12537_v3  ;;  %v650_v36 = vpack.c.bf16 %v645_v29, %v644_v26  ;;  %v646_v42 = vld [vmem:[#allocation2 + $0x12e] sm:$0xff]  ;;  %v647_v43 = vld [vmem:[#allocation2 + $0x136] sm:$0xff]  ;;  %v781_v49 = vpack.c.bf16 %v777_v38, %v776_v37 }
  0xa8   : > { %11422 = vmatmul.mubr.msk.bf16.gmra.mxu1 %vm278_vm0, %v408_v9  ;;  %v901_v44 = vld [vmem:[#allocation2 + $0x108] sm:$0xff]  ;;  %v651_v50 = vpack.c.bf16 %v647_v43, %v646_v42  ;;  %v903_v52 = vld [vmem:[#allocation2 + $0x118] sm:$0xff]  ;;  %v906_v58 = vld [vmem:[#allocation2 + $0x130] sm:$0xff] }
  0xa9   : > { %11406 = vmatmul.mubr.msk.bf16.gmra.mxu0 %vm278_vm0, %v428_v12  ;;  %11446 = vmatpush3.bf16.msra.mxu1 %v12538_v4  ;;  %v908_v51 = vpack.c.bf16 %v901_v44, %v900_v47  ;;  %v905_v54 = vld [vmem:[#allocation2 + $0x128] sm:$0xff]  ;;  %v909_v56 = vpack.c.bf16 %v903_v52, %v902_v55  ;;  %v907_v59 = vld [vmem:[#allocation2 + $0x138] sm:$0xff]  ;;  %v12547_v63 = vld [vmem:[%s14950_s3 + $0xd0] sm:$0xff]  }
  0xaa   : > { %11430 = vmatpush3.bf16.msra.mxu0 %v12537_v3  ;;  %11433 = vmatprep.mubr.msk.bf16.mxu0 %vm278_vm0, %v648_v17  ;;  %v910_v57 = vpack.c.bf16 %v905_v54, %v904_v53  ;;  %v911_v60 = vpack.c.bf16 %v907_v59, %v906_v58  ;;  %v12545_v61 = vld [vmem:[%s14950_s3 + $0xd8] sm:$0xff]   ;;  %v12548_v0 = vld [vmem:[%s14950_s3 + $0xb0] sm:$0xff]   ;;  %v12549_v1 = vld [vmem:[%s14950_s3 + $0xc8] sm:$0xff]  }
  0xab   : > { %11449 = vmatprep.mubr.msk.bf16.mxu1 %vm278_vm0, %v778_v20  ;;  %11431 = vmatprep.subr.bf16.mxu0 %v12539_v13  ;;  %v12546_v62 = vld [vmem:[%s14950_s3 + $0xb8] sm:$0xff]   ;;  %v12550_v2 = vld [vmem:[%s14950_s3 + $0xa8] sm:$0xff]   ;;  %v12551_v3 = vld [vmem:[%s14950_s3 + $0xc0] sm:$0xff]  }
  0xac   : > { %11447 = vmatprep.subr.bf16.mxu1 %v12540_v16  ;;  %v12552_v4 = vld [vmem:[%s14950_s3 + $0xa0] sm:$0xff]   ;;  %v13063_v5 = vld [vmem:[%s14950_s3 + $0xf8] sm:$0xff]  }
  0xad   : > { %11448 = vmatpush3.bf16.msra.mxu1 %v12540_v16  ;;  %v13068_v6 = vld [vmem:[%s14950_s3 + $0x118] sm:$0xff]   ;;  %v9774_v54 = vld [vmem:[%s14951_s4] ss:$0 sm:$0xff] }
  0xae   : > { %11432 = vmatpush3.bf16.msra.mxu0 %v12539_v13  ;;  %11473 = vmatprep.subr.bf16.mxu1 %v12545_v61 }
  0xaf   : > { %11457 = vmatprep.subr.bf16.mxu0 %v12541_v21 }
  0xb0   : > { %11450 = vmatmul.mubr.msk.bf16.vlgmr.msra.gmra.mxu1 %vm278_vm0, %v779_v31 }
  0xb1   : > { %11434 = vmatmul.mubr.msk.bf16.vlgmr.msra.gmra.mxu0 %vm278_vm0, %v649_v32  ;;  %11453 = vmatprep.mubr.msk.bf16.mxu1 %vm278_vm0, %v780_v35 }
  0xb2   : > { %11458 = vmatpush3.bf16.msra.mxu0 %v12541_v21  ;;  %11437 = vmatprep.mubr.msk.bf16.mxu0 %vm278_vm0, %v650_v36 }
  0xb3   : > { %11459 = vmatprep.subr.bf16.mxu0 %v12542_v30  ;;  %11474 = vmatpush3.bf16.msra.mxu1 %v12545_v61 }
  0xb4   : > { %11475 = vmatprep.subr.bf16.mxu1 %v12547_v63 }
  0xb6   : > { %11460 = vmatpush3.bf16.msra.mxu0 %v12542_v30 }
  0xb7   : > { %11461 = vmatprep.subr.bf16.mxu0 %v12543_v41  ;;  %11476 = vmatpush3.bf16.msra.mxu1 %v12547_v63 }
  0xb8   : > { %11454 = vmatmul.mubr.msk.bf16.gmra.mxu1 %vm278_vm0, %v781_v49  ;;  %11477 = vmatprep.subr.bf16.mxu1 %v12549_v1 }
  0xb9   : > { %11438 = vmatmul.mubr.msk.bf16.gmra.mxu0 %vm278_vm0, %v651_v50 }
  0xba   : > { %11462 = vmatpush3.bf16.msra.mxu0 %v12543_v41  ;;  %11465 = vmatprep.mubr.msk.bf16.mxu0 %vm278_vm0, %v908_v51 }
  0xbb   : > { %11463 = vmatprep.subr.bf16.mxu0 %v12544_v48  ;;  %11478 = vmatpush3.bf16.msra.mxu1 %v12549_v1 }
  0xbc   : > { %11479 = vmatprep.subr.bf16.mxu1 %v12551_v3 }
  0xbe   : > { %11464 = vmatpush3.bf16.msra.mxu0 %v12544_v48 }
  0xbf   : > { %11489 = vmatprep.subr.bf16.mxu0 %v12546_v62  ;;  %11480 = vmatpush3.bf16.msra.mxu1 %v12551_v3 }
  0xc0   : > { %11505 = vmatprep.subr.bf16.mxu1 %v13063_v5 }
  0xc1   : > { %11466 = vmatmul.mubr.msk.bf16.vlgmr.msra.gmra.mxu0 %vm278_vm0, %v909_v56 }
  0xc2   : > { %11469 = vmatprep.mubr.msk.bf16.mxu0 %vm278_vm0, %v910_v57  ;;  %11490 = vmatpush3.bf16.msra.mxu0 %v12546_v62 }
  0xc3   : > { %11491 = vmatprep.subr.bf16.mxu0 %v12548_v0 }
  0xc6   : > { %11492 = vmatpush3.bf16.msra.mxu0 %v12548_v0 }
  0xc7   : > { %11493 = vmatprep.subr.bf16.mxu0 %v12550_v2 }
  0xc9   : > { %11470 = vmatmul.mubr.msk.bf16.gmra.mxu0 %vm278_vm0, %v911_v60 }
  0xca   : > { %11494 = vmatpush3.bf16.msra.mxu0 %v12550_v2 }
  0xcb   : > { %11495 = vmatprep.subr.bf16.mxu0 %v12552_v4 }
  0xce   : > { %11496 = vmatpush3.bf16.msra.mxu0 %v12552_v4 }
  0xcf   : > { %11521 = vmatprep.subr.bf16.mxu0 %v13068_v6 }
 0x160   : > { %v11419_v7 = vpop.f32.mrf.mxu1 }
 0x161   : > { %v11403_v8 = vpop.f32.mrf.mxu0 }
 0x162   : > { %v609_v9 = vpop.f32.mrf.mxu1  ;;  %v618_v35 = vadd.f32 %v11419_v7, %v11403_v8 }
 0x163   : > { %v508_v10 = vpop.f32.mrf.mxu0 }
 0x164   : > { %v11420_v11 = vpop.f32.mrf.mxu1  ;;  %v610_v37 = vadd.f32 %v609_v9, %v508_v10 }
 0x165   : > { %v11404_v12 = vpop.f32.mrf.mxu0 }
 0x166   : > { %v612_v13 = vpop.f32.mrf.mxu1  ;;  %v621_v43 = vadd.f32 %v11420_v11, %v11404_v12 }
 0x167   : > { %v511_v14 = vpop.f32.mrf.mxu0 }
 0x168   : > { %v11423_v15 = vpop.f32.mrf.mxu1  ;;  %v613_v48 = vadd.f32 %v612_v13, %v511_v14 }
 0x169   : > { %v11407_v16 = vpop.f32.mrf.mxu0 }
 0x16a   : > { %v625_v17 = vpop.f32.mrf.mxu1  ;;  %v634_v51 = vadd.f32 %v11423_v15, %v11407_v16 }
 0x16b   : > { %v524_v18 = vpop.f32.mrf.mxu0 }
 0x16c   : > { %v11424_v19 = vpop.f32.mrf.mxu1  ;;  %v626_v58 = vadd.f32 %v625_v17, %v524_v18 }
 0x16d   : > { %v11408_v20 = vpop.f32.mrf.mxu0 }
 0x16e   : > { %v628_v21 = vpop.f32.mrf.mxu1  ;;  %v637_v0 = vadd.f32 %v11424_v19, %v11408_v20 }
 0x16f   : > { %v527_v22 = vpop.f32.mrf.mxu0 }
 0x170   : > { %v11451_v24 = vpop.f32.mrf.mxu1  ;;  %v629_v10 = vadd.f32 %v628_v21, %v527_v22 }
 0x171   : > { %v11435_v23 = vpop.f32.mrf.mxu0 }
 0x172   : > { %v861_v26 = vpop.f32.mrf.mxu1  ;;  %v764_v38 = vadd.f32 %v11435_v23, %v618_v35 }
 0x173   : > { %v731_v25 = vpop.f32.mrf.mxu0 }
 0x174   : > { %v11452_v31 = vpop.f32.mrf.mxu1  ;;  %v762_v44 = vadd.f32 %v731_v25, %v610_v37  ;;  %v894_v49 = vadd.f32 %v11451_v24, %v764_v38 }
 0x175   : > { %v11436_v29 = vpop.f32.mrf.mxu0 }
 0x176   : > { %v864_v41 = vpop.f32.mrf.mxu1  ;;  %v765_v50 = vadd.f32 %v11436_v29, %v621_v43  ;;  %v892_v55 = vadd.f32 %v861_v26, %v762_v44 }
 0x177   : > { %v734_v30 = vpop.f32.mrf.mxu0 }
 0x178   : > { %v11455_v52 = vpop.f32.mrf.mxu1  ;;  %v763_v56 = vadd.f32 %v734_v30, %v613_v48  ;;  %v895_v61 = vadd.f32 %v11452_v31, %v765_v50 }
 0x179   : > { %v11439_v32 = vpop.f32.mrf.mxu0 }
 0x17a   : > { %v768_v59 = vadd.f32 %v11439_v32, %v634_v51  ;;  %v877_v2 = vpop.f32.mrf.mxu1  ;;  %v893_v4 = vadd.f32 %v864_v41, %v763_v56 }
 0x17b   : > { %v747_v36 = vpop.f32.mrf.mxu0 }
 0x17c   : > { %v766_v1 = vadd.f32 %v747_v36, %v626_v58  ;;  %v898_v11 = vadd.f32 %v11455_v52, %v768_v59  ;;  %v11456_v18 = vpop.f32.mrf.mxu1 }
 0x17d   : > { %v11440_v42 = vpop.f32.mrf.mxu0 }
 0x17e   : > { %v769_v13 = vadd.f32 %v11440_v42, %v637_v0  ;;  %v896_v17 = vadd.f32 %v877_v2, %v766_v1  ;;  %v880_v31 = vpop.f32.mrf.mxu1  ;;  %v12557_v1 = vld [vmem:[%s14950_s3 + $0xe8] sm:$0xff]  }
 0x17f   : > { %v750_v47 = vpop.f32.mrf.mxu0  ;;  %v12558_v2 = vld [vmem:[%s14950_s3 + $0x108] sm:$0xff]  }
 0x180   : > { %v767_v19 = vadd.f32 %v750_v47, %v629_v10  ;;  %v899_v29 = vadd.f32 %v11456_v18, %v769_v13 }
 0x181   : > { %v11467_v53 = vpop.f32.mrf.mxu0 }
 0x182   : > { %v1024_v57 = vadd.f32 %v11467_v53, %v894_v49  ;;  %v897_v35 = vadd.f32 %v880_v31, %v767_v19  ;;  %v12560_v19 = vld [vmem:[%s14950_s3 + $0x100] sm:$0xff]  }
 0x183   : > { %v991_v60 = vpop.f32.mrf.mxu0 }
 0x184   : > { %v1037_v62 = vadd.f32 %v9774_v54, %v1024_v57  ;;  %v1022_v63 = vadd.f32 %v991_v60, %v892_v55 }
 0x185   : > { %v11468_v3 = vpop.f32.mrf.mxu0 }
 0x186   : > { %v1045_v7 = vmax.f32 %v1037_v62, 0.0  ;;  %v1035_v8 = vadd.f32 %v9774_v54, %v1022_v63  ;;  %v1025_v9 = vadd.f32 %v11468_v3, %v895_v61  ;;  %v12556_v63 = vld [vmem:[%s14950_s3 + $0x110] sm:$0xff]  }
 0x187   : > { %v994_v12 = vpop.f32.mrf.mxu0 }
 0x188   : > { %1053 = vst.msk [vmem:[#allocation2 + $0x110] sm:$0xff] %vm278_vm0, %v1045_v7  ;;  %v1043_v14 = vmax.f32 %v1035_v8, 0.0  ;;  %v1038_v15 = vadd.f32 %v9774_v54, %v1025_v9  ;;  %v1023_v16 = vadd.f32 %v994_v12, %v893_v4 }
 0x189   : > { %v11471_v23 = vpop.f32.mrf.mxu0 }
 0x18a   : > { %1051 = vst.msk [vmem:[#allocation2 + $0x100] sm:$0xff] %vm278_vm0, %v1043_v14  ;;  %v1046_v20 = vmax.f32 %v1038_v15, 0.0  ;;  %v1036_v24 = vadd.f32 %v9774_v54, %v1023_v16  ;;  %v1028_v25 = vadd.f32 %v11471_v23, %v898_v11  ;;  %v12559_v23 = vld [vmem:[%s14950_s3 + $0xe0] sm:$0xff]  }
 0x18b   : > { %v1007_v26 = vpop.f32.mrf.mxu0 }
 0x18c   : > { %1054 = vst.msk [vmem:[#allocation2 + $0x118] sm:$0xff] %vm278_vm0, %v1046_v20  ;;  %v1044_v21 = vmax.f32 %v1036_v24, 0.0  ;;  %v1041_v22 = vadd.f32 %v9774_v54, %v1028_v25  ;;  %v1026_v30 = vadd.f32 %v1007_v26, %v896_v17  ;;  %v12561_v24 = vld [vmem:[%s14950_s3 + $0x138] sm:$0xff]  }
 0x18d   : > { %v11472_v32 = vpop.f32.mrf.mxu0 }
 0x18e   : > { %1052 = vst.msk [vmem:[#allocation2 + $0x108] sm:$0xff] %vm278_vm0, %v1044_v21  ;;  %v1049_v36 = vmax.f32 %v1041_v22, 0.0  ;;  %v1039_v37 = vadd.f32 %v9774_v54, %v1026_v30  ;;  %v1029_v38 = vadd.f32 %v11472_v32, %v899_v29 }
 0x18f   : > { %v1010_v41 = vpop.f32.mrf.mxu0 }
 0x190   : > { %1057 = vst.msk [vmem:[#allocation2 + $0x130] sm:$0xff] %vm278_vm0, %v1049_v36  ;;  %v1047_v42 = vmax.f32 %v1039_v37, 0.0  ;;  %v1042_v43 = vadd.f32 %v9774_v54, %v1029_v38  ;;  %v1027_v44 = vadd.f32 %v1010_v41, %v897_v35  ;;  %v12562_v37 = vld [vmem:[%s14950_s3 + $0x130] sm:$0xff]  }
 0x191   : > { %v1080_v51 = vld [vmem:[#allocation2 + $0xfd] sm:$0xff] }
 0x192   : > { %1055 = vst.msk [vmem:[#allocation2 + $0x120] sm:$0xff] %vm278_vm0, %v1047_v42  ;;  %v1050_v47 = vmax.f32 %v1042_v43, 0.0  ;;  %v1040_v48 = vadd.f32 %v9774_v54, %v1027_v44  ;;  %v1059_v52 = vld [vmem:[#allocation2 + $0xfc] sm:$0xff]  ;;  %v12555_v54 = vld [vmem:[%s14950_s3 + $0xf0] sm:$0xff]   ;;  %v12563_v42 = vld [vmem:[%s14950_s3 + $0x128] sm:$0xff]  }
 0x193   : > { %v1062_v49 = vld [vmem:[#allocation2 + $0x114] sm:$0xff]  ;;  %v1303_v16 = vld [vmem:[#allocation2 + $0xfe] sm:$0xff] }
 0x194   : > { %1058 = vst.msk [vmem:[#allocation2 + $0x138] sm:$0xff] %vm278_vm0, %v1050_v47  ;;  %v1048_v50 = vmax.f32 %v1040_v48, 0.0  ;;  %v1083_v57 = vld [vmem:[#allocation2 + $0x115] sm:$0xff]  ;;  %v1433_v18 = vld [vmem:[#allocation2 + $0xff] sm:$0xff] }
 0x195   : > { %v1060_v53 = vld [vmem:[#allocation2 + $0x104] sm:$0xff]  ;;  %v1061_v55 = vld [vmem:[#allocation2 + $0x10c] sm:$0xff]  ;;  %v1306_v29 = vld [vmem:[#allocation2 + $0x116] sm:$0xff] }
 0x196   : > { %v1081_v56 = vld [vmem:[#allocation2 + $0x105] sm:$0xff]  ;;  %v1082_v58 = vld [vmem:[#allocation2 + $0x10d] sm:$0xff]  ;;  %1056 = vst.msk [vmem:[#allocation2 + $0x128] sm:$0xff] %vm278_vm0, %v1048_v50  ;;  %v1067_v60 = vpack.c.bf16 %v1060_v53, %v1059_v52  ;;  %v1068_v61 = vpack.c.bf16 %v1062_v49, %v1061_v55  ;;  %v1436_v30 = vld [vmem:[#allocation2 + $0x117] sm:$0xff] }
 0x197   : > { %v1088_v59 = vpack.c.bf16 %v1081_v56, %v1080_v51  ;;  %v1089_v62 = vpack.c.bf16 %v1083_v57, %v1082_v58  ;;  %v1304_v0 = vld [vmem:[#allocation2 + $0x106] sm:$0xff]  ;;  %v1305_v25 = vld [vmem:[#allocation2 + $0x10e] sm:$0xff]  ;;  %v1566_v56 = vld [vmem:[#allocation2 + $0x118] sm:$0xff] }
 0x198   : > { %11497 = vmatprep.mubr.msk.bf16.mxu0 %vm278_vm0, %v1067_v60  ;;  %v1311_v17 = vpack.c.bf16 %v1304_v0, %v1303_v16  ;;  %v1435_v26 = vld [vmem:[#allocation2 + $0x10f] sm:$0xff]  ;;  %v1312_v31 = vpack.c.bf16 %v1306_v29, %v1305_v25  ;;  %v12564_v51 = vld [vmem:[%s14950_s3 + $0x120] sm:$0xff]   ;;  %v12566_v0 = vld [vmem:[%s14950_s3 + $0x158] sm:$0xff]  }
 0x199   : > { %11481 = vmatprep.mubr.msk.bf16.mxu1 %vm278_vm0, %v1088_v59  ;;  %11498 = vmatmul.mubr.msk.bf16.vlgmr.msra.gmra.mxu0 %vm278_vm0, %v1068_v61  ;;  %v1063_v3 = vld [vmem:[#allocation2 + $0x11c] sm:$0xff]  ;;  %v1442_v36 = vpack.c.bf16 %v1436_v30, %v1435_v26  ;;  %v1564_v48 = vld [vmem:[#allocation2 + $0x108] sm:$0xff]  ;;  %v1565_v58 = vld [vmem:[#allocation2 + $0x110] sm:$0xff] }
 0x19a   : > { %11482 = vmatmul.mubr.msk.bf16.vlgmr.msra.gmra.mxu1 %vm278_vm0, %v1089_v62  ;;  %11522 = vmatpush3.bf16.msra.mxu0 %v13068_v6  ;;  %v1084_v4 = vld [vmem:[#allocation2 + $0x11d] sm:$0xff]  ;;  %v1572_v59 = vpack.c.bf16 %v1566_v56, %v1565_v58 }
 0x19b   : > { %11506 = vmatpush3.bf16.msra.mxu1 %v13063_v5  ;;  %11523 = vmatprep.subr.bf16.mxu0 %v12556_v63  ;;  %v1066_v7 = vld [vmem:[#allocation2 + $0x134] sm:$0xff]  ;;  %v1434_v5 = vld [vmem:[#allocation2 + $0x107] sm:$0xff]  ;;  %v1307_v32 = vld [vmem:[#allocation2 + $0x11e] sm:$0xff] }
 0x19c   : > { %11507 = vmatprep.subr.bf16.mxu1 %v12555_v54  ;;  %v1087_v11 = vld [vmem:[#allocation2 + $0x135] sm:$0xff]  ;;  %v1441_v20 = vpack.c.bf16 %v1434_v5, %v1433_v18  ;;  %v1437_v35 = vld [vmem:[#allocation2 + $0x11f] sm:$0xff] }
 0x19d   : > { %v1064_v8 = vld [vmem:[#allocation2 + $0x124] sm:$0xff]  ;;  %v1065_v9 = vld [vmem:[#allocation2 + $0x12c] sm:$0xff]  ;;  %v1310_v47 = vld [vmem:[#allocation2 + $0x136] sm:$0xff] }
 0x19e   : > { %v1085_v10 = vld [vmem:[#allocation2 + $0x125] sm:$0xff]  ;;  %v1086_v6 = vld [vmem:[#allocation2 + $0x12d] sm:$0xff]  ;;  %11524 = vmatpush3.bf16.msra.mxu0 %v12556_v63  ;;  %v1069_v13 = vpack.c.bf16 %v1064_v8, %v1063_v3  ;;  %v1070_v14 = vpack.c.bf16 %v1066_v7, %v1065_v9  ;;  %v1440_v49 = vld [vmem:[#allocation2 + $0x137] sm:$0xff] }
 0x19f   : > { %11508 = vmatpush3.bf16.msra.mxu1 %v12555_v54  ;;  %v1090_v12 = vpack.c.bf16 %v1085_v10, %v1084_v4  ;;  %v1091_v15 = vpack.c.bf16 %v1087_v11, %v1086_v6  ;;  %11525 = vmatprep.subr.bf16.mxu0 %v12558_v2  ;;  %v1308_v21 = vld [vmem:[#allocation2 + $0x126] sm:$0xff]  ;;  %v1309_v43 = vld [vmem:[#allocation2 + $0x12e] sm:$0xff]  ;;  %v1570_v62 = vld [vmem:[#allocation2 + $0x138] sm:$0xff] }
 0x1a0   : > { %11509 = vmatprep.subr.bf16.mxu1 %v12557_v1  ;;  %11501 = vmatprep.mubr.msk.bf16.mxu0 %vm278_vm0, %v1069_v13  ;;  %v1438_v22 = vld [vmem:[#allocation2 + $0x127] sm:$0xff]  ;;  %v1313_v38 = vpack.c.bf16 %v1308_v21, %v1307_v32  ;;  %v1439_v44 = vld [vmem:[#allocation2 + $0x12f] sm:$0xff]  ;;  %v1314_v50 = vpack.c.bf16 %v1310_v47, %v1309_v43  ;;  %v13162_v10 = vld [vmem:[%s14950_s3 + $0x198] sm:$0xff]  }
 0x1a1   : > { %11485 = vmatprep.mubr.msk.bf16.mxu1 %vm278_vm0, %v1090_v12  ;;  %11502 = vmatmul.mubr.msk.bf16.gmra.mxu0 %vm278_vm0, %v1070_v14  ;;  %v1443_v41 = vpack.c.bf16 %v1438_v22, %v1437_v35  ;;  %v1444_v52 = vpack.c.bf16 %v1440_v49, %v1439_v44  ;;  %v1563_v53 = vld [vmem:[#allocation2 + $0x100] sm:$0xff]  ;;  %v1568_v57 = vld [vmem:[#allocation2 + $0x128] sm:$0xff]  ;;  %v1569_v54 = vld [vmem:[#allocation2 + $0x130] sm:$0xff] }
 0x1a2   : > { %11486 = vmatmul.mubr.msk.bf16.gmra.mxu1 %vm278_vm0, %v1091_v15  ;;  %11526 = vmatpush3.bf16.msra.mxu0 %v12558_v2  ;;  %v1571_v55 = vpack.c.bf16 %v1564_v48, %v1563_v53  ;;  %v1567_v60 = vld [vmem:[#allocation2 + $0x120] sm:$0xff]  ;;  %v1574_v63 = vpack.c.bf16 %v1570_v62, %v1569_v54  ;;  %v12568_v2 = vld [vmem:[%s14950_s3 + $0x150] sm:$0xff]   ;;  %v12570_v4 = vld [vmem:[%s14950_s3 + $0x148] sm:$0xff]  }
 0x1a3   : > { %11510 = vmatpush3.bf16.msra.mxu1 %v12557_v1  ;;  %11513 = vmatprep.mubr.msk.bf16.mxu1 %vm278_vm0, %v1311_v17  ;;  %v1573_v61 = vpack.c.bf16 %v1568_v57, %v1567_v60  ;;  %v12565_v1 = vld [vmem:[%s14950_s3 + $0x178] sm:$0xff]   ;;  %v12567_v3 = vld [vmem:[%s14950_s3 + $0x170] sm:$0xff]   ;;  %v12569_v7 = vld [vmem:[%s14950_s3 + $0x168] sm:$0xff]  }
 0x1a4   : > { %11529 = vmatprep.mubr.msk.bf16.mxu0 %vm278_vm0, %v1441_v20  ;;  %11511 = vmatprep.subr.bf16.mxu1 %v12559_v23  ;;  %v12571_v8 = vld [vmem:[%s14950_s3 + $0x160] sm:$0xff]   ;;  %v13167_v5 = vld [vmem:[%s14950_s3 + $0x1b8] sm:$0xff]  }
 0x1a5   : > { %11527 = vmatprep.subr.bf16.mxu0 %v12560_v19  ;;  %v12572_v9 = vld [vmem:[%s14950_s3 + $0x140] sm:$0xff]  }
 0x1a6   : > { %11528 = vmatpush3.bf16.msra.mxu0 %v12560_v19  ;;  %v13174_v57 = vld [vmem:[%s14951_s4 + $0x1] ss:$0 sm:$0xff] }
 0x1a7   : > { %11512 = vmatpush3.bf16.msra.mxu1 %v12559_v23  ;;  %11553 = vmatprep.subr.bf16.mxu0 %v12565_v1 }
 0x1a8   : > { %11537 = vmatprep.subr.bf16.mxu1 %v12561_v24 }
 0x1a9   : > { %11530 = vmatmul.mubr.msk.bf16.vlgmr.msra.gmra.mxu0 %vm278_vm0, %v1442_v36 }
 0x1aa   : > { %11514 = vmatmul.mubr.msk.bf16.vlgmr.msra.gmra.mxu1 %vm278_vm0, %v1312_v31  ;;  %11533 = vmatprep.mubr.msk.bf16.mxu0 %vm278_vm0, %v1443_v41 }
 0x1ab   : > { %11538 = vmatpush3.bf16.msra.mxu1 %v12561_v24  ;;  %11517 = vmatprep.mubr.msk.bf16.mxu1 %vm278_vm0, %v1313_v38 }
 0x1ac   : > { %11539 = vmatprep.subr.bf16.mxu1 %v12562_v37  ;;  %11554 = vmatpush3.bf16.msra.mxu0 %v12565_v1 }
 0x1ad   : > { %11555 = vmatprep.subr.bf16.mxu0 %v12567_v3 }
 0x1af   : > { %11540 = vmatpush3.bf16.msra.mxu1 %v12562_v37 }
 0x1b0   : > { %11541 = vmatprep.subr.bf16.mxu1 %v12563_v42  ;;  %11556 = vmatpush3.bf16.msra.mxu0 %v12567_v3 }
 0x1b1   : > { %11534 = vmatmul.mubr.msk.bf16.gmra.mxu0 %vm278_vm0, %v1444_v52  ;;  %11557 = vmatprep.subr.bf16.mxu0 %v12569_v7 }
 0x1b2   : > { %11518 = vmatmul.mubr.msk.bf16.gmra.mxu1 %vm278_vm0, %v1314_v50 }
 0x1b3   : > { %11542 = vmatpush3.bf16.msra.mxu1 %v12563_v42  ;;  %11545 = vmatprep.mubr.msk.bf16.mxu1 %vm278_vm0, %v1571_v55 }
 0x1b4   : > { %11543 = vmatprep.subr.bf16.mxu1 %v12564_v51  ;;  %11558 = vmatpush3.bf16.msra.mxu0 %v12569_v7 }
 0x1b5   : > { %11559 = vmatprep.subr.bf16.mxu0 %v12571_v8 }
 0x1b7   : > { %11544 = vmatpush3.bf16.msra.mxu1 %v12564_v51 }
 0x1b8   : > { %11569 = vmatprep.subr.bf16.mxu1 %v12566_v0  ;;  %11560 = vmatpush3.bf16.msra.mxu0 %v12571_v8 }
 0x1b9   : > { %11585 = vmatprep.subr.bf16.mxu0 %v13162_v10 }
 0x1ba   : > { %11546 = vmatmul.mubr.msk.bf16.vlgmr.msra.gmra.mxu1 %vm278_vm0, %v1572_v59 }
 0x1bb   : > { %11549 = vmatprep.mubr.msk.bf16.mxu1 %vm278_vm0, %v1573_v61  ;;  %11570 = vmatpush3.bf16.msra.mxu1 %v12566_v0 }
 0x1bc   : > { %11571 = vmatprep.subr.bf16.mxu1 %v12568_v2 }
 0x1bf   : > { %11572 = vmatpush3.bf16.msra.mxu1 %v12568_v2 }
 0x1c0   : > { %11573 = vmatprep.subr.bf16.mxu1 %v12570_v4 }
 0x1c2   : > { %11550 = vmatmul.mubr.msk.bf16.gmra.mxu1 %vm278_vm0, %v1574_v63 }
 0x1c3   : > { %11574 = vmatpush3.bf16.msra.mxu1 %v12570_v4 }
 0x1c4   : > { %11575 = vmatprep.subr.bf16.mxu1 %v12572_v9 }
 0x1c7   : > { %11576 = vmatpush3.bf16.msra.mxu1 %v12572_v9 }
 0x1c8   : > { %11601 = vmatprep.subr.bf16.mxu1 %v13167_v5 }
 0x259   : > { %v11499_v6 = vpop.f32.mrf.mxu0 }
 0x25a   : > { %v11483_v11 = vpop.f32.mrf.mxu1 }
 0x25b   : > { %v1272_v13 = vpop.f32.mrf.mxu0  ;;  %v1281_v38 = vadd.f32 %v11499_v6, %v11483_v11 }
 0x25c   : > { %v1171_v12 = vpop.f32.mrf.mxu1 }
 0x25d   : > { %v11500_v15 = vpop.f32.mrf.mxu0  ;;  %v1273_v42 = vadd.f32 %v1272_v13, %v1171_v12 }
 0x25e   : > { %v11484_v14 = vpop.f32.mrf.mxu1 }
 0x25f   : > { %v1275_v17 = vpop.f32.mrf.mxu0  ;;  %v1284_v48 = vadd.f32 %v11500_v15, %v11484_v14 }
 0x260   : > { %v1174_v16 = vpop.f32.mrf.mxu1 }
 0x261   : > { %v11503_v23 = vpop.f32.mrf.mxu0  ;;  %v1276_v51 = vadd.f32 %v1275_v17, %v1174_v16 }
 0x262   : > { %v11487_v18 = vpop.f32.mrf.mxu1 }
 0x263   : > { %v1288_v20 = vpop.f32.mrf.mxu0  ;;  %v1297_v61 = vadd.f32 %v11503_v23, %v11487_v18 }
 0x264   : > { %v1187_v19 = vpop.f32.mrf.mxu1 }
 0x265   : > { %v11504_v25 = vpop.f32.mrf.mxu0  ;;  %v1289_v62 = vadd.f32 %v1288_v20, %v1187_v19 }
 0x266   : > { %v11488_v24 = vpop.f32.mrf.mxu1 }
 0x267   : > { %v1291_v29 = vpop.f32.mrf.mxu0  ;;  %v1300_v3 = vadd.f32 %v11504_v25, %v11488_v24 }
 0x268   : > { %v1190_v26 = vpop.f32.mrf.mxu1 }
 0x269   : > { %v11531_v22 = vpop.f32.mrf.mxu0  ;;  %v1292_v13 = vadd.f32 %v1291_v29, %v1190_v26 }
 0x26a   : > { %v11515_v21 = vpop.f32.mrf.mxu1 }
 0x26b   : > { %v1524_v31 = vpop.f32.mrf.mxu0  ;;  %v1427_v43 = vadd.f32 %v11515_v21, %v1281_v38 }
 0x26c   : > { %v1394_v30 = vpop.f32.mrf.mxu1 }
 0x26d   : > { %v11532_v36 = vpop.f32.mrf.mxu0  ;;  %v1425_v49 = vadd.f32 %v1394_v30, %v1273_v42  ;;  %v1557_v52 = vadd.f32 %v11531_v22, %v1427_v43 }
 0x26e   : > { %v11516_v32 = vpop.f32.mrf.mxu1 }
 0x26f   : > { %v1527_v44 = vpop.f32.mrf.mxu0  ;;  %v1428_v53 = vadd.f32 %v11516_v32, %v1284_v48  ;;  %v1555_v58 = vadd.f32 %v1524_v31, %v1425_v49 }
 0x270   : > { %v1397_v35 = vpop.f32.mrf.mxu1 }
 0x271   : > { %v11535_v55 = vpop.f32.mrf.mxu0  ;;  %v1426_v59 = vadd.f32 %v1397_v35, %v1276_v51  ;;  %v1558_v63 = vadd.f32 %v11532_v36, %v1428_v53 }
 0x272   : > { %v11519_v37 = vpop.f32.mrf.mxu1 }
 0x273   : > { %v1540_v0 = vpop.f32.mrf.mxu0  ;;  %v1431_v4 = vadd.f32 %v11519_v37, %v1297_v61  ;;  %v1556_v9 = vadd.f32 %v1527_v44, %v1426_v59  ;;  %v13219_v61 = vld [vmem:[#allocation2 + $0xf8] sm:$0xff] }
 0x274   : > { %v1410_v41 = vpop.f32.mrf.mxu1 }
 0x275   : > { %v1429_v7 = vadd.f32 %v1410_v41, %v1289_v62  ;;  %v11536_v16 = vpop.f32.mrf.mxu0  ;;  %v1561_v20 = vadd.f32 %v11535_v55, %v1431_v4 }
 0x276   : > { %v11520_v47 = vpop.f32.mrf.mxu1 }
 0x277   : > { %v1432_v14 = vadd.f32 %v11520_v47, %v1300_v3  ;;  %v1559_v24 = vadd.f32 %v1540_v0, %v1429_v7  ;;  %v1543_v35 = vpop.f32.mrf.mxu0 }
 0x278   : > { %v1413_v50 = vpop.f32.mrf.mxu1 }
 0x279   : > { %v1430_v25 = vadd.f32 %v1413_v50, %v1292_v13  ;;  %v1562_v31 = vadd.f32 %v11536_v16, %v1432_v14  ;;  %v12577_v16 = vld [vmem:[%s14950_s3 + $0x188] sm:$0xff]  }
 0x27a   : > { %v11547_v56 = vpop.f32.mrf.mxu1 }
 0x27b   : > { %v1687_v60 = vadd.f32 %v11547_v56, %v1557_v52 }
 0x27c   : > { %v1654_v54 = vpop.f32.mrf.mxu1 }
 0x27d   : > { %v1700_v1 = vadd.f32 %v13174_v57, %v1687_v60  ;;  %v1685_v2 = vadd.f32 %v1654_v54, %v1555_v58 }
 0x27e   : > { %v11548_v8 = vpop.f32.mrf.mxu1 }
 0x27f   : > { %v1708_v11 = vmax.f32 %v1700_v1, 0.0  ;;  %v1698_v6 = vadd.f32 %v13174_v57, %v1685_v2  ;;  %v1688_v12 = vadd.f32 %v11548_v8, %v1558_v63 }
 0x280   : > { %v1657_v15 = vpop.f32.mrf.mxu1 }
 0x281   : > { %v13179_v17 = vadd.f32 %v1708_v11, %v12953_v27  ;;  %v1706_v18 = vmax.f32 %v1698_v6, 0.0  ;;  %v1701_v23 = vadd.f32 %v13174_v57, %v1688_v12  ;;  %v1686_v19 = vadd.f32 %v1657_v15, %v1556_v9  ;;  %v12575_v6 = vld [vmem:[%s14950_s3 + $0x190] sm:$0xff]  }
 0x282   : > { %v11551_v21 = vpop.f32.mrf.mxu1  ;;  %v12576_v12 = vld [vmem:[%s14950_s3 + $0x1b0] sm:$0xff]  }
 0x283   : > { %v1724_v22 = vmax.f32 %v13179_v17, 0.0  ;;  %v13184_v30 = vadd.f32 %v1706_v18, %v12955_v28  ;;  %v1709_v26 = vmax.f32 %v1701_v23, 0.0  ;;  %v1699_v29 = vadd.f32 %v13174_v57, %v1686_v19  ;;  %v12578_v18 = vld [vmem:[%s14950_s3 + $0x1a8] sm:$0xff]  }
 0x284   : > { %v1691_v32 = vadd.f32 %v11551_v21, %v1561_v20  ;;  %v1670_v27 = vpop.f32.mrf.mxu1  ;;  %v1560_v28 = vadd.f32 %v1543_v35, %v1430_v25 }
 0x285   : > { %1732 = vst.msk [vmem:[#allocation2 + $0x110] sm:$0xff] %vm278_vm0, %v1724_v22  ;;  %v1722_v36 = vmax.f32 %v13184_v30, 0.0  ;;  %v13192_v37 = vadd.f32 %v1709_v26, %v12961_v33  ;;  %v1707_v38 = vmax.f32 %v1699_v29, 0.0  ;;  %v1689_v41 = vadd.f32 %v1670_v27, %v1559_v24 }
 0x286   : > { %v1704_v42 = vadd.f32 %v13174_v57, %v1691_v32  ;;  %v11552_v43 = vpop.f32.mrf.mxu1  ;;  %v12579_v32 = vld [vmem:[%s14950_s3 + $0x180] sm:$0xff]  }
 0x287   : > { %1730 = vst.msk [vmem:[#allocation2 + $0x100] sm:$0xff] %vm278_vm0, %v1722_v36  ;;  %v1725_v44 = vmax.f32 %v13192_v37, 0.0  ;;  %v13200_v47 = vadd.f32 %v1707_v38, %v12963_v34  ;;  %v1702_v48 = vadd.f32 %v13174_v57, %v1689_v41  ;;  %v1692_v49 = vadd.f32 %v11552_v43, %v1562_v31  ;;  %v12580_v38 = vld [vmem:[%s14950_s3 + $0x1a0] sm:$0xff]  }
 0x288   : > { %v1712_v33 = vmax.f32 %v1704_v42, 0.0  ;;  %v1673_v50 = vpop.f32.mrf.mxu1  ;;  %v12581_v42 = vld [vmem:[%s14950_s3 + $0x1d8] sm:$0xff]  }
 0x289   : > { %1733 = vst.msk [vmem:[#allocation2 + $0x118] sm:$0xff] %vm278_vm0, %v1725_v44  ;;  %v1723_v51 = vmax.f32 %v13200_v47, 0.0  ;;  %v1710_v52 = vmax.f32 %v1702_v48, 0.0  ;;  %v1705_v53 = vadd.f32 %v13174_v57, %v1692_v49  ;;  %v1690_v55 = vadd.f32 %v1673_v50, %v1560_v28 }
 0x28a   : > { %v13209_v56 = vadd.f32 %v1712_v33, %v12979_v46 }
 0x28b   : > { %1731 = vst.msk [vmem:[#allocation2 + $0x108] sm:$0xff] %vm278_vm0, %v1723_v51  ;;  %v13215_v34 = vadd.f32 %v1710_v52, %v12971_v40  ;;  %v1713_v58 = vmax.f32 %v1705_v53, 0.0  ;;  %v1703_v59 = vadd.f32 %v13174_v57, %v1690_v55 }
 0x28c   : > { %v1728_v60 = vmax.f32 %v13209_v56, 0.0  ;;  %v13244_v3 = vld [vmem:[#allocation2 + $0x110] sm:$0xff] }
 0x28d   : > { %v1726_v62 = vmax.f32 %v13215_v34, 0.0  ;;  %v13223_v54 = vadd.f32 %v1713_v58, %v12977_v45  ;;  %v1711_v46 = vmax.f32 %v1703_v59, 0.0  ;;  %v12582_v59 = vld [vmem:[%s14950_s3 + $0x1d0] sm:$0xff]  }
 0x28e   : > { %1736 = vst.msk [vmem:[#allocation2 + $0x130] sm:$0xff] %vm278_vm0, %v1728_v60  ;;  %v13228_v63 = vld [vmem:[#allocation2 + $0x100] sm:$0xff] }
 0x28f   : > { %1734 = vst.msk [vmem:[#allocation2 + $0x120] sm:$0xff] %vm278_vm0, %v1726_v62  ;;  %v1729_v40 = vmax.f32 %v13223_v54, 0.0  ;;  %v13235_v57 = vadd.f32 %v1711_v46, %v12969_v39  ;;  %v1746_v45 = vpack.c.bf16 %v13228_v63, %v13219_v61  ;;  %v1759_v2 = vld [vmem:[#allocation2 + $0xfa] sm:$0xff] }
 0x290   : > { %v1762_v8 = vld [vmem:[#allocation2 + $0x112] sm:$0xff]  ;;  %v2112_v27 = vld [vmem:[#allocation2 + $0xfe] sm:$0xff] }
 0x291   : > { %1737 = vst.msk [vmem:[#allocation2 + $0x138] sm:$0xff] %vm278_vm0, %v1729_v40  ;;  %v1727_v0 = vmax.f32 %v13235_v57, 0.0  ;;  %11577 = vmatprep.mubr.msk.bf16.mxu1 %vm278_vm0, %v1746_v45  ;;  %v13262_v13 = vld [vmem:[#allocation2 + $0x118] sm:$0xff] }
 0x292   : > { %v1760_v1 = vld [vmem:[#allocation2 + $0x102] sm:$0xff]  ;;  %v1761_v7 = vld [vmem:[#allocation2 + $0x10a] sm:$0xff]  ;;  %v1985_v33 = vld [vmem:[#allocation2 + $0x114] sm:$0xff] }
 0x293   : > { %1735 = vst.msk [vmem:[#allocation2 + $0x128] sm:$0xff] %vm278_vm0, %v1727_v0  ;;  %v1767_v39 = vpack.c.bf16 %v1760_v1, %v1759_v2  ;;  %v13249_v4 = vld [vmem:[#allocation2 + $0x108] sm:$0xff]  ;;  %v1768_v11 = vpack.c.bf16 %v1762_v8, %v1761_v7  ;;  %v1982_v35 = vld [vmem:[#allocation2 + $0xfc] sm:$0xff] }
 0x294   : > { %v1747_v9 = vpack.c.bf16 %v13244_v3, %v13249_v4  ;;  %v1983_v23 = vld [vmem:[#allocation2 + $0x104] sm:$0xff]  ;;  %v1984_v43 = vld [vmem:[#allocation2 + $0x10c] sm:$0xff]  ;;  %v2115_v50 = vld [vmem:[#allocation2 + $0x116] sm:$0xff] }
 0x295   : > { %11561 = vmatprep.mubr.msk.bf16.mxu0 %vm278_vm0, %v1767_v39  ;;  %v2113_v19 = vld [vmem:[#allocation2 + $0x106] sm:$0xff]  ;;  %v1990_v28 = vpack.c.bf16 %v1983_v23, %v1982_v35  ;;  %v2114_v48 = vld [vmem:[#allocation2 + $0x10e] sm:$0xff]  ;;  %v1991_v58 = vpack.c.bf16 %v1985_v33, %v1984_v43  ;;  %v12586_v23 = vld [vmem:[%s14950_s3 + $0x1f8] sm:$0xff]  }
 0x296   : > { %11578 = vmatmul.mubr.msk.bf16.vlgmr.msra.gmra.mxu1 %vm278_vm0, %v1747_v9  ;;  %11562 = vmatmul.mubr.msk.bf16.vlgmr.msra.gmra.mxu0 %vm278_vm0, %v1768_v11  ;;  %v13264_v14 = vld [vmem:[#allocation2 + $0x120] sm:$0xff]  ;;  %v2120_v41 = vpack.c.bf16 %v2113_v19, %v2112_v27  ;;  %v2121_v55 = vpack.c.bf16 %v2115_v50, %v2114_v48  ;;  %v12583_v2 = vld [vmem:[%s14950_s3 + $0x1c8] sm:$0xff]  }
 0x297   : > { %11586 = vmatpush3.bf16.msra.mxu0 %v13162_v10  ;;  %11602 = vmatpush3.bf16.msra.mxu1 %v13167_v5  ;;  %v1748_v15 = vpack.c.bf16 %v13264_v14, %v13262_v13  ;;  %v1763_v10 = vld [vmem:[#allocation2 + $0x11a] sm:$0xff]  ;;  %v13277_v5 = vld [vmem:[#allocation2 + $0x130] sm:$0xff]  ;;  %v12590_v19 = vld [vmem:[%s14950_s3 + $0x1e8] sm:$0xff]  }
 0x298   : > { %11587 = vmatprep.subr.bf16.mxu0 %v12575_v6  ;;  %11603 = vmatprep.subr.bf16.mxu1 %v12576_v12  ;;  %v1766_v26 = vld [vmem:[#allocation2 + $0x132] sm:$0xff]  ;;  %v2116_v53 = vld [vmem:[#allocation2 + $0x11e] sm:$0xff] }
 0x299   : > { %11581 = vmatprep.mubr.msk.bf16.mxu1 %vm278_vm0, %v1748_v15  ;;  %v1986_v46 = vld [vmem:[#allocation2 + $0x11c] sm:$0xff]  ;;  %v1989_v8 = vld [vmem:[#allocation2 + $0x134] sm:$0xff]  ;;  %v2250_v15 = vpack.c.bf16 %v13249_v4, %v13228_v63 }
 0x29a   : > { %v1764_v20 = vld [vmem:[#allocation2 + $0x122] sm:$0xff]  ;;  %v1765_v21 = vld [vmem:[#allocation2 + $0x12a] sm:$0xff]  ;;  %v2119_v9 = vld [vmem:[#allocation2 + $0x136] sm:$0xff] }
 0x29b   : > { %11588 = vmatpush3.bf16.msra.mxu0 %v12575_v6  ;;  %11604 = vmatpush3.bf16.msra.mxu1 %v12576_v12  ;;  %v1769_v24 = vpack.c.bf16 %v1764_v20, %v1763_v10  ;;  %v13279_v25 = vld [vmem:[#allocation2 + $0x128] sm:$0xff]  ;;  %v1770_v31 = vpack.c.bf16 %v1766_v26, %v1765_v21  ;;  %v12584_v12 = vld [vmem:[%s14950_s3 + $0x1c0] sm:$0xff]   ;;  %v2249_v63 = vld [vmem:[#allocation2 + $0x138] sm:$0xff] }
 0x29c   : > { %v1749_v29 = vpack.c.bf16 %v13277_v5, %v13279_v25  ;;  %11589 = vmatprep.subr.bf16.mxu0 %v12577_v16  ;;  %11605 = vmatprep.subr.bf16.mxu1 %v12578_v18  ;;  %v2117_v49 = vld [vmem:[#allocation2 + $0x126] sm:$0xff]  ;;  %v2118_v7 = vld [vmem:[#allocation2 + $0x12e] sm:$0xff]  ;;  %v2253_v4 = vpack.c.bf16 %v2249_v63, %v13277_v5 }
 0x29d   : > { %11565 = vmatprep.mubr.msk.bf16.mxu0 %vm278_vm0, %v1769_v24  ;;  %v1987_v52 = vld [vmem:[#allocation2 + $0x124] sm:$0xff]  ;;  %v2122_v45 = vpack.c.bf16 %v2117_v49, %v2116_v53  ;;  %v1988_v39 = vld [vmem:[#allocation2 + $0x12c] sm:$0xff]  ;;  %v2123_v11 = vpack.c.bf16 %v2119_v9, %v2118_v7  ;;  %v13350_v24 = vld [vmem:[%s14950_s3 + $0x238] sm:$0xff]  }
 0x29e   : > { %11582 = vmatmul.mubr.msk.bf16.gmra.mxu1 %vm278_vm0, %v1749_v29  ;;  %11566 = vmatmul.mubr.msk.bf16.gmra.mxu0 %vm278_vm0, %v1770_v31  ;;  %v1992_v1 = vpack.c.bf16 %v1987_v52, %v1986_v46  ;;  %v1993_v6 = vpack.c.bf16 %v1989_v8, %v1988_v39  ;;  %v12589_v10 = vld [vmem:[%s14950_s3 + $0x208] sm:$0xff]   ;;  %v12591_v20 = vld [vmem:[%s14950_s3 + $0x200] sm:$0xff]  }
 0x29f   : > { %11590 = vmatpush3.bf16.msra.mxu0 %v12577_v16  ;;  %11606 = vmatpush3.bf16.msra.mxu1 %v12578_v18  ;;  %v2251_v16 = vpack.c.bf16 %v13262_v13, %v13244_v3  ;;  %v2252_v18 = vpack.c.bf16 %v13279_v25, %v13264_v14  ;;  %v12585_v3 = vld [vmem:[%s14950_s3 + $0x218] sm:$0xff]   ;;  %v12588_v13 = vld [vmem:[%s14950_s3 + $0x1f0] sm:$0xff]   ;;  %v12592_v5 = vld [vmem:[%s14950_s3 + $0x1e0] sm:$0xff]  }
 0x2a0   : > { %11609 = vmatprep.mubr.msk.bf16.mxu1 %vm278_vm0, %v2120_v41  ;;  %11593 = vmatprep.mubr.msk.bf16.mxu0 %vm278_vm0, %v1990_v28  ;;  %v12587_v14 = vld [vmem:[%s14950_s3 + $0x210] sm:$0xff]   ;;  %v13355_v25 = vld [vmem:[%s14950_s3 + $0x258] sm:$0xff]  }
 0x2a1   : > { %11591 = vmatprep.subr.bf16.mxu0 %v12579_v32  ;;  %11607 = vmatprep.subr.bf16.mxu1 %v12580_v38 }
 0x2a3   : > { %11592 = vmatpush3.bf16.msra.mxu0 %v12579_v32  ;;  %11608 = vmatpush3.bf16.msra.mxu1 %v12580_v38 }
 0x2a4   : > { %11617 = vmatprep.subr.bf16.mxu0 %v12581_v42  ;;  %11633 = vmatprep.subr.bf16.mxu1 %v12585_v3 }
 0x2a6   : > { %11610 = vmatmul.mubr.msk.bf16.vlgmr.msra.gmra.mxu1 %vm278_vm0, %v2121_v55  ;;  %11594 = vmatmul.mubr.msk.bf16.vlgmr.msra.gmra.mxu0 %vm278_vm0, %v1991_v58 }
 0x2a7   : > { %11613 = vmatprep.mubr.msk.bf16.mxu1 %vm278_vm0, %v2122_v45  ;;  %11618 = vmatpush3.bf16.msra.mxu0 %v12581_v42 }
 0x2a8   : > { %11597 = vmatprep.mubr.msk.bf16.mxu0 %vm278_vm0, %v1992_v1  ;;  %11619 = vmatprep.subr.bf16.mxu0 %v12582_v59 }
 0x2a9   : > { %11634 = vmatpush3.bf16.msra.mxu1 %v12585_v3 }
 0x2aa   : > { %11635 = vmatprep.subr.bf16.mxu1 %v12587_v14 }
 0x2ab   : > { %11620 = vmatpush3.bf16.msra.mxu0 %v12582_v59 }
 0x2ac   : > { %11621 = vmatprep.subr.bf16.mxu0 %v12583_v2 }
 0x2ad   : > { %11636 = vmatpush3.bf16.msra.mxu1 %v12587_v14 }
 0x2ae   : > { %11614 = vmatmul.mubr.msk.bf16.gmra.mxu1 %vm278_vm0, %v2123_v11  ;;  %11598 = vmatmul.mubr.msk.bf16.gmra.mxu0 %vm278_vm0, %v1993_v6 }
 0x2af   : > { %11622 = vmatpush3.bf16.msra.mxu0 %v12583_v2  ;;  %11625 = vmatprep.mubr.msk.bf16.mxu0 %vm278_vm0, %v2250_v15 }
 0x2b0   : > { %11623 = vmatprep.subr.bf16.mxu0 %v12584_v12  ;;  %11637 = vmatprep.subr.bf16.mxu1 %v12589_v10 }
 0x2b1   : > { %11638 = vmatpush3.bf16.msra.mxu1 %v12589_v10 }
 0x2b2   : > { %11639 = vmatprep.subr.bf16.mxu1 %v12591_v20 }
 0x2b3   : > { %11624 = vmatpush3.bf16.msra.mxu0 %v12584_v12 }
 0x2b4   : > { %11649 = vmatprep.subr.bf16.mxu0 %v12586_v23 }
 0x2b5   : > { %11640 = vmatpush3.bf16.msra.mxu1 %v12591_v20 }
 0x2b6   : > { %11626 = vmatmul.mubr.msk.bf16.vlgmr.msra.gmra.mxu0 %vm278_vm0, %v2251_v16  ;;  %11665 = vmatprep.subr.bf16.mxu1 %v13350_v24 }
 0x2b7   : > { %11629 = vmatprep.mubr.msk.bf16.mxu0 %vm278_vm0, %v2252_v18  ;;  %11650 = vmatpush3.bf16.msra.mxu0 %v12586_v23 }
 0x2b8   : > { %11651 = vmatprep.subr.bf16.mxu0 %v12588_v13 }
 0x2bb   : > { %11652 = vmatpush3.bf16.msra.mxu0 %v12588_v13  ;;  %v9936_v13 = vld [vmem:[%s14951_s4 + $0x2] ss:$0 sm:$0xff] }
 0x2bc   : > { %11653 = vmatprep.subr.bf16.mxu0 %v12590_v19 }
 0x2be   : > { %11630 = vmatmul.mubr.msk.bf16.gmra.mxu0 %vm278_vm0, %v2253_v4 }
 0x2bf   : > { %11654 = vmatpush3.bf16.msra.mxu0 %v12590_v19 }
 0x2c0   : > { %11655 = vmatprep.subr.bf16.mxu0 %v12592_v5 }
 0x2c3   : > { %11656 = vmatpush3.bf16.msra.mxu0 %v12592_v5 }
 0x2c4   : > { %11681 = vmatprep.subr.bf16.mxu0 %v13355_v25 }
 0x356   : > { %v11579_v21 = vpop.f32.mrf.mxu1  ;;  %v11563_v26 = vpop.f32.mrf.mxu0 }
 0x357   : > { %v1960_v2 = vadd.f32 %v11579_v21, %v11563_v26 }
 0x358   : > { %v1951_v29 = vpop.f32.mrf.mxu1  ;;  %v1850_v31 = vpop.f32.mrf.mxu0 }
 0x359   : > { %v1952_v7 = vadd.f32 %v1951_v29, %v1850_v31 }
 0x35a   : > { %v11580_v32 = vpop.f32.mrf.mxu1  ;;  %v11564_v27 = vpop.f32.mrf.mxu0 }
 0x35b   : > { %v1963_v6 = vadd.f32 %v11580_v32, %v11564_v27 }
 0x35c   : > { %v1954_v35 = vpop.f32.mrf.mxu1  ;;  %v1853_v38 = vpop.f32.mrf.mxu0 }
 0x35d   : > { %v1955_v16 = vadd.f32 %v1954_v35, %v1853_v38 }
 0x35e   : > { %v11583_v41 = vpop.f32.mrf.mxu1  ;;  %v11567_v28 = vpop.f32.mrf.mxu0 }
 0x35f   : > { %v1976_v4 = vadd.f32 %v11583_v41, %v11567_v28 }
 0x360   : > { %v1967_v42 = vpop.f32.mrf.mxu1  ;;  %v1866_v43 = vpop.f32.mrf.mxu0 }
 0x361   : > { %v1968_v20 = vadd.f32 %v1967_v42, %v1866_v43 }
 0x362   : > { %v11584_v48 = vpop.f32.mrf.mxu1  ;;  %v11568_v49 = vpop.f32.mrf.mxu0 }
 0x363   : > { %v1979_v32 = vadd.f32 %v11584_v48, %v11568_v49 }
 0x364   : > { %v1970_v33 = vpop.f32.mrf.mxu1  ;;  %v1869_v50 = vpop.f32.mrf.mxu0 }
 0x366   : > { %v11611_v52 = vpop.f32.mrf.mxu1  ;;  %v11595_v53 = vpop.f32.mrf.mxu0 }
 0x367   : > { %v2106_v8 = vadd.f32 %v11595_v53, %v1960_v2 }
 0x368   : > { %v2073_v55 = vpop.f32.mrf.mxu0  ;;  %v2203_v58 = vpop.f32.mrf.mxu1 }
 0x369   : > { %v2104_v12 = vadd.f32 %v2073_v55, %v1952_v7  ;;  %v2236_v63 = vadd.f32 %v11611_v52, %v2106_v8  ;;  %v1971_v55 = vadd.f32 %v1970_v33, %v1869_v50 }
 0x36a   : > { %v11596_v59 = vpop.f32.mrf.mxu0  ;;  %v11612_v45 = vpop.f32.mrf.mxu1 }
 0x36b   : > { %v2107_v18 = vadd.f32 %v11596_v59, %v1963_v6  ;;  %v2234_v10 = vadd.f32 %v2203_v58, %v2104_v12 }
 0x36c   : > { %v2076_v46 = vpop.f32.mrf.mxu0  ;;  %v2206_v9 = vpop.f32.mrf.mxu1 }
 0x36d   : > { %v2105_v14 = vadd.f32 %v2076_v46, %v1955_v16  ;;  %v2237_v31 = vadd.f32 %v11612_v45, %v2107_v18 }
 0x36e   : > { %v11599_v1 = vpop.f32.mrf.mxu0  ;;  %v11615_v23 = vpop.f32.mrf.mxu1 }
 0x36f   : > { %v2110_v5 = vadd.f32 %v11599_v1, %v1976_v4  ;;  %v2235_v53 = vadd.f32 %v2206_v9, %v2105_v14 }
 0x370   : > { %v2089_v39 = vpop.f32.mrf.mxu0  ;;  %v2219_v27 = vpop.f32.mrf.mxu1 }
 0x371   : > { %v2108_v35 = vadd.f32 %v2089_v39, %v1968_v20  ;;  %v2240_v2 = vadd.f32 %v11615_v23, %v2110_v5 }
 0x372   : > { %v11600_v11 = vpop.f32.mrf.mxu0  ;;  %v11616_v1 = vpop.f32.mrf.mxu1 }
 0x373   : > { %v2111_v46 = vadd.f32 %v11600_v11, %v1979_v32  ;;  %v2238_v45 = vadd.f32 %v2219_v27, %v2108_v35 }
 0x374   : > { %v2092_v15 = vpop.f32.mrf.mxu0  ;;  %v2222_v12 = vpop.f32.mrf.mxu1 }
 0x375   : > { %v2109_v48 = vadd.f32 %v2092_v15, %v1971_v55  ;;  %v2241_v11 = vadd.f32 %v11616_v1, %v2111_v46  ;;  %v12597_v46 = vld [vmem:[%s14950_s3 + $0x228] sm:$0xff]  }
 0x376   : > { %v11627_v3 = vpop.f32.mrf.mxu0 }
 0x377   : > { %v2366_v19 = vadd.f32 %v11627_v3, %v2236_v63  ;;  %v2239_v15 = vadd.f32 %v2222_v12, %v2109_v48 }
 0x378   : > { %v2333_v21 = vpop.f32.mrf.mxu0 }
 0x379   : > { %v2379_v26 = vadd.f32 %v9936_v13, %v2366_v19  ;;  %v2364_v29 = vadd.f32 %v2333_v21, %v2234_v10 }
 0x37a   : > { %v11628_v38 = vpop.f32.mrf.mxu0 }
 0x37b   : > { %v2387_v41 = vmax.f32 %v2379_v26, 0.0  ;;  %v2377_v28 = vadd.f32 %v9936_v13, %v2364_v29  ;;  %v2367_v52 = vadd.f32 %v11628_v38, %v2237_v31 }
 0x37c   : > { %v2336_v59 = vpop.f32.mrf.mxu0 }
 0x37d   : > { %2395 = vst.msk [vmem:[#allocation2 + $0x110] sm:$0xff] %vm278_vm0, %v2387_v41  ;;  %v2385_v42 = vmax.f32 %v2377_v28, 0.0  ;;  %v2380_v43 = vadd.f32 %v9936_v13, %v2367_v52  ;;  %v2365_v58 = vadd.f32 %v2336_v59, %v2235_v53  ;;  %v12596_v28 = vld [vmem:[%s14950_s3 + $0x250] sm:$0xff]  }
 0x37e   : > { %v11631_v7 = vpop.f32.mrf.mxu0  ;;  %v12595_v52 = vld [vmem:[%s14950_s3 + $0x230] sm:$0xff]  }
 0x37f   : > { %2393 = vst.msk [vmem:[#allocation2 + $0x100] sm:$0xff] %vm278_vm0, %v2385_v42  ;;  %v2388_v49 = vmax.f32 %v2380_v43, 0.0  ;;  %v2378_v39 = vadd.f32 %v9936_v13, %v2365_v58  ;;  %v2370_v8 = vadd.f32 %v11631_v7, %v2240_v2  ;;  %v12598_v2 = vld [vmem:[%s14950_s3 + $0x248] sm:$0xff]  }
 0x380   : > { %v2349_v6 = vpop.f32.mrf.mxu0 }
 0x381   : > { %2396 = vst.msk [vmem:[#allocation2 + $0x118] sm:$0xff] %vm278_vm0, %v2388_v49  ;;  %v2386_v33 = vmax.f32 %v2378_v39, 0.0  ;;  %v2383_v50 = vadd.f32 %v9936_v13, %v2370_v8  ;;  %v2368_v9 = vadd.f32 %v2349_v6, %v2238_v45  ;;  %v12599_v6 = vld [vmem:[%s14950_s3 + $0x220] sm:$0xff]  }
 0x382   : > { %v11632_v16 = vpop.f32.mrf.mxu0 }
 0x383   : > { %2394 = vst.msk [vmem:[#allocation2 + $0x108] sm:$0xff] %vm278_vm0, %v2386_v33  ;;  %v2391_v18 = vmax.f32 %v2383_v50, 0.0  ;;  %v2381_v63 = vadd.f32 %v9936_v13, %v2368_v9  ;;  %v2371_v4 = vadd.f32 %v11632_v16, %v2241_v11  ;;  %v12600_v9 = vld [vmem:[%s14950_s3 + $0x240] sm:$0xff]   ;;  %v12601_v16 = vld [vmem:[%s14950_s3 + $0x278] sm:$0xff]  }
 0x384   : > { %v2352_v23 = vpop.f32.mrf.mxu0  ;;  %v13374_v31 = vld [vmem:[#allocation2 + $0x110] sm:$0xff] }
 0x385   : > { %2399 = vst.msk [vmem:[#allocation2 + $0x130] sm:$0xff] %vm278_vm0, %v2391_v18  ;;  %v2389_v3 = vmax.f32 %v2381_v63, 0.0  ;;  %v2384_v14 = vadd.f32 %v9936_v13, %v2371_v4  ;;  %v2369_v19 = vadd.f32 %v2352_v23, %v2239_v15 }
 0x386   : > { %v13367_v10 = vld [vmem:[#allocation2 + $0x100] sm:$0xff] }
 0x387   : > { %2397 = vst.msk [vmem:[#allocation2 + $0x120] sm:$0xff] %vm278_vm0, %v2389_v3  ;;  %v2392_v20 = vmax.f32 %v2384_v14, 0.0  ;;  %v2382_v5 = vadd.f32 %v9936_v13, %v2369_v19  ;;  %v2409_v21 = vpack.c.bf16 %v13367_v10, %v13219_v61  ;;  %v2422_v29 = vld [vmem:[#allocation2 + $0xfa] sm:$0xff] }
 0x388   : > { %v2425_v32 = vld [vmem:[#allocation2 + $0x112] sm:$0xff]  ;;  %v2775_v8 = vld [vmem:[#allocation2 + $0xfe] sm:$0xff] }
 0x389   : > { %2400 = vst.msk [vmem:[#allocation2 + $0x138] sm:$0xff] %vm278_vm0, %v2392_v20  ;;  %v2390_v26 = vmax.f32 %v2382_v5, 0.0  ;;  %11657 = vmatprep.mubr.msk.bf16.mxu0 %vm278_vm0, %v2409_v21  ;;  %v13391_v53 = vld [vmem:[#allocation2 + $0x118] sm:$0xff]  ;;  %v12602_v21 = vld [vmem:[%s14950_s3 + $0x270] sm:$0xff]  }
 0x38a   : > { %v2423_v27 = vld [vmem:[#allocation2 + $0x102] sm:$0xff]  ;;  %v2424_v38 = vld [vmem:[#allocation2 + $0x10a] sm:$0xff]  ;;  %v2778_v4 = vld [vmem:[#allocation2 + $0x116] sm:$0xff] }
 0x38b   : > { %v13376_v35 = vld [vmem:[#allocation2 + $0x108] sm:$0xff]  ;;  %2398 = vst.msk [vmem:[#allocation2 + $0x128] sm:$0xff] %vm278_vm0, %v2390_v26  ;;  %v2430_v41 = vpack.c.bf16 %v2423_v27, %v2422_v29  ;;  %v2431_v61 = vpack.c.bf16 %v2425_v32, %v2424_v38  ;;  %v2645_v50 = vld [vmem:[#allocation2 + $0xfc] sm:$0xff]  ;;  %v2648_v3 = vld [vmem:[#allocation2 + $0x114] sm:$0xff] }
 0x38c   : > { %v2410_v13 = vpack.c.bf16 %v13374_v31, %v13376_v35  ;;  %v13405_v43 = vld [vmem:[#allocation2 + $0x130] sm:$0xff]  ;;  %v2646_v39 = vld [vmem:[#allocation2 + $0x104] sm:$0xff] }
 0x38d   : > { %11641 = vmatprep.mubr.msk.bf16.mxu1 %vm278_vm0, %v2430_v41  ;;  %v2653_v11 = vpack.c.bf16 %v2646_v39, %v2645_v50  ;;  %v2777_v12 = vld [vmem:[#allocation2 + $0x10e] sm:$0xff] }
 0x38e   : > { %11658 = vmatmul.mubr.msk.bf16.vlgmr.msra.gmra.mxu0 %vm278_vm0, %v2410_v13  ;;  %11642 = vmatmul.mubr.msk.bf16.vlgmr.msra.gmra.mxu1 %vm278_vm0, %v2431_v61  ;;  %v13393_v55 = vld [vmem:[#allocation2 + $0x120] sm:$0xff]  ;;  %v2647_v18 = vld [vmem:[#allocation2 + $0x10c] sm:$0xff]  ;;  %v2784_v23 = vpack.c.bf16 %v2778_v4, %v2777_v12 }
 0x38f   : > { %11682 = vmatpush3.bf16.msra.mxu0 %v13355_v25  ;;  %11666 = vmatpush3.bf16.msra.mxu1 %v13350_v24  ;;  %v2411_v59 = vpack.c.bf16 %v13393_v55, %v13391_v53  ;;  %v2776_v25 = vld [vmem:[#allocation2 + $0x106] sm:$0xff]  ;;  %v2426_v42 = vld [vmem:[#allocation2 + $0x11a] sm:$0xff]  ;;  %v2654_v19 = vpack.c.bf16 %v2648_v3, %v2647_v18 }
 0x390   : > { %11683 = vmatprep.subr.bf16.mxu0 %v12596_v28  ;;  %11667 = vmatprep.subr.bf16.mxu1 %v12595_v52  ;;  %v2429_v24 = vld [vmem:[#allocation2 + $0x132] sm:$0xff]  ;;  %v2783_v33 = vpack.c.bf16 %v2776_v25, %v2775_v8  ;;  %v2779_v14 = vld [vmem:[#allocation2 + $0x11e] sm:$0xff]  ;;  %v12603_v32 = vld [vmem:[%s14950_s3 + $0x268] sm:$0xff]  }
 0x391   : > { %11661 = vmatprep.mubr.msk.bf16.mxu0 %vm278_vm0, %v2411_v59  ;;  %v2649_v5 = vld [vmem:[#allocation2 + $0x11c] sm:$0xff]  ;;  %v2652_v13 = vld [vmem:[#allocation2 + $0x134] sm:$0xff]  ;;  %v2914_v59 = vpack.c.bf16 %v13391_v53, %v13374_v31  ;;  %v12609_v25 = vld [vmem:[%s14950_s3 + $0x2a8] sm:$0xff]  }
 0x392   : > { %v2427_v58 = vld [vmem:[#allocation2 + $0x122] sm:$0xff]  ;;  %v2428_v7 = vld [vmem:[#allocation2 + $0x12a] sm:$0xff]  ;;  %v2782_v38 = vld [vmem:[#allocation2 + $0x136] sm:$0xff] }
 0x393   : > { %11684 = vmatpush3.bf16.msra.mxu0 %v12596_v28  ;;  %v13407_v1 = vld [vmem:[#allocation2 + $0x128] sm:$0xff]  ;;  %11668 = vmatpush3.bf16.msra.mxu1 %v12595_v52  ;;  %v2432_v45 = vpack.c.bf16 %v2427_v58, %v2426_v42  ;;  %v2433_v49 = vpack.c.bf16 %v2429_v24, %v2428_v7  ;;  %v12604_v28 = vld [vmem:[%s14950_s3 + $0x260] sm:$0xff]   ;;  %v2913_v52 = vpack.c.bf16 %v13376_v35, %v13367_v10  ;;  %v12605_v35 = vld [vmem:[%s14950_s3 + $0x2b8] sm:$0xff]  }
 0x394   : > { %v2412_v48 = vpack.c.bf16 %v13405_v43, %v13407_v1  ;;  %11685 = vmatprep.subr.bf16.mxu0 %v12598_v2  ;;  %11669 = vmatprep.subr.bf16.mxu1 %v12597_v46  ;;  %v2780_v63 = vld [vmem:[#allocation2 + $0x126] sm:$0xff]  ;;  %v2781_v29 = vld [vmem:[#allocation2 + $0x12e] sm:$0xff]  ;;  %v12606_v31 = vld [vmem:[%s14950_s3 + $0x298] sm:$0xff]  }
 0x395   : > { %11645 = vmatprep.mubr.msk.bf16.mxu1 %vm278_vm0, %v2432_v45  ;;  %v2650_v15 = vld [vmem:[#allocation2 + $0x124] sm:$0xff]  ;;  %v2785_v20 = vpack.c.bf16 %v2780_v63, %v2779_v14  ;;  %v2651_v27 = vld [vmem:[#allocation2 + $0x12c] sm:$0xff]  ;;  %v2786_v41 = vpack.c.bf16 %v2782_v38, %v2781_v29  ;;  %v13480_v7 = vld [vmem:[%s14950_s3 + $0x2d8] sm:$0xff]  }
 0x396   : > { %11662 = vmatmul.mubr.msk.bf16.gmra.mxu0 %vm278_vm0, %v2412_v48  ;;  %11646 = vmatmul.mubr.msk.bf16.gmra.mxu1 %vm278_vm0, %v2433_v49  ;;  %v2655_v26 = vpack.c.bf16 %v2650_v15, %v2649_v5  ;;  %v2656_v61 = vpack.c.bf16 %v2652_v13, %v2651_v27  ;;  %v12607_v53 = vld [vmem:[%s14950_s3 + $0x2b0] sm:$0xff]   ;;  %v12610_v42 = vld [vmem:[%s14950_s3 + $0x288] sm:$0xff]   ;;  %v12612_v24 = vld [vmem:[%s14950_s3 + $0x280] sm:$0xff]  }
 0x397   : > { %11686 = vmatpush3.bf16.msra.mxu0 %v12598_v2  ;;  %11670 = vmatpush3.bf16.msra.mxu1 %v12597_v46  ;;  %v2915_v2 = vpack.c.bf16 %v13407_v1, %v13393_v55  ;;  %v2912_v46 = vld [vmem:[#allocation2 + $0x138] sm:$0xff]  ;;  %v12608_v55 = vld [vmem:[%s14950_s3 + $0x290] sm:$0xff]  }
 0x398   : > { %11689 = vmatprep.mubr.msk.bf16.mxu0 %vm278_vm0, %v2783_v33  ;;  %11673 = vmatprep.mubr.msk.bf16.mxu1 %vm278_vm0, %v2653_v11  ;;  %v2916_v10 = vpack.c.bf16 %v2912_v46, %v13405_v43  ;;  %v12611_v43 = vld [vmem:[%s14950_s3 + $0x2a0] sm:$0xff]   ;;  %v3080_v58 = vld [vmem:[#allocation2 + $0xf0] sm:$0xff]  ;;  %v13475_v1 = vld [vmem:[#allocation2 + $0xf8] sm:$0xff] }
 0x399   : > { %11671 = vmatprep.subr.bf16.mxu1 %v12599_v6  ;;  %11687 = vmatprep.subr.bf16.mxu0 %v12600_v9  ;;  %v13483_v45 = vpack.c.bf16 %v13475_v1, %v3080_v58  ;;  %v13488_v48 = vld [vmem:[%s14950_s3 + $0x2f8] sm:$0xff]  }
 0x39b   : > { %11688 = vmatpush3.bf16.msra.mxu0 %v12600_v9  ;;  %11672 = vmatpush3.bf16.msra.mxu1 %v12599_v6 }
 0x39c   : > { %11697 = vmatprep.subr.bf16.mxu1 %v12601_v16  ;;  %11713 = vmatprep.subr.bf16.mxu0 %v12605_v35 }
 0x39e   : > { %11690 = vmatmul.mubr.msk.bf16.vlgmr.msra.gmra.mxu0 %vm278_vm0, %v2784_v23  ;;  %11674 = vmatmul.mubr.msk.bf16.vlgmr.msra.gmra.mxu1 %vm278_vm0, %v2654_v19 }
 0x39f   : > { %11693 = vmatprep.mubr.msk.bf16.mxu0 %vm278_vm0, %v2785_v20  ;;  %11698 = vmatpush3.bf16.msra.mxu1 %v12601_v16 }
 0x3a0   : > { %11677 = vmatprep.mubr.msk.bf16.mxu1 %vm278_vm0, %v2655_v26  ;;  %11699 = vmatprep.subr.bf16.mxu1 %v12602_v21 }
 0x3a1   : > { %11714 = vmatpush3.bf16.msra.mxu0 %v12605_v35 }
 0x3a2   : > { %11715 = vmatprep.subr.bf16.mxu0 %v12607_v53 }
 0x3a3   : > { %11700 = vmatpush3.bf16.msra.mxu1 %v12602_v21 }
 0x3a4   : > { %11701 = vmatprep.subr.bf16.mxu1 %v12603_v32 }
 0x3a5   : > { %11716 = vmatpush3.bf16.msra.mxu0 %v12607_v53 }
 0x3a6   : > { %11694 = vmatmul.mubr.msk.bf16.gmra.mxu0 %vm278_vm0, %v2786_v41  ;;  %11678 = vmatmul.mubr.msk.bf16.gmra.mxu1 %vm278_vm0, %v2656_v61 }
 0x3a7   : > { %11702 = vmatpush3.bf16.msra.mxu1 %v12603_v32  ;;  %11705 = vmatprep.mubr.msk.bf16.mxu1 %vm278_vm0, %v2913_v52 }
 0x3a8   : > { %11703 = vmatprep.subr.bf16.mxu1 %v12604_v28  ;;  %11717 = vmatprep.subr.bf16.mxu0 %v12609_v25 }
 0x3a9   : > { %11718 = vmatpush3.bf16.msra.mxu0 %v12609_v25 }
 0x3aa   : > { %11719 = vmatprep.subr.bf16.mxu0 %v12611_v43 }
 0x3ab   : > { %11704 = vmatpush3.bf16.msra.mxu1 %v12604_v28 }
 0x3ac   : > { %11729 = vmatprep.subr.bf16.mxu1 %v12606_v31 }
 0x3ad   : > { %11720 = vmatpush3.bf16.msra.mxu0 %v12611_v43 }
 0x3ae   : > { %11706 = vmatmul.mubr.msk.bf16.vlgmr.msra.gmra.mxu1 %vm278_vm0, %v2914_v59  ;;  %11745 = vmatprep.subr.bf16.mxu0 %v13480_v7 }
 0x3af   : > { %11709 = vmatprep.mubr.msk.bf16.mxu1 %vm278_vm0, %v2915_v2  ;;  %11730 = vmatpush3.bf16.msra.mxu1 %v12606_v31 }
 0x3b0   : > { %11731 = vmatprep.subr.bf16.mxu1 %v12608_v55 }
 0x3b3   : > { %11732 = vmatpush3.bf16.msra.mxu1 %v12608_v55  ;;  %v13497_v55 = vld [vmem:[%s14951_s4 + $0x3] ss:$0 sm:$0xff] }
 0x3b4   : > { %11733 = vmatprep.subr.bf16.mxu1 %v12610_v42 }
 0x3b6   : > { %11710 = vmatmul.mubr.msk.bf16.gmra.mxu1 %vm278_vm0, %v2916_v10 }
 0x3b7   : > { %11734 = vmatpush3.bf16.msra.mxu1 %v12610_v42  ;;  %11737 = vmatprep.mubr.msk.bf16.mxu1 %vm278_vm0, %v13483_v45 }
 0x3b8   : > { %11735 = vmatprep.subr.bf16.mxu1 %v12612_v24 }
 0x3bb   : > { %11736 = vmatpush3.bf16.msra.mxu1 %v12612_v24 }
 0x3bc   : > { %11761 = vmatprep.subr.bf16.mxu1 %v13488_v48 }
 0x44e   : > { %v11659_v49 = vpop.f32.mrf.mxu0  ;;  %v11643_v39 = vpop.f32.mrf.mxu1 }
 0x44f   : > { %v2623_v27 = vadd.f32 %v11659_v49, %v11643_v39 }
 0x450   : > { %v2614_v8 = vpop.f32.mrf.mxu0  ;;  %v2513_v6 = vpop.f32.mrf.mxu1 }
 0x451   : > { %v2615_v41 = vadd.f32 %v2614_v8, %v2513_v6 }
 0x452   : > { %v11660_v33 = vpop.f32.mrf.mxu0  ;;  %v11644_v50 = vpop.f32.mrf.mxu1 }
 0x453   : > { %v2626_v52 = vadd.f32 %v11660_v33, %v11644_v50 }
 0x454   : > { %v2617_v9 = vpop.f32.mrf.mxu0  ;;  %v2516_v11 = vpop.f32.mrf.mxu1 }
 0x455   : > { %v2618_v46 = vadd.f32 %v2617_v9, %v2516_v11 }
 0x456   : > { %v11663_v12 = vpop.f32.mrf.mxu0  ;;  %v11647_v16 = vpop.f32.mrf.mxu1 }
 0x457   : > { %v2639_v24 = vadd.f32 %v11663_v12, %v11647_v16 }
 0x458   : > { %v2630_v18 = vpop.f32.mrf.mxu0  ;;  %v2529_v63 = vpop.f32.mrf.mxu1 }
 0x459   : > { %v2631_v58 = vadd.f32 %v2630_v18, %v2529_v63 }
 0x45a   : > { %v11664_v4 = vpop.f32.mrf.mxu0  ;;  %v11648_v15 = vpop.f32.mrf.mxu1 }
 0x45b   : > { %v2642_v50 = vadd.f32 %v11664_v4, %v11648_v15 }
 0x45c   : > { %v2633_v23 = vpop.f32.mrf.mxu0  ;;  %v2532_v3 = vpop.f32.mrf.mxu1 }
 0x45e   : > { %v11691_v14 = vpop.f32.mrf.mxu0  ;;  %v11675_v19 = vpop.f32.mrf.mxu1 }
 0x45f   : > { %v2769_v13 = vadd.f32 %v11675_v19, %v2623_v27 }
 0x460   : > { %v2736_v20 = vpop.f32.mrf.mxu1  ;;  %v2866_v5 = vpop.f32.mrf.mxu0 }
 0x461   : > { %v2767_v59 = vadd.f32 %v2736_v20, %v2615_v41  ;;  %v2899_v31 = vadd.f32 %v11691_v14, %v2769_v13 }
 0x462   : > { %v11676_v21 = vpop.f32.mrf.mxu1  ;;  %v11692_v29 = vpop.f32.mrf.mxu0 }
 0x463   : > { %v2770_v10 = vadd.f32 %v11676_v21, %v2626_v52  ;;  %v2897_v43 = vadd.f32 %v2866_v5, %v2767_v59 }
 0x464   : > { %v2739_v26 = vpop.f32.mrf.mxu1  ;;  %v2869_v61 = vpop.f32.mrf.mxu0 }
 0x465   : > { %v2768_v25 = vadd.f32 %v2739_v26, %v2618_v46  ;;  %v2900_v33 = vadd.f32 %v11692_v29, %v2770_v10  ;;  %v2634_v26 = vadd.f32 %v2633_v23, %v2532_v3 }
 0x466   : > { %v11679_v32 = vpop.f32.mrf.mxu1  ;;  %v11695_v35 = vpop.f32.mrf.mxu0 }
 0x467   : > { %v2773_v9 = vadd.f32 %v11679_v32, %v2639_v24  ;;  %v2898_v27 = vadd.f32 %v2869_v61, %v2768_v25 }
 0x468   : > { %v2752_v38 = vpop.f32.mrf.mxu1  ;;  %v2882_v39 = vpop.f32.mrf.mxu0 }
 0x469   : > { %v2771_v11 = vadd.f32 %v2752_v38, %v2631_v58  ;;  %v2903_v29 = vadd.f32 %v11695_v35, %v2773_v9 }
 0x46a   : > { %v11680_v28 = vpop.f32.mrf.mxu1  ;;  %v11696_v12 = vpop.f32.mrf.mxu0 }
 0x46b   : > { %v2774_v41 = vadd.f32 %v11680_v28, %v2642_v50  ;;  %v2901_v38 = vadd.f32 %v2882_v39, %v2771_v11 }
 0x46c   : > { %v2755_v2 = vpop.f32.mrf.mxu1  ;;  %v2885_v52 = vpop.f32.mrf.mxu0 }
 0x46d   : > { %v2772_v15 = vadd.f32 %v2755_v2, %v2634_v26  ;;  %v2904_v28 = vadd.f32 %v11696_v12, %v2774_v41  ;;  %v12616_v41 = vld [vmem:[%s14950_s3 + $0x2f0] sm:$0xff]  }
 0x46e   : > { %v11707_v53 = vpop.f32.mrf.mxu1 }
 0x46f   : > { %v3029_v42 = vadd.f32 %v11707_v53, %v2899_v31  ;;  %v2902_v35 = vadd.f32 %v2885_v52, %v2772_v15 }
 0x470   : > { %v2996_v49 = vpop.f32.mrf.mxu1 }
 0x471   : > { %v3042_v8 = vadd.f32 %v13497_v55, %v3029_v42  ;;  %v3027_v6 = vadd.f32 %v2996_v49, %v2897_v43 }
 0x472   : > { %v11708_v14 = vpop.f32.mrf.mxu1 }
 0x473   : > { %v3050_v19 = vmax.f32 %v3042_v8, 0.0  ;;  %v3040_v20 = vadd.f32 %v13497_v55, %v3027_v6  ;;  %v3030_v21 = vadd.f32 %v11708_v14, %v2900_v33  ;;  %v13548_v33 = vld [vmem:[#allocation2 + $0xf4] sm:$0xff] }
 0x474   : > { %v2999_v5 = vpop.f32.mrf.mxu1 }
 0x475   : > { %v13503_v16 = vadd.f32 %v3050_v19, %v1724_v22  ;;  %v3048_v18 = vmax.f32 %v3040_v20, 0.0  ;;  %v3043_v63 = vadd.f32 %v13497_v55, %v3030_v21  ;;  %v3028_v4 = vadd.f32 %v2999_v5, %v2898_v27  ;;  %v12615_v27 = vld [vmem:[%s14950_s3 + $0x2d0] sm:$0xff]  }
 0x476   : > { %v11711_v32 = vpop.f32.mrf.mxu1 }
 0x477   : > { %v3066_v13 = vmax.f32 %v13503_v16, 0.0  ;;  %v13509_v23 = vadd.f32 %v3048_v18, %v1722_v36  ;;  %v3051_v3 = vmax.f32 %v3043_v63, 0.0  ;;  %v3041_v61 = vadd.f32 %v13497_v55, %v3028_v4  ;;  %v12617_v63 = vld [vmem:[%s14950_s3 + $0x2c8] sm:$0xff]  }
 0x478   : > { %v3033_v17 = vadd.f32 %v11711_v32, %v2903_v29  ;;  %v3012_v22 = vpop.f32.mrf.mxu1  ;;  %v12618_v4 = vld [vmem:[%s14950_s3 + $0x2e8] sm:$0xff]  }
 0x479   : > { %3074 = vst.msk [vmem:[#allocation2 + $0x110] sm:$0xff] %vm278_vm0, %v3066_v13  ;;  %v3064_v59 = vmax.f32 %v13509_v23, 0.0  ;;  %v13518_v2 = vadd.f32 %v3051_v3, %v1725_v44  ;;  %v3049_v30 = vmax.f32 %v3041_v61, 0.0  ;;  %v3031_v36 = vadd.f32 %v3012_v22, %v2901_v38  ;;  %v12619_v61 = vld [vmem:[%s14950_s3 + $0x2c0] sm:$0xff]  }
 0x47a   : > { %v3046_v46 = vadd.f32 %v13497_v55, %v3033_v17  ;;  %v11712_v10 = vpop.f32.mrf.mxu1  ;;  %v12620_v17 = vld [vmem:[%s14950_s3 + $0x2e0] sm:$0xff]  }
 0x47b   : > { %3072 = vst.msk [vmem:[#allocation2 + $0x100] sm:$0xff] %vm278_vm0, %v3064_v59  ;;  %v3067_v31 = vmax.f32 %v13518_v2, 0.0  ;;  %v13527_v53 = vadd.f32 %v3049_v30, %v1723_v51  ;;  %v3044_v37 = vadd.f32 %v13497_v55, %v3031_v36  ;;  %v3034_v44 = vadd.f32 %v11712_v10, %v2904_v28  ;;  %v12621_v28 = vld [vmem:[%s14950_s3 + $0x318] sm:$0xff]   ;;  %v12622_v36 = vld [vmem:[%s14950_s3 + $0x310] sm:$0xff]  }
 0x47c   : > { %v3054_v25 = vmax.f32 %v3046_v46, 0.0  ;;  %v3015_v42 = vpop.f32.mrf.mxu1 }
 0x47d   : > { %3075 = vst.msk [vmem:[#allocation2 + $0x118] sm:$0xff] %vm278_vm0, %v3067_v31  ;;  %v3065_v43 = vmax.f32 %v13527_v53, 0.0  ;;  %v3052_v24 = vmax.f32 %v3044_v37, 0.0  ;;  %v3047_v58 = vadd.f32 %v13497_v55, %v3034_v44  ;;  %v3032_v49 = vadd.f32 %v3015_v42, %v2902_v35  ;;  %v12623_v35 = vld [vmem:[%s14950_s3 + $0x308] sm:$0xff]   ;;  %v12624_v42 = vld [vmem:[%s14950_s3 + $0x300] sm:$0xff]  }
 0x47e   : > { %v13537_v47 = vadd.f32 %v3054_v25, %v1728_v60 }
 0x47f   : > { %3073 = vst.msk [vmem:[#allocation2 + $0x108] sm:$0xff] %vm278_vm0, %v3065_v43  ;;  %v13544_v51 = vadd.f32 %v3052_v24, %v1726_v62  ;;  %v3055_v39 = vmax.f32 %v3047_v58, 0.0  ;;  %v3045_v8 = vadd.f32 %v13497_v55, %v3032_v49 }
 0x480   : > { %v3070_v6 = vmax.f32 %v13537_v47, 0.0  ;;  %v3084_v21 = vld [vmem:[#allocation2 + $0x110] sm:$0xff] }
 0x481   : > { %v3068_v50 = vmax.f32 %v13544_v51, 0.0  ;;  %v13553_v56 = vadd.f32 %v3055_v39, %v1729_v40  ;;  %v3053_v60 = vmax.f32 %v3045_v8, 0.0  ;;  %v12625_v39 = vld [vmem:[%s14950_s3 + $0x358] sm:$0xff]  }
 0x482   : > { %3078 = vst.msk [vmem:[#allocation2 + $0x130] sm:$0xff] %vm278_vm0, %v3070_v6  ;;  %v3102_v34 = vld [vmem:[#allocation2 + $0xfc] sm:$0xff] }
 0x483   : > { %3076 = vst.msk [vmem:[#allocation2 + $0x120] sm:$0xff] %vm278_vm0, %v3068_v50  ;;  %v3071_v62 = vmax.f32 %v13553_v56, 0.0  ;;  %v13564_v55 = vadd.f32 %v3053_v60, %v1727_v0  ;;  %v3109_v54 = vpack.c.bf16 %v3102_v34, %v13548_v33  ;;  %v3082_v9 = vld [vmem:[#allocation2 + $0x100] sm:$0xff]  ;;  %v12626_v8 = vld [vmem:[%s14950_s3 + $0x338] sm:$0xff]   ;;  %v12627_v60 = vld [vmem:[%s14950_s3 + $0x350] sm:$0xff]  }
 0x484   : > { %v3085_v11 = vld [vmem:[#allocation2 + $0x118] sm:$0xff]  ;;  %v3332_v3 = vpack.c.bf16 %v3082_v9, %v13475_v1 }
 0x485   : > { %3079 = vst.msk [vmem:[#allocation2 + $0x138] sm:$0xff] %vm278_vm0, %v3071_v62  ;;  %v3069_v40 = vmax.f32 %v13564_v55, 0.0  ;;  %11721 = vmatprep.mubr.msk.bf16.mxu0 %vm278_vm0, %v3109_v54  ;;  %v13580_v26 = vpack.c.bf16 %v3085_v11, %v3084_v21  ;;  %v3105_v5 = vld [vmem:[#allocation2 + $0x114] sm:$0xff]  ;;  %v12630_v54 = vld [vmem:[%s14950_s3 + $0x328] sm:$0xff]  }
 0x486   : > { %v3103_v14 = vld [vmem:[#allocation2 + $0x104] sm:$0xff]  ;;  %v3104_v19 = vld [vmem:[#allocation2 + $0x10c] sm:$0xff] }
 0x487   : > { %v3083_v20 = vld [vmem:[#allocation2 + $0x108] sm:$0xff]  ;;  %3077 = vst.msk [vmem:[#allocation2 + $0x128] sm:$0xff] %vm278_vm0, %v3069_v40  ;;  %v3110_v57 = vpack.c.bf16 %v3104_v19, %v3103_v14  ;;  %v3462_v22 = vpack.c.bf16 %v3103_v14, %v3102_v34  ;;  %v3463_v30 = vpack.c.bf16 %v3105_v5, %v3104_v19  ;;  %v13663_v14 = vld [vmem:[%s14950_s3 + $0x378] sm:$0xff]  }
 0x488   : > { %v13575_v0 = vpack.c.bf16 %v3083_v20, %v3082_v9  ;;  %v3333_v52 = vpack.c.bf16 %v3084_v21, %v3083_v20  ;;  %v12629_v34 = vld [vmem:[%s14950_s3 + $0x348] sm:$0xff]   ;;  %v12631_v9 = vld [vmem:[%s14950_s3 + $0x340] sm:$0xff]   ;;  %v13668_v19 = vld [vmem:[%s14950_s3 + $0x398] sm:$0xff]  }
 0x489   : > { %11722 = vmatmul.mubr.msk.bf16.vlgmr.msra.gmra.mxu0 %vm278_vm0, %v3110_v57  ;;  %v3331_v37 = vld [vmem:[#allocation2 + $0x130] sm:$0xff] }
 0x48a   : > { %11738 = vmatmul.mubr.msk.bf16.vlgmr.msra.gmra.mxu1 %vm278_vm0, %v13575_v0  ;;  %11746 = vmatpush3.bf16.msra.mxu0 %v13480_v7  ;;  %v3106_v12 = vld [vmem:[#allocation2 + $0x11c] sm:$0xff] }
 0x48b   : > { %11741 = vmatprep.mubr.msk.bf16.mxu1 %vm278_vm0, %v13580_v26  ;;  %11762 = vmatpush3.bf16.msra.mxu1 %v13488_v48  ;;  %v3111_v18 = vpack.c.bf16 %v3106_v12, %v3105_v5  ;;  %v3086_v7 = vld [vmem:[#allocation2 + $0x120] sm:$0xff] }
 0x48c   : > { %11747 = vmatprep.subr.bf16.mxu0 %v12615_v27  ;;  %11763 = vmatprep.subr.bf16.mxu1 %v12616_v41  ;;  %v3334_v46 = vpack.c.bf16 %v3086_v7, %v3085_v11  ;;  %v3461_v25 = vld [vmem:[#allocation2 + $0x134] sm:$0xff]  ;;  %v12632_v11 = vld [vmem:[%s14950_s3 + $0x320] sm:$0xff]  }
 0x48d   : > { %11725 = vmatprep.mubr.msk.bf16.mxu0 %vm278_vm0, %v3111_v18  ;;  %v3591_v58 = vld [vmem:[#allocation2 + $0x138] sm:$0xff] }
 0x48e   : > { %11748 = vmatpush3.bf16.msra.mxu0 %v12615_v27  ;;  %v3107_v15 = vld [vmem:[#allocation2 + $0x124] sm:$0xff]  ;;  %v3108_v29 = vld [vmem:[#allocation2 + $0x12c] sm:$0xff]  ;;  %v3595_v49 = vpack.c.bf16 %v3591_v58, %v3331_v37 }
 0x48f   : > { %v3087_v32 = vld [vmem:[#allocation2 + $0x128] sm:$0xff]  ;;  %11764 = vmatpush3.bf16.msra.mxu1 %v12616_v41  ;;  %11749 = vmatprep.subr.bf16.mxu0 %v12617_v63  ;;  %v3112_v48 = vpack.c.bf16 %v3108_v29, %v3107_v15  ;;  %v3464_v10 = vpack.c.bf16 %v3107_v15, %v3106_v12  ;;  %v3465_v24 = vpack.c.bf16 %v3461_v25, %v3108_v29 }
 0x490   : > { %v3091_v38 = vpack.c.bf16 %v3087_v32, %v3086_v7  ;;  %11765 = vmatprep.subr.bf16.mxu1 %v12618_v4  ;;  %v3335_v44 = vpack.c.bf16 %v3331_v37, %v3087_v32 }
 0x491   : > { %11726 = vmatmul.mubr.msk.bf16.gmra.mxu0 %vm278_vm0, %v3112_v48 }
 0x492   : > { %11742 = vmatmul.mubr.msk.bf16.gmra.mxu1 %vm278_vm0, %v3091_v38  ;;  %11750 = vmatpush3.bf16.msra.mxu0 %v12617_v63 }
 0x493   : > { %11753 = vmatprep.mubr.msk.bf16.mxu0 %vm278_vm0, %v3332_v3  ;;  %11766 = vmatpush3.bf16.msra.mxu1 %v12618_v4 }
 0x494   : > { %11769 = vmatprep.mubr.msk.bf16.mxu1 %vm278_vm0, %v3462_v22  ;;  %11751 = vmatprep.subr.bf16.mxu0 %v12619_v61 }
 0x495   : > { %11767 = vmatprep.subr.bf16.mxu1 %v12620_v17 }
 0x496   : > { %11752 = vmatpush3.bf16.msra.mxu0 %v12619_v61 }
 0x497   : > { %11768 = vmatpush3.bf16.msra.mxu1 %v12620_v17  ;;  %11777 = vmatprep.subr.bf16.mxu0 %v12621_v28 }
 0x498   : > { %11793 = vmatprep.subr.bf16.mxu1 %v12625_v39 }
 0x499   : > { %11754 = vmatmul.mubr.msk.bf16.vlgmr.msra.gmra.mxu0 %vm278_vm0, %v3333_v52 }
 0x49a   : > { %11770 = vmatmul.mubr.msk.bf16.vlgmr.msra.gmra.mxu1 %vm278_vm0, %v3463_v30  ;;  %11778 = vmatpush3.bf16.msra.mxu0 %v12621_v28 }
 0x49b   : > { %11757 = vmatprep.mubr.msk.bf16.mxu0 %vm278_vm0, %v3334_v46  ;;  %11773 = vmatprep.mubr.msk.bf16.mxu1 %vm278_vm0, %v3464_v10 }
 0x49c   : > { %11779 = vmatprep.subr.bf16.mxu0 %v12622_v36  ;;  %11794 = vmatpush3.bf16.msra.mxu1 %v12625_v39 }
 0x49d   : > { %11795 = vmatprep.subr.bf16.mxu1 %v12627_v60 }
 0x49e   : > { %11780 = vmatpush3.bf16.msra.mxu0 %v12622_v36 }
 0x49f   : > { %11781 = vmatprep.subr.bf16.mxu0 %v12623_v35 }
 0x4a0   : > { %11796 = vmatpush3.bf16.msra.mxu1 %v12627_v60 }
 0x4a1   : > { %11758 = vmatmul.mubr.msk.bf16.gmra.mxu0 %vm278_vm0, %v3335_v44  ;;  %11797 = vmatprep.subr.bf16.mxu1 %v12629_v34 }
 0x4a2   : > { %11774 = vmatmul.mubr.msk.bf16.gmra.mxu1 %vm278_vm0, %v3465_v24  ;;  %11782 = vmatpush3.bf16.msra.mxu0 %v12623_v35 }
 0x4a3   : > { %11785 = vmatprep.mubr.msk.bf16.mxu0 %vm278_vm0, %v13575_v0  ;;  %11783 = vmatprep.subr.bf16.mxu0 %v12624_v42 }
 0x4a4   : > { %11798 = vmatpush3.bf16.msra.mxu1 %v12629_v34 }
 0x4a5   : > { %11799 = vmatprep.subr.bf16.mxu1 %v12631_v9 }
 0x4a6   : > { %11784 = vmatpush3.bf16.msra.mxu0 %v12624_v42 }
 0x4a7   : > { %11809 = vmatprep.subr.bf16.mxu0 %v12626_v8 }
 0x4a8   : > { %11800 = vmatpush3.bf16.msra.mxu1 %v12631_v9 }
 0x4a9   : > { %11786 = vmatmul.mubr.msk.bf16.vlgmr.msra.gmra.mxu0 %vm278_vm0, %v13580_v26  ;;  %11825 = vmatprep.subr.bf16.mxu1 %v13663_v14 }
 0x4aa   : > { %11789 = vmatprep.mubr.msk.bf16.mxu0 %vm278_vm0, %v3091_v38  ;;  %11810 = vmatpush3.bf16.msra.mxu0 %v12626_v8 }
 0x4b1   : > { %11790 = vmatmul.mubr.msk.bf16.gmra.mxu0 %vm278_vm0, %v3595_v49 }
 0x4b2   : > { %11817 = vmatprep.mubr.msk.bf16.mxu0 %vm278_vm0, %v13483_v45  ;;  %v12628_v45 = vld [vmem:[%s14950_s3 + $0x330] sm:$0xff]  }
 0x4b3   : > { %11811 = vmatprep.subr.bf16.mxu0 %v12628_v45 }
 0x4b4   : > { %11812 = vmatpush3.bf16.msra.mxu0 %v12628_v45  ;;  %v10098_v45 = vld [vmem:[%s14951_s4 + $0x4] ss:$0 sm:$0xff] }
 0x4b5   : > { %11813 = vmatprep.subr.bf16.mxu0 %v12630_v54 }
 0x4b8   : > { %11814 = vmatpush3.bf16.msra.mxu0 %v12630_v54 }
 0x4b9   : > { %11815 = vmatprep.subr.bf16.mxu0 %v12632_v11 }
 0x4bc   : > { %11816 = vmatpush3.bf16.msra.mxu0 %v12632_v11 }
 0x4bd   : > { %11841 = vmatprep.subr.bf16.mxu0 %v13668_v19 }
 0x549   : > { %v11723_v20 = vpop.f32.mrf.mxu0 }
 0x54a   : > { %v11739_v57 = vpop.f32.mrf.mxu1 }
 0x54b   : > { %v3192_v0 = vpop.f32.mrf.mxu0  ;;  %v3302_v30 = vadd.f32 %v11739_v57, %v11723_v20 }
 0x54c   : > { %v3293_v21 = vpop.f32.mrf.mxu1 }
 0x54d   : > { %v11724_v27 = vpop.f32.mrf.mxu0  ;;  %v3294_v46 = vadd.f32 %v3293_v21, %v3192_v0 }
 0x54e   : > { %v11740_v26 = vpop.f32.mrf.mxu1 }
 0x54f   : > { %v3195_v41 = vpop.f32.mrf.mxu0  ;;  %v3305_v44 = vadd.f32 %v11740_v26, %v11724_v27 }
 0x550   : > { %v3296_v5 = vpop.f32.mrf.mxu1 }
 0x551   : > { %v11727_v12 = vpop.f32.mrf.mxu0  ;;  %v3297_v24 = vadd.f32 %v3296_v5, %v3195_v41 }
 0x552   : > { %v11743_v18 = vpop.f32.mrf.mxu1 }
 0x553   : > { %v3208_v63 = vpop.f32.mrf.mxu0  ;;  %v3318_v39 = vadd.f32 %v11743_v18, %v11727_v12 }
 0x554   : > { %v3309_v4 = vpop.f32.mrf.mxu1 }
 0x555   : > { %v11728_v7 = vpop.f32.mrf.mxu0  ;;  %v3310_v11 = vadd.f32 %v3309_v4, %v3208_v63 }
 0x556   : > { %v11744_v15 = vpop.f32.mrf.mxu1 }
 0x557   : > { %v3211_v29 = vpop.f32.mrf.mxu0  ;;  %v3321_v26 = vadd.f32 %v11744_v15, %v11728_v7 }
 0x558   : > { %v3312_v32 = vpop.f32.mrf.mxu1 }
 0x559   : > { %v11755_v48 = vpop.f32.mrf.mxu0 }
 0x55a   : > { %v11771_v38 = vpop.f32.mrf.mxu1  ;;  %v3448_v10 = vadd.f32 %v11755_v48, %v3302_v30 }
 0x55b   : > { %v3415_v3 = vpop.f32.mrf.mxu0 }
 0x55c   : > { %v3545_v61 = vpop.f32.mrf.mxu1  ;;  %v3446_v25 = vadd.f32 %v3415_v3, %v3294_v46  ;;  %v3578_v58 = vadd.f32 %v11771_v38, %v3448_v10 }
 0x55d   : > { %v11756_v17 = vpop.f32.mrf.mxu0 }
 0x55e   : > { %v11772_v28 = vpop.f32.mrf.mxu1  ;;  %v3449_v49 = vadd.f32 %v11756_v17, %v3305_v44  ;;  %v3576_v34 = vadd.f32 %v3545_v61, %v3446_v25  ;;  %v3313_v17 = vadd.f32 %v3312_v32, %v3211_v29 }
 0x55f   : > { %v3418_v22 = vpop.f32.mrf.mxu0 }
 0x560   : > { %v3548_v35 = vpop.f32.mrf.mxu1  ;;  %v3447_v54 = vadd.f32 %v3418_v22, %v3297_v24  ;;  %v3579_v0 = vadd.f32 %v11772_v28, %v3449_v49 }
 0x561   : > { %v11759_v52 = vpop.f32.mrf.mxu0 }
 0x562   : > { %v11775_v8 = vpop.f32.mrf.mxu1  ;;  %v3452_v20 = vadd.f32 %v11759_v52, %v3318_v39  ;;  %v3577_v12 = vadd.f32 %v3548_v35, %v3447_v54 }
 0x563   : > { %v3431_v36 = vpop.f32.mrf.mxu0 }
 0x564   : > { %v3450_v41 = vadd.f32 %v3431_v36, %v3310_v11  ;;  %v3561_v5 = vpop.f32.mrf.mxu1  ;;  %v3582_v30 = vadd.f32 %v11775_v8, %v3452_v20 }
 0x565   : > { %v11760_v37 = vpop.f32.mrf.mxu0 }
 0x566   : > { %v3453_v61 = vadd.f32 %v11760_v37, %v3321_v26  ;;  %v3580_v28 = vadd.f32 %v3561_v5, %v3450_v41  ;;  %v11776_v52 = vpop.f32.mrf.mxu1 }
 0x567   : > { %v3434_v42 = vpop.f32.mrf.mxu0 }
 0x568   : > { %v3451_v7 = vadd.f32 %v3434_v42, %v3313_v17  ;;  %v3583_v25 = vadd.f32 %v11776_v52, %v3453_v61  ;;  %v3564_v24 = vpop.f32.mrf.mxu1  ;;  %v12637_v61 = vld [vmem:[%s14950_s3 + $0x368] sm:$0xff]  }
 0x569   : > { %v11787_v60 = vpop.f32.mrf.mxu0 }
 0x56a   : > { %v3708_v9 = vadd.f32 %v11787_v60, %v3578_v58  ;;  %v3581_v49 = vadd.f32 %v3564_v24, %v3451_v7  ;;  %v12639_v7 = vld [vmem:[%s14950_s3 + $0x360] sm:$0xff]  }
 0x56b   : > { %v3675_v57 = vpop.f32.mrf.mxu0 }
 0x56c   : > { %v3721_v21 = vadd.f32 %v10098_v45, %v3708_v9  ;;  %v3706_v27 = vadd.f32 %v3675_v57, %v3576_v34 }
 0x56d   : > { %v11788_v48 = vpop.f32.mrf.mxu0 }
 0x56e   : > { %v3729_v18 = vmax.f32 %v3721_v21, 0.0  ;;  %v3719_v38 = vadd.f32 %v10098_v45, %v3706_v27  ;;  %v3709_v3 = vadd.f32 %v11788_v48, %v3579_v0 }
 0x56f   : > { %v3678_v46 = vpop.f32.mrf.mxu0 }
 0x570   : > { %3737 = vst.msk [vmem:[#allocation2 + $0x110] sm:$0xff] %vm278_vm0, %v3729_v18  ;;  %v3727_v63 = vmax.f32 %v3719_v38, 0.0  ;;  %v3722_v4 = vadd.f32 %v10098_v45, %v3709_v3  ;;  %v3707_v22 = vadd.f32 %v3678_v46, %v3577_v12  ;;  %v12636_v3 = vld [vmem:[%s14950_s3 + $0x390] sm:$0xff]  }
 0x571   : > { %v11791_v10 = vpop.f32.mrf.mxu0 }
 0x572   : > { %3735 = vst.msk [vmem:[#allocation2 + $0x100] sm:$0xff] %vm278_vm0, %v3727_v63  ;;  %v3730_v15 = vmax.f32 %v3722_v4, 0.0  ;;  %v3720_v36 = vadd.f32 %v10098_v45, %v3707_v22  ;;  %v3712_v35 = vadd.f32 %v11791_v10, %v3582_v30  ;;  %v12638_v63 = vld [vmem:[%s14950_s3 + $0x388] sm:$0xff]  }
 0x573   : > { %v3691_v44 = vpop.f32.mrf.mxu0 }
 0x574   : > { %3738 = vst.msk [vmem:[#allocation2 + $0x118] sm:$0xff] %vm278_vm0, %v3730_v15  ;;  %v3728_v29 = vmax.f32 %v3720_v36, 0.0  ;;  %v3725_v32 = vadd.f32 %v10098_v45, %v3712_v35  ;;  %v3710_v37 = vadd.f32 %v3691_v44, %v3580_v28  ;;  %v12640_v15 = vld [vmem:[%s14950_s3 + $0x380] sm:$0xff]  }
 0x575   : > { %v11792_v58 = vpop.f32.mrf.mxu0 }
 0x576   : > { %3736 = vst.msk [vmem:[#allocation2 + $0x108] sm:$0xff] %vm278_vm0, %v3728_v29  ;;  %v3733_v39 = vmax.f32 %v3725_v32, 0.0  ;;  %v3723_v8 = vadd.f32 %v10098_v45, %v3710_v37  ;;  %v3713_v42 = vadd.f32 %v11792_v58, %v3583_v25  ;;  %v12642_v25 = vld [vmem:[%s14950_s3 + $0x3b0] sm:$0xff]   ;;  %v12643_v37 = vld [vmem:[%s14950_s3 + $0x3a8] sm:$0xff]  }
 0x577   : > { %v3694_v60 = vpop.f32.mrf.mxu0  ;;  %v3747_v38 = vld [vmem:[#allocation2 + $0x110] sm:$0xff] }
 0x578   : > { %3741 = vst.msk [vmem:[#allocation2 + $0x130] sm:$0xff] %vm278_vm0, %v3733_v39  ;;  %v3731_v34 = vmax.f32 %v3723_v8, 0.0  ;;  %v3726_v54 = vadd.f32 %v10098_v45, %v3713_v42  ;;  %v3711_v9 = vadd.f32 %v3694_v60, %v3581_v49  ;;  %v12644_v39 = vld [vmem:[%s14950_s3 + $0x3a0] sm:$0xff]  }
 0x579   : > { %v3765_v11 = vld [vmem:[#allocation2 + $0xfc] sm:$0xff] }
 0x57a   : > { %3739 = vst.msk [vmem:[#allocation2 + $0x120] sm:$0xff] %vm278_vm0, %v3731_v34  ;;  %v3734_v20 = vmax.f32 %v3726_v54, 0.0  ;;  %v3724_v57 = vadd.f32 %v10098_v45, %v3711_v9  ;;  %v3772_v0 = vpack.c.bf16 %v3765_v11, %v13548_v33  ;;  %v3745_v27 = vld [vmem:[#allocation2 + $0x100] sm:$0xff]  ;;  %v12635_v33 = vld [vmem:[%s14950_s3 + $0x370] sm:$0xff]   ;;  %v12645_v34 = vld [vmem:[%s14950_s3 + $0x3d8] sm:$0xff]  }
 0x57b   : > { %v3748_v26 = vld [vmem:[#allocation2 + $0x118] sm:$0xff]  ;;  %v3995_v10 = vpack.c.bf16 %v3745_v27, %v13475_v1  ;;  %v12647_v9 = vld [vmem:[%s14950_s3 + $0x3d0] sm:$0xff]  }
 0x57c   : > { %3742 = vst.msk [vmem:[#allocation2 + $0x138] sm:$0xff] %vm278_vm0, %v3734_v20  ;;  %v3732_v21 = vmax.f32 %v3724_v57, 0.0  ;;  %11801 = vmatprep.mubr.msk.bf16.mxu1 %vm278_vm0, %v3772_v0  ;;  %v13690_v45 = vpack.c.bf16 %v3748_v26, %v3747_v38  ;;  %v3768_v17 = vld [vmem:[#allocation2 + $0x114] sm:$0xff]  ;;  %v12649_v20 = vld [vmem:[%s14950_s3 + $0x3c8] sm:$0xff]   ;;  %v12651_v0 = vld [vmem:[%s14950_s3 + $0x3c0] sm:$0xff]  }
 0x57d   : > { %v3766_v41 = vld [vmem:[#allocation2 + $0x104] sm:$0xff]  ;;  %v3767_v5 = vld [vmem:[#allocation2 + $0x10c] sm:$0xff]  ;;  %v12641_v1 = vld [vmem:[%s14950_s3 + $0x3b8] sm:$0xff]  }
 0x57e   : > { %v3746_v48 = vld [vmem:[#allocation2 + $0x108] sm:$0xff]  ;;  %3740 = vst.msk [vmem:[#allocation2 + $0x128] sm:$0xff] %vm278_vm0, %v3732_v21  ;;  %v3773_v12 = vpack.c.bf16 %v3767_v5, %v3766_v41  ;;  %v4125_v36 = vpack.c.bf16 %v3766_v41, %v3765_v11  ;;  %v4126_v44 = vpack.c.bf16 %v3768_v17, %v3767_v5  ;;  %v12646_v54 = vld [vmem:[%s14950_s3 + $0x3f8] sm:$0xff]   ;;  %v12648_v11 = vld [vmem:[%s14950_s3 + $0x3f0] sm:$0xff]  }
 0x57f   : > { %v13685_v18 = vpack.c.bf16 %v3746_v48, %v3745_v27  ;;  %v3996_v35 = vpack.c.bf16 %v3747_v38, %v3746_v48  ;;  %v3994_v24 = vld [vmem:[#allocation2 + $0x130] sm:$0xff]  ;;  %v12650_v57 = vld [vmem:[%s14950_s3 + $0x3e8] sm:$0xff]   ;;  %v4422_v21 = vld [vmem:[#allocation2 + $0xe0] sm:$0xff] }
 0x580   : > { %11802 = vmatmul.mubr.msk.bf16.vlgmr.msra.gmra.mxu1 %vm278_vm0, %v3773_v12  ;;  %v4423_v27 = vld [vmem:[#allocation2 + $0xe8] sm:$0xff]  ;;  %v4424_v5 = vld [vmem:[#allocation2 + $0xf0] sm:$0xff]  ;;  %v13770_v48 = vld [vmem:[#allocation2 + $0xf8] sm:$0xff] }
 0x581   : > { %11818 = vmatmul.mubr.msk.bf16.vlgmr.msra.gmra.mxu0 %vm278_vm0, %v13685_v18  ;;  %11826 = vmatpush3.bf16.msra.mxu1 %v13663_v14  ;;  %v3769_v30 = vld [vmem:[#allocation2 + $0x11c] sm:$0xff]  ;;  %v13768_v41 = vpack.c.bf16 %v4423_v27, %v4422_v21  ;;  %v13773_v12 = vpack.c.bf16 %v13770_v48, %v4424_v5  ;;  %v13782_v38 = vpack.c.bf16 %v4424_v5, %v4423_v27  ;;  %v13804_v5 = vld [vmem:[%s14951_s4 + $0x5] ss:$0 sm:$0xff] }
 0x582   : > { %11821 = vmatprep.mubr.msk.bf16.mxu0 %vm278_vm0, %v13690_v45  ;;  %11842 = vmatpush3.bf16.msra.mxu0 %v13668_v19  ;;  %v3774_v46 = vpack.c.bf16 %v3769_v30, %v3768_v17  ;;  %v3749_v14 = vld [vmem:[#allocation2 + $0x120] sm:$0xff] }
 0x583   : > { %11827 = vmatprep.subr.bf16.mxu1 %v12635_v33  ;;  %11843 = vmatprep.subr.bf16.mxu0 %v12636_v3  ;;  %v3997_v29 = vpack.c.bf16 %v3749_v14, %v3748_v26  ;;  %v4124_v49 = vld [vmem:[#allocation2 + $0x134] sm:$0xff]  ;;  %v12652_v26 = vld [vmem:[%s14950_s3 + $0x3e0] sm:$0xff]  }
 0x584   : > { %11805 = vmatprep.mubr.msk.bf16.mxu1 %vm278_vm0, %v3774_v46  ;;  %v4254_v42 = vld [vmem:[#allocation2 + $0x138] sm:$0xff]  ;;  %v12659_v17 = vld [vmem:[%s14950_s3 + $0x420] sm:$0xff]  }
 0x585   : > { %11828 = vmatpush3.bf16.msra.mxu1 %v12635_v33  ;;  %v3770_v4 = vld [vmem:[#allocation2 + $0x124] sm:$0xff]  ;;  %v3771_v22 = vld [vmem:[#allocation2 + $0x12c] sm:$0xff]  ;;  %v4258_v60 = vpack.c.bf16 %v4254_v42, %v3994_v24  ;;  %v13787_v33 = vld [vmem:[%s14950_s3 + $0x418] sm:$0xff]  }
 0x586   : > { %v3750_v28 = vld [vmem:[#allocation2 + $0x128] sm:$0xff]  ;;  %11844 = vmatpush3.bf16.msra.mxu0 %v12636_v3  ;;  %11829 = vmatprep.subr.bf16.mxu1 %v12637_v61  ;;  %v3775_v19 = vpack.c.bf16 %v3771_v22, %v3770_v4  ;;  %v4127_v32 = vpack.c.bf16 %v3770_v4, %v3769_v30  ;;  %v4128_v8 = vpack.c.bf16 %v4124_v49, %v3771_v22 }
 0x587   : > { %v3754_v52 = vpack.c.bf16 %v3750_v28, %v3749_v14  ;;  %11845 = vmatprep.subr.bf16.mxu0 %v12638_v63  ;;  %v3998_v58 = vpack.c.bf16 %v3994_v24, %v3750_v28  ;;  %v12657_v3 = vld [vmem:[%s14950_s3 + $0x428] sm:$0xff]  }
 0x588   : > { %11806 = vmatmul.mubr.msk.bf16.gmra.mxu1 %vm278_vm0, %v3775_v19 }
 0x589   : > { %11822 = vmatmul.mubr.msk.bf16.gmra.mxu0 %vm278_vm0, %v3754_v52  ;;  %11830 = vmatpush3.bf16.msra.mxu1 %v12637_v61 }
 0x58a   : > { %11833 = vmatprep.mubr.msk.bf16.mxu1 %vm278_vm0, %v3995_v10  ;;  %11846 = vmatpush3.bf16.msra.mxu0 %v12638_v63 }
 0x58b   : > { %11849 = vmatprep.mubr.msk.bf16.mxu0 %vm278_vm0, %v4125_v36  ;;  %11831 = vmatprep.subr.bf16.mxu1 %v12639_v7 }
 0x58c   : > { %11847 = vmatprep.subr.bf16.mxu0 %v12640_v15 }
 0x58d   : > { %11832 = vmatpush3.bf16.msra.mxu1 %v12639_v7 }
 0x58e   : > { %11848 = vmatpush3.bf16.msra.mxu0 %v12640_v15  ;;  %11857 = vmatprep.subr.bf16.mxu1 %v12641_v1 }
 0x58f   : > { %11873 = vmatprep.subr.bf16.mxu0 %v12646_v54 }
 0x590   : > { %11834 = vmatmul.mubr.msk.bf16.vlgmr.msra.gmra.mxu1 %vm278_vm0, %v3996_v35 }
 0x591   : > { %11850 = vmatmul.mubr.msk.bf16.vlgmr.msra.gmra.mxu0 %vm278_vm0, %v4126_v44  ;;  %11858 = vmatpush3.bf16.msra.mxu1 %v12641_v1 }
 0x592   : > { %11837 = vmatprep.mubr.msk.bf16.mxu1 %vm278_vm0, %v3997_v29  ;;  %11853 = vmatprep.mubr.msk.bf16.mxu0 %vm278_vm0, %v4127_v32 }
 0x593   : > { %11859 = vmatprep.subr.bf16.mxu1 %v12642_v25  ;;  %11874 = vmatpush3.bf16.msra.mxu0 %v12646_v54 }
 0x594   : > { %11875 = vmatprep.subr.bf16.mxu0 %v12648_v11 }
 0x595   : > { %11860 = vmatpush3.bf16.msra.mxu1 %v12642_v25 }
 0x596   : > { %11861 = vmatprep.subr.bf16.mxu1 %v12643_v37 }
 0x597   : > { %11876 = vmatpush3.bf16.msra.mxu0 %v12648_v11 }
 0x598   : > { %11838 = vmatmul.mubr.msk.bf16.gmra.mxu1 %vm278_vm0, %v3998_v58  ;;  %11877 = vmatprep.subr.bf16.mxu0 %v12650_v57 }
 0x599   : > { %11854 = vmatmul.mubr.msk.bf16.gmra.mxu0 %vm278_vm0, %v4128_v8  ;;  %11862 = vmatpush3.bf16.msra.mxu1 %v12643_v37 }
 0x59a   : > { %11865 = vmatprep.mubr.msk.bf16.mxu1 %vm278_vm0, %v13685_v18  ;;  %11863 = vmatprep.subr.bf16.mxu1 %v12644_v39  ;;  %v12653_v18 = vld [vmem:[%s14950_s3 + $0x438] sm:$0xff]  }
 0x59b   : > { %11878 = vmatpush3.bf16.msra.mxu0 %v12650_v57  ;;  %11881 = vmatprep.mubr.msk.bf16.mxu0 %vm278_vm0, %v13782_v38 }
 0x59c   : > { %11879 = vmatprep.subr.bf16.mxu0 %v12652_v26 }
 0x59d   : > { %11864 = vmatpush3.bf16.msra.mxu1 %v12644_v39 }
 0x59e   : > { %11889 = vmatprep.subr.bf16.mxu1 %v12645_v34 }
 0x59f   : > { %11880 = vmatpush3.bf16.msra.mxu0 %v12652_v26 }
 0x5a0   : > { %11866 = vmatmul.mubr.msk.bf16.vlgmr.msra.gmra.mxu1 %vm278_vm0, %v13690_v45  ;;  %v12655_v45 = vld [vmem:[%s14950_s3 + $0x430] sm:$0xff]   ;;  %11905 = vmatprep.subr.bf16.mxu0 %v13787_v33 }
 0x5a1   : > { %11869 = vmatprep.mubr.msk.bf16.mxu1 %vm278_vm0, %v3754_v52  ;;  %11890 = vmatpush3.bf16.msra.mxu1 %v12645_v34 }
 0x5a2   : > { %11891 = vmatprep.subr.bf16.mxu1 %v12647_v9 }
 0x5a5   : > { %11892 = vmatpush3.bf16.msra.mxu1 %v12647_v9 }
 0x5a6   : > { %11893 = vmatprep.subr.bf16.mxu1 %v12649_v20 }
 0x5a8   : > { %11870 = vmatmul.mubr.msk.bf16.gmra.mxu1 %vm278_vm0, %v4258_v60 }
 0x5a9   : > { %11894 = vmatpush3.bf16.msra.mxu1 %v12649_v20  ;;  %11897 = vmatprep.mubr.msk.bf16.mxu1 %vm278_vm0, %v13768_v41 }
 0x5aa   : > { %11895 = vmatprep.subr.bf16.mxu1 %v12651_v0 }
 0x5ad   : > { %11896 = vmatpush3.bf16.msra.mxu1 %v12651_v0 }
 0x5ae   : > { %11921 = vmatprep.subr.bf16.mxu1 %v12653_v18 }
 0x5b0   : > { %11898 = vmatmul.mubr.msk.bf16.vlgmr.msra.gmra.mxu1 %vm278_vm0, %v13773_v12 }
 0x5b1   : > { %11922 = vmatpush3.bf16.msra.mxu1 %v12653_v18 }
 0x5b2   : > { %11923 = vmatprep.subr.bf16.mxu1 %v12655_v45 }
 0x5b5   : > { %11924 = vmatpush3.bf16.msra.mxu1 %v12655_v45 }
 0x5b6   : > { %11925 = vmatprep.subr.bf16.mxu1 %v12657_v3 }
 0x5b9   : > { %11926 = vmatpush3.bf16.msra.mxu1 %v12657_v3 }
 0x5ba   : > { %11927 = vmatprep.subr.bf16.mxu1 %v12659_v17 }
 0x5bd   : > { %11928 = vmatpush3.bf16.msra.mxu1 %v12659_v17 }
 0x640   : > { %v11803_v30 = vpop.f32.mrf.mxu1 }
 0x641   : > { %v11819_v46 = vpop.f32.mrf.mxu0 }
 0x642   : > { %v3855_v61 = vpop.f32.mrf.mxu1  ;;  %v3965_v39 = vadd.f32 %v11819_v46, %v11803_v30 }
 0x643   : > { %v3956_v63 = vpop.f32.mrf.mxu0 }
 0x644   : > { %v11804_v14 = vpop.f32.mrf.mxu1  ;;  %v3957_v42 = vadd.f32 %v3956_v63, %v3855_v61 }
 0x645   : > { %v11820_v4 = vpop.f32.mrf.mxu0 }
 0x646   : > { %v3858_v22 = vpop.f32.mrf.mxu1  ;;  %v3968_v9 = vadd.f32 %v11820_v4, %v11804_v14 }
 0x647   : > { %v3959_v28 = vpop.f32.mrf.mxu0 }
 0x648   : > { %v11807_v19 = vpop.f32.mrf.mxu1  ;;  %v3960_v57 = vadd.f32 %v3959_v28, %v3858_v22 }
 0x649   : > { %v11823_v52 = vpop.f32.mrf.mxu0 }
 0x64a   : > { %v3871_v10 = vpop.f32.mrf.mxu1  ;;  %v3981_v17 = vadd.f32 %v11823_v52, %v11807_v19 }
 0x64b   : > { %v3972_v7 = vpop.f32.mrf.mxu0 }
 0x64c   : > { %v11808_v15 = vpop.f32.mrf.mxu1  ;;  %v3973_v30 = vadd.f32 %v3972_v7, %v3871_v10 }
 0x64d   : > { %v11824_v36 = vpop.f32.mrf.mxu0 }
 0x64e   : > { %v3874_v1 = vpop.f32.mrf.mxu1  ;;  %v3984_v22 = vadd.f32 %v11824_v36, %v11808_v15 }
 0x64f   : > { %v3975_v35 = vpop.f32.mrf.mxu0 }
 0x650   : > { %v11835_v44 = vpop.f32.mrf.mxu1 }
 0x651   : > { %v11851_v25 = vpop.f32.mrf.mxu0  ;;  %v4111_v60 = vadd.f32 %v11835_v44, %v3965_v39 }
 0x652   : > { %v4078_v29 = vpop.f32.mrf.mxu1 }
 0x653   : > { %v4208_v32 = vpop.f32.mrf.mxu0  ;;  %v4109_v11 = vadd.f32 %v4078_v29, %v3957_v42  ;;  %v4241_v0 = vadd.f32 %v11851_v25, %v4111_v60 }
 0x654   : > { %v11836_v37 = vpop.f32.mrf.mxu1 }
 0x655   : > { %v11852_v58 = vpop.f32.mrf.mxu0  ;;  %v4112_v21 = vadd.f32 %v11836_v37, %v3968_v9  ;;  %v4239_v18 = vadd.f32 %v4208_v32, %v4109_v11  ;;  %v3976_v32 = vadd.f32 %v3975_v35, %v3874_v1 }
 0x656   : > { %v4081_v24 = vpop.f32.mrf.mxu1 }
 0x657   : > { %v4211_v34 = vpop.f32.mrf.mxu0  ;;  %v4110_v45 = vadd.f32 %v4081_v24, %v3960_v57  ;;  %v4242_v61 = vadd.f32 %v11852_v58, %v4112_v21 }
 0x658   : > { %v11839_v49 = vpop.f32.mrf.mxu1 }
 0x659   : > { %v11855_v27 = vpop.f32.mrf.mxu0  ;;  %v4115_v28 = vadd.f32 %v11839_v49, %v3981_v17  ;;  %v4240_v29 = vadd.f32 %v4211_v34, %v4110_v45 }
 0x65a   : > { %v4094_v8 = vpop.f32.mrf.mxu1 }
 0x65b   : > { %v4224_v63 = vpop.f32.mrf.mxu0  ;;  %v4113_v44 = vadd.f32 %v4094_v8, %v3973_v30  ;;  %v4245_v36 = vadd.f32 %v11855_v27, %v4115_v28 }
 0x65c   : > { %v11840_v54 = vpop.f32.mrf.mxu1 }
 0x65d   : > { %v4116_v24 = vadd.f32 %v11840_v54, %v3984_v22  ;;  %v11856_v19 = vpop.f32.mrf.mxu0  ;;  %v4243_v58 = vadd.f32 %v4224_v63, %v4113_v44 }
 0x65e   : > { %v4097_v20 = vpop.f32.mrf.mxu1 }
 0x65f   : > { %v4114_v49 = vadd.f32 %v4097_v20, %v3976_v32  ;;  %v4246_v16 = vadd.f32 %v11856_v19, %v4116_v24  ;;  %v4227_v11 = vpop.f32.mrf.mxu0  ;;  %v12660_v32 = vld [vmem:[%s14950_s3 + $0x400] sm:$0xff]   ;;  %v12661_v24 = vld [vmem:[%s14950_s3 + $0x458] sm:$0xff]  }
 0x660   : > { %v11867_v26 = vpop.f32.mrf.mxu1 }
 0x661   : > { %v4371_v3 = vadd.f32 %v11867_v26, %v4241_v0  ;;  %v4244_v0 = vadd.f32 %v4227_v11, %v4114_v49  ;;  %v12672_v11 = vld [vmem:[%s14950_s3 + $0x480] sm:$0xff]  }
 0x662   : > { %v4338_v46 = vpop.f32.mrf.mxu1 }
 0x663   : > { %v4384_v14 = vadd.f32 %v13804_v5, %v4371_v3  ;;  %v4369_v4 = vadd.f32 %v4338_v46, %v4239_v18 }
 0x664   : > { %v11868_v25 = vpop.f32.mrf.mxu1 }
 0x665   : > { %v4392_v37 = vmax.f32 %v4384_v14, 0.0  ;;  %v4382_v39 = vadd.f32 %v13804_v5, %v4369_v4  ;;  %v4372_v42 = vadd.f32 %v11868_v25, %v4242_v61 }
 0x666   : > { %v4341_v60 = vpop.f32.mrf.mxu1 }
 0x667   : > { %v13810_v52 = vadd.f32 %v4392_v37, %v3066_v13  ;;  %v4390_v10 = vmax.f32 %v4382_v39, 0.0  ;;  %v4385_v7 = vadd.f32 %v13804_v5, %v4372_v42  ;;  %v4370_v15 = vadd.f32 %v4341_v60, %v4240_v29  ;;  %v12658_v37 = vld [vmem:[%s14950_s3 + $0x408] sm:$0xff]   ;;  %v12662_v60 = vld [vmem:[%s14950_s3 + $0x450] sm:$0xff]  }
 0x668   : > { %v11871_v8 = vpop.f32.mrf.mxu1 }
 0x669   : > { %v4408_v34 = vmax.f32 %v13810_v52, 0.0  ;;  %v13816_v1 = vadd.f32 %v4390_v10, %v3064_v59  ;;  %v4393_v35 = vmax.f32 %v4385_v7, 0.0  ;;  %v4383_v54 = vadd.f32 %v13804_v5, %v4370_v15  ;;  %v12663_v7 = vld [vmem:[%s14950_s3 + $0x448] sm:$0xff]  }
 0x66a   : > { %v4375_v13 = vadd.f32 %v11871_v8, %v4245_v36  ;;  %v4354_v9 = vpop.f32.mrf.mxu1 }
 0x66b   : > { %4416 = vst.msk [vmem:[#allocation2 + $0x110] sm:$0xff] %vm278_vm0, %v4408_v34  ;;  %v4406_v20 = vmax.f32 %v13816_v1, 0.0  ;;  %v13825_v57 = vadd.f32 %v4393_v35, %v3067_v31  ;;  %v4391_v23 = vmax.f32 %v4383_v54, 0.0  ;;  %v4373_v59 = vadd.f32 %v4354_v9, %v4243_v58  ;;  %v12664_v58 = vld [vmem:[%s14950_s3 + $0x440] sm:$0xff]   ;;  %v12666_v35 = vld [vmem:[%s14950_s3 + $0x498] sm:$0xff]   ;;  %v12667_v54 = vld [vmem:[%s14950_s3 + $0x470] sm:$0xff]  }
 0x66c   : > { %v4388_v21 = vadd.f32 %v13804_v5, %v4375_v13  ;;  %v11872_v27 = vpop.f32.mrf.mxu1  ;;  %11953 = vmatprep.subr.bf16.mxu1 %v12666_v35  ;;  %v12670_v13 = vld [vmem:[%s14950_s3 + $0x488] sm:$0xff]   ;;  %v12671_v9 = vld [vmem:[%s14950_s3 + $0x460] sm:$0xff]  }
 0x66d   : > { %4414 = vst.msk [vmem:[#allocation2 + $0x100] sm:$0xff] %vm278_vm0, %v4406_v20  ;;  %v4409_v26 = vmax.f32 %v13825_v57, 0.0  ;;  %v13834_v18 = vadd.f32 %v4391_v23, %v3065_v43  ;;  %v4386_v2 = vadd.f32 %v13804_v5, %v4373_v59  ;;  %v4376_v31 = vadd.f32 %v11872_v27, %v4246_v16  ;;  %v12669_v16 = vld [vmem:[%s14950_s3 + $0x468] sm:$0xff]   ;;  %v12673_v23 = vld [vmem:[%s14950_s3 + $0x4d8] sm:$0xff]   ;;  %v12679_v27 = vld [vmem:[%s14950_s3 + $0x4c0] sm:$0xff]  }
 0x66e   : > { %v4396_v45 = vmax.f32 %v4388_v21, 0.0  ;;  %v4357_v3 = vpop.f32.mrf.mxu1  ;;  %v13955_v59 = vld [vmem:[%s14950_s3 + $0x4b8] sm:$0xff]   ;;  %v12677_v21 = vld [vmem:[%s14950_s3 + $0x4c8] sm:$0xff]  }
 0x66f   : > { %4417 = vst.msk [vmem:[#allocation2 + $0x118] sm:$0xff] %vm278_vm0, %v4409_v26  ;;  %v4407_v17 = vmax.f32 %v13834_v18, 0.0  ;;  %v4394_v30 = vmax.f32 %v4386_v2, 0.0  ;;  %v4389_v46 = vadd.f32 %v13804_v5, %v4376_v31  ;;  %v4374_v61 = vadd.f32 %v4357_v3, %v4244_v0  ;;  %v12675_v0 = vld [vmem:[%s14950_s3 + $0x4d0] sm:$0xff]  }
 0x670   : > { %v13844_v53 = vadd.f32 %v4396_v45, %v3070_v6  ;;  %v11899_v2 = vpop.f32.mrf.mxu1 }
 0x671   : > { %4415 = vst.msk [vmem:[#allocation2 + $0x108] sm:$0xff] %vm278_vm0, %v4407_v17  ;;  %v13851_v43 = vadd.f32 %v4394_v30, %v3068_v50  ;;  %v4397_v63 = vmax.f32 %v4389_v46, 0.0  ;;  %v4387_v14 = vadd.f32 %v13804_v5, %v4374_v61 }
 0x672   : > { %v4412_v4 = vmax.f32 %v13844_v53, 0.0  ;;  %v4628_v31 = vpop.f32.mrf.mxu1 }
 0x673   : > { %v4410_v22 = vmax.f32 %v13851_v43, 0.0  ;;  %v13858_v47 = vadd.f32 %v4397_v63, %v3071_v62  ;;  %v4395_v6 = vmax.f32 %v4387_v14, 0.0  ;;  %v12656_v62 = vld [vmem:[%s14950_s3 + $0x410] sm:$0xff]  }
 0x674   : > { %4420 = vst.msk [vmem:[#allocation2 + $0x130] sm:$0xff] %vm278_vm0, %v4412_v4  ;;  %v4426_v28 = vld [vmem:[#allocation2 + $0x100] sm:$0xff]  ;;  %v11900_v45 = vpop.f32.mrf.mxu1 }
 0x675   : > { %4418 = vst.msk [vmem:[#allocation2 + $0x120] sm:$0xff] %vm278_vm0, %v4410_v22  ;;  %v4413_v51 = vmax.f32 %v13858_v47, 0.0  ;;  %v13869_v50 = vadd.f32 %v4395_v6, %v3069_v40  ;;  %v4445_v56 = vpack.c.bf16 %v4426_v28, %v13770_v48  ;;  %v4428_v40 = vld [vmem:[#allocation2 + $0x110] sm:$0xff] }
 0x676   : > { %v4429_v44 = vld [vmem:[#allocation2 + $0x118] sm:$0xff]  ;;  %v4631_v30 = vpop.f32.mrf.mxu1 }
 0x677   : > { %4421 = vst.msk [vmem:[#allocation2 + $0x138] sm:$0xff] %vm278_vm0, %v4413_v51  ;;  %v4411_v5 = vmax.f32 %v13869_v50, 0.0  ;;  %11882 = vmatmul.mubr.msk.bf16.vlgmr.msra.gmra.mxu0 %vm278_vm0, %v4445_v56  ;;  %v4433_v39 = vpack.c.bf16 %v4429_v44, %v4428_v40 }
 0x678   : > { %11906 = vmatpush3.bf16.msra.mxu0 %v13787_v33  ;;  %v4427_v55 = vld [vmem:[#allocation2 + $0x108] sm:$0xff] }
 0x679   : > { %4419 = vst.msk [vmem:[#allocation2 + $0x128] sm:$0xff] %vm278_vm0, %v4411_v5  ;;  %11907 = vmatprep.subr.bf16.mxu0 %v12656_v62  ;;  %v4446_v25 = vpack.c.bf16 %v4428_v40, %v4427_v55  ;;  %v4432_v29 = vpack.c.bf16 %v4427_v55, %v4426_v28 }
 0x67b   : > { %11885 = vmatprep.mubr.msk.bf16.mxu0 %vm278_vm0, %v4446_v25  ;;  %11901 = vmatprep.mubr.msk.bf16.mxu1 %vm278_vm0, %v4432_v29  ;;  %v4796_v10 = vld [vmem:[#allocation2 + $0x130] sm:$0xff] }
 0x67c   : > { %11908 = vmatpush3.bf16.msra.mxu0 %v12656_v62  ;;  %11902 = vmatmul.mubr.msk.bf16.gmra.mxu1 %vm278_vm0, %v4433_v39  ;;  %v4443_v33 = vld [vmem:[#allocation2 + $0x120] sm:$0xff] }
 0x67d   : > { %11929 = vmatprep.mubr.msk.bf16.mxu1 %vm278_vm0, %v4445_v56  ;;  %11909 = vmatprep.subr.bf16.mxu0 %v12658_v37  ;;  %v4447_v42 = vpack.c.bf16 %v4443_v33, %v4429_v44 }
 0x67e   : > { %v4926_v49 = vld [vmem:[#allocation2 + $0x138] sm:$0xff] }
 0x67f   : > { %11886 = vmatmul.mubr.msk.bf16.gmra.mxu0 %vm278_vm0, %v4447_v42  ;;  %v4930_v8 = vpack.c.bf16 %v4926_v49, %v4796_v10 }
 0x680   : > { %11910 = vmatpush3.bf16.msra.mxu0 %v12658_v37  ;;  %11913 = vmatprep.mubr.msk.bf16.mxu0 %vm278_vm0, %v13773_v12  ;;  %v4795_v19 = vld [vmem:[#allocation2 + $0x128] sm:$0xff] }
 0x681   : > { %11911 = vmatprep.subr.bf16.mxu0 %v12660_v32  ;;  %v4800_v15 = vpack.c.bf16 %v4796_v10, %v4795_v19  ;;  %v4670_v36 = vpack.c.bf16 %v4795_v19, %v4443_v33 }
 0x684   : > { %11912 = vmatpush3.bf16.msra.mxu0 %v12660_v32  ;;  %11930 = vmatmul.mubr.msk.bf16.vlgmr.msra.gmra.mxu1 %vm278_vm0, %v4446_v25 }
 0x685   : > { %11933 = vmatprep.mubr.msk.bf16.mxu1 %vm278_vm0, %v4447_v42  ;;  %11937 = vmatprep.subr.bf16.mxu0 %v12661_v24 }
 0x686   : > { %11954 = vmatpush3.bf16.msra.mxu1 %v12666_v35 }
 0x687   : > { %11914 = vmatmul.mubr.msk.bf16.vlgmr.msra.gmra.mxu0 %vm278_vm0, %v4432_v29 }
 0x688   : > { %11938 = vmatpush3.bf16.msra.mxu0 %v12661_v24  ;;  %11917 = vmatprep.mubr.msk.bf16.mxu0 %vm278_vm0, %v4433_v39 }
 0x689   : > { %11939 = vmatprep.subr.bf16.mxu0 %v12662_v60 }
 0x68c   : > { %11940 = vmatpush3.bf16.msra.mxu0 %v12662_v60  ;;  %11934 = vmatmul.mubr.msk.bf16.gmra.mxu1 %vm278_vm0, %v4800_v15 }
 0x68d   : > { %11941 = vmatprep.subr.bf16.mxu0 %v12663_v7  ;;  %11961 = vmatprep.mubr.msk.bf16.mxu1 %vm278_vm0, %v13782_v38  ;;  %v12665_v38 = vld [vmem:[%s14950_s3 + $0x478] sm:$0xff]  }
 0x68f   : > { %11918 = vmatmul.mubr.msk.bf16.gmra.mxu0 %vm278_vm0, %v4670_v36 }
 0x690   : > { %11942 = vmatpush3.bf16.msra.mxu0 %v12663_v7  ;;  %11945 = vmatprep.mubr.msk.bf16.mxu0 %vm278_vm0, %v4432_v29 }
 0x691   : > { %11943 = vmatprep.subr.bf16.mxu0 %v12664_v58 }
 0x694   : > { %11944 = vmatpush3.bf16.msra.mxu0 %v12664_v58 }
 0x695   : > { %11969 = vmatprep.subr.bf16.mxu0 %v12665_v38 }
 0x697   : > { %11946 = vmatmul.mubr.msk.bf16.vlgmr.msra.gmra.mxu0 %vm278_vm0, %v4433_v39 }
 0x698   : > { %11949 = vmatprep.mubr.msk.bf16.mxu0 %vm278_vm0, %v4670_v36  ;;  %11970 = vmatpush3.bf16.msra.mxu0 %v12665_v38 }
 0x699   : > { %11971 = vmatprep.subr.bf16.mxu0 %v12667_v54 }
 0x69c   : > { %11972 = vmatpush3.bf16.msra.mxu0 %v12667_v54 }
 0x69d   : > { %11973 = vmatprep.subr.bf16.mxu0 %v12669_v16 }
 0x69f   : > { %11950 = vmatmul.mubr.msk.bf16.gmra.mxu0 %vm278_vm0, %v4930_v8 }
 0x6a0   : > { %11977 = vmatprep.mubr.msk.bf16.mxu0 %vm278_vm0, %v13768_v41  ;;  %v12668_v41 = vld [vmem:[%s14950_s3 + $0x490] sm:$0xff]   ;;  %11974 = vmatpush3.bf16.msra.mxu0 %v12669_v16 }
 0x6a1   : > { %11955 = vmatprep.subr.bf16.mxu1 %v12668_v41  ;;  %11975 = vmatprep.subr.bf16.mxu0 %v12671_v9 }
 0x6a2   : > { %11956 = vmatpush3.bf16.msra.mxu1 %v12668_v41 }
 0x6a3   : > { %11957 = vmatprep.subr.bf16.mxu1 %v12670_v13 }
 0x6a4   : > { %11976 = vmatpush3.bf16.msra.mxu0 %v12671_v9  ;;  %v10260_v9 = vld [vmem:[%s14951_s4 + $0x6] ss:$0 sm:$0xff] }
 0x6a5   : > { %12001 = vmatprep.subr.bf16.mxu0 %v12673_v23 }
 0x6a6   : > { %11958 = vmatpush3.bf16.msra.mxu1 %v12670_v13 }
 0x6a7   : > { %11959 = vmatprep.subr.bf16.mxu1 %v12672_v11  ;;  %11978 = vmatmul.mubr.msk.bf16.vlgmr.msra.gmra.mxu0 %vm278_vm0, %v13773_v12 }
 0x6a8   : > { %12002 = vmatpush3.bf16.msra.mxu0 %v12673_v23 }
 0x6a9   : > { %12003 = vmatprep.subr.bf16.mxu0 %v12675_v0 }
 0x6aa   : > { %11960 = vmatpush3.bf16.msra.mxu1 %v12672_v11 }
 0x6ab   : > { %11985 = vmatprep.subr.bf16.mxu1 %v13955_v59 }
 0x6ac   : > { %12004 = vmatpush3.bf16.msra.mxu0 %v12675_v0 }
 0x6ad   : > { %12005 = vmatprep.subr.bf16.mxu0 %v12677_v21 }
 0x6b0   : > { %12006 = vmatpush3.bf16.msra.mxu0 %v12677_v21 }
 0x6b1   : > { %12007 = vmatprep.subr.bf16.mxu0 %v12679_v27 }
 0x6b4   : > { %12008 = vmatpush3.bf16.msra.mxu0 %v12679_v27 }
 0x737   : > { %v11883_v3 = vpop.f32.mrf.mxu0 }
 0x738   : > { %v4637_v60 = vadd.f32 %v11899_v2, %v11883_v3 }
 0x739   : > { %v4527_v46 = vpop.f32.mrf.mxu0 }
 0x73a   : > { %v4629_v10 = vadd.f32 %v4628_v31, %v4527_v46 }
 0x73b   : > { %v11884_v61 = vpop.f32.mrf.mxu0 }
 0x73c   : > { %v11903_v63 = vpop.f32.mrf.mxu1  ;;  %v4640_v58 = vadd.f32 %v11900_v45, %v11884_v61 }
 0x73d   : > { %v4530_v14 = vpop.f32.mrf.mxu0 }
 0x73e   : > { %v4644_v6 = vpop.f32.mrf.mxu1  ;;  %v4632_v38 = vadd.f32 %v4631_v30, %v4530_v14 }
 0x73f   : > { %v11887_v28 = vpop.f32.mrf.mxu0 }
 0x740   : > { %v11904_v56 = vpop.f32.mrf.mxu1  ;;  %v4653_v41 = vadd.f32 %v11903_v63, %v11887_v28 }
 0x741   : > { %v4543_v62 = vpop.f32.mrf.mxu0 }
 0x742   : > { %v4647_v44 = vpop.f32.mrf.mxu1  ;;  %v4645_v21 = vadd.f32 %v4644_v6, %v4543_v62 }
 0x743   : > { %v11888_v55 = vpop.f32.mrf.mxu0 }
 0x744   : > { %v11931_v25 = vpop.f32.mrf.mxu1  ;;  %v4656_v46 = vadd.f32 %v11904_v56, %v11888_v55 }
 0x745   : > { %v4546_v40 = vpop.f32.mrf.mxu0 }
 0x746   : > { %v4880_v39 = vpop.f32.mrf.mxu1 }
 0x747   : > { %v11915_v29 = vpop.f32.mrf.mxu0 }
 0x748   : > { %v11932_v32 = vpop.f32.mrf.mxu1  ;;  %v4783_v7 = vadd.f32 %v11915_v29, %v4637_v60 }
 0x749   : > { %v4750_v37 = vpop.f32.mrf.mxu0 }
 0x74a   : > { %v4883_v15 = vpop.f32.mrf.mxu1  ;;  %v4781_v49 = vadd.f32 %v4750_v37, %v4629_v10  ;;  %v4913_v54 = vadd.f32 %v11931_v25, %v4783_v7  ;;  %v4648_v37 = vadd.f32 %v4647_v44, %v4546_v40 }
 0x74b   : > { %v11916_v33 = vpop.f32.mrf.mxu0 }
 0x74c   : > { %v4784_v35 = vadd.f32 %v11916_v33, %v4640_v58  ;;  %v11935_v16 = vpop.f32.mrf.mxu1  ;;  %v4911_v0 = vadd.f32 %v4880_v39, %v4781_v49 }
 0x74d   : > { %v4753_v42 = vpop.f32.mrf.mxu0 }
 0x74e   : > { %v4782_v11 = vadd.f32 %v4753_v42, %v4632_v38  ;;  %v4914_v3 = vadd.f32 %v11932_v32, %v4784_v35  ;;  %v4896_v30 = vpop.f32.mrf.mxu1 }
 0x74f   : > { %v11919_v24 = vpop.f32.mrf.mxu0 }
 0x750   : > { %v4787_v27 = vadd.f32 %v11919_v24, %v4653_v41  ;;  %v4912_v29 = vadd.f32 %v4883_v15, %v4782_v11  ;;  %v11936_v24 = vpop.f32.mrf.mxu1 }
 0x751   : > { %v4766_v19 = vpop.f32.mrf.mxu0 }
 0x752   : > { %v4785_v61 = vadd.f32 %v4766_v19, %v4645_v21  ;;  %v4917_v60 = vadd.f32 %v11935_v16, %v4787_v27  ;;  %v4899_v49 = vpop.f32.mrf.mxu1 }
 0x753   : > { %v11920_v36 = vpop.f32.mrf.mxu0 }
 0x754   : > { %v4788_v42 = vadd.f32 %v11920_v36, %v4656_v46  ;;  %v4915_v32 = vadd.f32 %v4896_v30, %v4785_v61 }
 0x755   : > { %v4769_v8 = vpop.f32.mrf.mxu0 }
 0x756   : > { %v4786_v56 = vadd.f32 %v4769_v8, %v4648_v37  ;;  %v4918_v36 = vadd.f32 %v11936_v24, %v4788_v42  ;;  %v12685_v24 = vld [vmem:[%s14950_s3 + $0x518] sm:$0xff]  }
 0x757   : > { %v11947_v13 = vpop.f32.mrf.mxu0 }
 0x758   : > { %v5043_v23 = vadd.f32 %v11947_v13, %v4913_v54  ;;  %v4916_v8 = vadd.f32 %v4899_v49, %v4786_v56  ;;  %v12688_v56 = vld [vmem:[%s14950_s3 + $0x530] sm:$0xff]   ;;  %v5753_v49 = vld [vmem:[#allocation2 + $0xd8] sm:$0xff] }
 0x759   : > { %v5010_v2 = vpop.f32.mrf.mxu0 }
 0x75a   : > { %v5056_v31 = vadd.f32 %v10260_v9, %v5043_v23  ;;  %v5041_v45 = vadd.f32 %v5010_v2, %v4911_v0 }
 0x75b   : > { %v11948_v14 = vpop.f32.mrf.mxu0 }
 0x75c   : > { %v5064_v63 = vmax.f32 %v5056_v31, 0.0  ;;  %v5054_v28 = vadd.f32 %v10260_v9, %v5041_v45  ;;  %v5044_v25 = vadd.f32 %v11948_v14, %v4914_v3  ;;  %v12676_v31 = vld [vmem:[%s14950_s3 + $0x4b0] sm:$0xff]  }
 0x75d   : > { %v5013_v33 = vpop.f32.mrf.mxu0 }
 0x75e   : > { %5072 = vst.msk [vmem:[#allocation2 + $0x110] sm:$0xff] %vm278_vm0, %v5064_v63  ;;  %v5062_v6 = vmax.f32 %v5054_v28, 0.0  ;;  %v5057_v62 = vadd.f32 %v10260_v9, %v5044_v25  ;;  %v5042_v39 = vadd.f32 %v5013_v33, %v4912_v29  ;;  %v12680_v28 = vld [vmem:[%s14950_s3 + $0x4a0] sm:$0xff]   ;;  %v12681_v25 = vld [vmem:[%s14950_s3 + $0x4f8] sm:$0xff]   ;;  %v12682_v29 = vld [vmem:[%s14950_s3 + $0x4f0] sm:$0xff]  }
 0x75f   : > { %v11951_v10 = vpop.f32.mrf.mxu0  ;;  %v12683_v33 = vld [vmem:[%s14950_s3 + $0x4e8] sm:$0xff]  }
 0x760   : > { %5070 = vst.msk [vmem:[#allocation2 + $0x100] sm:$0xff] %vm278_vm0, %v5062_v6  ;;  %v5065_v55 = vmax.f32 %v5057_v62, 0.0  ;;  %v5055_v19 = vadd.f32 %v10260_v9, %v5042_v39  ;;  %v5047_v7 = vadd.f32 %v11951_v10, %v4917_v60  ;;  %v12684_v6 = vld [vmem:[%s14950_s3 + $0x4e0] sm:$0xff]   ;;  %v12686_v10 = vld [vmem:[%s14950_s3 + $0x538] sm:$0xff]  }
 0x761   : > { %v5026_v58 = vpop.f32.mrf.mxu0  ;;  %12033 = vmatprep.subr.bf16.mxu0 %v12686_v10 }
 0x762   : > { %5073 = vst.msk [vmem:[#allocation2 + $0x118] sm:$0xff] %vm278_vm0, %v5065_v55  ;;  %v5063_v44 = vmax.f32 %v5055_v19, 0.0  ;;  %v5060_v40 = vadd.f32 %v10260_v9, %v5047_v7  ;;  %v5045_v15 = vadd.f32 %v5026_v58, %v4915_v32  ;;  %v12687_v32 = vld [vmem:[%s14950_s3 + $0x510] sm:$0xff]   ;;  %v12689_v55 = vld [vmem:[%s14950_s3 + $0x508] sm:$0xff]   ;;  %v12691_v7 = vld [vmem:[%s14950_s3 + $0x500] sm:$0xff]  }
 0x763   : > { %v11952_v38 = vpop.f32.mrf.mxu0  ;;  %v12690_v19 = vld [vmem:[%s14950_s3 + $0x528] sm:$0xff]   ;;  %v12692_v58 = vld [vmem:[%s14950_s3 + $0x520] sm:$0xff]  }
 0x764   : > { %5071 = vst.msk [vmem:[#allocation2 + $0x108] sm:$0xff] %vm278_vm0, %v5063_v44  ;;  %v5068_v35 = vmax.f32 %v5060_v40, 0.0  ;;  %v5058_v54 = vadd.f32 %v10260_v9, %v5045_v15  ;;  %v5048_v41 = vadd.f32 %v11952_v38, %v4918_v36  ;;  %v5750_v44 = vld [vmem:[#allocation2 + $0xc0] sm:$0xff]  ;;  %v5751_v40 = vld [vmem:[#allocation2 + $0xc8] sm:$0xff]  ;;  %v5752_v36 = vld [vmem:[#allocation2 + $0xd0] sm:$0xff] }
 0x765   : > { %v5029_v16 = vpop.f32.mrf.mxu0  ;;  %v5084_v30 = vld [vmem:[#allocation2 + $0x110] sm:$0xff]  ;;  %v14043_v15 = vpack.c.bf16 %v5751_v40, %v5750_v44  ;;  %v14045_v38 = vpack.c.bf16 %v5753_v49, %v5752_v36 }
 0x766   : > { %5076 = vst.msk [vmem:[#allocation2 + $0x130] sm:$0xff] %vm278_vm0, %v5068_v35  ;;  %v5066_v13 = vmax.f32 %v5058_v54, 0.0  ;;  %v5061_v11 = vadd.f32 %v10260_v9, %v5048_v41  ;;  %v5046_v23 = vadd.f32 %v5029_v16, %v4916_v8  ;;  %v12693_v35 = vld [vmem:[%s14950_s3 + $0x578] sm:$0xff]   ;;  %v5754_v54 = vld [vmem:[#allocation2 + $0xe0] sm:$0xff]  ;;  %v5755_v41 = vld [vmem:[#allocation2 + $0xe8] sm:$0xff] }
 0x767   : > { %v5082_v0 = vld [vmem:[#allocation2 + $0x100] sm:$0xff]  ;;  %v14054_v8 = vpack.c.bf16 %v5755_v41, %v5754_v54  ;;  %v12694_v16 = vld [vmem:[%s14950_s3 + $0x570] sm:$0xff]  }
 0x768   : > { %5074 = vst.msk [vmem:[#allocation2 + $0x120] sm:$0xff] %vm278_vm0, %v5066_v13  ;;  %v5069_v21 = vmax.f32 %v5061_v11, 0.0  ;;  %v5059_v27 = vadd.f32 %v10260_v9, %v5046_v23  ;;  %v5101_v2 = vpack.c.bf16 %v5082_v0, %v13770_v48  ;;  %v12678_v48 = vld [vmem:[%s14950_s3 + $0x4a8] sm:$0xff]   ;;  %v5756_v13 = vld [vmem:[#allocation2 + $0xf0] sm:$0xff]  ;;  %v5757_v11 = vld [vmem:[#allocation2 + $0xf8] sm:$0xff] }
 0x769   : > { %v5085_v3 = vld [vmem:[#allocation2 + $0x118] sm:$0xff] }
 0x76a   : > { %5077 = vst.msk [vmem:[#allocation2 + $0x138] sm:$0xff] %vm278_vm0, %v5069_v21  ;;  %v5067_v45 = vmax.f32 %v5059_v27, 0.0  ;;  %11962 = vmatmul.mubr.msk.bf16.vlgmr.msra.gmra.mxu1 %vm278_vm0, %v5101_v2  ;;  %v5089_v14 = vpack.c.bf16 %v5085_v3, %v5084_v30  ;;  %v12695_v23 = vld [vmem:[%s14950_s3 + $0x558] sm:$0xff]   ;;  %v12696_v21 = vld [vmem:[%s14950_s3 + $0x568] sm:$0xff]   ;;  %v12697_v27 = vld [vmem:[%s14950_s3 + $0x550] sm:$0xff]  }
 0x76b   : > { %11986 = vmatpush3.bf16.msra.mxu1 %v13955_v59  ;;  %v5083_v46 = vld [vmem:[#allocation2 + $0x108] sm:$0xff] }
 0x76c   : > { %5075 = vst.msk [vmem:[#allocation2 + $0x128] sm:$0xff] %vm278_vm0, %v5067_v45  ;;  %11987 = vmatprep.subr.bf16.mxu1 %v12676_v31  ;;  %v5102_v9 = vpack.c.bf16 %v5084_v30, %v5083_v46  ;;  %v5088_v61 = vpack.c.bf16 %v5083_v46, %v5082_v0  ;;  %v14068_v0 = vpack.c.bf16 %v5757_v11, %v5756_v13  ;;  %v12700_v45 = vld [vmem:[%s14950_s3 + $0x540] sm:$0xff]   ;;  %v11979_v46 = vpop.f32.mrf.mxu0 }
 0x76e   : > { %11965 = vmatprep.mubr.msk.bf16.mxu1 %vm278_vm0, %v5102_v9  ;;  %11981 = vmatprep.mubr.msk.bf16.mxu0 %vm278_vm0, %v5088_v61  ;;  %v5284_v30 = vpop.f32.mrf.mxu0 }
 0x76f   : > { %11988 = vmatpush3.bf16.msra.mxu1 %v12676_v31  ;;  %11982 = vmatmul.mubr.msk.bf16.gmra.mxu0 %vm278_vm0, %v5089_v14  ;;  %v5099_v59 = vld [vmem:[#allocation2 + $0x120] sm:$0xff]  ;;  %v12699_v31 = vld [vmem:[%s14950_s3 + $0x548] sm:$0xff]  }
 0x770   : > { %12009 = vmatprep.mubr.msk.bf16.mxu0 %vm278_vm0, %v5101_v2  ;;  %11989 = vmatprep.subr.bf16.mxu1 %v12678_v48  ;;  %v5103_v63 = vpack.c.bf16 %v5099_v59, %v5085_v3  ;;  %v12698_v2 = vld [vmem:[%s14950_s3 + $0x560] sm:$0xff]   ;;  %v14094_v3 = vld [vmem:[%s14950_s3 + $0x598] sm:$0xff]  }
 0x771   : > { %v5582_v62 = vld [vmem:[#allocation2 + $0x138] sm:$0xff] }
 0x772   : > { %11966 = vmatmul.mubr.msk.bf16.gmra.mxu1 %vm278_vm0, %v5103_v63 }
 0x773   : > { %11990 = vmatpush3.bf16.msra.mxu1 %v12678_v48  ;;  %11993 = vmatprep.mubr.msk.bf16.mxu1 %vm278_vm0, %v13773_v12  ;;  %v5451_v37 = vld [vmem:[#allocation2 + $0x128] sm:$0xff]  ;;  %v5452_v12 = vld [vmem:[#allocation2 + $0x130] sm:$0xff] }
 0x774   : > { %11991 = vmatprep.subr.bf16.mxu1 %v12680_v28  ;;  %v5456_v60 = vpack.c.bf16 %v5452_v12, %v5451_v37  ;;  %v5326_v42 = vpack.c.bf16 %v5451_v37, %v5099_v59  ;;  %v5586_v39 = vpack.c.bf16 %v5582_v62, %v5452_v12 }
 0x777   : > { %11992 = vmatpush3.bf16.msra.mxu1 %v12680_v28  ;;  %12010 = vmatmul.mubr.msk.bf16.vlgmr.msra.gmra.mxu0 %vm278_vm0, %v5102_v9  ;;  %v11980_v9 = vpop.f32.mrf.mxu0 }
 0x778   : > { %12013 = vmatprep.mubr.msk.bf16.mxu0 %vm278_vm0, %v5103_v63  ;;  %12017 = vmatprep.subr.bf16.mxu1 %v12681_v25 }
 0x779   : > { %12034 = vmatpush3.bf16.msra.mxu0 %v12686_v10  ;;  %v5287_v48 = vpop.f32.mrf.mxu0 }
 0x77a   : > { %11994 = vmatmul.mubr.msk.bf16.vlgmr.msra.gmra.mxu1 %vm278_vm0, %v5088_v61  ;;  %12035 = vmatprep.subr.bf16.mxu0 %v12688_v56 }
 0x77b   : > { %12018 = vmatpush3.bf16.msra.mxu1 %v12681_v25  ;;  %11997 = vmatprep.mubr.msk.bf16.mxu1 %vm278_vm0, %v5089_v14 }
 0x77c   : > { %12019 = vmatprep.subr.bf16.mxu1 %v12682_v29 }
 0x77d   : > { %12036 = vmatpush3.bf16.msra.mxu0 %v12688_v56 }
 0x77e   : > { %12037 = vmatprep.subr.bf16.mxu0 %v12690_v19 }
 0x77f   : > { %12020 = vmatpush3.bf16.msra.mxu1 %v12682_v29  ;;  %12014 = vmatmul.mubr.msk.bf16.gmra.mxu0 %vm278_vm0, %v5456_v60 }
 0x780   : > { %12021 = vmatprep.subr.bf16.mxu1 %v12683_v33  ;;  %12041 = vmatprep.mubr.msk.bf16.mxu0 %vm278_vm0, %v14045_v38 }
 0x781   : > { %12038 = vmatpush3.bf16.msra.mxu0 %v12690_v19 }
 0x782   : > { %11998 = vmatmul.mubr.msk.bf16.gmra.mxu1 %vm278_vm0, %v5326_v42  ;;  %12039 = vmatprep.subr.bf16.mxu0 %v12692_v58 }
 0x783   : > { %12022 = vmatpush3.bf16.msra.mxu1 %v12683_v33  ;;  %12025 = vmatprep.mubr.msk.bf16.mxu1 %vm278_vm0, %v5088_v61 }
 0x784   : > { %12023 = vmatprep.subr.bf16.mxu1 %v12684_v6 }
 0x785   : > { %12040 = vmatpush3.bf16.msra.mxu0 %v12692_v58 }
 0x786   : > { %12065 = vmatprep.subr.bf16.mxu0 %v12695_v23 }
 0x787   : > { %12024 = vmatpush3.bf16.msra.mxu1 %v12684_v6 }
 0x788   : > { %12049 = vmatprep.subr.bf16.mxu1 %v12685_v24  ;;  %12042 = vmatmul.mubr.msk.bf16.vlgmr.msra.gmra.mxu0 %vm278_vm0, %v14054_v8 }
 0x789   : > { %12066 = vmatpush3.bf16.msra.mxu0 %v12695_v23  ;;  %12045 = vmatprep.mubr.msk.bf16.mxu0 %vm278_vm0, %v14068_v0 }
 0x78a   : > { %12026 = vmatmul.mubr.msk.bf16.vlgmr.msra.gmra.mxu1 %vm278_vm0, %v5089_v14  ;;  %12067 = vmatprep.subr.bf16.mxu0 %v12697_v27 }
 0x78b   : > { %12029 = vmatprep.mubr.msk.bf16.mxu1 %vm278_vm0, %v5326_v42  ;;  %12050 = vmatpush3.bf16.msra.mxu1 %v12685_v24 }
 0x78c   : > { %12051 = vmatprep.subr.bf16.mxu1 %v12687_v32 }
 0x78d   : > { %12068 = vmatpush3.bf16.msra.mxu0 %v12697_v27 }
 0x78e   : > { %12069 = vmatprep.subr.bf16.mxu0 %v12699_v31 }
 0x78f   : > { %12052 = vmatpush3.bf16.msra.mxu1 %v12687_v32 }
 0x790   : > { %12053 = vmatprep.subr.bf16.mxu1 %v12689_v55 }
 0x791   : > { %12070 = vmatpush3.bf16.msra.mxu0 %v12699_v31 }
 0x792   : > { %12030 = vmatmul.mubr.msk.bf16.gmra.mxu1 %vm278_vm0, %v5586_v39  ;;  %12071 = vmatprep.subr.bf16.mxu0 %v12700_v45 }
 0x793   : > { %12054 = vmatpush3.bf16.msra.mxu1 %v12689_v55  ;;  %12057 = vmatprep.mubr.msk.bf16.mxu1 %vm278_vm0, %v14043_v15 }
 0x794   : > { %12055 = vmatprep.subr.bf16.mxu1 %v12691_v7 }
 0x795   : > { %12072 = vmatpush3.bf16.msra.mxu0 %v12700_v45 }
 0x796   : > { %12097 = vmatprep.subr.bf16.mxu0 %v14094_v3 }
 0x797   : > { %12056 = vmatpush3.bf16.msra.mxu1 %v12691_v7 }
 0x798   : > { %12081 = vmatprep.subr.bf16.mxu1 %v12693_v35 }
 0x79a   : > { %12058 = vmatmul.mubr.msk.bf16.vlgmr.msra.gmra.mxu1 %vm278_vm0, %v14045_v38 }
 0x79b   : > { %12082 = vmatpush3.bf16.msra.mxu1 %v12693_v35  ;;  %12061 = vmatprep.mubr.msk.bf16.mxu1 %vm278_vm0, %v14054_v8 }
 0x79c   : > { %12083 = vmatprep.subr.bf16.mxu1 %v12694_v16 }
 0x79f   : > { %12084 = vmatpush3.bf16.msra.mxu1 %v12694_v16 }
 0x7a0   : > { %12085 = vmatprep.subr.bf16.mxu1 %v12696_v21 }
 0x7a2   : > { %12062 = vmatmul.mubr.msk.bf16.gmra.mxu1 %vm278_vm0, %v14068_v0 }
 0x7a3   : > { %12086 = vmatpush3.bf16.msra.mxu1 %v12696_v21  ;;  %12089 = vmatprep.mubr.msk.bf16.mxu1 %vm278_vm0, %v14068_v0  ;;  %v14100_v21 = vld [vmem:[%s14951_s4 + $0x7] ss:$0 sm:$0xff] }
 0x7a4   : > { %12087 = vmatprep.subr.bf16.mxu1 %v12698_v2 }
 0x7a7   : > { %12088 = vmatpush3.bf16.msra.mxu1 %v12698_v2 }
 0x82a   : > { %v11963_v61 = vpop.f32.mrf.mxu1 }
 0x82b   : > { %v5293_v19 = vadd.f32 %v11979_v46, %v11963_v61 }
 0x82c   : > { %v5183_v14 = vpop.f32.mrf.mxu1 }
 0x82d   : > { %v5285_v58 = vadd.f32 %v5284_v30, %v5183_v14 }
 0x82e   : > { %v11964_v59 = vpop.f32.mrf.mxu1 }
 0x82f   : > { %v11983_v63 = vpop.f32.mrf.mxu0  ;;  %v5296_v49 = vadd.f32 %v11980_v9, %v11964_v59 }
 0x830   : > { %v5186_v28 = vpop.f32.mrf.mxu1 }
 0x831   : > { %v5300_v25 = vpop.f32.mrf.mxu0  ;;  %v5288_v41 = vadd.f32 %v5287_v48, %v5186_v28 }
 0x832   : > { %v11967_v29 = vpop.f32.mrf.mxu1 }
 0x833   : > { %v11984_v37 = vpop.f32.mrf.mxu0  ;;  %v5309_v45 = vadd.f32 %v11983_v63, %v11967_v29 }
 0x834   : > { %v5199_v12 = vpop.f32.mrf.mxu1 }
 0x835   : > { %v5303_v33 = vpop.f32.mrf.mxu0  ;;  %v5301_v46 = vadd.f32 %v5300_v25, %v5199_v12 }
 0x836   : > { %v11968_v60 = vpop.f32.mrf.mxu1 }
 0x837   : > { %v12011_v6 = vpop.f32.mrf.mxu0  ;;  %v5312_v59 = vadd.f32 %v11984_v37, %v11968_v60 }
 0x838   : > { %v5202_v42 = vpop.f32.mrf.mxu1 }
 0x839   : > { %v5536_v24 = vpop.f32.mrf.mxu0 }
 0x83a   : > { %v11995_v62 = vpop.f32.mrf.mxu1 }
 0x83b   : > { %v12012_v56 = vpop.f32.mrf.mxu0  ;;  %v5439_v44 = vadd.f32 %v11995_v62, %v5293_v19 }
 0x83c   : > { %v5406_v39 = vpop.f32.mrf.mxu1 }
 0x83d   : > { %v5539_v40 = vpop.f32.mrf.mxu0  ;;  %v5437_v35 = vadd.f32 %v5406_v39, %v5285_v58  ;;  %v5569_v11 = vadd.f32 %v12011_v6, %v5439_v44 }
 0x83e   : > { %v11996_v10 = vpop.f32.mrf.mxu1 }
 0x83f   : > { %v5440_v16 = vadd.f32 %v11996_v10, %v5296_v49  ;;  %v12015_v13 = vpop.f32.mrf.mxu0  ;;  %v5567_v31 = vadd.f32 %v5536_v24, %v5437_v35 }
 0x840   : > { %v5409_v32 = vpop.f32.mrf.mxu1 }
 0x841   : > { %v5438_v27 = vadd.f32 %v5409_v32, %v5288_v41  ;;  %v5552_v61 = vpop.f32.mrf.mxu0  ;;  %v5570_v48 = vadd.f32 %v12012_v56, %v5440_v16  ;;  %v5304_v32 = vadd.f32 %v5303_v33, %v5202_v42 }
 0x842   : > { %v11999_v55 = vpop.f32.mrf.mxu1 }
 0x843   : > { %v5443_v28 = vadd.f32 %v11999_v55, %v5309_v45  ;;  %v5568_v58 = vadd.f32 %v5539_v40, %v5438_v27  ;;  %v12016_v63 = vpop.f32.mrf.mxu0 }
 0x844   : > { %v5422_v7 = vpop.f32.mrf.mxu1 }
 0x845   : > { %v5441_v6 = vadd.f32 %v5422_v7, %v5301_v46  ;;  %v5573_v56 = vadd.f32 %v12015_v13, %v5443_v28  ;;  %v5555_v35 = vpop.f32.mrf.mxu0 }
 0x846   : > { %v12000_v36 = vpop.f32.mrf.mxu1 }
 0x847   : > { %v5444_v44 = vadd.f32 %v12000_v36, %v5312_v59  ;;  %v5571_v7 = vadd.f32 %v5552_v61, %v5441_v6 }
 0x848   : > { %v5425_v54 = vpop.f32.mrf.mxu1 }
 0x849   : > { %v5442_v60 = vadd.f32 %v5425_v54, %v5304_v32  ;;  %v5574_v36 = vadd.f32 %v12016_v63, %v5444_v44  ;;  %v12704_v32 = vld [vmem:[%s14950_s3 + $0x580] sm:$0xff]   ;;  %v12705_v63 = vld [vmem:[%s14950_s3 + $0x5b8] sm:$0xff]  }
 0x84a   : > { %v12027_v23 = vpop.f32.mrf.mxu1 }
 0x84b   : > { %v5699_v2 = vadd.f32 %v12027_v23, %v5569_v11  ;;  %v5572_v11 = vadd.f32 %v5555_v35, %v5442_v60  ;;  %v12710_v60 = vld [vmem:[%s14950_s3 + $0x5c8] sm:$0xff]   ;;  %v12720_v35 = vld [vmem:[%s14950_s3 + $0x5e0] sm:$0xff]  }
 0x84c   : > { %v5666_v30 = vpop.f32.mrf.mxu1 }
 0x84d   : > { %v5712_v9 = vadd.f32 %v14100_v21, %v5699_v2  ;;  %v5697_v14 = vadd.f32 %v5666_v30, %v5567_v31 }
 0x84e   : > { %v12028_v62 = vpop.f32.mrf.mxu1 }
 0x84f   : > { %v5720_v39 = vmax.f32 %v5712_v9, 0.0  ;;  %v5710_v10 = vadd.f32 %v14100_v21, %v5697_v14  ;;  %v5700_v19 = vadd.f32 %v12028_v62, %v5570_v48 }
 0x850   : > { %v5669_v24 = vpop.f32.mrf.mxu1 }
 0x851   : > { %v14106_v25 = vadd.f32 %v5720_v39, %v4408_v34  ;;  %v5718_v29 = vmax.f32 %v5710_v10, 0.0  ;;  %v5713_v12 = vadd.f32 %v14100_v21, %v5700_v19  ;;  %v5698_v37 = vadd.f32 %v5669_v24, %v5568_v58  ;;  %v12702_v19 = vld [vmem:[%s14950_s3 + $0x590] sm:$0xff]   ;;  %v12703_v58 = vld [vmem:[%s14950_s3 + $0x588] sm:$0xff]  }
 0x852   : > { %v12031_v55 = vpop.f32.mrf.mxu1 }
 0x853   : > { %v5736_v49 = vmax.f32 %v14106_v25, 0.0  ;;  %v14112_v33 = vadd.f32 %v5718_v29, %v4406_v20  ;;  %v5721_v42 = vmax.f32 %v5713_v12, 0.0  ;;  %v5711_v40 = vadd.f32 %v14100_v21, %v5698_v37  ;;  %v12706_v29 = vld [vmem:[%s14950_s3 + $0x5d8] sm:$0xff]   ;;  %v12707_v12 = vld [vmem:[%s14950_s3 + $0x5b0] sm:$0xff]   ;;  %v12709_v37 = vld [vmem:[%s14950_s3 + $0x5a8] sm:$0xff]  }
 0x854   : > { %v5703_v52 = vadd.f32 %v12031_v55, %v5573_v56  ;;  %v5682_v34 = vpop.f32.mrf.mxu1  ;;  %12113 = vmatprep.subr.bf16.mxu1 %v12706_v29  ;;  %v12711_v56 = vld [vmem:[%s14950_s3 + $0x5a0] sm:$0xff]  }
 0x855   : > { %5744 = vst.msk [vmem:[#allocation2 + $0x110] sm:$0xff] %vm278_vm0, %v5736_v49  ;;  %v5734_v54 = vmax.f32 %v14112_v33, 0.0  ;;  %v14121_v41 = vadd.f32 %v5721_v42, %v4409_v26  ;;  %v5719_v1 = vmax.f32 %v5711_v40, 0.0  ;;  %v5701_v20 = vadd.f32 %v5682_v34, %v5571_v7  ;;  %v12712_v55 = vld [vmem:[%s14950_s3 + $0x5c0] sm:$0xff]   ;;  %v12713_v7 = vld [vmem:[%s14950_s3 + $0x618] sm:$0xff]   ;;  %v12714_v42 = vld [vmem:[%s14950_s3 + $0x610] sm:$0xff]  }
 0x856   : > { %v5716_v16 = vadd.f32 %v14100_v21, %v5703_v52  ;;  %v12032_v13 = vpop.f32.mrf.mxu1  ;;  %v12716_v40 = vld [vmem:[%s14950_s3 + $0x608] sm:$0xff]   ;;  %v12717_v52 = vld [vmem:[%s14950_s3 + $0x5f0] sm:$0xff]   ;;  %v12718_v34 = vld [vmem:[%s14950_s3 + $0x600] sm:$0xff]  }
 0x857   : > { %5742 = vst.msk [vmem:[#allocation2 + $0x100] sm:$0xff] %vm278_vm0, %v5734_v54  ;;  %v5737_v23 = vmax.f32 %v14121_v41, 0.0  ;;  %v14130_v27 = vadd.f32 %v5719_v1, %v4407_v17  ;;  %v5714_v57 = vadd.f32 %v14100_v21, %v5701_v20  ;;  %v5704_v26 = vadd.f32 %v12032_v13, %v5574_v36  ;;  %v12719_v36 = vld [vmem:[%s14950_s3 + $0x5e8] sm:$0xff]   ;;  %v14265_v1 = vld [vmem:[%s14950_s3 + $0x638] sm:$0xff]  }
 0x858   : > { %v5724_v2 = vmax.f32 %v5716_v16, 0.0  ;;  %v5685_v31 = vpop.f32.mrf.mxu1  ;;  %v14271_v20 = vld [vmem:[%s14950_s3 + $0x678] sm:$0xff]  }
 0x859   : > { %5745 = vst.msk [vmem:[#allocation2 + $0x118] sm:$0xff] %vm278_vm0, %v5737_v23  ;;  %v5735_v45 = vmax.f32 %v14130_v27, 0.0  ;;  %v5722_v46 = vmax.f32 %v5714_v57, 0.0  ;;  %v5717_v30 = vadd.f32 %v14100_v21, %v5704_v26  ;;  %v5702_v61 = vadd.f32 %v5685_v31, %v5572_v11  ;;  %v12043_v57 = vpop.f32.mrf.mxu0 }
 0x85a   : > { %v14140_v18 = vadd.f32 %v5724_v2, %v4412_v4  ;;  %v12059_v16 = vpop.f32.mrf.mxu1 }
 0x85b   : > { %5743 = vst.msk [vmem:[#allocation2 + $0x108] sm:$0xff] %vm278_vm0, %v5735_v45  ;;  %v14147_v17 = vadd.f32 %v5722_v46, %v4410_v22  ;;  %v5725_v9 = vmax.f32 %v5717_v30, 0.0  ;;  %v5715_v14 = vadd.f32 %v14100_v21, %v5702_v61  ;;  %v5853_v2 = vpop.f32.mrf.mxu0 }
 0x85c   : > { %v5740_v48 = vmax.f32 %v14140_v18, 0.0  ;;  %v6110_v62 = vld [vmem:[#allocation2 + $0x110] sm:$0xff]  ;;  %v5945_v13 = vpop.f32.mrf.mxu1 }
 0x85d   : > { %v14957_v59 = vmax.f32 %v14147_v17, 0.0  ;;  %v14154_v53 = vadd.f32 %v5725_v9, %v4413_v51  ;;  %v5723_v4 = vmax.f32 %v5715_v14, 0.0  ;;  %v12044_v46 = vpop.f32.mrf.mxu0 }
 0x85e   : > { %5748 = vst.msk [vmem:[#allocation2 + $0x130] sm:$0xff] %vm278_vm0, %v5740_v48  ;;  %v5771_v21 = vld [vmem:[#allocation2 + $0x100] sm:$0xff]  ;;  %v12060_v11 = vpop.f32.mrf.mxu1 }
 0x85f   : > { %5746 = vst.msk [vmem:[#allocation2 + $0x120] sm:$0xff] %vm278_vm0, %v14957_v59  ;;  %v14956_v43 = vmax.f32 %v14154_v53, 0.0  ;;  %v14165_v22 = vadd.f32 %v5723_v4, %v4411_v5  ;;  %v5856_v61 = vpop.f32.mrf.mxu0 }
 0x860   : > { %v6111_v51 = vld [vmem:[#allocation2 + $0x118] sm:$0xff]  ;;  %v5948_v26 = vpop.f32.mrf.mxu1 }
 0x861   : > { %5749 = vst.msk [vmem:[#allocation2 + $0x138] sm:$0xff] %vm278_vm0, %v14956_v43  ;;  %v14955_v47 = vmax.f32 %v14165_v22, 0.0  ;;  %v6116_v39 = vpack.c.bf16 %v6111_v51, %v6110_v62 }
 0x862   : > { %v5772_v28 = vld [vmem:[#allocation2 + $0x108] sm:$0xff]  ;;  %v12063_v31 = vpop.f32.mrf.mxu1 }
 0x863   : > { %5747 = vst.msk [vmem:[#allocation2 + $0x128] sm:$0xff] %vm278_vm0, %v14955_v47  ;;  %v5773_v6 = vpack.c.bf16 %v5772_v28, %v5771_v21  ;;  %v14438_v47 = vld [vmem:[%s14951_s4 + $0x9] ss:$0 sm:$0xff] }
 0x864   : > { %v5961_v30 = vpop.f32.mrf.mxu1 }
 0x865   : > { %12046 = vmatmul.mubr.msk.bf16.gmra.mxu0 %vm278_vm0, %v5773_v6  ;;  %12090 = vmatmul.mubr.msk.bf16.vlgmr.msra.gmra.mxu1 %vm278_vm0, %v5773_v6  ;;  %v6242_v44 = vld [vmem:[#allocation2 + $0x130] sm:$0xff] }
 0x866   : > { %12093 = vmatprep.mubr.msk.bf16.mxu1 %vm278_vm0, %v6116_v39  ;;  %12073 = vmatprep.mubr.msk.bf16.mxu0 %vm278_vm0, %v14054_v8  ;;  %v6112_v50 = vld [vmem:[#allocation2 + $0x120] sm:$0xff]  ;;  %v12064_v9 = vpop.f32.mrf.mxu1 }
 0x867   : > { %12114 = vmatpush3.bf16.msra.mxu1 %v12706_v29 }
 0x868   : > { %v5964_v51 = vpop.f32.mrf.mxu1 }
 0x86a   : > { %v6113_v5 = vld [vmem:[#allocation2 + $0x128] sm:$0xff] }
 0x86b   : > { %v6117_v10 = vpack.c.bf16 %v6113_v5, %v6112_v50 }
 0x86d   : > { %12074 = vmatmul.mubr.msk.bf16.vlgmr.msra.gmra.mxu0 %vm278_vm0, %v14068_v0  ;;  %12094 = vmatmul.mubr.msk.bf16.gmra.mxu1 %vm278_vm0, %v6117_v10 }
 0x86e   : > { %12098 = vmatpush3.bf16.msra.mxu0 %v14094_v3  ;;  %12077 = vmatprep.mubr.msk.bf16.mxu0 %vm278_vm0, %v5773_v6  ;;  %v6243_v3 = vld [vmem:[#allocation2 + $0x138] sm:$0xff] }
 0x86f   : > { %12099 = vmatprep.subr.bf16.mxu0 %v12702_v19  ;;  %12121 = vmatprep.mubr.msk.bf16.mxu1 %vm278_vm0, %v14045_v38  ;;  %v6247_v24 = vpack.c.bf16 %v6243_v3, %v6242_v44  ;;  %v5946_v44 = vadd.f32 %v5945_v13, %v5853_v2 }
 0x872   : > { %12100 = vmatpush3.bf16.msra.mxu0 %v12702_v19 }
 0x873   : > { %12101 = vmatprep.subr.bf16.mxu0 %v12703_v58 }
 0x875   : > { %12078 = vmatmul.mubr.msk.bf16.gmra.mxu0 %vm278_vm0, %v6116_v39 }
 0x876   : > { %12102 = vmatpush3.bf16.msra.mxu0 %v12703_v58  ;;  %12105 = vmatprep.mubr.msk.bf16.mxu0 %vm278_vm0, %v5773_v6 }
 0x877   : > { %12103 = vmatprep.subr.bf16.mxu0 %v12704_v32 }
 0x87a   : > { %12104 = vmatpush3.bf16.msra.mxu0 %v12704_v32  ;;  %v5954_v32 = vadd.f32 %v12059_v16, %v12043_v57 }
 0x87b   : > { %12129 = vmatprep.subr.bf16.mxu0 %v12705_v63 }
 0x87d   : > { %12106 = vmatmul.mubr.msk.bf16.vlgmr.msra.gmra.mxu0 %vm278_vm0, %v6116_v39 }
 0x87e   : > { %12109 = vmatprep.mubr.msk.bf16.mxu0 %vm278_vm0, %v6117_v10  ;;  %12130 = vmatpush3.bf16.msra.mxu0 %v12705_v63 }
 0x87f   : > { %12131 = vmatprep.subr.bf16.mxu0 %v12707_v12 }
 0x882   : > { %12132 = vmatpush3.bf16.msra.mxu0 %v12707_v12  ;;  %v5957_v12 = vadd.f32 %v12060_v11, %v12044_v46 }
 0x883   : > { %12133 = vmatprep.subr.bf16.mxu0 %v12709_v37 }
 0x885   : > { %12110 = vmatmul.mubr.msk.bf16.gmra.mxu0 %vm278_vm0, %v6247_v24 }
 0x886   : > { %12137 = vmatprep.mubr.msk.bf16.mxu0 %vm278_vm0, %v14043_v15  ;;  %v12708_v15 = vld [vmem:[%s14950_s3 + $0x5d0] sm:$0xff]   ;;  %12134 = vmatpush3.bf16.msra.mxu0 %v12709_v37 }
 0x887   : > { %12115 = vmatprep.subr.bf16.mxu1 %v12708_v15  ;;  %12135 = vmatprep.subr.bf16.mxu0 %v12711_v56 }
 0x888   : > { %12116 = vmatpush3.bf16.msra.mxu1 %v12708_v15 }
 0x889   : > { %12117 = vmatprep.subr.bf16.mxu1 %v12710_v60 }
 0x88a   : > { %12136 = vmatpush3.bf16.msra.mxu0 %v12711_v56 }
 0x88b   : > { %12161 = vmatprep.subr.bf16.mxu0 %v12713_v7 }
 0x88c   : > { %12118 = vmatpush3.bf16.msra.mxu1 %v12710_v60  ;;  %v5949_v60 = vadd.f32 %v5948_v26, %v5856_v61 }
 0x88d   : > { %12119 = vmatprep.subr.bf16.mxu1 %v12712_v55  ;;  %12138 = vmatmul.mubr.msk.bf16.vlgmr.msra.gmra.mxu0 %vm278_vm0, %v14045_v38  ;;  %v12715_v38 = vld [vmem:[%s14950_s3 + $0x5f8] sm:$0xff]  }
 0x88e   : > { %12162 = vmatpush3.bf16.msra.mxu0 %v12713_v7  ;;  %12141 = vmatprep.mubr.msk.bf16.mxu0 %vm278_vm0, %v14054_v8 }
 0x88f   : > { %12163 = vmatprep.subr.bf16.mxu0 %v12714_v42 }
 0x890   : > { %12120 = vmatpush3.bf16.msra.mxu1 %v12712_v55 }
 0x891   : > { %12145 = vmatprep.subr.bf16.mxu1 %v12715_v38 }
 0x892   : > { %12164 = vmatpush3.bf16.msra.mxu0 %v12714_v42 }
 0x893   : > { %12122 = vmatmul.mubr.msk.bf16.vlgmr.msra.gmra.mxu1 %vm278_vm0, %v14054_v8  ;;  %12165 = vmatprep.subr.bf16.mxu0 %v12716_v40 }
 0x894   : > { %12125 = vmatprep.mubr.msk.bf16.mxu1 %vm278_vm0, %v14068_v0  ;;  %12146 = vmatpush3.bf16.msra.mxu1 %v12715_v38 }
 0x895   : > { %12142 = vmatmul.mubr.msk.bf16.gmra.mxu0 %vm278_vm0, %v14068_v0  ;;  %12147 = vmatprep.subr.bf16.mxu1 %v12717_v52 }
 0x896   : > { %12166 = vmatpush3.bf16.msra.mxu0 %v12716_v40  ;;  %12169 = vmatprep.mubr.msk.bf16.mxu0 %vm278_vm0, %v14068_v0  ;;  %v10422_v40 = vld [vmem:[%s14951_s4 + $0x8] ss:$0 sm:$0xff] }
 0x897   : > { %12167 = vmatprep.subr.bf16.mxu0 %v12718_v34 }
 0x898   : > { %12148 = vmatpush3.bf16.msra.mxu1 %v12717_v52 }
 0x899   : > { %12149 = vmatprep.subr.bf16.mxu1 %v12719_v36 }
 0x89a   : > { %12168 = vmatpush3.bf16.msra.mxu0 %v12718_v34 }
 0x89b   : > { %12193 = vmatprep.subr.bf16.mxu0 %v14271_v20 }
 0x89c   : > { %12150 = vmatpush3.bf16.msra.mxu1 %v12719_v36 }
 0x89d   : > { %12151 = vmatprep.subr.bf16.mxu1 %v12720_v35 }
 0x8a0   : > { %12152 = vmatpush3.bf16.msra.mxu1 %v12720_v35 }
 0x8a1   : > { %12177 = vmatprep.subr.bf16.mxu1 %v14265_v1 }
 0x925   : > { %v12047_v14 = vpop.f32.mrf.mxu0  ;;  %v12091_v6 = vpop.f32.mrf.mxu1 }
 0x926   : > { %v5970_v7 = vadd.f32 %v12063_v31, %v12047_v14 }
 0x927   : > { %v5869_v4 = vpop.f32.mrf.mxu0  ;;  %v6197_v50 = vpop.f32.mrf.mxu1 }
 0x928   : > { %v5962_v35 = vadd.f32 %v5961_v30, %v5869_v4 }
 0x929   : > { %v12048_v21 = vpop.f32.mrf.mxu0  ;;  %v12092_v19 = vpop.f32.mrf.mxu1 }
 0x92a   : > { %v5973_v46 = vadd.f32 %v12064_v9, %v12048_v21 }
 0x92b   : > { %v5872_v28 = vpop.f32.mrf.mxu0  ;;  %v6200_v63 = vpop.f32.mrf.mxu1 }
 0x92d   : > { %v12075_v62 = vpop.f32.mrf.mxu0  ;;  %v12095_v42 = vpop.f32.mrf.mxu1 }
 0x92e   : > { %v6100_v24 = vadd.f32 %v12075_v62, %v5954_v32 }
 0x92f   : > { %v6067_v39 = vpop.f32.mrf.mxu0  ;;  %v6213_v26 = vpop.f32.mrf.mxu1 }
 0x930   : > { %v6098_v15 = vadd.f32 %v6067_v39, %v5946_v44  ;;  %v6230_v55 = vadd.f32 %v12091_v6, %v6100_v24 }
 0x931   : > { %v12076_v5 = vpop.f32.mrf.mxu0 }
 0x932   : > { %v6101_v56 = vadd.f32 %v12076_v5, %v5957_v12  ;;  %v6228_v36 = vadd.f32 %v6197_v50, %v6098_v15  ;;  %v5965_v5 = vadd.f32 %v5964_v51, %v5872_v28 }
 0x933   : > { %v6070_v10 = vpop.f32.mrf.mxu0 }
 0x934   : > { %v6099_v52 = vadd.f32 %v6070_v10, %v5949_v60  ;;  %v6231_v2 = vadd.f32 %v12092_v19, %v6101_v56 }
 0x935   : > { %v12079_v58 = vpop.f32.mrf.mxu0 }
 0x936   : > { %v6104_v16 = vadd.f32 %v12079_v58, %v5970_v7  ;;  %v6229_v39 = vadd.f32 %v6200_v63, %v6099_v52  ;;  %v12096_v58 = vpop.f32.mrf.mxu1 }
 0x937   : > { %v6083_v3 = vpop.f32.mrf.mxu0 }
 0x938   : > { %v6102_v61 = vadd.f32 %v6083_v3, %v5962_v35  ;;  %v6234_v44 = vadd.f32 %v12095_v42, %v6104_v16  ;;  %v6216_v60 = vpop.f32.mrf.mxu1 }
 0x939   : > { %v12080_v29 = vpop.f32.mrf.mxu0 }
 0x93a   : > { %v6105_v10 = vadd.f32 %v12080_v29, %v5973_v46  ;;  %v6232_v19 = vadd.f32 %v6213_v26, %v6102_v61 }
 0x93b   : > { %v6086_v37 = vpop.f32.mrf.mxu0 }
 0x93c   : > { %v6103_v9 = vadd.f32 %v6086_v37, %v5965_v5  ;;  %v6235_v29 = vadd.f32 %v12096_v58, %v6105_v10  ;;  %v12728_v10 = vld [vmem:[%s14950_s3 + $0x650] sm:$0xff]  }
 0x93d   : > { %v12107_v38 = vpop.f32.mrf.mxu0 }
 0x93e   : > { %v6360_v34 = vadd.f32 %v12107_v38, %v6230_v55  ;;  %v6233_v37 = vadd.f32 %v6216_v60, %v6103_v9  ;;  %v7063_v9 = vld [vmem:[#allocation2 + $0xb8] sm:$0xff] }
 0x93f   : > { %v6327_v13 = vpop.f32.mrf.mxu0 }
 0x940   : > { %v6373_v57 = vadd.f32 %v10422_v40, %v6360_v34  ;;  %v6358_v11 = vadd.f32 %v6327_v13, %v6228_v36 }
 0x941   : > { %v12108_v6 = vpop.f32.mrf.mxu0 }
 0x942   : > { %v6381_v31 = vmax.f32 %v6373_v57, 0.0  ;;  %v6371_v14 = vadd.f32 %v10422_v40, %v6358_v11  ;;  %v6361_v62 = vadd.f32 %v12108_v6, %v6231_v2  ;;  %v12727_v6 = vld [vmem:[%s14950_s3 + $0x670] sm:$0xff]  }
 0x943   : > { %v6330_v32 = vpop.f32.mrf.mxu0 }
 0x944   : > { %6389 = vst.msk [vmem:[#allocation2 + $0x110] sm:$0xff] %vm278_vm0, %v6381_v31  ;;  %v6379_v30 = vmax.f32 %v6371_v14, 0.0  ;;  %v6374_v4 = vadd.f32 %v10422_v40, %v6361_v62  ;;  %v6359_v50 = vadd.f32 %v6330_v32, %v6229_v39  ;;  %v7060_v31 = vld [vmem:[#allocation2 + $0xa0] sm:$0xff]  ;;  %v7061_v14 = vld [vmem:[#allocation2 + $0xa8] sm:$0xff]  ;;  %v12722_v32 = vld [vmem:[%s14950_s3 + $0x630] sm:$0xff]  }
 0x945   : > { %v12111_v24 = vpop.f32.mrf.mxu0 }
 0x946   : > { %6387 = vst.msk [vmem:[#allocation2 + $0x100] sm:$0xff] %vm278_vm0, %v6379_v30  ;;  %v6382_v21 = vmax.f32 %v6374_v4, 0.0  ;;  %v6372_v3 = vadd.f32 %v10422_v40, %v6359_v50  ;;  %v6364_v12 = vadd.f32 %v12111_v24, %v6234_v44  ;;  %v12723_v44 = vld [vmem:[%s14950_s3 + $0x628] sm:$0xff]   ;;  %v12732_v24 = vld [vmem:[%s14950_s3 + $0x640] sm:$0xff]  }
 0x947   : > { %v6343_v15 = vpop.f32.mrf.mxu0  ;;  %v12730_v30 = vld [vmem:[%s14950_s3 + $0x648] sm:$0xff]  }
 0x948   : > { %6390 = vst.msk [vmem:[#allocation2 + $0x118] sm:$0xff] %vm278_vm0, %v6382_v21  ;;  %v6380_v51 = vmax.f32 %v6372_v3, 0.0  ;;  %v6377_v28 = vadd.f32 %v10422_v40, %v6364_v12  ;;  %v6362_v63 = vadd.f32 %v6343_v15, %v6232_v19  ;;  %v7062_v19 = vld [vmem:[#allocation2 + $0xb0] sm:$0xff]  ;;  %v12733_v21 = vld [vmem:[%s14950_s3 + $0x698] sm:$0xff]   ;;  %v7056_v12 = vld [vmem:[#allocation2 + $0x80] sm:$0xff] }
 0x949   : > { %v12112_v56 = vpop.f32.mrf.mxu0  ;;  %v14338_v3 = vpack.c.bf16 %v7063_v9, %v7062_v19  ;;  %v7057_v15 = vld [vmem:[#allocation2 + $0x88] sm:$0xff] }
 0x94a   : > { %6388 = vst.msk [vmem:[#allocation2 + $0x108] sm:$0xff] %vm278_vm0, %v6380_v51  ;;  %v6385_v55 = vmax.f32 %v6377_v28, 0.0  ;;  %v6375_v7 = vadd.f32 %v10422_v40, %v6362_v63  ;;  %v6365_v42 = vadd.f32 %v12112_v56, %v6235_v29  ;;  %v14340_v51 = vpack.c.bf16 %v7057_v15, %v7056_v12  ;;  %v7058_v28 = vld [vmem:[#allocation2 + $0x90] sm:$0xff]  ;;  %v7059_v63 = vld [vmem:[#allocation2 + $0x98] sm:$0xff] }
 0x94b   : > { %v6346_v38 = vpop.f32.mrf.mxu0  ;;  %v6755_v26 = vld [vmem:[#allocation2 + $0x110] sm:$0xff]  ;;  %v12734_v29 = vld [vmem:[%s14950_s3 + $0x6b8] sm:$0xff]   ;;  %v14347_v60 = vpack.c.bf16 %v7059_v63, %v7058_v28 }
 0x94c   : > { %6393 = vst.msk [vmem:[#allocation2 + $0x130] sm:$0xff] %vm278_vm0, %v6385_v55  ;;  %v6383_v52 = vmax.f32 %v6375_v7, 0.0  ;;  %v6378_v34 = vadd.f32 %v10422_v40, %v6365_v42  ;;  %v6363_v36 = vadd.f32 %v6346_v38, %v6233_v37  ;;  %v12735_v56 = vld [vmem:[%s14950_s3 + $0x690] sm:$0xff]   ;;  %v7077_v7 = vld [vmem:[#allocation2 + $0xc0] sm:$0xff]  ;;  %v7078_v42 = vld [vmem:[#allocation2 + $0xc8] sm:$0xff] }
 0x94d   : > { %v6416_v11 = vld [vmem:[#allocation2 + $0x100] sm:$0xff]  ;;  %v12736_v55 = vld [vmem:[%s14950_s3 + $0x6b0] sm:$0xff]   ;;  %v14359_v37 = vpack.c.bf16 %v7078_v42, %v7077_v7 }
 0x94e   : > { %6391 = vst.msk [vmem:[#allocation2 + $0x120] sm:$0xff] %vm278_vm0, %v6383_v52  ;;  %v6386_v35 = vmax.f32 %v6378_v34, 0.0  ;;  %v6376_v16 = vadd.f32 %v10422_v40, %v6363_v36  ;;  %v12729_v40 = vld [vmem:[%s14950_s3 + $0x668] sm:$0xff]   ;;  %v7079_v38 = vld [vmem:[#allocation2 + $0xd0] sm:$0xff]  ;;  %v7080_v52 = vld [vmem:[#allocation2 + $0xd8] sm:$0xff] }
 0x94f   : > { %v6756_v57 = vld [vmem:[#allocation2 + $0x118] sm:$0xff]  ;;  %v12737_v34 = vld [vmem:[%s14950_s3 + $0x688] sm:$0xff]   ;;  %v14368_v36 = vpack.c.bf16 %v7080_v52, %v7079_v38 }
 0x950   : > { %6394 = vst.msk [vmem:[#allocation2 + $0x138] sm:$0xff] %vm278_vm0, %v6386_v35  ;;  %v6384_v13 = vmax.f32 %v6376_v16, 0.0  ;;  %v6761_v61 = vpack.c.bf16 %v6756_v57, %v6755_v26  ;;  %v12738_v35 = vld [vmem:[%s14950_s3 + $0x6a8] sm:$0xff]   ;;  %v12739_v16 = vld [vmem:[%s14950_s3 + $0x680] sm:$0xff]   ;;  %v7421_v26 = vld [vmem:[#allocation2 + $0xf8] sm:$0xff] }
 0x951   : > { %v6417_v2 = vld [vmem:[#allocation2 + $0x108] sm:$0xff]  ;;  %v7418_v57 = vld [vmem:[#allocation2 + $0xe0] sm:$0xff] }
 0x952   : > { %6392 = vst.msk [vmem:[#allocation2 + $0x128] sm:$0xff] %vm278_vm0, %v6384_v13  ;;  %v6418_v46 = vpack.c.bf16 %v6417_v2, %v6416_v11  ;;  %v12740_v13 = vld [vmem:[%s14950_s3 + $0x6a0] sm:$0xff]   ;;  %v7419_v11 = vld [vmem:[#allocation2 + $0xe8] sm:$0xff] }
 0x953   : > { %v6887_v50 = vld [vmem:[#allocation2 + $0x130] sm:$0xff]  ;;  %v14385_v2 = vpack.c.bf16 %v7419_v11, %v7418_v57 }
 0x954   : > { %12126 = vmatmul.mubr.msk.bf16.gmra.mxu1 %vm278_vm0, %v6418_v46  ;;  %12170 = vmatmul.mubr.msk.bf16.vlgmr.msra.gmra.mxu0 %vm278_vm0, %v6418_v46 }
 0x955   : > { %12173 = vmatprep.mubr.msk.bf16.mxu0 %vm278_vm0, %v6761_v61  ;;  %12153 = vmatprep.mubr.msk.bf16.mxu1 %vm278_vm0, %v14054_v8  ;;  %v6757_v62 = vld [vmem:[#allocation2 + $0x120] sm:$0xff] }
 0x956   : > { %12194 = vmatpush3.bf16.msra.mxu0 %v14271_v20  ;;  %v12731_v8 = vld [vmem:[%s14950_s3 + $0x660] sm:$0xff]   ;;  %v14303_v20 = vpack.c.bf16 %v7061_v14, %v7060_v31  ;;  %v12743_v31 = vld [vmem:[%s14950_s3 + $0x6c8] sm:$0xff]  }
 0x957   : > { %12195 = vmatprep.subr.bf16.mxu0 %v12727_v6  ;;  %v6888_v4 = vld [vmem:[#allocation2 + $0x138] sm:$0xff]  ;;  %v12744_v14 = vld [vmem:[%s14950_s3 + $0x6c0] sm:$0xff]  }
 0x958   : > { %v6892_v58 = vpack.c.bf16 %v6888_v4, %v6887_v50 }
 0x959   : > { %v6758_v39 = vld [vmem:[#allocation2 + $0x128] sm:$0xff] }
 0x95a   : > { %v6762_v5 = vpack.c.bf16 %v6758_v39, %v6757_v62  ;;  %12196 = vmatpush3.bf16.msra.mxu0 %v12727_v6  ;;  %v12741_v6 = vld [vmem:[%s14950_s3 + $0x6d8] sm:$0xff]  }
 0x95b   : > { %12197 = vmatprep.subr.bf16.mxu0 %v12729_v40  ;;  %v12745_v62 = vld [vmem:[%s14950_s3 + $0x718] sm:$0xff]  }
 0x95c   : > { %12154 = vmatmul.mubr.msk.bf16.vlgmr.msra.gmra.mxu1 %vm278_vm0, %v14068_v0  ;;  %12174 = vmatmul.mubr.msk.bf16.gmra.mxu0 %vm278_vm0, %v6762_v5  ;;  %v12724_v0 = vld [vmem:[%s14950_s3 + $0x620] sm:$0xff]   ;;  %v14417_v39 = vld [vmem:[%s14950_s3 + $0x6f8] sm:$0xff]  }
 0x95d   : > { %12178 = vmatpush3.bf16.msra.mxu1 %v14265_v1  ;;  %12157 = vmatprep.mubr.msk.bf16.mxu1 %vm278_vm0, %v6418_v46  ;;  %v12726_v1 = vld [vmem:[%s14950_s3 + $0x658] sm:$0xff]  }
 0x95e   : > { %12179 = vmatprep.subr.bf16.mxu1 %v12722_v32  ;;  %12198 = vmatpush3.bf16.msra.mxu0 %v12729_v40  ;;  %v12742_v40 = vld [vmem:[%s14950_s3 + $0x6d0] sm:$0xff]  }
 0x95f   : > { %12199 = vmatprep.subr.bf16.mxu0 %v12731_v8  ;;  %12201 = vmatprep.mubr.msk.bf16.mxu0 %vm278_vm0, %v14303_v20 }
 0x961   : > { %12180 = vmatpush3.bf16.msra.mxu1 %v12722_v32  ;;  %v12749_v32 = vld [vmem:[%s14950_s3 + $0x708] sm:$0xff]  }
 0x962   : > { %12181 = vmatprep.subr.bf16.mxu1 %v12723_v44  ;;  %12200 = vmatpush3.bf16.msra.mxu0 %v12731_v8  ;;  %v12751_v8 = vld [vmem:[%s14950_s3 + $0x700] sm:$0xff]  }
 0x963   : > { %12225 = vmatprep.subr.bf16.mxu0 %v12733_v21 }
 0x964   : > { %12158 = vmatmul.mubr.msk.bf16.gmra.mxu1 %vm278_vm0, %v6761_v61 }
 0x965   : > { %12182 = vmatpush3.bf16.msra.mxu1 %v12723_v44  ;;  %12185 = vmatprep.mubr.msk.bf16.mxu1 %vm278_vm0, %v6418_v46  ;;  %v7420_v46 = vld [vmem:[#allocation2 + $0xf0] sm:$0xff]  ;;  %v14432_v44 = vld [vmem:[%s14950_s3 + $0x738] sm:$0xff]  }
 0x966   : > { %12183 = vmatprep.subr.bf16.mxu1 %v12724_v0  ;;  %12202 = vmatmul.mubr.msk.bf16.vlgmr.msra.gmra.mxu0 %vm278_vm0, %v14338_v3 }
 0x967   : > { %12226 = vmatpush3.bf16.msra.mxu0 %v12733_v21  ;;  %12205 = vmatprep.mubr.msk.bf16.mxu0 %vm278_vm0, %v14359_v37 }
 0x968   : > { %12227 = vmatprep.subr.bf16.mxu0 %v12735_v56 }
 0x969   : > { %12184 = vmatpush3.bf16.msra.mxu1 %v12724_v0  ;;  %v12139_v0 = vpop.f32.mrf.mxu0 }
 0x96a   : > { %12209 = vmatprep.subr.bf16.mxu1 %v12726_v1 }
 0x96b   : > { %12228 = vmatpush3.bf16.msra.mxu0 %v12735_v56 }
 0x96c   : > { %12186 = vmatmul.mubr.msk.bf16.vlgmr.msra.gmra.mxu1 %vm278_vm0, %v6761_v61  ;;  %12229 = vmatprep.subr.bf16.mxu0 %v12737_v34  ;;  %v14391_v61 = vpack.c.bf16 %v7421_v26, %v7420_v46 }
 0x96d   : > { %12189 = vmatprep.mubr.msk.bf16.mxu1 %vm278_vm0, %v6762_v5  ;;  %12210 = vmatpush3.bf16.msra.mxu1 %v12726_v1  ;;  %v12747_v5 = vld [vmem:[%s14950_s3 + $0x710] sm:$0xff]   ;;  %v6590_v1 = vpop.f32.mrf.mxu0 }
 0x96e   : > { %12211 = vmatprep.subr.bf16.mxu1 %v12728_v10  ;;  %12206 = vmatmul.mubr.msk.bf16.gmra.mxu0 %vm278_vm0, %v14368_v36 }
 0x96f   : > { %12230 = vmatpush3.bf16.msra.mxu0 %v12737_v34  ;;  %12233 = vmatprep.mubr.msk.bf16.mxu0 %vm278_vm0, %v14359_v37 }
 0x970   : > { %12231 = vmatprep.subr.bf16.mxu0 %v12739_v16 }
 0x971   : > { %12212 = vmatpush3.bf16.msra.mxu1 %v12728_v10  ;;  %v12140_v10 = vpop.f32.mrf.mxu0 }
 0x972   : > { %12213 = vmatprep.subr.bf16.mxu1 %v12730_v30 }
 0x973   : > { %12232 = vmatpush3.bf16.msra.mxu0 %v12739_v16  ;;  %v6593_v4 = vpop.f32.mrf.mxu0 }
 0x974   : > { %12190 = vmatmul.mubr.msk.bf16.gmra.mxu1 %vm278_vm0, %v6892_v58  ;;  %12257 = vmatprep.subr.bf16.mxu0 %v12741_v6 }
 0x975   : > { %12214 = vmatpush3.bf16.msra.mxu1 %v12730_v30  ;;  %12217 = vmatprep.mubr.msk.bf16.mxu1 %vm278_vm0, %v14340_v51  ;;  %v12123_v30 = vpop.f32.mrf.mxu1  ;;  %v12143_v58 = vpop.f32.mrf.mxu0 }
 0x976   : > { %12215 = vmatprep.subr.bf16.mxu1 %v12732_v24  ;;  %12234 = vmatmul.mubr.msk.bf16.vlgmr.msra.gmra.mxu0 %vm278_vm0, %v14368_v36  ;;  %v6599_v16 = vadd.f32 %v12139_v0, %v12123_v30 }
 0x977   : > { %12237 = vmatprep.mubr.msk.bf16.mxu0 %vm278_vm0, %v14385_v2  ;;  %12258 = vmatpush3.bf16.msra.mxu0 %v12741_v6  ;;  %v6498_v50 = vpop.f32.mrf.mxu1  ;;  %v6606_v19 = vpop.f32.mrf.mxu0 }
 0x978   : > { %12259 = vmatprep.subr.bf16.mxu0 %v12742_v40  ;;  %v6591_v57 = vadd.f32 %v6590_v1, %v6498_v50 }
 0x979   : > { %12216 = vmatpush3.bf16.msra.mxu1 %v12732_v24  ;;  %v12124_v24 = vpop.f32.mrf.mxu1  ;;  %v12144_v21 = vpop.f32.mrf.mxu0 }
 0x97a   : > { %12241 = vmatprep.subr.bf16.mxu1 %v12734_v29  ;;  %v6602_v6 = vadd.f32 %v12140_v10, %v12124_v24 }
 0x97b   : > { %12260 = vmatpush3.bf16.msra.mxu0 %v12742_v40  ;;  %v6501_v9 = vpop.f32.mrf.mxu1  ;;  %v6609_v28 = vpop.f32.mrf.mxu0 }
 0x97c   : > { %12218 = vmatmul.mubr.msk.bf16.vlgmr.msra.gmra.mxu1 %vm278_vm0, %v14347_v60  ;;  %12261 = vmatprep.subr.bf16.mxu0 %v12743_v31 }
 0x97d   : > { %12242 = vmatpush3.bf16.msra.mxu1 %v12734_v29  ;;  %12221 = vmatprep.mubr.msk.bf16.mxu1 %vm278_vm0, %v14303_v20 }
 0x97e   : > { %12243 = vmatprep.subr.bf16.mxu1 %v12736_v55  ;;  %12238 = vmatmul.mubr.msk.bf16.gmra.mxu0 %vm278_vm0, %v14391_v61 }
 0x97f   : > { %12262 = vmatpush3.bf16.msra.mxu0 %v12743_v31 }
 0x980   : > { %12263 = vmatprep.subr.bf16.mxu0 %v12744_v14 }
 0x981   : > { %12244 = vmatpush3.bf16.msra.mxu1 %v12736_v55 }
 0x982   : > { %12245 = vmatprep.subr.bf16.mxu1 %v12738_v35 }
 0x983   : > { %12264 = vmatpush3.bf16.msra.mxu0 %v12744_v14  ;;  %v6594_v14 = vadd.f32 %v6593_v4, %v6501_v9 }
 0x984   : > { %12222 = vmatmul.mubr.msk.bf16.gmra.mxu1 %vm278_vm0, %v14338_v3  ;;  %12289 = vmatprep.subr.bf16.mxu0 %v14417_v39 }
 0x985   : > { %12246 = vmatpush3.bf16.msra.mxu1 %v12738_v35  ;;  %12249 = vmatprep.mubr.msk.bf16.mxu1 %vm278_vm0, %v14385_v2 }
 0x986   : > { %12247 = vmatprep.subr.bf16.mxu1 %v12740_v13 }
 0x989   : > { %12248 = vmatpush3.bf16.msra.mxu1 %v12740_v13 }
 0x98a   : > { %12273 = vmatprep.subr.bf16.mxu1 %v12745_v62 }
 0x98c   : > { %12250 = vmatmul.mubr.msk.bf16.vlgmr.msra.gmra.mxu1 %vm278_vm0, %v14391_v61 }
 0x98d   : > { %12274 = vmatpush3.bf16.msra.mxu1 %v12745_v62 }
 0x98e   : > { %12275 = vmatprep.subr.bf16.mxu1 %v12747_v5 }
 0x991   : > { %12276 = vmatpush3.bf16.msra.mxu1 %v12747_v5 }
 0x992   : > { %12277 = vmatprep.subr.bf16.mxu1 %v12749_v32 }
 0x995   : > { %12278 = vmatpush3.bf16.msra.mxu1 %v12749_v32 }
 0x996   : > { %12279 = vmatprep.subr.bf16.mxu1 %v12751_v8 }
 0x999   : > { %12280 = vmatpush3.bf16.msra.mxu1 %v12751_v8 }
 0x99a   : > { %12305 = vmatprep.subr.bf16.mxu1 %v14432_v44 }
 0xa14   : > { %v12127_v12 = vpop.f32.mrf.mxu1  ;;  %v12171_v56 = vpop.f32.mrf.mxu0 }
 0xa15   : > { %v6615_v1 = vadd.f32 %v12143_v58, %v12127_v12 }
 0xa16   : > { %v6514_v15 = vpop.f32.mrf.mxu1  ;;  %v6842_v42 = vpop.f32.mrf.mxu0 }
 0xa17   : > { %v6607_v50 = vadd.f32 %v6606_v19, %v6514_v15 }
 0xa18   : > { %v12128_v63 = vpop.f32.mrf.mxu1  ;;  %v12172_v34 = vpop.f32.mrf.mxu0 }
 0xa19   : > { %v6618_v9 = vadd.f32 %v12144_v21, %v12128_v63 }
 0xa1a   : > { %v6517_v29 = vpop.f32.mrf.mxu1  ;;  %v6845_v11 = vpop.f32.mrf.mxu0 }
 0xa1c   : > { %v12155_v55 = vpop.f32.mrf.mxu1  ;;  %v12175_v62 = vpop.f32.mrf.mxu0 }
 0xa1d   : > { %v6745_v46 = vadd.f32 %v12155_v55, %v6599_v16 }
 0xa1e   : > { %v6712_v7 = vpop.f32.mrf.mxu1  ;;  %v6858_v16 = vpop.f32.mrf.mxu0 }
 0xa1f   : > { %v6743_v40 = vadd.f32 %v6712_v7, %v6591_v57  ;;  %v6875_v32 = vadd.f32 %v12171_v56, %v6745_v46 }
 0xa20   : > { %v12156_v38 = vpop.f32.mrf.mxu1  ;;  %v12176_v58 = vpop.f32.mrf.mxu0 }
 0xa21   : > { %v6746_v5 = vadd.f32 %v12156_v38, %v6602_v6  ;;  %v6873_v30 = vadd.f32 %v6842_v42, %v6743_v40 }
 0xa22   : > { %v6715_v52 = vpop.f32.mrf.mxu1 }
 0xa23   : > { %v6744_v43 = vadd.f32 %v6715_v52, %v6594_v14  ;;  %v6876_v4 = vadd.f32 %v12172_v34, %v6746_v5  ;;  %v6610_v52 = vadd.f32 %v6609_v28, %v6517_v29 }
 0xa24   : > { %v12159_v35 = vpop.f32.mrf.mxu1 }
 0xa25   : > { %v6749_v7 = vadd.f32 %v12159_v35, %v6615_v1  ;;  %v6874_v59 = vadd.f32 %v6845_v11, %v6744_v43 }
 0xa26   : > { %v6728_v13 = vpop.f32.mrf.mxu1 }
 0xa27   : > { %v6747_v56 = vadd.f32 %v6728_v13, %v6607_v50  ;;  %v6879_v34 = vadd.f32 %v12175_v62, %v6749_v7 }
 0xa28   : > { %v12160_v26 = vpop.f32.mrf.mxu1 }
 0xa29   : > { %v6750_v14 = vadd.f32 %v12160_v26, %v6618_v9  ;;  %v6877_v13 = vadd.f32 %v6858_v16, %v6747_v56  ;;  %v6861_v26 = vpop.f32.mrf.mxu0 }
 0xa2a   : > { %v6731_v31 = vpop.f32.mrf.mxu1 }
 0xa2b   : > { %v6748_v63 = vadd.f32 %v6731_v31, %v6610_v52  ;;  %v6880_v11 = vadd.f32 %v12176_v58, %v6750_v14 }
 0xa2c   : > { %v12187_v8 = vpop.f32.mrf.mxu1 }
 0xa2d   : > { %v7005_v0 = vadd.f32 %v12187_v8, %v6875_v32  ;;  %v6878_v32 = vadd.f32 %v6861_v26, %v6748_v63  ;;  %v12769_v26 = vld [vmem:[%s14950_s3 + $0x7a8] sm:$0xff]  }
 0xa2e   : > { %v6972_v55 = vpop.f32.mrf.mxu1 }
 0xa2f   : > { %v7018_v10 = vadd.f32 %v14438_v47, %v7005_v0  ;;  %v7003_v24 = vadd.f32 %v6972_v55, %v6873_v30 }
 0xa30   : > { %v12188_v38 = vpop.f32.mrf.mxu1 }
 0xa31   : > { %v7026_v57 = vmax.f32 %v7018_v10, 0.0  ;;  %v7016_v46 = vadd.f32 %v14438_v47, %v7003_v24  ;;  %v7006_v6 = vadd.f32 %v12188_v38, %v6876_v4  ;;  %v14961_v38 = vmax.f32 %v14154_v53, 0.0 }
 0xa32   : > { %v6975_v42 = vpop.f32.mrf.mxu1 }
 0xa33   : > { %v14444_v19 = vadd.f32 %v7026_v57, %v5736_v49  ;;  %v7024_v12 = vmax.f32 %v7016_v46, 0.0  ;;  %v7019_v15 = vadd.f32 %v14438_v47, %v7006_v6  ;;  %v7004_v21 = vadd.f32 %v6975_v42, %v6874_v59 }
 0xa34   : > { %v12191_v35 = vpop.f32.mrf.mxu1 }
 0xa35   : > { %v7042_v40 = vmax.f32 %v14444_v19, 0.0  ;;  %v14450_v43 = vadd.f32 %v7024_v12, %v5734_v54  ;;  %v7027_v28 = vmax.f32 %v7019_v15, 0.0  ;;  %v7017_v29 = vadd.f32 %v14438_v47, %v7004_v21  ;;  %v12750_v12 = vld [vmem:[%s14950_s3 + $0x6e8] sm:$0xff]  }
 0xa36   : > { %v7009_v25 = vadd.f32 %v12191_v35, %v6879_v34  ;;  %v6988_v49 = vpop.f32.mrf.mxu1 }
 0xa37   : > { %7050 = vst.msk [vmem:[#allocation2 + $0x110] sm:$0xff] %vm278_vm0, %v7042_v40  ;;  %v7040_v59 = vmax.f32 %v14450_v43, 0.0  ;;  %v14459_v31 = vadd.f32 %v7027_v28, %v5737_v23  ;;  %v7025_v33 = vmax.f32 %v7017_v29, 0.0  ;;  %v7007_v54 = vadd.f32 %v6988_v49, %v6877_v13  ;;  %v12755_v28 = vld [vmem:[%s14950_s3 + $0x730] sm:$0xff]   ;;  %v12754_v29 = vld [vmem:[%s14950_s3 + $0x758] sm:$0xff]   ;;  %v12758_v49 = vld [vmem:[%s14950_s3 + $0x748] sm:$0xff]  }
 0xa38   : > { %v7022_v62 = vadd.f32 %v14438_v47, %v7009_v25  ;;  %v12192_v5 = vpop.f32.mrf.mxu1  ;;  %v12757_v25 = vld [vmem:[%s14950_s3 + $0x728] sm:$0xff]  }
 0xa39   : > { %7048 = vst.msk [vmem:[#allocation2 + $0x100] sm:$0xff] %vm278_vm0, %v7040_v59  ;;  %v7043_v8 = vmax.f32 %v14459_v31, 0.0  ;;  %v14468_v0 = vadd.f32 %v7025_v33, %v5735_v45  ;;  %v7020_v41 = vadd.f32 %v14438_v47, %v7007_v54  ;;  %v7010_v23 = vadd.f32 %v12192_v5, %v6880_v11  ;;  %v12767_v11 = vld [vmem:[%s14950_s3 + $0x7b0] sm:$0xff]   ;;  %v12771_v33 = vld [vmem:[%s14950_s3 + $0x7a0] sm:$0xff]   ;;  %v14611_v54 = vld [vmem:[%s14950_s3 + $0x7d8] sm:$0xff]  }
 0xa3a   : > { %v7030_v30 = vmax.f32 %v7022_v62, 0.0  ;;  %v6991_v1 = vpop.f32.mrf.mxu1  ;;  %v14960_v45 = vmax.f32 %v14147_v17, 0.0  ;;  %v12203_v62 = vpop.f32.mrf.mxu0 }
 0xa3b   : > { %7051 = vst.msk [vmem:[#allocation2 + $0x118] sm:$0xff] %vm278_vm0, %v7043_v8  ;;  %v7041_v50 = vmax.f32 %v14468_v0, 0.0  ;;  %v7028_v55 = vmax.f32 %v7020_v41, 0.0  ;;  %v7023_v16 = vadd.f32 %v14438_v47, %v7010_v23  ;;  %v7008_v10 = vadd.f32 %v6991_v1, %v6878_v32 }
 0xa3c   : > { %v14478_v27 = vadd.f32 %v7030_v30, %v5740_v48  ;;  %v7162_v5 = vpop.f32.mrf.mxu0  ;;  %v12219_v23 = vpop.f32.mrf.mxu1 }
 0xa3d   : > { %7049 = vst.msk [vmem:[#allocation2 + $0x108] sm:$0xff] %vm278_vm0, %v7041_v50  ;;  %v14485_v24 = vadd.f32 %v7028_v55, %v14960_v45  ;;  %v7031_v4 = vmax.f32 %v7023_v16, 0.0  ;;  %v7021_v9 = vadd.f32 %v14438_v47, %v7008_v10  ;;  %v14962_v47 = vmax.f32 %v14165_v22, 0.0  ;;  %v12748_v22 = vld [vmem:[%s14950_s3 + $0x6f0] sm:$0xff]  }
 0xa3e   : > { %v7046_v7 = vmax.f32 %v14478_v27, 0.0  ;;  %v7424_v42 = vld [vmem:[#allocation2 + $0x110] sm:$0xff]  ;;  %v12204_v32 = vpop.f32.mrf.mxu0  ;;  %v7257_v1 = vpop.f32.mrf.mxu1 }
 0xa3f   : > { %v7044_v56 = vmax.f32 %v14485_v24, 0.0  ;;  %v14492_v18 = vadd.f32 %v7031_v4, %v14961_v38  ;;  %v7029_v48 = vmax.f32 %v7021_v9, 0.0 }
 0xa40   : > { %7054 = vst.msk [vmem:[#allocation2 + $0x130] sm:$0xff] %vm278_vm0, %v7046_v7  ;;  %v7422_v6 = vld [vmem:[#allocation2 + $0x100] sm:$0xff]  ;;  %v7165_v41 = vpop.f32.mrf.mxu0  ;;  %v12220_v16 = vpop.f32.mrf.mxu1 }
 0xa41   : > { %7052 = vst.msk [vmem:[#allocation2 + $0x120] sm:$0xff] %vm278_vm0, %v7044_v56  ;;  %v14959_v17 = vmax.f32 %v14492_v18, 0.0  ;;  %v14503_v57 = vadd.f32 %v7029_v48, %v14962_v47 }
 0xa42   : > { %v7425_v46 = vld [vmem:[#allocation2 + $0x118] sm:$0xff]  ;;  %v12207_v30 = vpop.f32.mrf.mxu0  ;;  %v7260_v45 = vpop.f32.mrf.mxu1 }
 0xa43   : > { %7055 = vst.msk [vmem:[#allocation2 + $0x138] sm:$0xff] %vm278_vm0, %v14959_v17  ;;  %v14958_v53 = vmax.f32 %v14503_v57, 0.0  ;;  %v7429_v58 = vpack.c.bf16 %v7425_v46, %v7424_v42 }
 0xa44   : > { %v7423_v52 = vld [vmem:[#allocation2 + $0x108] sm:$0xff]  ;;  %v7178_v55 = vpop.f32.mrf.mxu0  ;;  %v12223_v9 = vpop.f32.mrf.mxu1 }
 0xa45   : > { %7053 = vst.msk [vmem:[#allocation2 + $0x128] sm:$0xff] %vm278_vm0, %v14958_v53  ;;  %v7428_v14 = vpack.c.bf16 %v7423_v52, %v7422_v6 }
 0xa46   : > { %v12208_v10 = vpop.f32.mrf.mxu0  ;;  %v7273_v48 = vpop.f32.mrf.mxu1 }
 0xa47   : > { %12253 = vmatprep.mubr.msk.bf16.mxu1 %vm278_vm0, %v7428_v14  ;;  %12265 = vmatprep.mubr.msk.bf16.mxu0 %vm278_vm0, %v7428_v14  ;;  %v7554_v35 = vld [vmem:[#allocation2 + $0x130] sm:$0xff] }
 0xa48   : > { %12254 = vmatmul.mubr.msk.bf16.gmra.mxu1 %vm278_vm0, %v7429_v58  ;;  %12266 = vmatmul.mubr.msk.bf16.vlgmr.msra.gmra.mxu0 %vm278_vm0, %v7429_v58  ;;  %v7552_v21 = vld [vmem:[#allocation2 + $0x120] sm:$0xff]  ;;  %v7181_v4 = vpop.f32.mrf.mxu0  ;;  %v12224_v46 = vpop.f32.mrf.mxu1 }
 0xa49   : > { %12290 = vmatpush3.bf16.msra.mxu0 %v14417_v39  ;;  %12281 = vmatprep.mubr.msk.bf16.mxu1 %vm278_vm0, %v14303_v20  ;;  %v12752_v39 = vld [vmem:[%s14950_s3 + $0x6e0] sm:$0xff]  }
 0xa4a   : > { %12291 = vmatprep.subr.bf16.mxu0 %v12748_v22  ;;  %v7555_v15 = vld [vmem:[#allocation2 + $0x138] sm:$0xff]  ;;  %v12235_v38 = vpop.f32.mrf.mxu0  ;;  %v7276_v52 = vpop.f32.mrf.mxu1 }
 0xa4b   : > { %v7559_v13 = vpack.c.bf16 %v7555_v15, %v7554_v35  ;;  %v7266_v15 = vadd.f32 %v12219_v23, %v12203_v62  ;;  %v7269_v35 = vadd.f32 %v12220_v16, %v12204_v32 }
 0xa4c   : > { %v7553_v63 = vld [vmem:[#allocation2 + $0x128] sm:$0xff]  ;;  %v7379_v47 = vpop.f32.mrf.mxu0  ;;  %v12251_v42 = vpop.f32.mrf.mxu1 }
 0xa4d   : > { %v7558_v34 = vpack.c.bf16 %v7553_v63, %v7552_v21  ;;  %12292 = vmatpush3.bf16.msra.mxu0 %v12748_v22  ;;  %v7258_v21 = vadd.f32 %v7257_v1, %v7162_v5 }
 0xa4e   : > { %12293 = vmatprep.subr.bf16.mxu0 %v12750_v12  ;;  %v12236_v6 = vpop.f32.mrf.mxu0  ;;  %v7509_v22 = vpop.f32.mrf.mxu1 }
 0xa4f   : > { %12269 = vmatprep.mubr.msk.bf16.mxu0 %vm278_vm0, %v7558_v34 }
 0xa50   : > { %12270 = vmatmul.mubr.msk.bf16.gmra.mxu0 %vm278_vm0, %v7559_v13  ;;  %12282 = vmatmul.mubr.msk.bf16.vlgmr.msra.gmra.mxu1 %vm278_vm0, %v14338_v3  ;;  %v7382_v14 = vpop.f32.mrf.mxu0  ;;  %v12252_v63 = vpop.f32.mrf.mxu1  ;;  %v7412_v13 = vadd.f32 %v12235_v38, %v7266_v15  ;;  %v7277_v38 = vadd.f32 %v7276_v52, %v7181_v4 }
 0xa51   : > { %12294 = vmatpush3.bf16.msra.mxu0 %v12750_v12  ;;  %12297 = vmatprep.mubr.msk.bf16.mxu0 %vm278_vm0, %v14340_v51  ;;  %v12756_v51 = vld [vmem:[%s14950_s3 + $0x750] sm:$0xff]  }
 0xa52   : > { %12295 = vmatprep.subr.bf16.mxu0 %v12752_v39  ;;  %12306 = vmatpush3.bf16.msra.mxu1 %v14432_v44  ;;  %v12759_v44 = vld [vmem:[%s14950_s3 + $0x720] sm:$0xff]   ;;  %v12239_v58 = vpop.f32.mrf.mxu0 }
 0xa53   : > { %12307 = vmatprep.subr.bf16.mxu1 %v12755_v28  ;;  %12285 = vmatprep.mubr.msk.bf16.mxu1 %vm278_vm0, %v14359_v37 }
 0xa54   : > { %v7395_v12 = vpop.f32.mrf.mxu0 }
 0xa55   : > { %12296 = vmatpush3.bf16.msra.mxu0 %v12752_v39  ;;  %v7261_v39 = vadd.f32 %v7260_v45, %v7165_v41  ;;  %v7285_v41 = vadd.f32 %v12224_v46, %v12208_v10 }
 0xa56   : > { %12321 = vmatprep.subr.bf16.mxu0 %v12754_v29  ;;  %12308 = vmatpush3.bf16.msra.mxu1 %v12755_v28  ;;  %v12240_v34 = vpop.f32.mrf.mxu0  ;;  %v7410_v28 = vadd.f32 %v7379_v47, %v7258_v21 }
 0xa57   : > { %12309 = vmatprep.subr.bf16.mxu1 %v12757_v25  ;;  %v7417_v15 = vadd.f32 %v12240_v34, %v7285_v41 }
 0xa58   : > { %12298 = vmatmul.mubr.msk.bf16.vlgmr.msra.gmra.mxu0 %vm278_vm0, %v14347_v60  ;;  %12286 = vmatmul.mubr.msk.bf16.gmra.mxu1 %vm278_vm0, %v14368_v36  ;;  %v12760_v60 = vld [vmem:[%s14950_s3 + $0x740] sm:$0xff]  }
 0xa59   : > { %12322 = vmatpush3.bf16.msra.mxu0 %v12754_v29  ;;  %12301 = vmatprep.mubr.msk.bf16.mxu0 %vm278_vm0, %v14303_v20  ;;  %v12761_v20 = vld [vmem:[%s14950_s3 + $0x778] sm:$0xff]   ;;  %v7512_v29 = vpop.f32.mrf.mxu1 }
 0xa5a   : > { %12323 = vmatprep.subr.bf16.mxu0 %v12756_v51  ;;  %12310 = vmatpush3.bf16.msra.mxu1 %v12757_v25  ;;  %v7398_v25 = vpop.f32.mrf.mxu0 }
 0xa5b   : > { %12311 = vmatprep.subr.bf16.mxu1 %v12759_v44  ;;  %12313 = vmatprep.mubr.msk.bf16.mxu1 %vm278_vm0, %v14359_v37  ;;  %v12763_v37 = vld [vmem:[%s14950_s3 + $0x768] sm:$0xff]  }
 0xa5d   : > { %12324 = vmatpush3.bf16.msra.mxu0 %v12756_v51  ;;  %v7542_v51 = vadd.f32 %v12251_v42, %v7412_v13 }
 0xa5e   : > { %12325 = vmatprep.subr.bf16.mxu0 %v12758_v49  ;;  %12312 = vmatpush3.bf16.msra.mxu1 %v12759_v44  ;;  %v7413_v44 = vadd.f32 %v12236_v6, %v7269_v35  ;;  %v7415_v35 = vadd.f32 %v7398_v25, %v7277_v38  ;;  %v8374_v38 = vld [vmem:[#allocation2] sm:$0xff] }
 0xa5f   : > { %12337 = vmatprep.subr.bf16.mxu1 %v12761_v20 }
 0xa60   : > { %12302 = vmatmul.mubr.msk.bf16.gmra.mxu0 %vm278_vm0, %v14338_v3  ;;  %v12762_v3 = vld [vmem:[%s14950_s3 + $0x770] sm:$0xff]   ;;  %v7543_v62 = vadd.f32 %v12252_v63, %v7413_v44 }
 0xa61   : > { %12326 = vmatpush3.bf16.msra.mxu0 %v12758_v49  ;;  %12314 = vmatmul.mubr.msk.bf16.vlgmr.msra.gmra.mxu1 %vm278_vm0, %v14368_v36  ;;  %v12764_v36 = vld [vmem:[%s14950_s3 + $0x760] sm:$0xff]   ;;  %v7282_v49 = vadd.f32 %v12223_v9, %v12207_v30 }
 0xa62   : > { %12327 = vmatprep.subr.bf16.mxu0 %v12760_v60  ;;  %12329 = vmatprep.mubr.msk.bf16.mxu0 %vm278_vm0, %v14385_v2 }
 0xa63   : > { %12317 = vmatprep.mubr.msk.bf16.mxu1 %vm278_vm0, %v14385_v2  ;;  %12338 = vmatpush3.bf16.msra.mxu1 %v12761_v20  ;;  %v12765_v2 = vld [vmem:[%s14950_s3 + $0x7b8] sm:$0xff]   ;;  %v7416_v23 = vadd.f32 %v12239_v58, %v7282_v49 }
 0xa64   : > { %12339 = vmatprep.subr.bf16.mxu1 %v12762_v3 }
 0xa65   : > { %12328 = vmatpush3.bf16.msra.mxu0 %v12760_v60 }
 0xa66   : > { %12353 = vmatprep.subr.bf16.mxu0 %v12765_v2 }
 0xa67   : > { %12340 = vmatpush3.bf16.msra.mxu1 %v12762_v3  ;;  %v10584_v3 = vld [vmem:[%s14951_s4 + $0xa] ss:$0 sm:$0xff] }
 0xa68   : > { %12330 = vmatmul.mubr.msk.bf16.vlgmr.msra.gmra.mxu0 %vm278_vm0, %v14391_v61  ;;  %12341 = vmatprep.subr.bf16.mxu1 %v12763_v37 }
 0xa69   : > { %12318 = vmatmul.mubr.msk.bf16.gmra.mxu1 %vm278_vm0, %v14391_v61  ;;  %v14596_v61 = vld [vmem:[%s14950_s3 + $0x798] sm:$0xff]   ;;  %12354 = vmatpush3.bf16.msra.mxu0 %v12765_v2 }
 0xa6a   : > { %12355 = vmatprep.subr.bf16.mxu0 %v12767_v11 }
 0xa6b   : > { %12342 = vmatpush3.bf16.msra.mxu1 %v12763_v37  ;;  %v7540_v37 = vadd.f32 %v7509_v22, %v7410_v28 }
 0xa6c   : > { %12343 = vmatprep.subr.bf16.mxu1 %v12764_v36 }
 0xa6d   : > { %12356 = vmatpush3.bf16.msra.mxu0 %v12767_v11  ;;  %v7274_v11 = vadd.f32 %v7273_v48, %v7178_v55 }
 0xa6e   : > { %12357 = vmatprep.subr.bf16.mxu0 %v12769_v26 }
 0xa6f   : > { %12344 = vmatpush3.bf16.msra.mxu1 %v12764_v36  ;;  %v7411_v36 = vadd.f32 %v7382_v14, %v7261_v39  ;;  %v7414_v47 = vadd.f32 %v7395_v12, %v7274_v11  ;;  %v8395_v11 = vld [vmem:[#allocation2 + $0x40] sm:$0xff] }
 0xa70   : > { %12369 = vmatprep.subr.bf16.mxu1 %v14596_v61 }
 0xa71   : > { %12358 = vmatpush3.bf16.msra.mxu0 %v12769_v26  ;;  %v7541_v16 = vadd.f32 %v7512_v29, %v7411_v36 }
 0xa72   : > { %12359 = vmatprep.subr.bf16.mxu0 %v12771_v33 }
 0xa75   : > { %12360 = vmatpush3.bf16.msra.mxu0 %v12771_v33 }
 0xa76   : > { %12385 = vmatprep.subr.bf16.mxu0 %v14611_v54 }
 0xb08   : > { %v12255_v60 = vpop.f32.mrf.mxu1  ;;  %v12267_v20 = vpop.f32.mrf.mxu0 }
 0xb09   : > { %v7672_v2 = vadd.f32 %v12267_v20, %v7542_v51  ;;  %v7546_v22 = vadd.f32 %v12255_v60, %v7416_v23 }
 0xb0a   : > { %v7525_v26 = vpop.f32.mrf.mxu1  ;;  %v7639_v33 = vpop.f32.mrf.mxu0 }
 0xb0b   : > { %v7685_v5 = vadd.f32 %v10584_v3, %v7672_v2  ;;  %v7670_v32 = vadd.f32 %v7639_v33, %v7540_v37  ;;  %v7544_v63 = vadd.f32 %v7525_v26, %v7414_v47  ;;  %v8396_v26 = vld [vmem:[#allocation2 + $0x48] sm:$0xff] }
 0xb0c   : > { %v12268_v1 = vpop.f32.mrf.mxu0  ;;  %v12256_v6 = vpop.f32.mrf.mxu1  ;;  %v8375_v47 = vld [vmem:[#allocation2 + $0x8] sm:$0xff] }
 0xb0d   : > { %v7693_v30 = vmax.f32 %v7685_v5, 0.0  ;;  %v7683_v45 = vadd.f32 %v10584_v3, %v7670_v32  ;;  %v7673_v9 = vadd.f32 %v12268_v1, %v7543_v62  ;;  %v7547_v52 = vadd.f32 %v12256_v6, %v7417_v15 }
 0xb0e   : > { %v7642_v42 = vpop.f32.mrf.mxu0  ;;  %v7528_v13 = vpop.f32.mrf.mxu1  ;;  %v14625_v1 = vpack.c.bf16 %v8396_v26, %v8395_v11  ;;  %v8620_v11 = vld [vmem:[#allocation2 + $0x90] sm:$0xff]  ;;  %v8621_v26 = vld [vmem:[#allocation2 + $0x98] sm:$0xff] }
 0xb0f   : > { %7701 = vst.msk [vmem:[#allocation2 + $0x110] sm:$0xff] %vm278_vm0, %v7693_v30  ;;  %v7691_v55 = vmax.f32 %v7683_v45, 0.0  ;;  %v7686_v48 = vadd.f32 %v10584_v3, %v7673_v9  ;;  %v7671_v14 = vadd.f32 %v7642_v42, %v7541_v16  ;;  %v7545_v51 = vadd.f32 %v7528_v13, %v7415_v35  ;;  %v12768_v30 = vld [vmem:[%s14950_s3 + $0x790] sm:$0xff]   ;;  %v8398_v45 = vld [vmem:[#allocation2 + $0x58] sm:$0xff]  ;;  %v12770_v9 = vld [vmem:[%s14950_s3 + $0x788] sm:$0xff]  }
 0xb10   : > { %v12271_v21 = vpop.f32.mrf.mxu0  ;;  %v8399_v42 = vld [vmem:[#allocation2 + $0x60] sm:$0xff]  ;;  %v8376_v35 = vld [vmem:[#allocation2 + $0x10] sm:$0xff]  ;;  %v8377_v13 = vld [vmem:[#allocation2 + $0x18] sm:$0xff] }
 0xb11   : > { %7699 = vst.msk [vmem:[#allocation2 + $0x100] sm:$0xff] %vm278_vm0, %v7691_v55  ;;  %v7694_v10 = vmax.f32 %v7686_v48, 0.0  ;;  %v7684_v46 = vadd.f32 %v10584_v3, %v7671_v14  ;;  %v7676_v58 = vadd.f32 %v12271_v21, %v7546_v22  ;;  %v8400_v14 = vld [vmem:[#allocation2 + $0x68] sm:$0xff]  ;;  %v14642_v21 = vpack.c.bf16 %v8375_v47, %v8374_v38  ;;  %v8624_v47 = vld [vmem:[#allocation2 + $0xb0] sm:$0xff] }
 0xb12   : > { %v7655_v4 = vpop.f32.mrf.mxu0 }
 0xb13   : > { %7702 = vst.msk [vmem:[#allocation2 + $0x118] sm:$0xff] %vm278_vm0, %v7694_v10  ;;  %v7692_v12 = vmax.f32 %v7684_v46, 0.0  ;;  %v7689_v39 = vadd.f32 %v10584_v3, %v7676_v58  ;;  %v7674_v28 = vadd.f32 %v7655_v4, %v7544_v63  ;;  %v12772_v10 = vld [vmem:[%s14950_s3 + $0x780] sm:$0xff]   ;;  %v12775_v46 = vld [vmem:[%s14950_s3 + $0x7d0] sm:$0xff]   ;;  %v14651_v58 = vpack.c.bf16 %v8400_v14, %v8399_v42 }
 0xb14   : > { %v12272_v29 = vpop.f32.mrf.mxu0  ;;  %v8401_v4 = vld [vmem:[#allocation2 + $0x70] sm:$0xff] }
 0xb15   : > { %7700 = vst.msk [vmem:[#allocation2 + $0x108] sm:$0xff] %vm278_vm0, %v7692_v12  ;;  %v7697_v34 = vmax.f32 %v7689_v39, 0.0  ;;  %v7687_v44 = vadd.f32 %v10584_v3, %v7674_v28  ;;  %v7677_v49 = vadd.f32 %v12272_v29, %v7547_v52  ;;  %v8402_v52 = vld [vmem:[#allocation2 + $0x78] sm:$0xff]  ;;  %v8378_v39 = vld [vmem:[#allocation2 + $0x20] sm:$0xff]  ;;  %v8379_v28 = vld [vmem:[#allocation2 + $0x28] sm:$0xff] }
 0xb16   : > { %v7658_v60 = vpop.f32.mrf.mxu0  ;;  %v8075_v23 = vld [vmem:[#allocation2 + $0x110] sm:$0xff]  ;;  %v12774_v12 = vld [vmem:[%s14950_s3 + $0x7f8] sm:$0xff]   ;;  %v12777_v29 = vld [vmem:[%s14950_s3 + $0x7c8] sm:$0xff]  }
 0xb17   : > { %7705 = vst.msk [vmem:[#allocation2 + $0x130] sm:$0xff] %vm278_vm0, %v7697_v34  ;;  %v7695_v20 = vmax.f32 %v7687_v44, 0.0  ;;  %v7690_v25 = vadd.f32 %v10584_v3, %v7677_v49  ;;  %v7675_v37 = vadd.f32 %v7658_v60, %v7545_v51  ;;  %v14667_v51 = vpack.c.bf16 %v8377_v13, %v8376_v35  ;;  %v8618_v44 = vld [vmem:[#allocation2 + $0x80] sm:$0xff]  ;;  %v12776_v60 = vld [vmem:[%s14950_s3 + $0x7f0] sm:$0xff]   ;;  %v12783_v35 = vld [vmem:[%s14950_s3 + $0x808] sm:$0xff]  }
 0xb18   : > { %v8073_v5 = vld [vmem:[#allocation2 + $0x100] sm:$0xff]  ;;  %v14669_v34 = vpack.c.bf16 %v8402_v52, %v8401_v4  ;;  %v14671_v49 = vpack.c.bf16 %v8379_v28, %v8378_v39  ;;  %v12785_v13 = vld [vmem:[%s14950_s3 + $0x858] sm:$0xff]   ;;  %v12787_v52 = vld [vmem:[%s14950_s3 + $0x850] sm:$0xff]   ;;  %v12283_v28 = vpop.f32.mrf.mxu1 }
 0xb19   : > { %7703 = vst.msk [vmem:[#allocation2 + $0x120] sm:$0xff] %vm278_vm0, %v7695_v20  ;;  %v7698_v36 = vmax.f32 %v7690_v25, 0.0  ;;  %v7688_v2 = vadd.f32 %v10584_v3, %v7675_v37  ;;  %v8397_v3 = vld [vmem:[#allocation2 + $0x50] sm:$0xff]  ;;  %v12779_v20 = vld [vmem:[%s14950_s3 + $0x7c0] sm:$0xff]   ;;  %v14747_v4 = vld [vmem:[%s14950_s3 + $0x838] sm:$0xff]  }
 0xb1a   : > { %v8076_v62 = vld [vmem:[#allocation2 + $0x118] sm:$0xff]  ;;  %v14640_v48 = vpack.c.bf16 %v8398_v45, %v8397_v3  ;;  %v8380_v37 = vld [vmem:[#allocation2 + $0x30] sm:$0xff]  ;;  %v12791_v39 = vld [vmem:[%s14950_s3 + $0x840] sm:$0xff]  }
 0xb1b   : > { %7706 = vst.msk [vmem:[#allocation2 + $0x138] sm:$0xff] %vm278_vm0, %v7698_v36  ;;  %v7696_v33 = vmax.f32 %v7688_v2, 0.0  ;;  %v8080_v16 = vpack.c.bf16 %v8076_v62, %v8075_v23  ;;  %v8381_v36 = vld [vmem:[#allocation2 + $0x38] sm:$0xff]  ;;  %v12778_v2 = vld [vmem:[%s14950_s3 + $0x7e8] sm:$0xff]   ;;  %v14694_v23 = vpack.c.bf16 %v8621_v26, %v8620_v11  ;;  %v8750_v45 = vld [vmem:[#allocation2 + $0xd0] sm:$0xff] }
 0xb1c   : > { %v8074_v32 = vld [vmem:[#allocation2 + $0x108] sm:$0xff] }
 0xb1d   : > { %7704 = vst.msk [vmem:[#allocation2 + $0x128] sm:$0xff] %vm278_vm0, %v7696_v33  ;;  %v8079_v41 = vpack.c.bf16 %v8074_v32, %v8073_v5  ;;  %v8748_v33 = vld [vmem:[#allocation2 + $0xc0] sm:$0xff]  ;;  %v8749_v62 = vld [vmem:[#allocation2 + $0xc8] sm:$0xff]  ;;  %v14692_v5 = vpack.c.bf16 %v8381_v36, %v8380_v37 }
 0xb1e   : > { %v8205_v15 = vld [vmem:[#allocation2 + $0x130] sm:$0xff]  ;;  %v8622_v32 = vld [vmem:[#allocation2 + $0xa0] sm:$0xff] }
 0xb1f   : > { %12333 = vmatprep.mubr.msk.bf16.mxu0 %vm278_vm0, %v8079_v41  ;;  %12345 = vmatprep.mubr.msk.bf16.mxu1 %vm278_vm0, %v8079_v41  ;;  %v8623_v41 = vld [vmem:[#allocation2 + $0xa8] sm:$0xff] }
 0xb20   : > { %12334 = vmatmul.mubr.msk.bf16.gmra.mxu0 %vm278_vm0, %v8080_v16  ;;  %12346 = vmatmul.mubr.msk.bf16.vlgmr.msra.gmra.mxu1 %vm278_vm0, %v8080_v16  ;;  %v8203_v22 = vld [vmem:[#allocation2 + $0x120] sm:$0xff]  ;;  %v14701_v3 = vpack.c.bf16 %v8623_v41, %v8622_v32 }
 0xb21   : > { %12370 = vmatpush3.bf16.msra.mxu1 %v14596_v61  ;;  %12361 = vmatprep.mubr.msk.bf16.mxu0 %vm278_vm0, %v14625_v1  ;;  %v12780_v16 = vld [vmem:[%s14950_s3 + $0x7e0] sm:$0xff]  }
 0xb22   : > { %12371 = vmatprep.subr.bf16.mxu1 %v12768_v30  ;;  %v8206_v6 = vld [vmem:[#allocation2 + $0x138] sm:$0xff] }
 0xb23   : > { %v8210_v63 = vpack.c.bf16 %v8206_v6, %v8205_v15  ;;  %v8625_v6 = vld [vmem:[#allocation2 + $0xb8] sm:$0xff] }
 0xb24   : > { %v8204_v55 = vld [vmem:[#allocation2 + $0x128] sm:$0xff]  ;;  %v14715_v42 = vpack.c.bf16 %v8625_v6, %v8624_v47  ;;  %v8755_v15 = vld [vmem:[#allocation2 + $0xf8] sm:$0xff] }
 0xb25   : > { %v8209_v61 = vpack.c.bf16 %v8204_v55, %v8203_v22  ;;  %12372 = vmatpush3.bf16.msra.mxu1 %v12768_v30  ;;  %v14699_v30 = vpack.c.bf16 %v8749_v62, %v8748_v33  ;;  %v8752_v22 = vld [vmem:[#allocation2 + $0xe0] sm:$0xff]  ;;  %v8753_v55 = vld [vmem:[#allocation2 + $0xe8] sm:$0xff] }
 0xb26   : > { %12373 = vmatprep.subr.bf16.mxu1 %v12770_v9  ;;  %v14717_v14 = vpack.c.bf16 %v8753_v55, %v8752_v22 }
 0xb27   : > { %12349 = vmatprep.mubr.msk.bf16.mxu1 %vm278_vm0, %v8209_v61  ;;  %v8754_v61 = vld [vmem:[#allocation2 + $0xf0] sm:$0xff] }
 0xb28   : > { %12350 = vmatmul.mubr.msk.bf16.gmra.mxu1 %vm278_vm0, %v8210_v63  ;;  %12362 = vmatmul.mubr.msk.bf16.vlgmr.msra.gmra.mxu0 %vm278_vm0, %v14640_v48  ;;  %v14721_v63 = vpack.c.bf16 %v8755_v15, %v8754_v61 }
 0xb29   : > { %12374 = vmatpush3.bf16.msra.mxu1 %v12770_v9  ;;  %12377 = vmatprep.mubr.msk.bf16.mxu1 %vm278_vm0, %v14642_v21  ;;  %v8751_v9 = vld [vmem:[#allocation2 + $0xd8] sm:$0xff] }
 0xb2a   : > { %12375 = vmatprep.subr.bf16.mxu1 %v12772_v10  ;;  %12386 = vmatpush3.bf16.msra.mxu0 %v14611_v54  ;;  %v8619_v54 = vld [vmem:[#allocation2 + $0x88] sm:$0xff]  ;;  %v14711_v38 = vpack.c.bf16 %v8751_v9, %v8750_v45 }
 0xb2b   : > { %12387 = vmatprep.subr.bf16.mxu0 %v12775_v46  ;;  %12365 = vmatprep.mubr.msk.bf16.mxu0 %vm278_vm0, %v14651_v58  ;;  %v14679_v25 = vpack.c.bf16 %v8619_v54, %v8618_v44  ;;  %v12793_v44 = vld [vmem:[%s14950_s3 + $0x878] sm:$0xff]  }
 0xb2d   : > { %12376 = vmatpush3.bf16.msra.mxu1 %v12772_v10  ;;  %v12781_v10 = vld [vmem:[%s14950_s3 + $0x818] sm:$0xff]  }
 0xb2e   : > { %12401 = vmatprep.subr.bf16.mxu1 %v12774_v12  ;;  %12388 = vmatpush3.bf16.msra.mxu0 %v12775_v46  ;;  %v12782_v46 = vld [vmem:[%s14950_s3 + $0x810] sm:$0xff]  }
 0xb2f   : > { %12389 = vmatprep.subr.bf16.mxu0 %v12777_v29 }
 0xb30   : > { %12378 = vmatmul.mubr.msk.bf16.vlgmr.msra.gmra.mxu1 %vm278_vm0, %v14667_v51  ;;  %12366 = vmatmul.mubr.msk.bf16.gmra.mxu0 %vm278_vm0, %v14669_v34 }
 0xb31   : > { %12402 = vmatpush3.bf16.msra.mxu1 %v12774_v12  ;;  %12381 = vmatprep.mubr.msk.bf16.mxu1 %vm278_vm0, %v14671_v49  ;;  %v12789_v12 = vld [vmem:[%s14950_s3 + $0x848] sm:$0xff]  }
 0xb32   : > { %12403 = vmatprep.subr.bf16.mxu1 %v12776_v60  ;;  %12390 = vmatpush3.bf16.msra.mxu0 %v12777_v29  ;;  %v7813_v29 = vpop.f32.mrf.mxu1 }
 0xb33   : > { %12391 = vmatprep.subr.bf16.mxu0 %v12779_v20  ;;  %12393 = vmatprep.mubr.msk.bf16.mxu0 %vm278_vm0, %v14679_v25 }
 0xb34   : > { %v12284_v54 = vpop.f32.mrf.mxu1 }
 0xb35   : > { %12404 = vmatpush3.bf16.msra.mxu1 %v12776_v60  ;;  %v12799_v60 = vld [vmem:[%s14950_s3 + $0x860] sm:$0xff]  }
 0xb36   : > { %12405 = vmatprep.subr.bf16.mxu1 %v12778_v2  ;;  %12392 = vmatpush3.bf16.msra.mxu0 %v12779_v20  ;;  %v12299_v20 = vpop.f32.mrf.mxu0 }
 0xb37   : > { %12417 = vmatprep.subr.bf16.mxu0 %v12781_v10  ;;  %v7917_v15 = vadd.f32 %v12299_v20, %v12283_v28 }
 0xb38   : > { %12382 = vmatmul.mubr.msk.bf16.gmra.mxu1 %vm278_vm0, %v14692_v5  ;;  %v7908_v37 = vpop.f32.mrf.mxu0 }
 0xb39   : > { %12406 = vmatpush3.bf16.msra.mxu1 %v12778_v2  ;;  %12394 = vmatmul.mubr.msk.bf16.vlgmr.msra.gmra.mxu0 %vm278_vm0, %v14694_v23 }
 0xb3a   : > { %12407 = vmatprep.subr.bf16.mxu1 %v12780_v16  ;;  %12409 = vmatprep.mubr.msk.bf16.mxu1 %vm278_vm0, %v14699_v30  ;;  %v12300_v2 = vpop.f32.mrf.mxu0 }
 0xb3b   : > { %12397 = vmatprep.mubr.msk.bf16.mxu0 %vm278_vm0, %v14701_v3  ;;  %12418 = vmatpush3.bf16.msra.mxu0 %v12781_v10  ;;  %v7909_v10 = vadd.f32 %v7908_v37, %v7813_v29 }
 0xb3c   : > { %12419 = vmatprep.subr.bf16.mxu0 %v12782_v46  ;;  %v7911_v26 = vpop.f32.mrf.mxu0 }
 0xb3d   : > { %12408 = vmatpush3.bf16.msra.mxu1 %v12780_v16 }
 0xb3e   : > { %12433 = vmatprep.subr.bf16.mxu1 %v12785_v13  ;;  %v12303_v62 = vpop.f32.mrf.mxu0 }
 0xb3f   : > { %12420 = vmatpush3.bf16.msra.mxu0 %v12782_v46 }
 0xb40   : > { %12410 = vmatmul.mubr.msk.bf16.vlgmr.msra.gmra.mxu1 %vm278_vm0, %v14711_v38  ;;  %12421 = vmatprep.subr.bf16.mxu0 %v12783_v35  ;;  %v7924_v41 = vpop.f32.mrf.mxu0 }
 0xb41   : > { %12398 = vmatmul.mubr.msk.bf16.gmra.mxu0 %vm278_vm0, %v14715_v42  ;;  %12413 = vmatprep.mubr.msk.bf16.mxu1 %vm278_vm0, %v14717_v14 }
 0xb42   : > { %12434 = vmatpush3.bf16.msra.mxu1 %v12785_v13  ;;  %v12304_v45 = vpop.f32.mrf.mxu0 }
 0xb43   : > { %12422 = vmatpush3.bf16.msra.mxu0 %v12783_v35  ;;  %12435 = vmatprep.subr.bf16.mxu1 %v12787_v52  ;;  %v7920_v35 = vadd.f32 %v12300_v2, %v12284_v54 }
 0xb44   : > { %v7927_v47 = vpop.f32.mrf.mxu0 }
 0xb46   : > { %12436 = vmatpush3.bf16.msra.mxu1 %v12787_v52  ;;  %v12331_v22 = vpop.f32.mrf.mxu0 }
 0xb47   : > { %12437 = vmatprep.subr.bf16.mxu1 %v12789_v12 }
 0xb48   : > { %12414 = vmatmul.mubr.msk.bf16.gmra.mxu1 %vm278_vm0, %v14721_v63  ;;  %v8160_v61 = vpop.f32.mrf.mxu0 }
 0xb49   : > { %12441 = vmatprep.mubr.msk.bf16.mxu1 %vm278_vm0, %v14625_v1  ;;  %v12784_v1 = vld [vmem:[%s14950_s3 + $0x800] sm:$0xff]  }
 0xb4a   : > { %12423 = vmatprep.subr.bf16.mxu0 %v12784_v1  ;;  %12438 = vmatpush3.bf16.msra.mxu1 %v12789_v12 }
 0xb4b   : > { %12424 = vmatpush3.bf16.msra.mxu0 %v12784_v1  ;;  %12439 = vmatprep.subr.bf16.mxu1 %v12791_v39 }
 0xb4c   : > { %12449 = vmatprep.subr.bf16.mxu0 %v14747_v4 }
 0xb4e   : > { %12440 = vmatpush3.bf16.msra.mxu1 %v12791_v39 }
 0xb4f   : > { %12465 = vmatprep.subr.bf16.mxu1 %v12793_v44 }
 0xb51   : > { %12442 = vmatmul.mubr.msk.bf16.vlgmr.msra.gmra.mxu1 %vm278_vm0, %v14640_v48  ;;  %v12795_v48 = vld [vmem:[%s14950_s3 + $0x870] sm:$0xff]  }
 0xb52   : > { %12445 = vmatprep.mubr.msk.bf16.mxu1 %vm278_vm0, %v14651_v58  ;;  %12466 = vmatpush3.bf16.msra.mxu1 %v12793_v44  ;;  %v7816_v58 = vpop.f32.mrf.mxu1 }
 0xb53   : > { %12467 = vmatprep.subr.bf16.mxu1 %v12795_v48  ;;  %v7912_v52 = vadd.f32 %v7911_v26, %v7816_v58 }
 0xb56   : > { %12468 = vmatpush3.bf16.msra.mxu1 %v12795_v48 }
 0xb59   : > { %12446 = vmatmul.mubr.msk.bf16.gmra.mxu1 %vm278_vm0, %v14669_v34  ;;  %v12797_v34 = vld [vmem:[%s14950_s3 + $0x868] sm:$0xff]  }
 0xb5a   : > { %12473 = vmatprep.mubr.msk.bf16.mxu1 %vm278_vm0, %v14679_v25  ;;  %12469 = vmatprep.subr.bf16.mxu1 %v12797_v34  ;;  %v12287_v25 = vpop.f32.mrf.mxu1 }
 0xb5b   : > { %12470 = vmatpush3.bf16.msra.mxu1 %v12797_v34  ;;  %v7933_v53 = vadd.f32 %v12303_v62, %v12287_v25 }
 0xb5c   : > { %12471 = vmatprep.subr.bf16.mxu1 %v12799_v60  ;;  %v7829_v36 = vpop.f32.mrf.mxu1 }
 0xb5d   : > { %v7925_v20 = vadd.f32 %v7924_v41, %v7829_v36 }
 0xb5e   : > { %v12288_v11 = vpop.f32.mrf.mxu1 }
 0xb5f   : > { %12472 = vmatpush3.bf16.msra.mxu1 %v12799_v60  ;;  %v14788_v60 = vld [vmem:[%s14951_s4 + $0xb] ss:$0 sm:$0xff] }
 0xb60   : > { %v7832_v33 = vpop.f32.mrf.mxu1 }
 0xb61   : > { %v7928_v17 = vadd.f32 %v7927_v47, %v7832_v33 }
 0xb62   : > { %12474 = vmatmul.mubr.msk.bf16.vlgmr.msra.gmra.mxu1 %vm278_vm0, %v14694_v23  ;;  %v12315_v32 = vpop.f32.mrf.mxu1 }
 0xb63   : > { %12477 = vmatprep.mubr.msk.bf16.mxu1 %vm278_vm0, %v14701_v3  ;;  %v12332_v3 = vpop.f32.mrf.mxu0  ;;  %v8063_v1 = vadd.f32 %v12315_v32, %v7917_v15 }
 0xb64   : > { %v8030_v16 = vpop.f32.mrf.mxu1 }
 0xb65   : > { %v8061_v13 = vadd.f32 %v8030_v16, %v7909_v10  ;;  %v8163_v12 = vpop.f32.mrf.mxu0  ;;  %v8193_v39 = vadd.f32 %v12331_v22, %v8063_v1  ;;  %v7936_v16 = vadd.f32 %v12304_v45, %v12288_v11 }
 0xb66   : > { %v12316_v9 = vpop.f32.mrf.mxu1 }
 0xb67   : > { %v8064_v44 = vadd.f32 %v12316_v9, %v7920_v35  ;;  %v8191_v28 = vadd.f32 %v8160_v61, %v8061_v13 }
 0xb68   : > { %v8033_v6 = vpop.f32.mrf.mxu1 }
 0xb69   : > { %v8062_v37 = vadd.f32 %v8033_v6, %v7912_v52  ;;  %v8194_v32 = vadd.f32 %v12332_v3, %v8064_v44 }
 0xb6a   : > { %12478 = vmatmul.mubr.msk.bf16.gmra.mxu1 %vm278_vm0, %v14715_v42  ;;  %v12319_v55 = vpop.f32.mrf.mxu1 }
 0xb6b   : > { %v8067_v15 = vadd.f32 %v12319_v55, %v7933_v53  ;;  %v8192_v25 = vadd.f32 %v8163_v12, %v8062_v37 }
 0xb6c   : > { %v8046_v23 = vpop.f32.mrf.mxu1 }
 0xb6d   : > { %v8065_v62 = vadd.f32 %v8046_v23, %v7925_v20 }
 0xb6e   : > { %v12320_v46 = vpop.f32.mrf.mxu1 }
 0xb6f   : > { %v8068_v11 = vadd.f32 %v12320_v46, %v7936_v16 }
 0xb70   : > { %v8049_v42 = vpop.f32.mrf.mxu1 }
 0xb71   : > { %v8066_v12 = vadd.f32 %v8049_v42, %v7928_v17 }
 0xbe0   : > { %v12335_v48 = vpop.f32.mrf.mxu0  ;;  %v12347_v34 = vpop.f32.mrf.mxu1 }
 0xbe1   : > { %v8323_v29 = vadd.f32 %v12347_v34, %v8193_v39  ;;  %v8197_v41 = vadd.f32 %v12335_v48, %v8067_v15 }
 0xbe2   : > { %v8176_v54 = vpop.f32.mrf.mxu0  ;;  %v8290_v2 = vpop.f32.mrf.mxu1 }
 0xbe3   : > { %v8336_v58 = vadd.f32 %v14788_v60, %v8323_v29  ;;  %v8321_v26 = vadd.f32 %v8290_v2, %v8191_v28  ;;  %v8195_v45 = vadd.f32 %v8176_v54, %v8065_v62  ;;  %v14963_v62 = vmax.f32 %v14492_v18, 0.0 }
 0xbe4   : > { %v12336_v9 = vpop.f32.mrf.mxu0  ;;  %v12348_v22 = vpop.f32.mrf.mxu1 }
 0xbe5   : > { %v8344_v10 = vmax.f32 %v8336_v58, 0.0  ;;  %v8334_v35 = vadd.f32 %v14788_v60, %v8321_v26  ;;  %v8324_v1 = vadd.f32 %v12348_v22, %v8194_v32  ;;  %v8198_v44 = vadd.f32 %v12336_v9, %v8068_v11 }
 0xbe6   : > { %v8179_v61 = vpop.f32.mrf.mxu0  ;;  %v8293_v36 = vpop.f32.mrf.mxu1 }
 0xbe7   : > { %v8352_v6 = vadd.f32 %v8344_v10, %v7042_v40  ;;  %v8342_v3 = vmax.f32 %v8334_v35, 0.0  ;;  %v8337_v13 = vadd.f32 %v14788_v60, %v8324_v1  ;;  %v8322_v52 = vadd.f32 %v8293_v36, %v8192_v25 }
 0xbe8   : > { %v12351_v53 = vpop.f32.mrf.mxu1  ;;  %v12363_v55 = vpop.f32.mrf.mxu0  ;;  %v8196_v20 = vadd.f32 %v8179_v61, %v8066_v12 }
 0xbe9   : > { %v8360_v39 = vmax.f32 %v8352_v6, 0.0  ;;  %v8350_v33 = vadd.f32 %v8342_v3, %v7040_v59  ;;  %v8345_v47 = vmax.f32 %v8337_v13, 0.0  ;;  %v8327_v23 = vadd.f32 %v12351_v53, %v8197_v41 }
 0xbea   : > { %v8335_v48 = vadd.f32 %v14788_v60, %v8322_v52  ;;  %v8306_v19 = vpop.f32.mrf.mxu1  ;;  %v8486_v40 = vpop.f32.mrf.mxu0 }
 0xbeb   : > { %8368 = vst.msk [vmem:[#allocation2 + $0x110] sm:$0xff] %vm278_vm0, %v8360_v39  ;;  %v8358_v34 = vmax.f32 %v8350_v33, 0.0  ;;  %v8353_v46 = vadd.f32 %v8345_v47, %v7043_v8  ;;  %v8340_v28 = vadd.f32 %v14788_v60, %v8327_v23  ;;  %v8325_v29 = vadd.f32 %v8306_v19, %v8195_v45 }
 0xbec   : > { %v8343_v43 = vmax.f32 %v8335_v48, 0.0  ;;  %v12352_v59 = vpop.f32.mrf.mxu1  ;;  %v12364_v37 = vpop.f32.mrf.mxu0  ;;  %v12788_v48 = vld [vmem:[%s14950_s3 + $0x830] sm:$0xff]  }
 0xbed   : > { %8366 = vst.msk [vmem:[#allocation2 + $0x100] sm:$0xff] %vm278_vm0, %v8358_v34  ;;  %v8361_v17 = vmax.f32 %v8353_v46, 0.0  ;;  %v8348_v42 = vmax.f32 %v8340_v28, 0.0  ;;  %v8338_v54 = vadd.f32 %v14788_v60, %v8325_v29  ;;  %v8328_v2 = vadd.f32 %v12352_v59, %v8198_v44 }
 0xbee   : > { %v8351_v32 = vadd.f32 %v8343_v43, %v7041_v50  ;;  %v8309_v58 = vpop.f32.mrf.mxu1  ;;  %v8489_v31 = vpop.f32.mrf.mxu0 }
 0xbef   : > { %8369 = vst.msk [vmem:[#allocation2 + $0x118] sm:$0xff] %vm278_vm0, %v8361_v17  ;;  %v8356_v8 = vadd.f32 %v8348_v42, %v7046_v7  ;;  %v8346_v26 = vmax.f32 %v8338_v54, 0.0  ;;  %v8341_v16 = vadd.f32 %v14788_v60, %v8328_v2  ;;  %v8326_v9 = vadd.f32 %v8309_v58, %v8196_v20 }
 0xbf0   : > { %v8359_v22 = vmax.f32 %v8351_v32, 0.0  ;;  %v12379_v15 = vpop.f32.mrf.mxu1  ;;  %v14810_v10 = vpop.f32.mrf.mxu0 }
 0xbf1   : > { %v8364_v35 = vmax.f32 %v8356_v8, 0.0  ;;  %v8354_v0 = vadd.f32 %v8346_v26, %v7044_v56  ;;  %v8349_v50 = vmax.f32 %v8341_v16, 0.0  ;;  %v8339_v1 = vadd.f32 %v14788_v60, %v8326_v9  ;;  %v12792_v9 = vld [vmem:[%s14950_s3 + $0x820] sm:$0xff]  }
 0xbf2   : > { %8367 = vst.msk [vmem:[#allocation2 + $0x108] sm:$0xff] %vm278_vm0, %v8359_v22  ;;  %v8587_v25 = vpop.f32.mrf.mxu1  ;;  %v14816_v27 = vpop.f32.mrf.mxu0  ;;  %v14964_v56 = vmax.f32 %v14503_v57, 0.0  ;;  %v8596_v39 = vadd.f32 %v12379_v15, %v12363_v55  ;;  %v8880_v57 = vld [vmem:[#allocation2 + $0x110] sm:$0xff] }
 0xbf3   : > { %8372 = vst.msk [vmem:[#allocation2 + $0x130] sm:$0xff] %vm278_vm0, %v8364_v35  ;;  %v8362_v7 = vmax.f32 %v8354_v0, 0.0  ;;  %v14821_v61 = vadd.f32 %v8349_v50, %v14963_v62  ;;  %v8347_v36 = vmax.f32 %v8339_v1, 0.0  ;;  %v8588_v44 = vadd.f32 %v8587_v25, %v8486_v40  ;;  %v12790_v40 = vld [vmem:[%s14950_s3 + $0x828] sm:$0xff]   ;;  %v12794_v50 = vld [vmem:[%s14950_s3 + $0x898] sm:$0xff]   ;;  %v12796_v1 = vld [vmem:[%s14950_s3 + $0x890] sm:$0xff]  }
 0xbf4   : > { %v12380_v41 = vpop.f32.mrf.mxu1  ;;  %v14823_v6 = vpop.f32.mrf.mxu0  ;;  %v8878_v52 = vld [vmem:[#allocation2 + $0x100] sm:$0xff] }
 0xbf5   : > { %8370 = vst.msk [vmem:[#allocation2 + $0x120] sm:$0xff] %vm278_vm0, %v8362_v7  ;;  %v8365_v24 = vmax.f32 %v14821_v61, 0.0  ;;  %v8355_v60 = vadd.f32 %v8347_v36, %v14964_v56  ;;  %v8599_v46 = vadd.f32 %v12380_v41, %v12364_v37  ;;  %v12800_v25 = vld [vmem:[%s14950_s3 + $0x880] sm:$0xff]  }
 0xbf6   : > { %v8590_v3 = vpop.f32.mrf.mxu1  ;;  %v14829_v13 = vpop.f32.mrf.mxu0  ;;  %v8881_v11 = vld [vmem:[#allocation2 + $0x118] sm:$0xff] }
 0xbf7   : > { %8373 = vst.msk [vmem:[#allocation2 + $0x138] sm:$0xff] %vm278_vm0, %v8365_v24  ;;  %v8363_v18 = vmax.f32 %v8355_v60, 0.0  ;;  %v8887_v12 = vpack.c.bf16 %v8881_v11, %v8880_v57  ;;  %v8591_v20 = vadd.f32 %v8590_v3, %v8489_v31 }
 0xbf8   : > { %v14834_v45 = vpop.f32.mrf.mxu1 }
 0xbf9   : > { %8371 = vst.msk [vmem:[#allocation2 + $0x128] sm:$0xff] %vm278_vm0, %v8363_v18  ;;  %v8879_v53 = vld [vmem:[#allocation2 + $0x108] sm:$0xff]  ;;  %v12395_v33 = vpop.f32.mrf.mxu0 }
 0xbfa   : > { %v8886_v47 = vpack.c.bf16 %v8879_v53, %v8878_v52  ;;  %v8603_v23 = vpop.f32.mrf.mxu1  ;;  %v8742_v28 = vadd.f32 %v12395_v33, %v8596_v39  ;;  %v8884_v8 = vld [vmem:[#allocation2 + $0x130] sm:$0xff]  ;;  %v12804_v39 = vld [vmem:[%s14950_s3 + $0x8a0] sm:$0xff]  }
 0xbfb   : > { %v8709_v19 = vpop.f32.mrf.mxu0 }
 0xbfc   : > { %12425 = vmatprep.mubr.msk.bf16.mxu0 %vm278_vm0, %v8886_v47  ;;  %v12384_v34 = vpop.f32.mrf.mxu1  ;;  %v8740_v43 = vadd.f32 %v8709_v19, %v8588_v44  ;;  %v8882_v59 = vld [vmem:[#allocation2 + $0x120] sm:$0xff] }
 0xbfd   : > { %12426 = vmatmul.mubr.msk.bf16.vlgmr.msra.gmra.mxu0 %vm278_vm0, %v8887_v12  ;;  %v12396_v29 = vpop.f32.mrf.mxu0 }
 0xbfe   : > { %12450 = vmatpush3.bf16.msra.mxu0 %v14747_v4  ;;  %v8606_v55 = vpop.f32.mrf.mxu1  ;;  %v8885_v42 = vld [vmem:[#allocation2 + $0x138] sm:$0xff]  ;;  %v8743_v37 = vadd.f32 %v12396_v29, %v8599_v46 }
 0xbff   : > { %12451 = vmatprep.subr.bf16.mxu0 %v12788_v48  ;;  %v8712_v2 = vpop.f32.mrf.mxu0  ;;  %v8889_v31 = vpack.c.bf16 %v8885_v42, %v8884_v8  ;;  %v8607_v41 = vadd.f32 %v8606_v55, %v14829_v13  ;;  %v12803_v13 = vld [vmem:[%s14950_s3 + $0x8a8] sm:$0xff]  }
 0xc00   : > { %v8883_v17 = vld [vmem:[#allocation2 + $0x128] sm:$0xff]  ;;  %v12411_v54 = vpop.f32.mrf.mxu1  ;;  %v8741_v16 = vadd.f32 %v8712_v2, %v8591_v20 }
 0xc01   : > { %v8888_v32 = vpack.c.bf16 %v8883_v17, %v8882_v59  ;;  %v14846_v58 = vadd.f32 %v12411_v54, %v8742_v28  ;;  %v12399_v7 = vpop.f32.mrf.mxu0  ;;  %v10746_v17 = vld [vmem:[%s14951_s4 + $0xc] ss:$0 sm:$0xff] }
 0xc02   : > { %12452 = vmatpush3.bf16.msra.mxu0 %v12788_v48  ;;  %v8839_v4 = vpop.f32.mrf.mxu1 }
 0xc03   : > { %12429 = vmatprep.mubr.msk.bf16.mxu0 %vm278_vm0, %v8888_v32  ;;  %v14849_v26 = vadd.f32 %v8839_v4, %v8740_v43  ;;  %12453 = vmatprep.subr.bf16.mxu0 %v12790_v40  ;;  %v8725_v62 = vpop.f32.mrf.mxu0 }
 0xc04   : > { %v12412_v22 = vpop.f32.mrf.mxu1 }
 0xc05   : > { %12430 = vmatmul.mubr.msk.bf16.gmra.mxu0 %vm278_vm0, %v8889_v31  ;;  %v14855_v15 = vadd.f32 %v12412_v22, %v8743_v37  ;;  %v12400_v60 = vpop.f32.mrf.mxu0 }
 0xc06   : > { %12454 = vmatpush3.bf16.msra.mxu0 %v12790_v40  ;;  %v8842_v35 = vpop.f32.mrf.mxu1  ;;  %12457 = vmatprep.mubr.msk.bf16.mxu0 %vm278_vm0, %v14642_v21  ;;  %v12798_v21 = vld [vmem:[%s14950_s3 + $0x888] sm:$0xff]  }
 0xc07   : > { %v14859_v0 = vadd.f32 %v8842_v35, %v8741_v16  ;;  %12455 = vmatprep.subr.bf16.mxu0 %v12792_v9 }
 0xc08   : > { %v12415_v36 = vpop.f32.mrf.mxu1 }
 0xc0a   : > { %12456 = vmatpush3.bf16.msra.mxu0 %v12792_v9 }
 0xc0b   : > { %12481 = vmatprep.subr.bf16.mxu0 %v12794_v50 }
 0xc0d   : > { %12458 = vmatmul.mubr.msk.bf16.vlgmr.msra.gmra.mxu0 %vm278_vm0, %v14667_v51  ;;  %v8612_v51 = vadd.f32 %v14834_v45, %v14810_v10  ;;  %v8728_v10 = vpop.f32.mrf.mxu0 }
 0xc0e   : > { %12482 = vmatpush3.bf16.msra.mxu0 %v12794_v50  ;;  %12461 = vmatprep.mubr.msk.bf16.mxu0 %vm278_vm0, %v14671_v49  ;;  %v8604_v49 = vadd.f32 %v8603_v23, %v14816_v27  ;;  %v8745_v27 = vadd.f32 %v8728_v10, %v8607_v41 }
 0xc0f   : > { %12483 = vmatprep.subr.bf16.mxu0 %v12796_v1 }
 0xc12   : > { %12484 = vmatpush3.bf16.msra.mxu0 %v12796_v1 }
 0xc13   : > { %12485 = vmatprep.subr.bf16.mxu0 %v12798_v21 }
 0xc15   : > { %12462 = vmatmul.mubr.msk.bf16.gmra.mxu0 %vm278_vm0, %v14692_v5  ;;  %v8615_v5 = vadd.f32 %v12384_v34, %v14823_v6  ;;  %v12802_v6 = vld [vmem:[%s14950_s3 + $0x8b0] sm:$0xff]  }
 0xc16   : > { %12486 = vmatpush3.bf16.msra.mxu0 %v12798_v21  ;;  %12489 = vmatprep.mubr.msk.bf16.mxu0 %vm278_vm0, %v14699_v30  ;;  %v8746_v30 = vadd.f32 %v12399_v7, %v8612_v51 }
 0xc17   : > { %12487 = vmatprep.subr.bf16.mxu0 %v12800_v25  ;;  %v8747_v3 = vadd.f32 %v12400_v60, %v8615_v5 }
 0xc18   : > { %v8876_v56 = vadd.f32 %v12415_v36, %v8746_v30 }
 0xc1a   : > { %12488 = vmatpush3.bf16.msra.mxu0 %v12800_v25 }
 0xc1d   : > { %12490 = vmatmul.mubr.msk.bf16.vlgmr.msra.gmra.mxu0 %vm278_vm0, %v14711_v38  ;;  %v8744_v38 = vadd.f32 %v8725_v62, %v8604_v49 }
 0xc1e   : > { %12493 = vmatprep.mubr.msk.bf16.mxu0 %vm278_vm0, %v14717_v14  ;;  %v8855_v14 = vpop.f32.mrf.mxu1 }
 0xc1f   : > { %v8874_v18 = vadd.f32 %v8855_v14, %v8744_v38 }
 0xc20   : > { %v12416_v11 = vpop.f32.mrf.mxu1 }
 0xc21   : > { %v8877_v45 = vadd.f32 %v12416_v11, %v8747_v3 }
 0xc22   : > { %v8858_v52 = vpop.f32.mrf.mxu1 }
 0xc23   : > { %v14892_v53 = vadd.f32 %v8858_v52, %v8745_v27 }
 0xc24   : > { %v12443_v33 = vpop.f32.mrf.mxu1 }
 0xc25   : > { %12494 = vmatmul.mubr.msk.bf16.gmra.mxu0 %vm278_vm0, %v14721_v63  ;;  %v12801_v63 = vld [vmem:[%s14950_s3 + $0x8b8] sm:$0xff]  }
 0xc26   : > { %12497 = vmatprep.subr.bf16.mxu1 %v12801_v63  ;;  %v9149_v47 = vpop.f32.mrf.mxu1 }
 0xc27   : > { %12498 = vmatpush3.bf16.msra.mxu1 %v12801_v63 }
 0xc28   : > { %12499 = vmatprep.subr.bf16.mxu1 %v12802_v6  ;;  %v12444_v57 = vpop.f32.mrf.mxu1 }
 0xc2a   : > { %v9151_v23 = vpop.f32.mrf.mxu1 }
 0xc2b   : > { %12500 = vmatpush3.bf16.msra.mxu1 %v12802_v6 }
 0xc2c   : > { %12501 = vmatprep.subr.bf16.mxu1 %v12803_v13  ;;  %v12447_v12 = vpop.f32.mrf.mxu1 }
 0xc2e   : > { %v9161_v44 = vpop.f32.mrf.mxu1 }
 0xc2f   : > { %12502 = vmatpush3.bf16.msra.mxu1 %v12803_v13 }
 0xc30   : > { %12503 = vmatprep.subr.bf16.mxu1 %v12804_v39  ;;  %v14906_v48 = vpop.f32.mrf.mxu1 }
 0xc32   : > { %v9163_v19 = vpop.f32.mrf.mxu1 }
 0xc33   : > { %12504 = vmatpush3.bf16.msra.mxu1 %v12804_v39 }
 0xc34   : > { %v12475_v34 = vpop.f32.mrf.mxu1 }
 0xc36   : > { %v9358_v46 = vpop.f32.mrf.mxu1 }
 0xc38   : > { %v12476_v28 = vpop.f32.mrf.mxu1 }
 0xc3a   : > { %v9360_v29 = vpop.f32.mrf.mxu1 }
 0xc3c   : > { %v12479_v55 = vpop.f32.mrf.mxu1 }
 0xc3e   : > { %v9370_v20 = vpop.f32.mrf.mxu1 }
 0xc40   : > { %v14908_v43 = vpop.f32.mrf.mxu1 }
 0xc42   : > { %v9372_v40 = vpop.f32.mrf.mxu1 }
 0xcbd   : > { %v12427_v59 = vpop.f32.mrf.mxu0 }
 0xcbe   : > { %v9002_v42 = vadd.f32 %v12427_v59, %v14846_v58 }
 0xcbf   : > { %v8969_v54 = vpop.f32.mrf.mxu0 }
 0xcc0   : > { %v9015_v2 = vadd.f32 %v10746_v17, %v9002_v42  ;;  %v9000_v32 = vadd.f32 %v8969_v54, %v14849_v26 }
 0xcc1   : > { %v12428_v37 = vpop.f32.mrf.mxu0 }
 0xcc2   : > { %v9023_v8 = vmax.f32 %v9015_v2, 0.0  ;;  %v9013_v4 = vadd.f32 %v10746_v17, %v9000_v32  ;;  %v9003_v31 = vadd.f32 %v12428_v37, %v14855_v15 }
 0xcc3   : > { %v8972_v16 = vpop.f32.mrf.mxu0 }
 0xcc4   : > { %9031 = vst.msk [vmem:[#allocation2 + $0x110] sm:$0xff] %vm278_vm0, %v9023_v8  ;;  %v9021_v9 = vmax.f32 %v9013_v4, 0.0  ;;  %v9016_v22 = vadd.f32 %v10746_v17, %v9003_v31  ;;  %v9001_v35 = vadd.f32 %v8972_v16, %v14859_v0 }
 0xcc5   : > { %v12431_v50 = vpop.f32.mrf.mxu0 }
 0xcc6   : > { %9029 = vst.msk [vmem:[#allocation2 + $0x100] sm:$0xff] %vm278_vm0, %v9021_v9  ;;  %v9024_v58 = vmax.f32 %v9016_v22, 0.0  ;;  %v9014_v1 = vadd.f32 %v10746_v17, %v9001_v35  ;;  %v9006_v21 = vadd.f32 %v12431_v50, %v8876_v56 }
 0xcc7   : > { %v8985_v25 = vpop.f32.mrf.mxu0 }
 0xcc8   : > { %9032 = vst.msk [vmem:[#allocation2 + $0x118] sm:$0xff] %vm278_vm0, %v9024_v58  ;;  %v9022_v26 = vmax.f32 %v9014_v1, 0.0  ;;  %v9019_v51 = vadd.f32 %v10746_v17, %v9006_v21  ;;  %v9004_v49 = vadd.f32 %v8985_v25, %v8874_v18  ;;  %v10828_v58 = vld [vmem:[%s14952_s5] ss:$0 sm:$0xff] }
 0xcc9   : > { %v12432_v15 = vpop.f32.mrf.mxu0 }
 0xcca   : > { %9030 = vst.msk [vmem:[#allocation2 + $0x108] sm:$0xff] %vm278_vm0, %v9022_v26  ;;  %v9027_v7 = vmax.f32 %v9019_v51, 0.0  ;;  %v9017_v5 = vadd.f32 %v10746_v17, %v9004_v49  ;;  %v9007_v30 = vadd.f32 %v12432_v15, %v8877_v45  ;;  %v10829_v26 = vld [vmem:[#allocation3] ss:$0 sm:$0xff] }
 0xccb   : > { %v8988_v62 = vpop.f32.mrf.mxu0  ;;  %v9501_v52 = vld [vmem:[#allocation2 + $0x110] sm:$0xff] }
 0xccc   : > { %9035 = vst.msk [vmem:[#allocation2 + $0x130] sm:$0xff] %vm278_vm0, %v9027_v7  ;;  %v9025_v0 = vmax.f32 %v9017_v5, 0.0  ;;  %v9020_v36 = vadd.f32 %v10746_v17, %v9007_v30  ;;  %v9005_v41 = vadd.f32 %v8988_v62, %v14892_v53 }
 0xccd   : > { %v12459_v38 = vpop.f32.mrf.mxu0  ;;  %v9499_v10 = vld [vmem:[#allocation2 + $0x100] sm:$0xff] }
 0xcce   : > { %9033 = vst.msk [vmem:[#allocation2 + $0x120] sm:$0xff] %vm278_vm0, %v9025_v0  ;;  %v9028_v56 = vmax.f32 %v9020_v36, 0.0  ;;  %v9018_v60 = vadd.f32 %v10746_v17, %v9005_v41 }
 0xccf   : > { %v9243_v14 = vpop.f32.mrf.mxu0  ;;  %v9502_v18 = vld [vmem:[#allocation2 + $0x118] sm:$0xff] }
 0xcd0   : > { %9036 = vst.msk [vmem:[#allocation2 + $0x138] sm:$0xff] %vm278_vm0, %v9028_v56  ;;  %v9026_v3 = vmax.f32 %v9018_v60, 0.0  ;;  %v9508_v63 = vpack.c.bf16 %v9502_v18, %v9501_v52 }
 0xcd1   : > { %v9500_v11 = vld [vmem:[#allocation2 + $0x108] sm:$0xff]  ;;  %v12460_v27 = vpop.f32.mrf.mxu0 }
 0xcd2   : > { %9034 = vst.msk [vmem:[#allocation2 + $0x128] sm:$0xff] %vm278_vm0, %v9026_v3  ;;  %v9507_v45 = vpack.c.bf16 %v9500_v11, %v9499_v10 }
 0xcd3   : > { %v9245_v6 = vpop.f32.mrf.mxu0  ;;  %v9505_v12 = vld [vmem:[#allocation2 + $0x130] sm:$0xff] }
 0xcd4   : > { %12505 = vmatprep.mubr.msk.bf16.mxu1 %vm278_vm0, %v9507_v45 }
 0xcd5   : > { %12506 = vmatmul.mubr.msk.bf16.vlgmr.msra.gmra.mxu1 %vm278_vm0, %v9508_v63  ;;  %v12463_v53 = vpop.f32.mrf.mxu0  ;;  %v9503_v33 = vld [vmem:[#allocation2 + $0x120] sm:$0xff] }
 0xcd7   : > { %v9255_v13 = vpop.f32.mrf.mxu0  ;;  %v9506_v39 = vld [vmem:[#allocation2 + $0x138] sm:$0xff] }
 0xcd8   : > { %v9510_v44 = vpack.c.bf16 %v9506_v39, %v9505_v12 }
 0xcd9   : > { %v9504_v47 = vld [vmem:[#allocation2 + $0x128] sm:$0xff]  ;;  %v12464_v57 = vpop.f32.mrf.mxu0 }
 0xcda   : > { %v9509_v23 = vpack.c.bf16 %v9504_v47, %v9503_v33  ;;  %v9264_v29 = vadd.f32 %v12464_v57, %v14906_v48  ;;  %v10827_v48 = vld [vmem:[%s14951_s4 + $0xd] ss:$0 sm:$0xff] }
 0xcdb   : > { %v9257_v19 = vpop.f32.mrf.mxu0 }
 0xcdc   : > { %12509 = vmatprep.mubr.msk.bf16.mxu1 %vm278_vm0, %v9509_v23  ;;  %v9382_v40 = vadd.f32 %v14908_v43, %v9264_v29 }
 0xcdd   : > { %12510 = vmatmul.mubr.msk.bf16.gmra.mxu1 %vm278_vm0, %v9510_v44  ;;  %v12491_v34 = vpop.f32.mrf.mxu0 }
 0xcdf   : > { %v9474_v46 = vpop.f32.mrf.mxu0 }
 0xce1   : > { %v12492_v28 = vpop.f32.mrf.mxu0 }
 0xce3   : > { %v9476_v55 = vpop.f32.mrf.mxu0 }
 0xce5   : > { %v12495_v20 = vpop.f32.mrf.mxu0 }
 0xce7   : > { %v9486_v59 = vpop.f32.mrf.mxu0 }
 0xce9   : > { %v12496_v17 = vpop.f32.mrf.mxu0 }
 0xcea   : > { %v9498_v42 = vadd.f32 %v12496_v17, %v9382_v40 }
 0xceb   : > { %v9488_v54 = vpop.f32.mrf.mxu0 }
 0xd95   : > { %v12507_v2 = vpop.f32.mrf.mxu1 }
 0xd97   : > { %v9590_v32 = vpop.f32.mrf.mxu1 }
 0xd99   : > { %v12508_v37 = vpop.f32.mrf.mxu1 }
 0xd9b   : > { %v9592_v8 = vpop.f32.mrf.mxu1 }
 0xd9d   : > { %v12511_v4 = vpop.f32.mrf.mxu1 }
 0xd9f   : > { %v9602_v31 = vpop.f32.mrf.mxu1 }
 0xda1   : > { %v12512_v16 = vpop.f32.mrf.mxu1 }
 0xda2   : > { %v9614_v9 = vadd.f32 %v12512_v16, %v9498_v42 }
 0xda3   : > { %v9604_v22 = vpop.f32.mrf.mxu1 }
 0xda4   : > { %v9620_v35 = vadd.f32 %v10827_v48, %v9614_v9 }
 0xda6   : > { %v9621_v43 = vmax.f32 %v9620_v35, 0.0 }
 0xda8   : > { %v9622_v50 = vadd.f32 %v9621_v43, %v8365_v24 }
 0xdaa   : > { %v9623_v1 = vmax.f32 %v9622_v50, 0.0 }
 0xdac   : > { %v9631_v21 = vmul.f32 %v10828_v58, %v9623_v1 }
 0xdae   : > { %v9633_v25 = vsel %vm9632_vm1, %v9631_v21, 0.0 }
 0xdaf   : > { %9634 = vadd.xlane.f32.xlu0 %v9633_v25 }
 0xe38   : > { %v9635_v51 = vpop.xlane.xlu0 %9634 }
 0xe39   : > { %v9643_v49 = vadd.f32 %v10829_v26, %v9635_v51 }
 0xe3b   : > { %9645 = vst.msk [vmem:[%s276_s10 - $0x7] sm:$0x80] %vm9644_vm2, %v9643_v49 }
 0xe3c PF: > { %s19_s26 = sadd.s32 1, %s12811_s26  }
 0xe3d   : > { %p16_p4 = scmp.ge.s32.totalorder %s19_s26, 6  }
 0xe3f   :  { %18 = sbr.rel (!%p16_p4) target bundleno = 3 (0x3), region = 147 }

</bundles_post_ra>
